<compile_context>
chip_gen: v6e
topology: v6e:2x2x1
jax: 0.10.0
libtpu: 0.0.40
codegen_flags: <defaults>
</compile_context>

<pallas_src>
import numpy as np
import jax
import jax.numpy as jnp
from jax import lax
from jax.experimental import pallas as pl
from jax.experimental.pallas import tpu as pltpu

H = 16
W = 16
HW = H * W
C = 32                 # in_channels
DC = C // 4            # distilled channels
RC = C - DC            # remaining channels
RED = C // 16          # CCA reduction channels (32 // 16 = 2)
NEG = 0.05             # leaky-relu negative slope
KA = 5                 # taps in the first K-half of each 3x3 conv
KB = 4                 # taps in the second K-half


# --------------------------------------------------------------------------
# Pallas kernel: whole IMDModule forward for one batch chunk (lane-dense).
# --------------------------------------------------------------------------
def _imd_kernel(x_ref, m_ref, sel_ref,
                w1a_ref, w1b_ref, b1_ref,
                w2a_ref, w2b_ref, b2_ref,
                w3a_ref, w3b_ref, b3_ref,
                w4a_ref, w4b_ref, b4_ref,
                wd_ref, bd_ref, wu_ref, bu_ref,
                w5_ref, b5_ref,
                o_ref, xa_ref, xb_ref, acc_ref):
    bhw = x_ref.shape[-1]                  # chunk * HW lanes in this grid step
    chunk = bhw // HW

    x_in = x_ref[...]                      # (C, chunk*HW), already lane-dense

    # Hoisted tap masks: broadcast each (1, bhw) mask once to (C, bhw) and
    # reuse across all four convs (JAX does not CSE broadcast_in_dim).
    masks_c = [None if t == 4 else jnp.broadcast_to(m_ref[t], (C, bhw))
               for t in range(9)]

    def lrelu(v):
        return jnp.maximum(v, NEG * v)

    def conv3x3(inp, wa_ref, wb_ref, b_ref):
        # inp: (Cin, bhw).  The 9 rolled+masked taps of a 3x3 "same" conv are
        # written to VMEM scratch in two K-halves; each half is contracted
        # with its half of the fused weight so the MXU can start on taps 0-4
        # while taps 5-8 are still being rolled/masked/stored.
        cin = inp.shape[0]

        def tap(t):
            if t == 4:                     # centre tap: no shift, no mask
                return inp
            dh, dw = t // 3 - 1, t % 3 - 1
            s = dh * W + dw                # flattened-HW source offset
            return pltpu.roll(inp, shift=(-s) % bhw, axis=1) * masks_c[t][:cin]

        for t in range(KA):
            xa_ref[t * cin:(t + 1) * cin, :] = tap(t)
        out = jnp.dot(wa_ref[...], xa_ref[0:KA * cin, :],
                      preferred_element_type=jnp.float32)
        for t in range(KA, 9):
            xb_ref[(t - KA) * cin:(t - KA + 1) * cin, :] = tap(t)
        out = out + jnp.dot(wb_ref[...], xb_ref[0:KB * cin, :],
                            preferred_element_type=jnp.float32)
        return out + b_ref[...]

    # ---- distillation chain: distilled slices go straight into acc_ref ----
    out_c1 = lrelu(conv3x3(x_in, w1a_ref, w1b_ref, b1_ref))           # (C, bhw)
    acc_ref[0 * DC:1 * DC, :] = out_c1[:DC]
    out_c2 = lrelu(conv3x3(out_c1[DC:], w2a_ref, w2b_ref, b2_ref))
    acc_ref[1 * DC:2 * DC, :] = out_c2[:DC]
    out_c3 = lrelu(conv3x3(out_c2[DC:], w3a_ref, w3b_ref, b3_ref))
    acc_ref[2 * DC:3 * DC, :] = out_c3[:DC]
    acc_ref[3 * DC:4 * DC, :] = conv3x3(out_c3[DC:], w4a_ref, w4b_ref, b4_ref)

    # ---- CCA (contrast + mean -> squeeze/excite), batched over the chunk ----
    inv_hw = 1.0 / HW
    accv = acc_ref[...]                                               # (C, bhw)
    ssum = jnp.dot(accv, sel_ref[...], preferred_element_type=jnp.float32)
    ssq = jnp.dot(accv * accv, sel_ref[...], preferred_element_type=jnp.float32)
    mean = ssum * inv_hw                                              # (C, chunk)
    var = jnp.maximum(ssq * inv_hw - mean * mean, 0.0)                # one-pass
    y = jnp.sqrt(var) + mean                                          # (C, chunk)
    hid = jnp.maximum(
        jnp.dot(wd_ref[...], y, preferred_element_type=jnp.float32)
        + bd_ref[...], 0.0)                                           # (RED, chunk)
    z = (jnp.dot(wu_ref[...], hid, preferred_element_type=jnp.float32)
         + bu_ref[...])                                               # (C, chunk)
    gate = 1.0 / (1.0 + jnp.exp(-z))

    # Gate each image's HW block in place (aligned 256-lane unmasked stores).
    for b in range(chunk):
        acc_ref[:, b * HW:(b + 1) * HW] = (acc_ref[:, b * HW:(b + 1) * HW]
                                           * gate[:, b:b + 1])

    # ---- fused c5 (1x1) + bias + residual: one matmul, one full-width store ----
    o_ref[...] = (jnp.dot(w5_ref[...], acc_ref[...],
                          preferred_element_type=jnp.float32)
                  + b5_ref[...] + x_ref[...])


# --------------------------------------------------------------------------
# Wrapper
# --------------------------------------------------------------------------
def _tap_masks_single():
    # Border masks for the 9 taps of a 3x3 "same" conv on the flattened HW axis.
    m = np.zeros((9, 1, HW), np.float32)
    for t in range(9):
        dh, dw = t // 3 - 1, t % 3 - 1
        for h in range(H):
            for w in range(W):
                if 0 <= h + dh < H and 0 <= w + dw < W:
                    m[t, 0, h * W + w] = 1.0
    return m


def _image_selector(chunk):
    # (chunk*HW, chunk) 0/1 matrix: column b selects image b's lanes.
    s = np.zeros((chunk * HW, chunk), np.float32)
    for b in range(chunk):
        s[b * HW:(b + 1) * HW, b] = 1.0
    return s


def _default_batch_chunk(batch):
    chunk = batch
    try:
        kind = jax.devices()[0].device_kind.lower()
        # v7x has 2 TensorCores per chip: split the batch across them.
        if ("v7" in kind or "tpu7" in kind or "7x" in kind) and batch % 2 == 0:
            chunk = batch // 2
    except Exception:
        pass
    chunk = max(1, min(chunk, 16))   # VMEM guard (~0.7 MiB scratch+blocks / image)
    if batch % chunk != 0:
        chunk = batch
    return chunk


def imd_module_pallas(x_nchw, kp, *, batch_chunk=None):
    Bn, Cc, Hh, Ww = x_nchw.shape
    assert (Cc, Hh, Ww) == (C, H, W)
    chunk = batch_chunk if batch_chunk is not None else _default_batch_chunk(Bn)
    assert Bn % chunk == 0
    nsteps = Bn // chunk
    chw = chunk * HW

    # Lane-dense layout: channels on sublanes, images side-by-side along lanes.
    # The tiny (64 KiB) transpose happens once in XLA, not inside the kernel.
    x_slab = jnp.transpose(x_nchw, (1, 0, 2, 3)).reshape(C, Bn * HW)

    masks = jnp.asarray(np.tile(_tap_masks_single(), (1, 1, chunk)))  # (9,1,chw)
    sel = jnp.asarray(_image_selector(chunk))                         # (chw,chunk)

    params = (masks, sel,
              kp["w1a"], kp["w1b"], kp["b1"],
              kp["w2a"], kp["w2b"], kp["b2"],
              kp["w3a"], kp["w3b"], kp["b3"],
              kp["w4a"], kp["w4b"], kp["b4"],
              kp["wd"], kp["bd"], kp["wu"], kp["bu"],
              kp["w5"], kp["b5"])

    def _full(arr):
        n = arr.ndim
        return pl.BlockSpec(arr.shape, lambda i, n=n: (0,) * n)

    slab_spec = pl.BlockSpec((C, chw), lambda i: (0, i))

    out = pl.pallas_call(
        _imd_kernel,
        out_shape=jax.ShapeDtypeStruct((C, Bn * HW), jnp.float32),
        grid=(nsteps,),
        in_specs=[slab_spec] + [_full(p) for p in params],
        out_specs=slab_spec,
        scratch_shapes=[pltpu.VMEM((KA * C, chw), jnp.float32),   # taps 0-4
                        pltpu.VMEM((KB * C, chw), jnp.float32),   # taps 5-8
                        pltpu.VMEM((C, chw), jnp.float32)],       # distilled concat
        compiler_params=pltpu.CompilerParams(
            dimension_semantics=("parallel",)),
    )(x_slab, *params)

    return jnp.transpose(out.reshape(C, Bn, H, W), (1, 0, 2, 3))


# --------------------------------------------------------------------------
# Parameter init (deterministic, "torch layout": OIHW conv weights)
# --------------------------------------------------------------------------
def init_torch_params(key):
    ks = jax.random.split(key, 14)
    rn = lambda k, s: (0.1 * jax.random.normal(k, s)).astype(jnp.float32)
    return dict(
        w1=rn(ks[0], (C, C, 3, 3)),   b1=rn(ks[1], (C,)),
        w2=rn(ks[2], (C, RC, 3, 3)),  b2=rn(ks[3], (C,)),
        w3=rn(ks[4], (C, RC, 3, 3)),  b3=rn(ks[5], (C,)),
        w4=rn(ks[6], (DC, RC, 3, 3)), b4=rn(ks[7], (DC,)),
        wd=rn(ks[8], (RED, C, 1, 1)), bd=rn(ks[9], (RED,)),
        wu=rn(ks[10], (C, RED, 1, 1)), bu=rn(ks[11], (C,)),
        w5=rn(ks[12], (C, C, 1, 1)),  b5=rn(ks[13], (C,)),
    )


def build_kernel_params(tp):
    def fuse_split(wt):
        # (Cout, Cin, 3, 3) -> tap-major / channel-minor (Cout, 9*Cin),
        # pre-split at tap 5 so the kernel's two K-half dots need no slicing.
        co, ci = wt.shape[0], wt.shape[1]
        f = jnp.transpose(wt, (0, 2, 3, 1)).reshape(co, 9 * ci)
        return f[:, :KA * ci], f[:, KA * ci:]

    col = lambda v: v.reshape(-1, 1)
    w1a, w1b = fuse_split(tp["w1"])
    w2a, w2b = fuse_split(tp["w2"])
    w3a, w3b = fuse_split(tp["w3"])
    w4a, w4b = fuse_split(tp["w4"])
    return dict(
        w1a=w1a, w1b=w1b, b1=col(tp["b1"]),
        w2a=w2a, w2b=w2b, b2=col(tp["b2"]),
        w3a=w3a, w3b=w3b, b3=col(tp["b3"]),
        w4a=w4a, w4b=w4b, b4=col(tp["b4"]),
        wd=tp["wd"][:, :, 0, 0], bd=col(tp["bd"]),
        wu=tp["wu"][:, :, 0, 0], bu=col(tp["bu"]),
        w5=tp["w5"][:, :, 0, 0], b5=col(tp["b5"]),
    )


# --------------------------------------------------------------------------
# Pure-JAX reference (mirrors the PyTorch forward exactly, NCHW, f32-accurate)
# --------------------------------------------------------------------------
def ref_forward(x, tp):
    def conv2d(v, wt, bt, pad):
        y = lax.conv_general_dilated(
            v, wt, (1, 1), [(pad, pad), (pad, pad)],
            dimension_numbers=("NCHW", "OIHW", "NCHW"),
            precision=lax.Precision.HIGHEST)
        return y + bt[None, :, None, None]

    lrelu = lambda v: jnp.where(v >= 0, v, NEG * v)

    out_c1 = lrelu(conv2d(x, tp["w1"], tp["b1"], 1))
    d1, r1 = out_c1[:, :DC], out_c1[:, DC:]
    out_c2 = lrelu(conv2d(r1, tp["w2"], tp["b2"], 1))
    d2, r2 = out_c2[:, :DC], out_c2[:, DC:]
    out_c3 = lrelu(conv2d(r2, tp["w3"], tp["b3"], 1))
    d3, r3 = out_c3[:, :DC], out_c3[:, DC:]
    out_c4 = conv2d(r3, tp["w4"], tp["b4"], 1)
    out = jnp.concatenate([d1, d2, d3, out_c4], axis=1)

    mean = out.mean(axis=(2, 3), keepdims=True)
    var = ((out - mean) ** 2).mean(axis=(2, 3), keepdims=True)
    y = jnp.sqrt(var) + mean
    t = jnp.maximum(conv2d(y, tp["wd"], tp["bd"], 0), 0.0)
    g = jax.nn.sigmoid(conv2d(t, tp["wu"], tp["bu"], 0))
    cca = out * g
    return conv2d(cca, tp["w5"], tp["b5"], 0) + x


# --------------------------------------------------------------------------
if __name__ == "__main__":
    key = jax.random.PRNGKey(0)
    kx, kw = jax.random.split(key)
    x = jax.random.normal(kx, (2, C, H, W), jnp.float32)   # NCHW, like PyTorch

    torch_params = init_torch_params(kw)
    kernel_params = build_kernel_params(torch_params)

    out = jax.block_until_ready(imd_module_pallas(x, kernel_params))

    ref = jax.block_until_ready(ref_forward(x, torch_params))
    np.testing.assert_allclose(np.asarray(out), np.asarray(ref),
                               rtol=1e-3, atol=1e-3)
    print("KERNEL_OK")
</pallas_src>

<mosaic_0001>
module attributes {stable_mosaic.version = 11 : i64} {
  func.func @_imd_kernel(%arg0: i32, %arg1: memref<32x512xf32, #tpu.memory_space<vmem>>, %arg2: memref<9x1x512xf32, #tpu.memory_space<vmem>>, %arg3: memref<512x2xf32, #tpu.memory_space<vmem>>, %arg4: memref<32x160xf32, #tpu.memory_space<vmem>>, %arg5: memref<32x128xf32, #tpu.memory_space<vmem>>, %arg6: memref<32x1xf32, #tpu.memory_space<vmem>>, %arg7: memref<32x120xf32, #tpu.memory_space<vmem>>, %arg8: memref<32x96xf32, #tpu.memory_space<vmem>>, %arg9: memref<32x1xf32, #tpu.memory_space<vmem>>, %arg10: memref<32x120xf32, #tpu.memory_space<vmem>>, %arg11: memref<32x96xf32, #tpu.memory_space<vmem>>, %arg12: memref<32x1xf32, #tpu.memory_space<vmem>>, %arg13: memref<8x120xf32, #tpu.memory_space<vmem>>, %arg14: memref<8x96xf32, #tpu.memory_space<vmem>>, %arg15: memref<8x1xf32, #tpu.memory_space<vmem>>, %arg16: memref<2x32xf32, #tpu.memory_space<vmem>>, %arg17: memref<2x1xf32, #tpu.memory_space<vmem>>, %arg18: memref<32x2xf32, #tpu.memory_space<vmem>>, %arg19: memref<32x1xf32, #tpu.memory_space<vmem>>, %arg20: memref<32x32xf32, #tpu.memory_space<vmem>>, %arg21: memref<32x1xf32, #tpu.memory_space<vmem>>, %arg22: memref<32x512xf32, #tpu.memory_space<vmem>>, %arg23: memref<160x512xf32, #tpu.memory_space<vmem>>, %arg24: memref<128x512xf32, #tpu.memory_space<vmem>>, %arg25: memref<32x512xf32, #tpu.memory_space<vmem>>) attributes {dimension_semantics = [#tpu.dimension_semantics<parallel>], iteration_bounds = array<i64: 1>, scalar_prefetch = 0 : i64, scratch_operands = 3 : i64, tpu.core_type = #tpu.core_type<tc>, window_params = [{transform_indices = @transform_0, window_bounds = array<i64: 32, 512>}, {pipeline_mode = #tpu.pipeline_mode<synchronous>, transform_indices = @transform_1, window_bounds = array<i64: 9, 1, 512>}, {pipeline_mode = #tpu.pipeline_mode<synchronous>, transform_indices = @transform_2, window_bounds = array<i64: 512, 2>}, {pipeline_mode = #tpu.pipeline_mode<synchronous>, transform_indices = @transform_3, window_bounds = array<i64: 32, 160>}, {pipeline_mode = #tpu.pipeline_mode<synchronous>, transform_indices = @transform_4, window_bounds = array<i64: 32, 128>}, {pipeline_mode = #tpu.pipeline_mode<synchronous>, transform_indices = @transform_5, window_bounds = array<i64: 32, 1>}, {pipeline_mode = #tpu.pipeline_mode<synchronous>, transform_indices = @transform_6, window_bounds = array<i64: 32, 120>}, {pipeline_mode = #tpu.pipeline_mode<synchronous>, transform_indices = @transform_7, window_bounds = array<i64: 32, 96>}, {pipeline_mode = #tpu.pipeline_mode<synchronous>, transform_indices = @transform_8, window_bounds = array<i64: 32, 1>}, {pipeline_mode = #tpu.pipeline_mode<synchronous>, transform_indices = @transform_9, window_bounds = array<i64: 32, 120>}, {pipeline_mode = #tpu.pipeline_mode<synchronous>, transform_indices = @transform_10, window_bounds = array<i64: 32, 96>}, {pipeline_mode = #tpu.pipeline_mode<synchronous>, transform_indices = @transform_11, window_bounds = array<i64: 32, 1>}, {pipeline_mode = #tpu.pipeline_mode<synchronous>, transform_indices = @transform_12, window_bounds = array<i64: 8, 120>}, {pipeline_mode = #tpu.pipeline_mode<synchronous>, transform_indices = @transform_13, window_bounds = array<i64: 8, 96>}, {pipeline_mode = #tpu.pipeline_mode<synchronous>, transform_indices = @transform_14, window_bounds = array<i64: 8, 1>}, {pipeline_mode = #tpu.pipeline_mode<synchronous>, transform_indices = @transform_15, window_bounds = array<i64: 2, 32>}, {pipeline_mode = #tpu.pipeline_mode<synchronous>, transform_indices = @transform_16, window_bounds = array<i64: 2, 1>}, {pipeline_mode = #tpu.pipeline_mode<synchronous>, transform_indices = @transform_17, window_bounds = array<i64: 32, 2>}, {pipeline_mode = #tpu.pipeline_mode<synchronous>, transform_indices = @transform_18, window_bounds = array<i64: 32, 1>}, {pipeline_mode = #tpu.pipeline_mode<synchronous>, transform_indices = @transform_19, window_bounds = array<i64: 32, 32>}, {pipeline_mode = #tpu.pipeline_mode<synchronous>, transform_indices = @transform_20, window_bounds = array<i64: 32, 1>}, {transform_indices = @transform_21, window_bounds = array<i64: 32, 512>}]} {
    %c0 = arith.constant 0 : index
    %c0_0 = arith.constant 0 : index
    %0 = vector.load %arg1[%c0, %c0_0] : memref<32x512xf32, #tpu.memory_space<vmem>>, vector<32x512xf32>
    %c0_1 = arith.constant 0 : index
    %c0_2 = arith.constant 0 : index
    %c0_3 = arith.constant 0 : index
    %1 = vector.load %arg2[%c0_1, %c0_2, %c0_3] : memref<9x1x512xf32, #tpu.memory_space<vmem>>, vector<1x1x512xf32>
    %2 = vector.shape_cast %1 : vector<1x1x512xf32> to vector<1x512xf32>
    %3 = vector.shape_cast %2 : vector<1x512xf32> to vector<1x512xf32>
    %4 = vector.broadcast %3 : vector<1x512xf32> to vector<32x512xf32>
    %c1 = arith.constant 1 : index
    %c0_4 = arith.constant 0 : index
    %c0_5 = arith.constant 0 : index
    %5 = vector.load %arg2[%c1, %c0_4, %c0_5] : memref<9x1x512xf32, #tpu.memory_space<vmem>>, vector<1x1x512xf32>
    %6 = vector.shape_cast %5 : vector<1x1x512xf32> to vector<1x512xf32>
    %7 = vector.shape_cast %6 : vector<1x512xf32> to vector<1x512xf32>
    %8 = vector.broadcast %7 : vector<1x512xf32> to vector<32x512xf32>
    %c2 = arith.constant 2 : index
    %c0_6 = arith.constant 0 : index
    %c0_7 = arith.constant 0 : index
    %9 = vector.load %arg2[%c2, %c0_6, %c0_7] : memref<9x1x512xf32, #tpu.memory_space<vmem>>, vector<1x1x512xf32>
    %10 = vector.shape_cast %9 : vector<1x1x512xf32> to vector<1x512xf32>
    %11 = vector.shape_cast %10 : vector<1x512xf32> to vector<1x512xf32>
    %12 = vector.broadcast %11 : vector<1x512xf32> to vector<32x512xf32>
    %c3 = arith.constant 3 : index
    %c0_8 = arith.constant 0 : index
    %c0_9 = arith.constant 0 : index
    %13 = vector.load %arg2[%c3, %c0_8, %c0_9] : memref<9x1x512xf32, #tpu.memory_space<vmem>>, vector<1x1x512xf32>
    %14 = vector.shape_cast %13 : vector<1x1x512xf32> to vector<1x512xf32>
    %15 = vector.shape_cast %14 : vector<1x512xf32> to vector<1x512xf32>
    %16 = vector.broadcast %15 : vector<1x512xf32> to vector<32x512xf32>
    %c5 = arith.constant 5 : index
    %c0_10 = arith.constant 0 : index
    %c0_11 = arith.constant 0 : index
    %17 = vector.load %arg2[%c5, %c0_10, %c0_11] : memref<9x1x512xf32, #tpu.memory_space<vmem>>, vector<1x1x512xf32>
    %18 = vector.shape_cast %17 : vector<1x1x512xf32> to vector<1x512xf32>
    %19 = vector.shape_cast %18 : vector<1x512xf32> to vector<1x512xf32>
    %20 = vector.broadcast %19 : vector<1x512xf32> to vector<32x512xf32>
    %c6 = arith.constant 6 : index
    %c0_12 = arith.constant 0 : index
    %c0_13 = arith.constant 0 : index
    %21 = vector.load %arg2[%c6, %c0_12, %c0_13] : memref<9x1x512xf32, #tpu.memory_space<vmem>>, vector<1x1x512xf32>
    %22 = vector.shape_cast %21 : vector<1x1x512xf32> to vector<1x512xf32>
    %23 = vector.shape_cast %22 : vector<1x512xf32> to vector<1x512xf32>
    %24 = vector.broadcast %23 : vector<1x512xf32> to vector<32x512xf32>
    %c7 = arith.constant 7 : index
    %c0_14 = arith.constant 0 : index
    %c0_15 = arith.constant 0 : index
    %25 = vector.load %arg2[%c7, %c0_14, %c0_15] : memref<9x1x512xf32, #tpu.memory_space<vmem>>, vector<1x1x512xf32>
    %26 = vector.shape_cast %25 : vector<1x1x512xf32> to vector<1x512xf32>
    %27 = vector.shape_cast %26 : vector<1x512xf32> to vector<1x512xf32>
    %28 = vector.broadcast %27 : vector<1x512xf32> to vector<32x512xf32>
    %c8 = arith.constant 8 : index
    %c0_16 = arith.constant 0 : index
    %c0_17 = arith.constant 0 : index
    %29 = vector.load %arg2[%c8, %c0_16, %c0_17] : memref<9x1x512xf32, #tpu.memory_space<vmem>>, vector<1x1x512xf32>
    %30 = vector.shape_cast %29 : vector<1x1x512xf32> to vector<1x512xf32>
    %31 = vector.shape_cast %30 : vector<1x512xf32> to vector<1x512xf32>
    %32 = vector.broadcast %31 : vector<1x512xf32> to vector<32x512xf32>
    %c17_i32 = arith.constant 17 : i32
    %33 = tpu.dynamic_rotate %0 by %c17_i32 dim 1 : vector<32x512xf32>, i32 -> vector<32x512xf32>
    %34 = arith.mulf %33, %4 : vector<32x512xf32>
    %c0_18 = arith.constant 0 : index
    %c0_19 = arith.constant 0 : index
    %35 = vector.load %arg23[%c0_18, %c0_19] : memref<160x512xf32, #tpu.memory_space<vmem>>, vector<32x512xf32>
    tpu.vector_store %arg23[%c0_18, %c0_19], %34 {strides = array<i32>} : memref<160x512xf32, #tpu.memory_space<vmem>>, vector<32x512xf32>,
    %c16_i32 = arith.constant 16 : i32
    %36 = tpu.dynamic_rotate %0 by %c16_i32 dim 1 : vector<32x512xf32>, i32 -> vector<32x512xf32>
    %37 = arith.mulf %36, %8 : vector<32x512xf32>
    %c32 = arith.constant 32 : index
    %c0_20 = arith.constant 0 : index
    %38 = vector.load %arg23[%c32, %c0_20] : memref<160x512xf32, #tpu.memory_space<vmem>>, vector<32x512xf32>
    tpu.vector_store %arg23[%c32, %c0_20], %37 {strides = array<i32>} : memref<160x512xf32, #tpu.memory_space<vmem>>, vector<32x512xf32>,
    %c15_i32 = arith.constant 15 : i32
    %39 = tpu.dynamic_rotate %0 by %c15_i32 dim 1 : vector<32x512xf32>, i32 -> vector<32x512xf32>
    %40 = arith.mulf %39, %12 : vector<32x512xf32>
    %c64 = arith.constant 64 : index
    %c0_21 = arith.constant 0 : index
    %41 = vector.load %arg23[%c64, %c0_21] : memref<160x512xf32, #tpu.memory_space<vmem>>, vector<32x512xf32>
    tpu.vector_store %arg23[%c64, %c0_21], %40 {strides = array<i32>} : memref<160x512xf32, #tpu.memory_space<vmem>>, vector<32x512xf32>,
    %c1_i32 = arith.constant 1 : i32
    %42 = tpu.dynamic_rotate %0 by %c1_i32 dim 1 : vector<32x512xf32>, i32 -> vector<32x512xf32>
    %43 = arith.mulf %42, %16 : vector<32x512xf32>
    %c96 = arith.constant 96 : index
    %c0_22 = arith.constant 0 : index
    %44 = vector.load %arg23[%c96, %c0_22] : memref<160x512xf32, #tpu.memory_space<vmem>>, vector<32x512xf32>
    tpu.vector_store %arg23[%c96, %c0_22], %43 {strides = array<i32>} : memref<160x512xf32, #tpu.memory_space<vmem>>, vector<32x512xf32>,
    %c128 = arith.constant 128 : index
    %c0_23 = arith.constant 0 : index
    %45 = vector.load %arg23[%c128, %c0_23] : memref<160x512xf32, #tpu.memory_space<vmem>>, vector<32x512xf32>
    tpu.vector_store %arg23[%c128, %c0_23], %0 {strides = array<i32>} : memref<160x512xf32, #tpu.memory_space<vmem>>, vector<32x512xf32>,
    %c0_24 = arith.constant 0 : index
    %c0_25 = arith.constant 0 : index
    %46 = vector.load %arg4[%c0_24, %c0_25] : memref<32x160xf32, #tpu.memory_space<vmem>>, vector<32x160xf32>
    %c0_26 = arith.constant 0 : index
    %c0_27 = arith.constant 0 : index
    %47 = vector.load %arg23[%c0_26, %c0_27] : memref<160x512xf32, #tpu.memory_space<vmem>>, vector<160x512xf32>
    %cst = arith.constant dense<0.000000e+00> : vector<32x512xf32>
    %48 = tpu.matmul %46, %47, %cst {dimension_numbers = #tpu.dot_dimension_numbers<[1], [0], [0], [1], [0, 0, 1, 1], [], []>} : vector<32x160xf32>, vector<160x512xf32>, vector<32x512xf32> -> vector<32x512xf32>
    %c511_i32 = arith.constant 511 : i32
    %49 = tpu.dynamic_rotate %0 by %c511_i32 dim 1 : vector<32x512xf32>, i32 -> vector<32x512xf32>
    %50 = arith.mulf %49, %20 : vector<32x512xf32>
    %c0_28 = arith.constant 0 : index
    %c0_29 = arith.constant 0 : index
    %51 = vector.load %arg24[%c0_28, %c0_29] : memref<128x512xf32, #tpu.memory_space<vmem>>, vector<32x512xf32>
    tpu.vector_store %arg24[%c0_28, %c0_29], %50 {strides = array<i32>} : memref<128x512xf32, #tpu.memory_space<vmem>>, vector<32x512xf32>,
    %c497_i32 = arith.constant 497 : i32
    %52 = tpu.dynamic_rotate %0 by %c497_i32 dim 1 : vector<32x512xf32>, i32 -> vector<32x512xf32>
    %53 = arith.mulf %52, %24 : vector<32x512xf32>
    %c32_30 = arith.constant 32 : index
    %c0_31 = arith.constant 0 : index
    %54 = vector.load %arg24[%c32_30, %c0_31] : memref<128x512xf32, #tpu.memory_space<vmem>>, vector<32x512xf32>
    tpu.vector_store %arg24[%c32_30, %c0_31], %53 {strides = array<i32>} : memref<128x512xf32, #tpu.memory_space<vmem>>, vector<32x512xf32>,
    %c496_i32 = arith.constant 496 : i32
    %55 = tpu.dynamic_rotate %0 by %c496_i32 dim 1 : vector<32x512xf32>, i32 -> vector<32x512xf32>
    %56 = arith.mulf %55, %28 : vector<32x512xf32>
    %c64_32 = arith.constant 64 : index
    %c0_33 = arith.constant 0 : index
    %57 = vector.load %arg24[%c64_32, %c0_33] : memref<128x512xf32, #tpu.memory_space<vmem>>, vector<32x512xf32>
    tpu.vector_store %arg24[%c64_32, %c0_33], %56 {strides = array<i32>} : memref<128x512xf32, #tpu.memory_space<vmem>>, vector<32x512xf32>,
    %c495_i32 = arith.constant 495 : i32
    %58 = tpu.dynamic_rotate %0 by %c495_i32 dim 1 : vector<32x512xf32>, i32 -> vector<32x512xf32>
    %59 = arith.mulf %58, %32 : vector<32x512xf32>
    %c96_34 = arith.constant 96 : index
    %c0_35 = arith.constant 0 : index
    %60 = vector.load %arg24[%c96_34, %c0_35] : memref<128x512xf32, #tpu.memory_space<vmem>>, vector<32x512xf32>
    tpu.vector_store %arg24[%c96_34, %c0_35], %59 {strides = array<i32>} : memref<128x512xf32, #tpu.memory_space<vmem>>, vector<32x512xf32>,
    %c0_36 = arith.constant 0 : index
    %c0_37 = arith.constant 0 : index
    %61 = vector.load %arg5[%c0_36, %c0_37] : memref<32x128xf32, #tpu.memory_space<vmem>>, vector<32x128xf32>
    %c0_38 = arith.constant 0 : index
    %c0_39 = arith.constant 0 : index
    %62 = vector.load %arg24[%c0_38, %c0_39] : memref<128x512xf32, #tpu.memory_space<vmem>>, vector<128x512xf32>
    %cst_40 = arith.constant dense<0.000000e+00> : vector<32x512xf32>
    %63 = tpu.matmul %61, %62, %cst_40 {dimension_numbers = #tpu.dot_dimension_numbers<[1], [0], [0], [1], [0, 0, 1, 1], [], []>} : vector<32x128xf32>, vector<128x512xf32>, vector<32x512xf32> -> vector<32x512xf32>
    %64 = arith.addf %48, %63 : vector<32x512xf32>
    %c0_41 = arith.constant 0 : index
    %c0_42 = arith.constant 0 : index
    %65 = vector.load %arg6[%c0_41, %c0_42] : memref<32x1xf32, #tpu.memory_space<vmem>>, vector<32x1xf32>
    %66 = vector.broadcast %65 : vector<32x1xf32> to vector<32x512xf32>
    %67 = arith.addf %64, %66 : vector<32x512xf32>
    %cst_43 = arith.constant 5.000000e-02 : f32
    %68 = vector.broadcast %cst_43 : f32 to vector<32x512xf32>
    %69 = arith.mulf %68, %67 : vector<32x512xf32>
    %70 = arith.maximumf %67, %69 : vector<32x512xf32>
    %71 = vector.extract_strided_slice %70 {offsets = [0, 0], sizes = [8, 512], strides = [1, 1]} : vector<32x512xf32> to vector<8x512xf32>
    %c0_44 = arith.constant 0 : index
    %c0_45 = arith.constant 0 : index
    %72 = vector.load %arg25[%c0_44, %c0_45] : memref<32x512xf32, #tpu.memory_space<vmem>>, vector<8x512xf32>
    tpu.vector_store %arg25[%c0_44, %c0_45], %71 {strides = array<i32>} : memref<32x512xf32, #tpu.memory_space<vmem>>, vector<8x512xf32>,
    %73 = vector.extract_strided_slice %70 {offsets = [8, 0], sizes = [24, 512], strides = [1, 1]} : vector<32x512xf32> to vector<24x512xf32>
    %c17_i32_46 = arith.constant 17 : i32
    %74 = tpu.dynamic_rotate %73 by %c17_i32_46 dim 1 : vector<24x512xf32>, i32 -> vector<24x512xf32>
    %75 = vector.extract_strided_slice %4 {offsets = [0, 0], sizes = [24, 512], strides = [1, 1]} : vector<32x512xf32> to vector<24x512xf32>
    %76 = arith.mulf %74, %75 : vector<24x512xf32>
    %c0_47 = arith.constant 0 : index
    %c0_48 = arith.constant 0 : index
    %77 = vector.load %arg23[%c0_47, %c0_48] : memref<160x512xf32, #tpu.memory_space<vmem>>, vector<24x512xf32>
    tpu.vector_store %arg23[%c0_47, %c0_48], %76 {strides = array<i32>} : memref<160x512xf32, #tpu.memory_space<vmem>>, vector<24x512xf32>,
    %c16_i32_49 = arith.constant 16 : i32
    %78 = tpu.dynamic_rotate %73 by %c16_i32_49 dim 1 : vector<24x512xf32>, i32 -> vector<24x512xf32>
    %79 = vector.extract_strided_slice %8 {offsets = [0, 0], sizes = [24, 512], strides = [1, 1]} : vector<32x512xf32> to vector<24x512xf32>
    %80 = arith.mulf %78, %79 : vector<24x512xf32>
    %c24 = arith.constant 24 : index
    %c0_50 = arith.constant 0 : index
    %81 = vector.load %arg23[%c24, %c0_50] : memref<160x512xf32, #tpu.memory_space<vmem>>, vector<24x512xf32>
    tpu.vector_store %arg23[%c24, %c0_50], %80 {strides = array<i32>} : memref<160x512xf32, #tpu.memory_space<vmem>>, vector<24x512xf32>,
    %c15_i32_51 = arith.constant 15 : i32
    %82 = tpu.dynamic_rotate %73 by %c15_i32_51 dim 1 : vector<24x512xf32>, i32 -> vector<24x512xf32>
    %83 = vector.extract_strided_slice %12 {offsets = [0, 0], sizes = [24, 512], strides = [1, 1]} : vector<32x512xf32> to vector<24x512xf32>
    %84 = arith.mulf %82, %83 : vector<24x512xf32>
    %c48 = arith.constant 48 : index
    %c0_52 = arith.constant 0 : index
    %85 = vector.load %arg23[%c48, %c0_52] : memref<160x512xf32, #tpu.memory_space<vmem>>, vector<24x512xf32>
    tpu.vector_store %arg23[%c48, %c0_52], %84 {strides = array<i32>} : memref<160x512xf32, #tpu.memory_space<vmem>>, vector<24x512xf32>,
    %c1_i32_53 = arith.constant 1 : i32
    %86 = tpu.dynamic_rotate %73 by %c1_i32_53 dim 1 : vector<24x512xf32>, i32 -> vector<24x512xf32>
    %87 = vector.extract_strided_slice %16 {offsets = [0, 0], sizes = [24, 512], strides = [1, 1]} : vector<32x512xf32> to vector<24x512xf32>
    %88 = arith.mulf %86, %87 : vector<24x512xf32>
    %c72 = arith.constant 72 : index
    %c0_54 = arith.constant 0 : index
    %89 = vector.load %arg23[%c72, %c0_54] : memref<160x512xf32, #tpu.memory_space<vmem>>, vector<24x512xf32>
    tpu.vector_store %arg23[%c72, %c0_54], %88 {strides = array<i32>} : memref<160x512xf32, #tpu.memory_space<vmem>>, vector<24x512xf32>,
    %c96_55 = arith.constant 96 : index
    %c0_56 = arith.constant 0 : index
    %90 = vector.load %arg23[%c96_55, %c0_56] : memref<160x512xf32, #tpu.memory_space<vmem>>, vector<24x512xf32>
    tpu.vector_store %arg23[%c96_55, %c0_56], %73 {strides = array<i32>} : memref<160x512xf32, #tpu.memory_space<vmem>>, vector<24x512xf32>,
    %c0_57 = arith.constant 0 : index
    %c0_58 = arith.constant 0 : index
    %91 = vector.load %arg7[%c0_57, %c0_58] : memref<32x120xf32, #tpu.memory_space<vmem>>, vector<32x120xf32>
    %c0_59 = arith.constant 0 : index
    %c0_60 = arith.constant 0 : index
    %92 = vector.load %arg23[%c0_59, %c0_60] : memref<160x512xf32, #tpu.memory_space<vmem>>, vector<120x512xf32>
    %cst_61 = arith.constant dense<0.000000e+00> : vector<32x512xf32>
    %93 = tpu.matmul %91, %92, %cst_61 {dimension_numbers = #tpu.dot_dimension_numbers<[1], [0], [0], [1], [0, 0, 1, 1], [], []>} : vector<32x120xf32>, vector<120x512xf32>, vector<32x512xf32> -> vector<32x512xf32>
    %c511_i32_62 = arith.constant 511 : i32
    %94 = tpu.dynamic_rotate %73 by %c511_i32_62 dim 1 : vector<24x512xf32>, i32 -> vector<24x512xf32>
    %95 = vector.extract_strided_slice %20 {offsets = [0, 0], sizes = [24, 512], strides = [1, 1]} : vector<32x512xf32> to vector<24x512xf32>
    %96 = arith.mulf %94, %95 : vector<24x512xf32>
    %c0_63 = arith.constant 0 : index
    %c0_64 = arith.constant 0 : index
    %97 = vector.load %arg24[%c0_63, %c0_64] : memref<128x512xf32, #tpu.memory_space<vmem>>, vector<24x512xf32>
    tpu.vector_store %arg24[%c0_63, %c0_64], %96 {strides = array<i32>} : memref<128x512xf32, #tpu.memory_space<vmem>>, vector<24x512xf32>,
    %c497_i32_65 = arith.constant 497 : i32
    %98 = tpu.dynamic_rotate %73 by %c497_i32_65 dim 1 : vector<24x512xf32>, i32 -> vector<24x512xf32>
    %99 = vector.extract_strided_slice %24 {offsets = [0, 0], sizes = [24, 512], strides = [1, 1]} : vector<32x512xf32> to vector<24x512xf32>
    %100 = arith.mulf %98, %99 : vector<24x512xf32>
    %c24_66 = arith.constant 24 : index
    %c0_67 = arith.constant 0 : index
    %101 = vector.load %arg24[%c24_66, %c0_67] : memref<128x512xf32, #tpu.memory_space<vmem>>, vector<24x512xf32>
    tpu.vector_store %arg24[%c24_66, %c0_67], %100 {strides = array<i32>} : memref<128x512xf32, #tpu.memory_space<vmem>>, vector<24x512xf32>,
    %c496_i32_68 = arith.constant 496 : i32
    %102 = tpu.dynamic_rotate %73 by %c496_i32_68 dim 1 : vector<24x512xf32>, i32 -> vector<24x512xf32>
    %103 = vector.extract_strided_slice %28 {offsets = [0, 0], sizes = [24, 512], strides = [1, 1]} : vector<32x512xf32> to vector<24x512xf32>
    %104 = arith.mulf %102, %103 : vector<24x512xf32>
    %c48_69 = arith.constant 48 : index
    %c0_70 = arith.constant 0 : index
    %105 = vector.load %arg24[%c48_69, %c0_70] : memref<128x512xf32, #tpu.memory_space<vmem>>, vector<24x512xf32>
    tpu.vector_store %arg24[%c48_69, %c0_70], %104 {strides = array<i32>} : memref<128x512xf32, #tpu.memory_space<vmem>>, vector<24x512xf32>,
    %c495_i32_71 = arith.constant 495 : i32
    %106 = tpu.dynamic_rotate %73 by %c495_i32_71 dim 1 : vector<24x512xf32>, i32 -> vector<24x512xf32>
    %107 = vector.extract_strided_slice %32 {offsets = [0, 0], sizes = [24, 512], strides = [1, 1]} : vector<32x512xf32> to vector<24x512xf32>
    %108 = arith.mulf %106, %107 : vector<24x512xf32>
    %c72_72 = arith.constant 72 : index
    %c0_73 = arith.constant 0 : index
    %109 = vector.load %arg24[%c72_72, %c0_73] : memref<128x512xf32, #tpu.memory_space<vmem>>, vector<24x512xf32>
    tpu.vector_store %arg24[%c72_72, %c0_73], %108 {strides = array<i32>} : memref<128x512xf32, #tpu.memory_space<vmem>>, vector<24x512xf32>,
    %c0_74 = arith.constant 0 : index
    %c0_75 = arith.constant 0 : index
    %110 = vector.load %arg8[%c0_74, %c0_75] : memref<32x96xf32, #tpu.memory_space<vmem>>, vector<32x96xf32>
    %c0_76 = arith.constant 0 : index
    %c0_77 = arith.constant 0 : index
    %111 = vector.load %arg24[%c0_76, %c0_77] : memref<128x512xf32, #tpu.memory_space<vmem>>, vector<96x512xf32>
    %cst_78 = arith.constant dense<0.000000e+00> : vector<32x512xf32>
    %112 = tpu.matmul %110, %111, %cst_78 {dimension_numbers = #tpu.dot_dimension_numbers<[1], [0], [0], [1], [0, 0, 1, 1], [], []>} : vector<32x96xf32>, vector<96x512xf32>, vector<32x512xf32> -> vector<32x512xf32>
    %113 = arith.addf %93, %112 : vector<32x512xf32>
    %c0_79 = arith.constant 0 : index
    %c0_80 = arith.constant 0 : index
    %114 = vector.load %arg9[%c0_79, %c0_80] : memref<32x1xf32, #tpu.memory_space<vmem>>, vector<32x1xf32>
    %115 = vector.broadcast %114 : vector<32x1xf32> to vector<32x512xf32>
    %116 = arith.addf %113, %115 : vector<32x512xf32>
    %cst_81 = arith.constant 5.000000e-02 : f32
    %117 = vector.broadcast %cst_81 : f32 to vector<32x512xf32>
    %118 = arith.mulf %117, %116 : vector<32x512xf32>
    %119 = arith.maximumf %116, %118 : vector<32x512xf32>
    %120 = vector.extract_strided_slice %119 {offsets = [0, 0], sizes = [8, 512], strides = [1, 1]} : vector<32x512xf32> to vector<8x512xf32>
    %c8_82 = arith.constant 8 : index
    %c0_83 = arith.constant 0 : index
    %121 = vector.load %arg25[%c8_82, %c0_83] : memref<32x512xf32, #tpu.memory_space<vmem>>, vector<8x512xf32>
    tpu.vector_store %arg25[%c8_82, %c0_83], %120 {strides = array<i32>} : memref<32x512xf32, #tpu.memory_space<vmem>>, vector<8x512xf32>,
    %122 = vector.extract_strided_slice %119 {offsets = [8, 0], sizes = [24, 512], strides = [1, 1]} : vector<32x512xf32> to vector<24x512xf32>
    %c17_i32_84 = arith.constant 17 : i32
    %123 = tpu.dynamic_rotate %122 by %c17_i32_84 dim 1 : vector<24x512xf32>, i32 -> vector<24x512xf32>
    %124 = vector.extract_strided_slice %4 {offsets = [0, 0], sizes = [24, 512], strides = [1, 1]} : vector<32x512xf32> to vector<24x512xf32>
    %125 = arith.mulf %123, %124 : vector<24x512xf32>
    %c0_85 = arith.constant 0 : index
    %c0_86 = arith.constant 0 : index
    %126 = vector.load %arg23[%c0_85, %c0_86] : memref<160x512xf32, #tpu.memory_space<vmem>>, vector<24x512xf32>
    tpu.vector_store %arg23[%c0_85, %c0_86], %125 {strides = array<i32>} : memref<160x512xf32, #tpu.memory_space<vmem>>, vector<24x512xf32>,
    %c16_i32_87 = arith.constant 16 : i32
    %127 = tpu.dynamic_rotate %122 by %c16_i32_87 dim 1 : vector<24x512xf32>, i32 -> vector<24x512xf32>
    %128 = vector.extract_strided_slice %8 {offsets = [0, 0], sizes = [24, 512], strides = [1, 1]} : vector<32x512xf32> to vector<24x512xf32>
    %129 = arith.mulf %127, %128 : vector<24x512xf32>
    %c24_88 = arith.constant 24 : index
    %c0_89 = arith.constant 0 : index
    %130 = vector.load %arg23[%c24_88, %c0_89] : memref<160x512xf32, #tpu.memory_space<vmem>>, vector<24x512xf32>
    tpu.vector_store %arg23[%c24_88, %c0_89], %129 {strides = array<i32>} : memref<160x512xf32, #tpu.memory_space<vmem>>, vector<24x512xf32>,
    %c15_i32_90 = arith.constant 15 : i32
    %131 = tpu.dynamic_rotate %122 by %c15_i32_90 dim 1 : vector<24x512xf32>, i32 -> vector<24x512xf32>
    %132 = vector.extract_strided_slice %12 {offsets = [0, 0], sizes = [24, 512], strides = [1, 1]} : vector<32x512xf32> to vector<24x512xf32>
    %133 = arith.mulf %131, %132 : vector<24x512xf32>
    %c48_91 = arith.constant 48 : index
    %c0_92 = arith.constant 0 : index
    %134 = vector.load %arg23[%c48_91, %c0_92] : memref<160x512xf32, #tpu.memory_space<vmem>>, vector<24x512xf32>
    tpu.vector_store %arg23[%c48_91, %c0_92], %133 {strides = array<i32>} : memref<160x512xf32, #tpu.memory_space<vmem>>, vector<24x512xf32>,
    %c1_i32_93 = arith.constant 1 : i32
    %135 = tpu.dynamic_rotate %122 by %c1_i32_93 dim 1 : vector<24x512xf32>, i32 -> vector<24x512xf32>
    %136 = vector.extract_strided_slice %16 {offsets = [0, 0], sizes = [24, 512], strides = [1, 1]} : vector<32x512xf32> to vector<24x512xf32>
    %137 = arith.mulf %135, %136 : vector<24x512xf32>
    %c72_94 = arith.constant 72 : index
    %c0_95 = arith.constant 0 : index
    %138 = vector.load %arg23[%c72_94, %c0_95] : memref<160x512xf32, #tpu.memory_space<vmem>>, vector<24x512xf32>
    tpu.vector_store %arg23[%c72_94, %c0_95], %137 {strides = array<i32>} : memref<160x512xf32, #tpu.memory_space<vmem>>, vector<24x512xf32>,
    %c96_96 = arith.constant 96 : index
    %c0_97 = arith.constant 0 : index
    %139 = vector.load %arg23[%c96_96, %c0_97] : memref<160x512xf32, #tpu.memory_space<vmem>>, vector<24x512xf32>
    tpu.vector_store %arg23[%c96_96, %c0_97], %122 {strides = array<i32>} : memref<160x512xf32, #tpu.memory_space<vmem>>, vector<24x512xf32>,
    %c0_98 = arith.constant 0 : index
    %c0_99 = arith.constant 0 : index
    %140 = vector.load %arg10[%c0_98, %c0_99] : memref<32x120xf32, #tpu.memory_space<vmem>>, vector<32x120xf32>
    %c0_100 = arith.constant 0 : index
    %c0_101 = arith.constant 0 : index
    %141 = vector.load %arg23[%c0_100, %c0_101] : memref<160x512xf32, #tpu.memory_space<vmem>>, vector<120x512xf32>
    %cst_102 = arith.constant dense<0.000000e+00> : vector<32x512xf32>
    %142 = tpu.matmul %140, %141, %cst_102 {dimension_numbers = #tpu.dot_dimension_numbers<[1], [0], [0], [1], [0, 0, 1, 1], [], []>} : vector<32x120xf32>, vector<120x512xf32>, vector<32x512xf32> -> vector<32x512xf32>
    %c511_i32_103 = arith.constant 511 : i32
    %143 = tpu.dynamic_rotate %122 by %c511_i32_103 dim 1 : vector<24x512xf32>, i32 -> vector<24x512xf32>
    %144 = vector.extract_strided_slice %20 {offsets = [0, 0], sizes = [24, 512], strides = [1, 1]} : vector<32x512xf32> to vector<24x512xf32>
    %145 = arith.mulf %143, %144 : vector<24x512xf32>
    %c0_104 = arith.constant 0 : index
    %c0_105 = arith.constant 0 : index
    %146 = vector.load %arg24[%c0_104, %c0_105] : memref<128x512xf32, #tpu.memory_space<vmem>>, vector<24x512xf32>
    tpu.vector_store %arg24[%c0_104, %c0_105], %145 {strides = array<i32>} : memref<128x512xf32, #tpu.memory_space<vmem>>, vector<24x512xf32>,
    %c497_i32_106 = arith.constant 497 : i32
    %147 = tpu.dynamic_rotate %122 by %c497_i32_106 dim 1 : vector<24x512xf32>, i32 -> vector<24x512xf32>
    %148 = vector.extract_strided_slice %24 {offsets = [0, 0], sizes = [24, 512], strides = [1, 1]} : vector<32x512xf32> to vector<24x512xf32>
    %149 = arith.mulf %147, %148 : vector<24x512xf32>
    %c24_107 = arith.constant 24 : index
    %c0_108 = arith.constant 0 : index
    %150 = vector.load %arg24[%c24_107, %c0_108] : memref<128x512xf32, #tpu.memory_space<vmem>>, vector<24x512xf32>
    tpu.vector_store %arg24[%c24_107, %c0_108], %149 {strides = array<i32>} : memref<128x512xf32, #tpu.memory_space<vmem>>, vector<24x512xf32>,
    %c496_i32_109 = arith.constant 496 : i32
    %151 = tpu.dynamic_rotate %122 by %c496_i32_109 dim 1 : vector<24x512xf32>, i32 -> vector<24x512xf32>
    %152 = vector.extract_strided_slice %28 {offsets = [0, 0], sizes = [24, 512], strides = [1, 1]} : vector<32x512xf32> to vector<24x512xf32>
    %153 = arith.mulf %151, %152 : vector<24x512xf32>
    %c48_110 = arith.constant 48 : index
    %c0_111 = arith.constant 0 : index
    %154 = vector.load %arg24[%c48_110, %c0_111] : memref<128x512xf32, #tpu.memory_space<vmem>>, vector<24x512xf32>
    tpu.vector_store %arg24[%c48_110, %c0_111], %153 {strides = array<i32>} : memref<128x512xf32, #tpu.memory_space<vmem>>, vector<24x512xf32>,
    %c495_i32_112 = arith.constant 495 : i32
    %155 = tpu.dynamic_rotate %122 by %c495_i32_112 dim 1 : vector<24x512xf32>, i32 -> vector<24x512xf32>
    %156 = vector.extract_strided_slice %32 {offsets = [0, 0], sizes = [24, 512], strides = [1, 1]} : vector<32x512xf32> to vector<24x512xf32>
    %157 = arith.mulf %155, %156 : vector<24x512xf32>
    %c72_113 = arith.constant 72 : index
    %c0_114 = arith.constant 0 : index
    %158 = vector.load %arg24[%c72_113, %c0_114] : memref<128x512xf32, #tpu.memory_space<vmem>>, vector<24x512xf32>
    tpu.vector_store %arg24[%c72_113, %c0_114], %157 {strides = array<i32>} : memref<128x512xf32, #tpu.memory_space<vmem>>, vector<24x512xf32>,
    %c0_115 = arith.constant 0 : index
    %c0_116 = arith.constant 0 : index
    %159 = vector.load %arg11[%c0_115, %c0_116] : memref<32x96xf32, #tpu.memory_space<vmem>>, vector<32x96xf32>
    %c0_117 = arith.constant 0 : index
    %c0_118 = arith.constant 0 : index
    %160 = vector.load %arg24[%c0_117, %c0_118] : memref<128x512xf32, #tpu.memory_space<vmem>>, vector<96x512xf32>
    %cst_119 = arith.constant dense<0.000000e+00> : vector<32x512xf32>
    %161 = tpu.matmul %159, %160, %cst_119 {dimension_numbers = #tpu.dot_dimension_numbers<[1], [0], [0], [1], [0, 0, 1, 1], [], []>} : vector<32x96xf32>, vector<96x512xf32>, vector<32x512xf32> -> vector<32x512xf32>
    %162 = arith.addf %142, %161 : vector<32x512xf32>
    %c0_120 = arith.constant 0 : index
    %c0_121 = arith.constant 0 : index
    %163 = vector.load %arg12[%c0_120, %c0_121] : memref<32x1xf32, #tpu.memory_space<vmem>>, vector<32x1xf32>
    %164 = vector.broadcast %163 : vector<32x1xf32> to vector<32x512xf32>
    %165 = arith.addf %162, %164 : vector<32x512xf32>
    %cst_122 = arith.constant 5.000000e-02 : f32
    %166 = vector.broadcast %cst_122 : f32 to vector<32x512xf32>
    %167 = arith.mulf %166, %165 : vector<32x512xf32>
    %168 = arith.maximumf %165, %167 : vector<32x512xf32>
    %169 = vector.extract_strided_slice %168 {offsets = [0, 0], sizes = [8, 512], strides = [1, 1]} : vector<32x512xf32> to vector<8x512xf32>
    %c16 = arith.constant 16 : index
    %c0_123 = arith.constant 0 : index
    %170 = vector.load %arg25[%c16, %c0_123] : memref<32x512xf32, #tpu.memory_space<vmem>>, vector<8x512xf32>
    tpu.vector_store %arg25[%c16, %c0_123], %169 {strides = array<i32>} : memref<32x512xf32, #tpu.memory_space<vmem>>, vector<8x512xf32>,
    %171 = vector.extract_strided_slice %168 {offsets = [8, 0], sizes = [24, 512], strides = [1, 1]} : vector<32x512xf32> to vector<24x512xf32>
    %c17_i32_124 = arith.constant 17 : i32
    %172 = tpu.dynamic_rotate %171 by %c17_i32_124 dim 1 : vector<24x512xf32>, i32 -> vector<24x512xf32>
    %173 = vector.extract_strided_slice %4 {offsets = [0, 0], sizes = [24, 512], strides = [1, 1]} : vector<32x512xf32> to vector<24x512xf32>
    %174 = arith.mulf %172, %173 : vector<24x512xf32>
    %c0_125 = arith.constant 0 : index
    %c0_126 = arith.constant 0 : index
    %175 = vector.load %arg23[%c0_125, %c0_126] : memref<160x512xf32, #tpu.memory_space<vmem>>, vector<24x512xf32>
    tpu.vector_store %arg23[%c0_125, %c0_126], %174 {strides = array<i32>} : memref<160x512xf32, #tpu.memory_space<vmem>>, vector<24x512xf32>,
    %c16_i32_127 = arith.constant 16 : i32
    %176 = tpu.dynamic_rotate %171 by %c16_i32_127 dim 1 : vector<24x512xf32>, i32 -> vector<24x512xf32>
    %177 = vector.extract_strided_slice %8 {offsets = [0, 0], sizes = [24, 512], strides = [1, 1]} : vector<32x512xf32> to vector<24x512xf32>
    %178 = arith.mulf %176, %177 : vector<24x512xf32>
    %c24_128 = arith.constant 24 : index
    %c0_129 = arith.constant 0 : index
    %179 = vector.load %arg23[%c24_128, %c0_129] : memref<160x512xf32, #tpu.memory_space<vmem>>, vector<24x512xf32>
    tpu.vector_store %arg23[%c24_128, %c0_129], %178 {strides = array<i32>} : memref<160x512xf32, #tpu.memory_space<vmem>>, vector<24x512xf32>,
    %c15_i32_130 = arith.constant 15 : i32
    %180 = tpu.dynamic_rotate %171 by %c15_i32_130 dim 1 : vector<24x512xf32>, i32 -> vector<24x512xf32>
    %181 = vector.extract_strided_slice %12 {offsets = [0, 0], sizes = [24, 512], strides = [1, 1]} : vector<32x512xf32> to vector<24x512xf32>
    %182 = arith.mulf %180, %181 : vector<24x512xf32>
    %c48_131 = arith.constant 48 : index
    %c0_132 = arith.constant 0 : index
    %183 = vector.load %arg23[%c48_131, %c0_132] : memref<160x512xf32, #tpu.memory_space<vmem>>, vector<24x512xf32>
    tpu.vector_store %arg23[%c48_131, %c0_132], %182 {strides = array<i32>} : memref<160x512xf32, #tpu.memory_space<vmem>>, vector<24x512xf32>,
    %c1_i32_133 = arith.constant 1 : i32
    %184 = tpu.dynamic_rotate %171 by %c1_i32_133 dim 1 : vector<24x512xf32>, i32 -> vector<24x512xf32>
    %185 = vector.extract_strided_slice %16 {offsets = [0, 0], sizes = [24, 512], strides = [1, 1]} : vector<32x512xf32> to vector<24x512xf32>
    %186 = arith.mulf %184, %185 : vector<24x512xf32>
    %c72_134 = arith.constant 72 : index
    %c0_135 = arith.constant 0 : index
    %187 = vector.load %arg23[%c72_134, %c0_135] : memref<160x512xf32, #tpu.memory_space<vmem>>, vector<24x512xf32>
    tpu.vector_store %arg23[%c72_134, %c0_135], %186 {strides = array<i32>} : memref<160x512xf32, #tpu.memory_space<vmem>>, vector<24x512xf32>,
    %c96_136 = arith.constant 96 : index
    %c0_137 = arith.constant 0 : index
    %188 = vector.load %arg23[%c96_136, %c0_137] : memref<160x512xf32, #tpu.memory_space<vmem>>, vector<24x512xf32>
    tpu.vector_store %arg23[%c96_136, %c0_137], %171 {strides = array<i32>} : memref<160x512xf32, #tpu.memory_space<vmem>>, vector<24x512xf32>,
    %c0_138 = arith.constant 0 : index
    %c0_139 = arith.constant 0 : index
    %189 = vector.load %arg13[%c0_138, %c0_139] : memref<8x120xf32, #tpu.memory_space<vmem>>, vector<8x120xf32>
    %c0_140 = arith.constant 0 : index
    %c0_141 = arith.constant 0 : index
    %190 = vector.load %arg23[%c0_140, %c0_141] : memref<160x512xf32, #tpu.memory_space<vmem>>, vector<120x512xf32>
    %cst_142 = arith.constant dense<0.000000e+00> : vector<8x512xf32>
    %191 = tpu.matmul %189, %190, %cst_142 {dimension_numbers = #tpu.dot_dimension_numbers<[1], [0], [0], [1], [0, 0, 1, 1], [], []>} : vector<8x120xf32>, vector<120x512xf32>, vector<8x512xf32> -> vector<8x512xf32>
    %c511_i32_143 = arith.constant 511 : i32
    %192 = tpu.dynamic_rotate %171 by %c511_i32_143 dim 1 : vector<24x512xf32>, i32 -> vector<24x512xf32>
    %193 = vector.extract_strided_slice %20 {offsets = [0, 0], sizes = [24, 512], strides = [1, 1]} : vector<32x512xf32> to vector<24x512xf32>
    %194 = arith.mulf %192, %193 : vector<24x512xf32>
    %c0_144 = arith.constant 0 : index
    %c0_145 = arith.constant 0 : index
    %195 = vector.load %arg24[%c0_144, %c0_145] : memref<128x512xf32, #tpu.memory_space<vmem>>, vector<24x512xf32>
    tpu.vector_store %arg24[%c0_144, %c0_145], %194 {strides = array<i32>} : memref<128x512xf32, #tpu.memory_space<vmem>>, vector<24x512xf32>,
    %c497_i32_146 = arith.constant 497 : i32
    %196 = tpu.dynamic_rotate %171 by %c497_i32_146 dim 1 : vector<24x512xf32>, i32 -> vector<24x512xf32>
    %197 = vector.extract_strided_slice %24 {offsets = [0, 0], sizes = [24, 512], strides = [1, 1]} : vector<32x512xf32> to vector<24x512xf32>
    %198 = arith.mulf %196, %197 : vector<24x512xf32>
    %c24_147 = arith.constant 24 : index
    %c0_148 = arith.constant 0 : index
    %199 = vector.load %arg24[%c24_147, %c0_148] : memref<128x512xf32, #tpu.memory_space<vmem>>, vector<24x512xf32>
    tpu.vector_store %arg24[%c24_147, %c0_148], %198 {strides = array<i32>} : memref<128x512xf32, #tpu.memory_space<vmem>>, vector<24x512xf32>,
    %c496_i32_149 = arith.constant 496 : i32
    %200 = tpu.dynamic_rotate %171 by %c496_i32_149 dim 1 : vector<24x512xf32>, i32 -> vector<24x512xf32>
    %201 = vector.extract_strided_slice %28 {offsets = [0, 0], sizes = [24, 512], strides = [1, 1]} : vector<32x512xf32> to vector<24x512xf32>
    %202 = arith.mulf %200, %201 : vector<24x512xf32>
    %c48_150 = arith.constant 48 : index
    %c0_151 = arith.constant 0 : index
    %203 = vector.load %arg24[%c48_150, %c0_151] : memref<128x512xf32, #tpu.memory_space<vmem>>, vector<24x512xf32>
    tpu.vector_store %arg24[%c48_150, %c0_151], %202 {strides = array<i32>} : memref<128x512xf32, #tpu.memory_space<vmem>>, vector<24x512xf32>,
    %c495_i32_152 = arith.constant 495 : i32
    %204 = tpu.dynamic_rotate %171 by %c495_i32_152 dim 1 : vector<24x512xf32>, i32 -> vector<24x512xf32>
    %205 = vector.extract_strided_slice %32 {offsets = [0, 0], sizes = [24, 512], strides = [1, 1]} : vector<32x512xf32> to vector<24x512xf32>
    %206 = arith.mulf %204, %205 : vector<24x512xf32>
    %c72_153 = arith.constant 72 : index
    %c0_154 = arith.constant 0 : index
    %207 = vector.load %arg24[%c72_153, %c0_154] : memref<128x512xf32, #tpu.memory_space<vmem>>, vector<24x512xf32>
    tpu.vector_store %arg24[%c72_153, %c0_154], %206 {strides = array<i32>} : memref<128x512xf32, #tpu.memory_space<vmem>>, vector<24x512xf32>,
    %c0_155 = arith.constant 0 : index
    %c0_156 = arith.constant 0 : index
    %208 = vector.load %arg14[%c0_155, %c0_156] : memref<8x96xf32, #tpu.memory_space<vmem>>, vector<8x96xf32>
    %c0_157 = arith.constant 0 : index
    %c0_158 = arith.constant 0 : index
    %209 = vector.load %arg24[%c0_157, %c0_158] : memref<128x512xf32, #tpu.memory_space<vmem>>, vector<96x512xf32>
    %cst_159 = arith.constant dense<0.000000e+00> : vector<8x512xf32>
    %210 = tpu.matmul %208, %209, %cst_159 {dimension_numbers = #tpu.dot_dimension_numbers<[1], [0], [0], [1], [0, 0, 1, 1], [], []>} : vector<8x96xf32>, vector<96x512xf32>, vector<8x512xf32> -> vector<8x512xf32>
    %211 = arith.addf %191, %210 : vector<8x512xf32>
    %c0_160 = arith.constant 0 : index
    %c0_161 = arith.constant 0 : index
    %212 = vector.load %arg15[%c0_160, %c0_161] : memref<8x1xf32, #tpu.memory_space<vmem>>, vector<8x1xf32>
    %213 = vector.broadcast %212 : vector<8x1xf32> to vector<8x512xf32>
    %214 = arith.addf %211, %213 : vector<8x512xf32>
    %c24_162 = arith.constant 24 : index
    %c0_163 = arith.constant 0 : index
    %215 = vector.load %arg25[%c24_162, %c0_163] : memref<32x512xf32, #tpu.memory_space<vmem>>, vector<8x512xf32>
    tpu.vector_store %arg25[%c24_162, %c0_163], %214 {strides = array<i32>} : memref<32x512xf32, #tpu.memory_space<vmem>>, vector<8x512xf32>,
    %c0_164 = arith.constant 0 : index
    %c0_165 = arith.constant 0 : index
    %216 = vector.load %arg25[%c0_164, %c0_165] : memref<32x512xf32, #tpu.memory_space<vmem>>, vector<32x512xf32>
    %c0_166 = arith.constant 0 : index
    %c0_167 = arith.constant 0 : index
    %217 = vector.load %arg3[%c0_166, %c0_167] : memref<512x2xf32, #tpu.memory_space<vmem>>, vector<512x2xf32>
    %cst_168 = arith.constant dense<0.000000e+00> : vector<32x2xf32>
    %218 = tpu.matmul %216, %217, %cst_168 {dimension_numbers = #tpu.dot_dimension_numbers<[1], [0], [0], [1], [0, 0, 1, 1], [], []>} : vector<32x512xf32>, vector<512x2xf32>, vector<32x2xf32> -> vector<32x2xf32>
    %219 = arith.mulf %216, %216 : vector<32x512xf32>
    %c0_169 = arith.constant 0 : index
    %c0_170 = arith.constant 0 : index
    %220 = vector.load %arg3[%c0_169, %c0_170] : memref<512x2xf32, #tpu.memory_space<vmem>>, vector<512x2xf32>
    %cst_171 = arith.constant dense<0.000000e+00> : vector<32x2xf32>
    %221 = tpu.matmul %219, %220, %cst_171 {dimension_numbers = #tpu.dot_dimension_numbers<[1], [0], [0], [1], [0, 0, 1, 1], [], []>} : vector<32x512xf32>, vector<512x2xf32>, vector<32x2xf32> -> vector<32x2xf32>
    %cst_172 = arith.constant 3.906250e-03 : f32
    %222 = vector.broadcast %cst_172 : f32 to vector<32x2xf32>
    %223 = arith.mulf %218, %222 : vector<32x2xf32>
    %cst_173 = arith.constant 3.906250e-03 : f32
    %224 = vector.broadcast %cst_173 : f32 to vector<32x2xf32>
    %225 = arith.mulf %221, %224 : vector<32x2xf32>
    %226 = arith.mulf %223, %223 : vector<32x2xf32>
    %227 = arith.subf %225, %226 : vector<32x2xf32>
    %cst_174 = arith.constant 0.000000e+00 : f32
    %228 = vector.broadcast %cst_174 : f32 to vector<32x2xf32>
    %229 = arith.maximumf %227, %228 : vector<32x2xf32>
    %230 = math.sqrt %229 : vector<32x2xf32>
    %231 = arith.addf %230, %223 : vector<32x2xf32>
    %c0_175 = arith.constant 0 : index
    %c0_176 = arith.constant 0 : index
    %232 = vector.load %arg16[%c0_175, %c0_176] : memref<2x32xf32, #tpu.memory_space<vmem>>, vector<2x32xf32>
    %cst_177 = arith.constant dense<0.000000e+00> : vector<2x2xf32>
    %233 = tpu.matmul %232, %231, %cst_177 {dimension_numbers = #tpu.dot_dimension_numbers<[1], [0], [0], [1], [0, 0, 1, 1], [], []>} : vector<2x32xf32>, vector<32x2xf32>, vector<2x2xf32> -> vector<2x2xf32>
    %c0_178 = arith.constant 0 : index
    %c0_179 = arith.constant 0 : index
    %234 = vector.load %arg17[%c0_178, %c0_179] : memref<2x1xf32, #tpu.memory_space<vmem>>, vector<2x1xf32>
    %235 = vector.broadcast %234 : vector<2x1xf32> to vector<2x2xf32>
    %236 = arith.addf %233, %235 : vector<2x2xf32>
    %cst_180 = arith.constant 0.000000e+00 : f32
    %237 = vector.broadcast %cst_180 : f32 to vector<2x2xf32>
    %238 = arith.maximumf %236, %237 : vector<2x2xf32>
    %c0_181 = arith.constant 0 : index
    %c0_182 = arith.constant 0 : index
    %239 = vector.load %arg18[%c0_181, %c0_182] : memref<32x2xf32, #tpu.memory_space<vmem>>, vector<32x2xf32>
    %cst_183 = arith.constant dense<0.000000e+00> : vector<32x2xf32>
    %240 = tpu.matmul %239, %238, %cst_183 {dimension_numbers = #tpu.dot_dimension_numbers<[1], [0], [0], [1], [0, 0, 1, 1], [], []>} : vector<32x2xf32>, vector<2x2xf32>, vector<32x2xf32> -> vector<32x2xf32>
    %c0_184 = arith.constant 0 : index
    %c0_185 = arith.constant 0 : index
    %241 = vector.load %arg19[%c0_184, %c0_185] : memref<32x1xf32, #tpu.memory_space<vmem>>, vector<32x1xf32>
    %242 = vector.broadcast %241 : vector<32x1xf32> to vector<32x2xf32>
    %243 = arith.addf %240, %242 : vector<32x2xf32>
    %cst_186 = arith.constant 0.000000e+00 : f32
    %244 = vector.broadcast %cst_186 : f32 to vector<32x2xf32>
    %245 = arith.subf %244, %243 : vector<32x2xf32>
    %246 = math.exp %245 : vector<32x2xf32>
    %cst_187 = arith.constant 1.000000e+00 : f32
    %247 = vector.broadcast %cst_187 : f32 to vector<32x2xf32>
    %248 = arith.addf %247, %246 : vector<32x2xf32>
    %cst_188 = arith.constant 1.000000e+00 : f32
    %249 = vector.broadcast %cst_188 : f32 to vector<32x2xf32>
    %250 = arith.divf %249, %248 : vector<32x2xf32>
    %c0_189 = arith.constant 0 : index
    %c0_190 = arith.constant 0 : index
    %251 = vector.load %arg25[%c0_189, %c0_190] : memref<32x512xf32, #tpu.memory_space<vmem>>, vector<32x256xf32>
    %252 = vector.extract_strided_slice %250 {offsets = [0, 0], sizes = [32, 1], strides = [1, 1]} : vector<32x2xf32> to vector<32x1xf32>
    %253 = vector.broadcast %252 : vector<32x1xf32> to vector<32x256xf32>
    %254 = arith.mulf %251, %253 : vector<32x256xf32>
    %c0_191 = arith.constant 0 : index
    %c0_192 = arith.constant 0 : index
    %255 = vector.load %arg25[%c0_191, %c0_192] : memref<32x512xf32, #tpu.memory_space<vmem>>, vector<32x256xf32>
    tpu.vector_store %arg25[%c0_191, %c0_192], %254 {strides = array<i32>} : memref<32x512xf32, #tpu.memory_space<vmem>>, vector<32x256xf32>,
    %c0_193 = arith.constant 0 : index
    %c256 = arith.constant 256 : index
    %256 = vector.load %arg25[%c0_193, %c256] : memref<32x512xf32, #tpu.memory_space<vmem>>, vector<32x256xf32>
    %257 = vector.extract_strided_slice %250 {offsets = [0, 1], sizes = [32, 1], strides = [1, 1]} : vector<32x2xf32> to vector<32x1xf32>
    %258 = vector.broadcast %257 : vector<32x1xf32> to vector<32x256xf32>
    %259 = arith.mulf %256, %258 : vector<32x256xf32>
    %c0_194 = arith.constant 0 : index
    %c256_195 = arith.constant 256 : index
    %260 = vector.load %arg25[%c0_194, %c256_195] : memref<32x512xf32, #tpu.memory_space<vmem>>, vector<32x256xf32>
    tpu.vector_store %arg25[%c0_194, %c256_195], %259 {strides = array<i32>} : memref<32x512xf32, #tpu.memory_space<vmem>>, vector<32x256xf32>,
    %c0_196 = arith.constant 0 : index
    %c0_197 = arith.constant 0 : index
    %261 = vector.load %arg20[%c0_196, %c0_197] : memref<32x32xf32, #tpu.memory_space<vmem>>, vector<32x32xf32>
    %c0_198 = arith.constant 0 : index
    %c0_199 = arith.constant 0 : index
    %262 = vector.load %arg25[%c0_198, %c0_199] : memref<32x512xf32, #tpu.memory_space<vmem>>, vector<32x512xf32>
    %cst_200 = arith.constant dense<0.000000e+00> : vector<32x512xf32>
    %263 = tpu.matmul %261, %262, %cst_200 {dimension_numbers = #tpu.dot_dimension_numbers<[1], [0], [0], [1], [0, 0, 1, 1], [], []>} : vector<32x32xf32>, vector<32x512xf32>, vector<32x512xf32> -> vector<32x512xf32>
    %c0_201 = arith.constant 0 : index
    %c0_202 = arith.constant 0 : index
    %264 = vector.load %arg21[%c0_201, %c0_202] : memref<32x1xf32, #tpu.memory_space<vmem>>, vector<32x1xf32>
    %265 = vector.broadcast %264 : vector<32x1xf32> to vector<32x512xf32>
    %266 = arith.addf %263, %265 : vector<32x512xf32>
    %c0_203 = arith.constant 0 : index
    %c0_204 = arith.constant 0 : index
    %267 = vector.load %arg1[%c0_203, %c0_204] : memref<32x512xf32, #tpu.memory_space<vmem>>, vector<32x512xf32>
    %268 = arith.addf %266, %267 : vector<32x512xf32>
    %c0_205 = arith.constant 0 : index
    %c0_206 = arith.constant 0 : index
    %269 = vector.load %arg22[%c0_205, %c0_206] : memref<32x512xf32, #tpu.memory_space<vmem>>, vector<32x512xf32>
    tpu.vector_store %arg22[%c0_205, %c0_206], %268 {strides = array<i32>} : memref<32x512xf32, #tpu.memory_space<vmem>>, vector<32x512xf32>,
    return
  }
  func.func @transform_0(%arg0: i32) -> (i32, i32) {
    %c0_i32 = arith.constant 0 : i32
    %c0_i32_0 = arith.constant 0 : i32
    return %c0_i32, %arg0 : i32, i32
  }
  func.func @transform_1(%arg0: i32) -> (i32, i32, i32) {
    %c0_i32 = arith.constant 0 : i32
    %c0_i32_0 = arith.constant 0 : i32
    %c0_i32_1 = arith.constant 0 : i32
    %c0_i32_2 = arith.constant 0 : i32
    return %c0_i32, %c0_i32_0, %c0_i32_1 : i32, i32, i32
  }
  func.func @transform_2(%arg0: i32) -> (i32, i32) {
    %c0_i32 = arith.constant 0 : i32
    %c0_i32_0 = arith.constant 0 : i32
    %c0_i32_1 = arith.constant 0 : i32
    return %c0_i32, %c0_i32_0 : i32, i32
  }
  func.func @transform_3(%arg0: i32) -> (i32, i32) {
    %c0_i32 = arith.constant 0 : i32
    %c0_i32_0 = arith.constant 0 : i32
    %c0_i32_1 = arith.constant 0 : i32
    return %c0_i32, %c0_i32_0 : i32, i32
  }
  func.func @transform_4(%arg0: i32) -> (i32, i32) {
    %c0_i32 = arith.constant 0 : i32
    %c0_i32_0 = arith.constant 0 : i32
    %c0_i32_1 = arith.constant 0 : i32
    return %c0_i32, %c0_i32_0 : i32, i32
  }
  func.func @transform_5(%arg0: i32) -> (i32, i32) {
    %c0_i32 = arith.constant 0 : i32
    %c0_i32_0 = arith.constant 0 : i32
    %c0_i32_1 = arith.constant 0 : i32
    return %c0_i32, %c0_i32_0 : i32, i32
  }
  func.func @transform_6(%arg0: i32) -> (i32, i32) {
    %c0_i32 = arith.constant 0 : i32
    %c0_i32_0 = arith.constant 0 : i32
    %c0_i32_1 = arith.constant 0 : i32
    return %c0_i32, %c0_i32_0 : i32, i32
  }
  func.func @transform_7(%arg0: i32) -> (i32, i32) {
    %c0_i32 = arith.constant 0 : i32
    %c0_i32_0 = arith.constant 0 : i32
    %c0_i32_1 = arith.constant 0 : i32
    return %c0_i32, %c0_i32_0 : i32, i32
  }
  func.func @transform_8(%arg0: i32) -> (i32, i32) {
    %c0_i32 = arith.constant 0 : i32
    %c0_i32_0 = arith.constant 0 : i32
    %c0_i32_1 = arith.constant 0 : i32
    return %c0_i32, %c0_i32_0 : i32, i32
  }
  func.func @transform_9(%arg0: i32) -> (i32, i32) {
    %c0_i32 = arith.constant 0 : i32
    %c0_i32_0 = arith.constant 0 : i32
    %c0_i32_1 = arith.constant 0 : i32
    return %c0_i32, %c0_i32_0 : i32, i32
  }
  func.func @transform_10(%arg0: i32) -> (i32, i32) {
    %c0_i32 = arith.constant 0 : i32
    %c0_i32_0 = arith.constant 0 : i32
    %c0_i32_1 = arith.constant 0 : i32
    return %c0_i32, %c0_i32_0 : i32, i32
  }
  func.func @transform_11(%arg0: i32) -> (i32, i32) {
    %c0_i32 = arith.constant 0 : i32
    %c0_i32_0 = arith.constant 0 : i32
    %c0_i32_1 = arith.constant 0 : i32
    return %c0_i32, %c0_i32_0 : i32, i32
  }
  func.func @transform_12(%arg0: i32) -> (i32, i32) {
    %c0_i32 = arith.constant 0 : i32
    %c0_i32_0 = arith.constant 0 : i32
    %c0_i32_1 = arith.constant 0 : i32
    return %c0_i32, %c0_i32_0 : i32, i32
  }
  func.func @transform_13(%arg0: i32) -> (i32, i32) {
    %c0_i32 = arith.constant 0 : i32
    %c0_i32_0 = arith.constant 0 : i32
    %c0_i32_1 = arith.constant 0 : i32
    return %c0_i32, %c0_i32_0 : i32, i32
  }
  func.func @transform_14(%arg0: i32) -> (i32, i32) {
    %c0_i32 = arith.constant 0 : i32
    %c0_i32_0 = arith.constant 0 : i32
    %c0_i32_1 = arith.constant 0 : i32
    return %c0_i32, %c0_i32_0 : i32, i32
  }
  func.func @transform_15(%arg0: i32) -> (i32, i32) {
    %c0_i32 = arith.constant 0 : i32
    %c0_i32_0 = arith.constant 0 : i32
    %c0_i32_1 = arith.constant 0 : i32
    return %c0_i32, %c0_i32_0 : i32, i32
  }
  func.func @transform_16(%arg0: i32) -> (i32, i32) {
    %c0_i32 = arith.constant 0 : i32
    %c0_i32_0 = arith.constant 0 : i32
    %c0_i32_1 = arith.constant 0 : i32
    return %c0_i32, %c0_i32_0 : i32, i32
  }
  func.func @transform_17(%arg0: i32) -> (i32, i32) {
    %c0_i32 = arith.constant 0 : i32
    %c0_i32_0 = arith.constant 0 : i32
    %c0_i32_1 = arith.constant 0 : i32
    return %c0_i32, %c0_i32_0 : i32, i32
  }
  func.func @transform_18(%arg0: i32) -> (i32, i32) {
    %c0_i32 = arith.constant 0 : i32
    %c0_i32_0 = arith.constant 0 : i32
    %c0_i32_1 = arith.constant 0 : i32
    return %c0_i32, %c0_i32_0 : i32, i32
  }
  func.func @transform_19(%arg0: i32) -> (i32, i32) {
    %c0_i32 = arith.constant 0 : i32
    %c0_i32_0 = arith.constant 0 : i32
    %c0_i32_1 = arith.constant 0 : i32
    return %c0_i32, %c0_i32_0 : i32, i32
  }
  func.func @transform_20(%arg0: i32) -> (i32, i32) {
    %c0_i32 = arith.constant 0 : i32
    %c0_i32_0 = arith.constant 0 : i32
    %c0_i32_1 = arith.constant 0 : i32
    return %c0_i32, %c0_i32_0 : i32, i32
  }
  func.func @transform_21(%arg0: i32) -> (i32, i32) {
    %c0_i32 = arith.constant 0 : i32
    %c0_i32_0 = arith.constant 0 : i32
    return %c0_i32, %arg0 : i32, i32
  }
}

</mosaic_0001>

<bundles_post_ra>
// kernel: tpu_custom_call.1
= control target key start
LH: loop header
LB: loop body
LE: loop exit
PB: predicated region body
PF: predicated region fallthrough
CT: control target
= control target key end

     0   :  { %s10270_s0 = inlined_call_operand.vmem [shape: f32[32,512], index: 0, kind: input, shape index: {}]   ;;  %s10271_s1 = inlined_call_operand.vmem [shape: f32[9,1,512], index: 1, kind: input, shape index: {}]   ;;  %s10272_s2 = inlined_call_operand.vmem [shape: f32[512,2], index: 2, kind: input, shape index: {}]   ;;  %s10273_s3 = inlined_call_operand.vmem [shape: f32[32,160], index: 3, kind: input, shape index: {}]   ;;  %s10274_s4 = inlined_call_operand.vmem [shape: f32[32,128], index: 4, kind: input, shape index: {}]   ;;  %s10275_s5 = inlined_call_operand.vmem [shape: f32[32,1], index: 5, kind: input, shape index: {}]   ;;  %s10276_s6 = inlined_call_operand.vmem [shape: f32[32,120], index: 6, kind: input, shape index: {}]   ;;  %s10277_s7 = inlined_call_operand.vmem [shape: f32[32,96], index: 7, kind: input, shape index: {}]   ;;  %s10278_s8 = inlined_call_operand.vmem [shape: f32[32,1], index: 8, kind: input, shape index: {}]   ;;  %s10279_s9 = inlined_call_operand.vmem [shape: f32[32,120], index: 9, kind: input, shape index: {}]   ;;  %s10280_s10 = inlined_call_operand.vmem [shape: f32[32,96], index: 10, kind: input, shape index: {}]   ;;  %s10281_s11 = inlined_call_operand.vmem [shape: f32[32,1], index: 11, kind: input, shape index: {}]   ;;  %s10282_s12 = inlined_call_operand.vmem [shape: f32[8,120], index: 12, kind: input, shape index: {}]   ;;  %s10283_s13 = inlined_call_operand.vmem [shape: f32[8,96], index: 13, kind: input, shape index: {}]   ;;  %s10284_s14 = inlined_call_operand.vmem [shape: f32[8,1], index: 14, kind: input, shape index: {}]   ;;  %s10285_s15 = inlined_call_operand.vmem [shape: f32[2,32], index: 15, kind: input, shape index: {}]   ;;  %s10286_s16 = inlined_call_operand.vmem [shape: f32[2,1], index: 16, kind: input, shape index: {}]   ;;  %s10287_s17 = inlined_call_operand.vmem [shape: f32[32,2], index: 17, kind: input, shape index: {}]   ;;  %s10288_s18 = inlined_call_operand.vmem [shape: f32[32,1], index: 18, kind: input, shape index: {}]   ;;  %s10289_s19 = inlined_call_operand.vmem [shape: f32[32,32], index: 19, kind: input, shape index: {}]   ;;  %s10290_s20 = inlined_call_operand.vmem [shape: f32[32,1], index: 20, kind: input, shape index: {}]   ;;  %s10291_s21 = inlined_call_operand.hbm [shape: f32[32,512], index: 21, kind: output, shape index: {}]  }
   0x1   :  { %10501 = sst [smem:[#allocation81_spill]] %s10270_s0 }
   0x2   :  { %10502 = sst [smem:[#allocation82_spill]] %s10271_s1 }
   0x3   :  { %10503 = sst [smem:[#allocation83_spill]] %s10272_s2 }
   0x4   :  { %10504 = sst [smem:[#allocation84_spill]] %s10273_s3 }
   0x5   :  { %10505 = sst [smem:[#allocation85_spill]] %s10274_s4 }
   0x6   :  { %10506 = sst [smem:[#allocation86_spill]] %s10275_s5 }
   0x7   :  { %s10507_s26 = sld [smem:[#allocation81_spill]]  ;;  %s6033_s28 = smov 111  }
   0xd   :  { %v6161_v0 = vld [vmem:[%s10507_s26 + $0x70] sm:$0xff]  ;;  %v6166_v1 = vld [vmem:[%s10507_s26 + $0x60] sm:$0xff]  ;;  %v6175_v2 = vld [vmem:[%s10507_s26 + $0x78] sm:$0xff] }
   0xe   :  { %963 = vrot.lane.b32.xlu1 %v6161_v0, %s6033_s28  ;;  %947 = vrot.lane.b32.xlu0 %v6166_v1, %s6033_s28  ;;  %v6180_v3 = vld [vmem:[%s10507_s26 + $0x68] sm:$0xff]  ;;  %v6194_v5 = vld [vmem:[%s10507_s26 + $0x40] sm:$0xff] }
   0xf   :  { %v6189_v4 = vld [vmem:[%s10507_s26 + $0x48] sm:$0xff] }
  0x12   :  { %971 = vrot.lane.b32.xlu1 %v6175_v2, %s6033_s28  ;;  %955 = vrot.lane.b32.xlu0 %v6180_v3, %s6033_s28 }
  0x13   :  { %26 = vsyncpa [#allocation6], 0  ;;  %v6203_v6 = vld [vmem:[%s10507_s26 + $0x58] sm:$0xff]  ;;  %v6208_v7 = vld [vmem:[%s10507_s26 + $0x50] sm:$0xff]  ;;  %s10350_s4 = smov 112   ;;  %s10308_s30 = smov 113   ;;  %v87_v16 = vlaneseq }
  0x14   :  { %v6217_v8 = vld [vmem:[%s10507_s26 + $0x28] sm:$0xff]  ;;  %v6222_v9 = vld [vmem:[%s10507_s26 + $0x20] sm:$0xff]  ;;  %v6231_v10 = vld [vmem:[%s10507_s26 + $0x38] sm:$0xff]  ;;  %s10306_s5 = smov 127   ;;  %s10508_s1 = sld [smem:[#allocation82_spill]]  ;;  %v10312_v40 = vmov 0.0  }
  0x15   :  { %v6236_v11 = vld [vmem:[%s10507_s26 + $0x30] sm:$0xff]  ;;  %v6245_v12 = vld [vmem:[%s10507_s26 + $0x8] sm:$0xff]  ;;  %v6250_v13 = vld [vmem:[%s10507_s26] sm:$0xff]  ;;  %v88_v17 = vshrl.u32 %v87_v16, 7  ;;  %v6356_v19 = vand.u32 127, %v87_v16  ;;  %1154 = vmatprep.mubr.f32.mxu0 %v10312_v40  ;;  %1243 = vmatprep.mubr.f32.mxu1 %v10312_v40  ;;  %s10304_s24 = smov 1  }
  0x16   :  { %953 = vrot.lane.b32.xlu1 %v6189_v4, %s6033_s28  ;;  %945 = vrot.lane.b32.xlu0 %v6194_v5, %s6033_s28  ;;  %v6259_v14 = vld [vmem:[%s10507_s26 + $0x18] sm:$0xff]  ;;  %v6264_v15 = vld [vmem:[%s10507_s26 + $0x10] sm:$0xff]  ;;  %s10302_s27 = smov 15   ;;  %s10300_s0 = smov 16   ;;  %vm1268_vm5 = vcmask 261120   ;;  %vm2143_vm9 = vcmask 785408  }
  0x17   :  { %v6354_v18 = vsub.s32 1, %v88_v17  ;;  %v6358_v20 = vsub.s32 3, %v88_v17  ;;  %v6360_v21 = vsub.s32 0, %v88_v17  ;;  %v6365_v23 = vsub.s32 2, %v88_v17  ;;  %s10298_s2 = smov 17   ;;  %s10510_s23 = sld [smem:[#allocation85_spill]] }
  0x18   :  { %vm973_vm0 = vcmp.lt.s32.totalorder %v6356_v19, 111  ;;  %vm892_vm1 = vcmp.lt.s32.totalorder %v6356_v19, 112  ;;  %vm811_vm2 = vcmp.lt.s32.totalorder %v6356_v19, 113  ;;  %vm730_vm3 = vcmp.lt.s32.totalorder %v6356_v19, 127  ;;  %s10514_s22 = sld [smem:[#allocation84_spill]] }
  0x19   :  { %vm545_vm4 = vcmp.lt.s32.totalorder %v6356_v19, 1  ;;  %s10515_s29 = sld [smem:[#allocation86_spill]]  ;;  %vm464_vm6 = vcmp.lt.s32.totalorder %v6356_v19, 15  ;;  %vm383_vm7 = vcmp.lt.s32.totalorder %v6356_v19, 16  ;;  %vm302_vm8 = vcmp.lt.s32.totalorder %v6356_v19, 17 }
  0x1a   :  { %969 = vrot.lane.b32.xlu1 %v6203_v6, %s6033_s28  ;;  %961 = vrot.lane.b32.xlu0 %v6208_v7, %s6033_s28  ;;  %v5682_v22 = vld [vmem:[%s10508_s1 + $0x20] sm:$0xf]  ;;  %vm2334_vm10 = vcmask 982016   ;;  %vm6043_vm11 = vmmov 0  }
  0x1b   :  { %v6372_v26 = vrot.slane %v5682_v22, %v6354_v18  ;;  %v6376_v27 = vrot.slane %v5682_v22, %v6358_v20  ;;  %v6379_v28 = vrot.slane %v5682_v22, %v6360_v21  ;;  %v6382_v29 = vrot.slane %v5682_v22, %v6365_v23 }
  0x1e   :  { %951 = vrot.lane.b32.xlu1 %v6217_v8, %s6033_s28  ;;  %943 = vrot.lane.b32.xlu0 %v6222_v9, %s6033_s28 }
  0x22   :  { %967 = vrot.lane.b32.xlu1 %v6231_v10, %s6033_s28  ;;  %959 = vrot.lane.b32.xlu0 %v6236_v11, %s6033_s28 }
  0x26   :  { %949 = vrot.lane.b32.xlu1 %v6245_v12, %s6033_s28  ;;  %941 = vrot.lane.b32.xlu0 %v6250_v13, %s6033_s28 }
  0x2a   :  { %965 = vrot.lane.b32.xlu1 %v6259_v14, %s6033_s28  ;;  %957 = vrot.lane.b32.xlu0 %v6264_v15, %s6033_s28 }
  0x2e   :  { %874 = vrot.lane.b32.xlu1 %v6180_v3, %s10350_s4  ;;  %866 = vrot.lane.b32.xlu0 %v6166_v1, %s10350_s4 }
  0x32   :  { %890 = vrot.lane.b32.xlu1 %v6175_v2, %s10350_s4  ;;  %882 = vrot.lane.b32.xlu0 %v6161_v0, %s10350_s4 }
  0x36   :  { %872 = vrot.lane.b32.xlu1 %v6189_v4, %s10350_s4  ;;  %864 = vrot.lane.b32.xlu0 %v6194_v5, %s10350_s4 }
  0x3a   :  { %888 = vrot.lane.b32.xlu1 %v6203_v6, %s10350_s4  ;;  %880 = vrot.lane.b32.xlu0 %v6208_v7, %s10350_s4 }
  0x3e   :  { %870 = vrot.lane.b32.xlu1 %v6217_v8, %s10350_s4  ;;  %862 = vrot.lane.b32.xlu0 %v6222_v9, %s10350_s4 }
  0x42   :  { %886 = vrot.lane.b32.xlu1 %v6231_v10, %s10350_s4  ;;  %878 = vrot.lane.b32.xlu0 %v6236_v11, %s10350_s4 }
  0x46   :  { %868 = vrot.lane.b32.xlu1 %v6245_v12, %s10350_s4  ;;  %860 = vrot.lane.b32.xlu0 %v6250_v13, %s10350_s4 }
  0x4a   :  { %884 = vrot.lane.b32.xlu1 %v6259_v14, %s10350_s4  ;;  %876 = vrot.lane.b32.xlu0 %v6264_v15, %s10350_s4 }
  0x4e   :  { %793 = vrot.lane.b32.xlu1 %v6180_v3, %s10308_s30  ;;  %785 = vrot.lane.b32.xlu0 %v6166_v1, %s10308_s30 }
  0x52   :  { %809 = vrot.lane.b32.xlu1 %v6175_v2, %s10308_s30  ;;  %801 = vrot.lane.b32.xlu0 %v6161_v0, %s10308_s30 }
  0x56   :  { %791 = vrot.lane.b32.xlu1 %v6189_v4, %s10308_s30  ;;  %783 = vrot.lane.b32.xlu0 %v6194_v5, %s10308_s30 }
  0x5a   :  { %807 = vrot.lane.b32.xlu1 %v6203_v6, %s10308_s30  ;;  %799 = vrot.lane.b32.xlu0 %v6208_v7, %s10308_s30 }
  0x5e   :  { %789 = vrot.lane.b32.xlu1 %v6217_v8, %s10308_s30  ;;  %781 = vrot.lane.b32.xlu0 %v6222_v9, %s10308_s30 }
  0x62   :  { %805 = vrot.lane.b32.xlu1 %v6231_v10, %s10308_s30  ;;  %797 = vrot.lane.b32.xlu0 %v6236_v11, %s10308_s30 }
  0x66   :  { %787 = vrot.lane.b32.xlu1 %v6245_v12, %s10308_s30  ;;  %779 = vrot.lane.b32.xlu0 %v6250_v13, %s10308_s30 }
  0x6a   :  { %803 = vrot.lane.b32.xlu1 %v6259_v14, %s10308_s30  ;;  %795 = vrot.lane.b32.xlu0 %v6264_v15, %s10308_s30  ;;  %s10562_s30 = smov 17  }
  0x6e   :  { %712 = vrot.lane.b32.xlu1 %v6180_v3, %s10306_s5  ;;  %704 = vrot.lane.b32.xlu0 %v6166_v1, %s10306_s5 }
  0x72   :  { %728 = vrot.lane.b32.xlu1 %v6175_v2, %s10306_s5  ;;  %720 = vrot.lane.b32.xlu0 %v6161_v0, %s10306_s5 }
  0x76   :  { %710 = vrot.lane.b32.xlu1 %v6189_v4, %s10306_s5  ;;  %702 = vrot.lane.b32.xlu0 %v6194_v5, %s10306_s5 }
  0x7a   :  { %726 = vrot.lane.b32.xlu1 %v6203_v6, %s10306_s5  ;;  %718 = vrot.lane.b32.xlu0 %v6208_v7, %s10306_s5 }
  0x7e   :  { %708 = vrot.lane.b32.xlu1 %v6217_v8, %s10306_s5  ;;  %700 = vrot.lane.b32.xlu0 %v6222_v9, %s10306_s5 }
  0x80   :  { %v964_v24 = vpop.permute.xlu1 %963  ;;  %v948_v25 = vpop.permute.xlu0 %947 }
  0x82   :  { %724 = vrot.lane.b32.xlu1 %v6231_v10, %s10306_s5  ;;  %716 = vrot.lane.b32.xlu0 %v6236_v11, %s10306_s5 }
  0x84   :  { %v972_v30 = vpop.permute.xlu1 %971  ;;  %v956_v31 = vpop.permute.xlu0 %955 }
  0x85   :  { %v981_v32 = vsel %vm973_vm0, %v956_v31, %v964_v24  ;;  %v989_v33 = vsel %vm973_vm0, %v972_v30, %v948_v25  ;;  %v985_v34 = vsel %vm973_vm0, %v948_v25, %v956_v31  ;;  %v977_v35 = vsel %vm973_vm0, %v964_v24, %v972_v30 }
  0x86   :  { %706 = vrot.lane.b32.xlu1 %v6245_v12, %s10306_s5  ;;  %698 = vrot.lane.b32.xlu0 %v6250_v13, %s10306_s5  ;;  %v1003_v36 = vmul.f32 %v981_v32, %v6372_v26  ;;  %v1005_v37 = vmul.f32 %v989_v33, %v6376_v27  ;;  %v1002_v38 = vmul.f32 %v985_v34, %v6379_v28 }
  0x87   :  { %v1004_v39 = vmul.f32 %v977_v35, %v6382_v29 }
  0x88   :  { %1090 = vmatprep.subr.mxu0 %v1003_v36  ;;  %1179 = vmatprep.subr.mxu1 %v1005_v37  ;;  %v954_v41 = vpop.permute.xlu1 %953  ;;  %v946_v42 = vpop.permute.xlu0 %945 }
  0x89   :  { %1091 = vmatpush1.msra.mxu0 %v1002_v38  ;;  %1180 = vmatpush1.msra.mxu1 %v1004_v39  ;;  %v984_v43 = vsel %vm973_vm0, %v946_v42, %v954_v41 }
  0x8a   :  { %722 = vrot.lane.b32.xlu1 %v6259_v14, %s10306_s5  ;;  %714 = vrot.lane.b32.xlu0 %v6264_v15, %s10306_s5  ;;  %v998_v52 = vmul.f32 %v984_v43, %v6379_v28  ;;  %s10543_s5 = smov 15  }
  0x8c   :  { %v970_v44 = vpop.permute.xlu1 %969  ;;  %v962_v45 = vpop.permute.xlu0 %961 }
  0x8d   :  { %v988_v46 = vsel %vm973_vm0, %v970_v44, %v946_v42  ;;  %v976_v47 = vsel %vm973_vm0, %v962_v45, %v970_v44  ;;  %v980_v48 = vsel %vm973_vm0, %v954_v41, %v962_v45  ;;  %v5681_v41 = vld [vmem:[%s10508_s1 + $0x1c] sm:$0xf] }
  0x8e   :  { %527 = vrot.lane.b32.xlu1 %v6180_v3, %s10304_s24  ;;  %519 = vrot.lane.b32.xlu0 %v6166_v1, %s10304_s24  ;;  %v999_v49 = vmul.f32 %v980_v48, %v6372_v26  ;;  %v1001_v50 = vmul.f32 %v988_v46, %v6376_v27  ;;  %v1000_v51 = vmul.f32 %v976_v47, %v6382_v29 }
  0x8f   :  { %v6471_v42 = vrot.slane %v5681_v41, %v6354_v18  ;;  %v6474_v43 = vrot.slane %v5681_v41, %v6358_v20  ;;  %v6477_v44 = vrot.slane %v5681_v41, %v6365_v23  ;;  %v6480_v45 = vrot.slane %v5681_v41, %v6360_v21 }
  0x90   :  { %1092 = vmatprep.subr.mxu0 %v999_v49  ;;  %1181 = vmatprep.subr.mxu1 %v1001_v50  ;;  %v952_v53 = vpop.permute.xlu1 %951  ;;  %v944_v54 = vpop.permute.xlu0 %943 }
  0x91   :  { %1093 = vmatpush1.msra.mxu0 %v998_v52  ;;  %1182 = vmatpush1.msra.mxu1 %v1000_v51  ;;  %v983_v55 = vsel %vm973_vm0, %v944_v54, %v952_v53 }
  0x92   :  { %543 = vrot.lane.b32.xlu1 %v6175_v2, %s10304_s24  ;;  %535 = vrot.lane.b32.xlu0 %v6161_v0, %s10304_s24  ;;  %v994_v16 = vmul.f32 %v983_v55, %v6379_v28 }
  0x94   :  { %v968_v56 = vpop.permute.xlu1 %967  ;;  %v960_v57 = vpop.permute.xlu0 %959 }
  0x95   :  { %v987_v58 = vsel %vm973_vm0, %v968_v56, %v944_v54  ;;  %v975_v59 = vsel %vm973_vm0, %v960_v57, %v968_v56  ;;  %v979_v60 = vsel %vm973_vm0, %v952_v53, %v960_v57 }
  0x96   :  { %525 = vrot.lane.b32.xlu1 %v6189_v4, %s10304_s24  ;;  %517 = vrot.lane.b32.xlu0 %v6194_v5, %s10304_s24  ;;  %v995_v61 = vmul.f32 %v979_v60, %v6372_v26  ;;  %v997_v62 = vmul.f32 %v987_v58, %v6376_v27  ;;  %v996_v63 = vmul.f32 %v975_v59, %v6382_v29 }
  0x98   :  { %1094 = vmatprep.subr.mxu0 %v995_v61  ;;  %1183 = vmatprep.subr.mxu1 %v997_v62  ;;  %v950_v17 = vpop.permute.xlu1 %949  ;;  %v942_v22 = vpop.permute.xlu0 %941 }
  0x99   :  { %1095 = vmatpush1.msra.mxu0 %v994_v16  ;;  %1184 = vmatpush1.msra.mxu1 %v996_v63  ;;  %v982_v24 = vsel %vm973_vm0, %v942_v22, %v950_v17 }
  0x9a   :  { %541 = vrot.lane.b32.xlu1 %v6203_v6, %s10304_s24  ;;  %533 = vrot.lane.b32.xlu0 %v6208_v7, %s10304_s24  ;;  %v990_v37 = vmul.f32 %v982_v24, %v6379_v28 }
  0x9c   :  { %v966_v25 = vpop.permute.xlu1 %965  ;;  %v958_v30 = vpop.permute.xlu0 %957 }
  0x9d   :  { %v986_v31 = vsel %vm973_vm0, %v966_v25, %v942_v22  ;;  %v974_v32 = vsel %vm973_vm0, %v958_v30, %v966_v25  ;;  %v978_v33 = vsel %vm973_vm0, %v950_v17, %v958_v30 }
  0x9e   :  { %523 = vrot.lane.b32.xlu1 %v6217_v8, %s10304_s24  ;;  %515 = vrot.lane.b32.xlu0 %v6222_v9, %s10304_s24  ;;  %v991_v34 = vmul.f32 %v978_v33, %v6372_v26  ;;  %v993_v35 = vmul.f32 %v986_v31, %v6376_v27  ;;  %v992_v36 = vmul.f32 %v974_v32, %v6382_v29 }
  0xa0   :  { %v875_v38 = vpop.permute.xlu1 %874  ;;  %1096 = vmatprep.subr.mxu0 %v991_v34  ;;  %1185 = vmatprep.subr.mxu1 %v993_v35  ;;  %v867_v39 = vpop.permute.xlu0 %866 }
  0xa1   :  { %1097 = vmatpush1.msra.mxu0 %v990_v37  ;;  %1186 = vmatpush1.msra.mxu1 %v992_v36  ;;  %v904_v46 = vsel %vm892_vm1, %v867_v39, %v875_v38 }
  0xa2   :  { %539 = vrot.lane.b32.xlu1 %v6231_v10, %s10304_s24  ;;  %531 = vrot.lane.b32.xlu0 %v6236_v11, %s10304_s24  ;;  %v921_v55 = vmul.f32 %v904_v46, %v6480_v45 }
  0xa4   :  { %v891_v47 = vpop.permute.xlu1 %890  ;;  %v883_v48 = vpop.permute.xlu0 %882 }
  0xa5   :  { %v908_v49 = vsel %vm892_vm1, %v891_v47, %v867_v39  ;;  %v896_v50 = vsel %vm892_vm1, %v883_v48, %v891_v47  ;;  %v900_v51 = vsel %vm892_vm1, %v875_v38, %v883_v48 }
  0xa6   :  { %521 = vrot.lane.b32.xlu1 %v6245_v12, %s10304_s24  ;;  %513 = vrot.lane.b32.xlu0 %v6250_v13, %s10304_s24  ;;  %v922_v52 = vmul.f32 %v900_v51, %v6471_v42  ;;  %v924_v53 = vmul.f32 %v908_v49, %v6474_v43  ;;  %v923_v54 = vmul.f32 %v896_v50, %v6477_v44 }
  0xa8   :  { %v873_v56 = vpop.permute.xlu1 %872  ;;  %1098 = vmatprep.subr.mxu0 %v922_v52  ;;  %1187 = vmatprep.subr.mxu1 %v924_v53  ;;  %v865_v57 = vpop.permute.xlu0 %864 }
  0xa9   :  { %1099 = vmatpush1.msra.mxu0 %v921_v55  ;;  %1188 = vmatpush1.msra.mxu1 %v923_v54  ;;  %v903_v58 = vsel %vm892_vm1, %v865_v57, %v873_v56 }
  0xaa   :  { %537 = vrot.lane.b32.xlu1 %v6259_v14, %s10304_s24  ;;  %529 = vrot.lane.b32.xlu0 %v6264_v15, %s10304_s24  ;;  %v917_v24 = vmul.f32 %v903_v58, %v6480_v45  ;;  %s10541_s24 = smov 127  }
  0xac   :  { %v889_v59 = vpop.permute.xlu1 %888  ;;  %v881_v60 = vpop.permute.xlu0 %880 }
  0xad   :  { %v907_v61 = vsel %vm892_vm1, %v889_v59, %v865_v57  ;;  %v895_v62 = vsel %vm892_vm1, %v881_v60, %v889_v59  ;;  %v899_v63 = vsel %vm892_vm1, %v873_v56, %v881_v60  ;;  %v5680_v60 = vld [vmem:[%s10508_s1 + $0x18] sm:$0xf] }
  0xae   :  { %446 = vrot.lane.b32.xlu1 %v6180_v3, %s10302_s27  ;;  %438 = vrot.lane.b32.xlu0 %v6166_v1, %s10302_s27  ;;  %v918_v16 = vmul.f32 %v899_v63, %v6471_v42  ;;  %v920_v17 = vmul.f32 %v907_v61, %v6474_v43  ;;  %v919_v22 = vmul.f32 %v895_v62, %v6477_v44 }
  0xaf   :  { %v6567_v61 = vrot.slane %v5680_v60, %v6354_v18  ;;  %v6570_v62 = vrot.slane %v5680_v60, %v6358_v20  ;;  %v6573_v63 = vrot.slane %v5680_v60, %v6365_v23 }
  0xb0   :  { %v871_v25 = vpop.permute.xlu1 %870  ;;  %1100 = vmatprep.subr.mxu0 %v918_v16  ;;  %1189 = vmatprep.subr.mxu1 %v920_v17  ;;  %v863_v30 = vpop.permute.xlu0 %862  ;;  %v6576_v16 = vrot.slane %v5680_v60, %v6360_v21 }
  0xb1   :  { %1101 = vmatpush1.msra.mxu0 %v917_v24  ;;  %1190 = vmatpush1.msra.mxu1 %v919_v22  ;;  %v902_v31 = vsel %vm892_vm1, %v863_v30, %v871_v25 }
  0xb2   :  { %462 = vrot.lane.b32.xlu1 %v6175_v2, %s10302_s27  ;;  %454 = vrot.lane.b32.xlu0 %v6161_v0, %s10302_s27  ;;  %v913_v41 = vmul.f32 %v902_v31, %v6480_v45 }
  0xb4   :  { %v887_v32 = vpop.permute.xlu1 %886  ;;  %v879_v33 = vpop.permute.xlu0 %878 }
  0xb5   :  { %v906_v34 = vsel %vm892_vm1, %v887_v32, %v863_v30  ;;  %v894_v35 = vsel %vm892_vm1, %v879_v33, %v887_v32  ;;  %v898_v36 = vsel %vm892_vm1, %v871_v25, %v879_v33 }
  0xb6   :  { %444 = vrot.lane.b32.xlu1 %v6189_v4, %s10302_s27  ;;  %436 = vrot.lane.b32.xlu0 %v6194_v5, %s10302_s27  ;;  %v914_v37 = vmul.f32 %v898_v36, %v6471_v42  ;;  %v916_v38 = vmul.f32 %v906_v34, %v6474_v43  ;;  %v915_v39 = vmul.f32 %v894_v35, %v6477_v44 }
  0xb8   :  { %v869_v46 = vpop.permute.xlu1 %868  ;;  %1102 = vmatprep.subr.mxu0 %v914_v37  ;;  %1191 = vmatprep.subr.mxu1 %v916_v38  ;;  %v861_v47 = vpop.permute.xlu0 %860 }
  0xb9   :  { %1103 = vmatpush1.msra.mxu0 %v913_v41  ;;  %1192 = vmatpush1.msra.mxu1 %v915_v39  ;;  %v901_v48 = vsel %vm892_vm1, %v861_v47, %v869_v46 }
  0xba   :  { %460 = vrot.lane.b32.xlu1 %v6203_v6, %s10302_s27  ;;  %452 = vrot.lane.b32.xlu0 %v6208_v7, %s10302_s27  ;;  %v909_v57 = vmul.f32 %v901_v48, %v6480_v45 }
  0xbc   :  { %v885_v49 = vpop.permute.xlu1 %884  ;;  %v877_v50 = vpop.permute.xlu0 %876 }
  0xbd   :  { %v905_v51 = vsel %vm892_vm1, %v885_v49, %v861_v47  ;;  %v893_v52 = vsel %vm892_vm1, %v877_v50, %v885_v49  ;;  %v897_v53 = vsel %vm892_vm1, %v869_v46, %v877_v50 }
  0xbe   :  { %442 = vrot.lane.b32.xlu1 %v6217_v8, %s10302_s27  ;;  %434 = vrot.lane.b32.xlu0 %v6222_v9, %s10302_s27  ;;  %v910_v54 = vmul.f32 %v897_v53, %v6471_v42  ;;  %v912_v55 = vmul.f32 %v905_v51, %v6474_v43  ;;  %v911_v56 = vmul.f32 %v893_v52, %v6477_v44 }
  0xc0   :  { %v794_v58 = vpop.permute.xlu1 %793  ;;  %1104 = vmatprep.subr.mxu0 %v910_v54  ;;  %1193 = vmatprep.subr.mxu1 %v912_v55  ;;  %v786_v59 = vpop.permute.xlu0 %785 }
  0xc1   :  { %1105 = vmatpush1.msra.mxu0 %v909_v57  ;;  %1194 = vmatpush1.msra.mxu1 %v911_v56  ;;  %v823_v17 = vsel %vm811_vm2, %v786_v59, %v794_v58 }
  0xc2   :  { %458 = vrot.lane.b32.xlu1 %v6231_v10, %s10302_s27  ;;  %450 = vrot.lane.b32.xlu0 %v6236_v11, %s10302_s27  ;;  %v840_v35 = vmul.f32 %v823_v17, %v6576_v16 }
  0xc4   :  { %v810_v22 = vpop.permute.xlu1 %809  ;;  %v802_v24 = vpop.permute.xlu0 %801 }
  0xc5   :  { %v827_v25 = vsel %vm811_vm2, %v810_v22, %v786_v59  ;;  %v815_v30 = vsel %vm811_vm2, %v802_v24, %v810_v22  ;;  %v819_v31 = vsel %vm811_vm2, %v794_v58, %v802_v24 }
  0xc6   :  { %440 = vrot.lane.b32.xlu1 %v6245_v12, %s10302_s27  ;;  %432 = vrot.lane.b32.xlu0 %v6250_v13, %s10302_s27  ;;  %v841_v32 = vmul.f32 %v819_v31, %v6567_v61  ;;  %v843_v33 = vmul.f32 %v827_v25, %v6570_v62  ;;  %v842_v34 = vmul.f32 %v815_v30, %v6573_v63 }
  0xc8   :  { %v792_v36 = vpop.permute.xlu1 %791  ;;  %1106 = vmatprep.subr.mxu0 %v841_v32  ;;  %1195 = vmatprep.subr.mxu1 %v843_v33  ;;  %v784_v37 = vpop.permute.xlu0 %783 }
  0xc9   :  { %1107 = vmatpush1.msra.mxu0 %v840_v35  ;;  %1196 = vmatpush1.msra.mxu1 %v842_v34  ;;  %v822_v38 = vsel %vm811_vm2, %v784_v37, %v792_v36 }
  0xca   :  { %456 = vrot.lane.b32.xlu1 %v6259_v14, %s10302_s27  ;;  %448 = vrot.lane.b32.xlu0 %v6264_v15, %s10302_s27  ;;  %v836_v52 = vmul.f32 %v822_v38, %v6576_v16 }
  0xcc   :  { %v808_v39 = vpop.permute.xlu1 %807  ;;  %v800_v41 = vpop.permute.xlu0 %799 }
  0xcd   :  { %v826_v46 = vsel %vm811_vm2, %v808_v39, %v784_v37  ;;  %v814_v47 = vsel %vm811_vm2, %v800_v41, %v808_v39  ;;  %v818_v48 = vsel %vm811_vm2, %v792_v36, %v800_v41 }
  0xce   :  { %365 = vrot.lane.b32.xlu1 %v6180_v3, %s10300_s0  ;;  %357 = vrot.lane.b32.xlu0 %v6166_v1, %s10300_s0  ;;  %v837_v49 = vmul.f32 %v818_v48, %v6567_v61  ;;  %v839_v50 = vmul.f32 %v826_v46, %v6570_v62  ;;  %v838_v51 = vmul.f32 %v814_v47, %v6573_v63 }
  0xd0   :  { %v790_v53 = vpop.permute.xlu1 %789  ;;  %1108 = vmatprep.subr.mxu0 %v837_v49  ;;  %1197 = vmatprep.subr.mxu1 %v839_v50  ;;  %v782_v54 = vpop.permute.xlu0 %781  ;;  %v5679_v49 = vld [vmem:[%s10508_s1 + $0x14] sm:$0xf] }
  0xd1   :  { %1109 = vmatpush1.msra.mxu0 %v836_v52  ;;  %1198 = vmatpush1.msra.mxu1 %v838_v51  ;;  %v821_v55 = vsel %vm811_vm2, %v782_v54, %v790_v53  ;;  %v6663_v50 = vrot.slane %v5679_v49, %v6354_v18  ;;  %v6666_v51 = vrot.slane %v5679_v49, %v6358_v20 }
  0xd2   :  { %381 = vrot.lane.b32.xlu1 %v6175_v2, %s10300_s0  ;;  %373 = vrot.lane.b32.xlu0 %v6161_v0, %s10300_s0  ;;  %v832_v25 = vmul.f32 %v821_v55, %v6576_v16  ;;  %v6669_v52 = vrot.slane %v5679_v49, %v6365_v23 }
  0xd4   :  { %v806_v56 = vpop.permute.xlu1 %805  ;;  %v798_v57 = vpop.permute.xlu0 %797 }
  0xd5   :  { %v825_v58 = vsel %vm811_vm2, %v806_v56, %v782_v54  ;;  %v813_v59 = vsel %vm811_vm2, %v798_v57, %v806_v56  ;;  %v817_v60 = vsel %vm811_vm2, %v790_v53, %v798_v57  ;;  %v6672_v53 = vrot.slane %v5679_v49, %v6360_v21 }
  0xd6   :  { %363 = vrot.lane.b32.xlu1 %v6189_v4, %s10300_s0  ;;  %355 = vrot.lane.b32.xlu0 %v6194_v5, %s10300_s0  ;;  %v833_v17 = vmul.f32 %v817_v60, %v6567_v61  ;;  %v835_v22 = vmul.f32 %v825_v58, %v6570_v62  ;;  %v834_v24 = vmul.f32 %v813_v59, %v6573_v63 }
  0xd8   :  { %v788_v30 = vpop.permute.xlu1 %787  ;;  %1110 = vmatprep.subr.mxu0 %v833_v17  ;;  %1199 = vmatprep.subr.mxu1 %v835_v22  ;;  %v780_v31 = vpop.permute.xlu0 %779 }
  0xd9   :  { %1111 = vmatpush1.msra.mxu0 %v832_v25  ;;  %1200 = vmatpush1.msra.mxu1 %v834_v24  ;;  %v820_v32 = vsel %vm811_vm2, %v780_v31, %v788_v30 }
  0xda   :  { %379 = vrot.lane.b32.xlu1 %v6203_v6, %s10300_s0  ;;  %371 = vrot.lane.b32.xlu0 %v6208_v7, %s10300_s0  ;;  %v828_v46 = vmul.f32 %v820_v32, %v6576_v16 }
  0xdc   :  { %v804_v33 = vpop.permute.xlu1 %803  ;;  %v796_v34 = vpop.permute.xlu0 %795 }
  0xdd   :  { %v824_v35 = vsel %vm811_vm2, %v804_v33, %v780_v31  ;;  %v812_v36 = vsel %vm811_vm2, %v796_v34, %v804_v33  ;;  %v816_v37 = vsel %vm811_vm2, %v788_v30, %v796_v34 }
  0xde   :  { %361 = vrot.lane.b32.xlu1 %v6217_v8, %s10300_s0  ;;  %353 = vrot.lane.b32.xlu0 %v6222_v9, %s10300_s0  ;;  %v829_v38 = vmul.f32 %v816_v37, %v6567_v61  ;;  %v831_v39 = vmul.f32 %v824_v35, %v6570_v62  ;;  %v830_v41 = vmul.f32 %v812_v36, %v6573_v63 }
  0xe0   :  { %v713_v47 = vpop.permute.xlu1 %712  ;;  %1112 = vmatprep.subr.mxu0 %v829_v38  ;;  %1201 = vmatprep.subr.mxu1 %v831_v39  ;;  %v705_v48 = vpop.permute.xlu0 %704 }
  0xe1   :  { %1113 = vmatpush1.msra.mxu0 %v828_v46  ;;  %1202 = vmatpush1.msra.mxu1 %v830_v41  ;;  %v742_v54 = vsel %vm730_vm3, %v705_v48, %v713_v47 }
  0xe2   :  { %377 = vrot.lane.b32.xlu1 %v6231_v10, %s10300_s0  ;;  %369 = vrot.lane.b32.xlu0 %v6236_v11, %s10300_s0  ;;  %v759_v24 = vmul.f32 %v742_v54, %v6672_v53 }
  0xe4   :  { %v729_v55 = vpop.permute.xlu1 %728  ;;  %v721_v56 = vpop.permute.xlu0 %720 }
  0xe5   :  { %v746_v57 = vsel %vm730_vm3, %v729_v55, %v705_v48  ;;  %v734_v58 = vsel %vm730_vm3, %v721_v56, %v729_v55  ;;  %v738_v59 = vsel %vm730_vm3, %v713_v47, %v721_v56 }
  0xe6   :  { %359 = vrot.lane.b32.xlu1 %v6245_v12, %s10300_s0  ;;  %351 = vrot.lane.b32.xlu0 %v6250_v13, %s10300_s0  ;;  %v760_v60 = vmul.f32 %v738_v59, %v6663_v50  ;;  %v762_v17 = vmul.f32 %v746_v57, %v6666_v51  ;;  %v761_v22 = vmul.f32 %v734_v58, %v6669_v52 }
  0xe8   :  { %v711_v25 = vpop.permute.xlu1 %710  ;;  %1114 = vmatprep.subr.mxu0 %v760_v60  ;;  %1203 = vmatprep.subr.mxu1 %v762_v17  ;;  %v703_v30 = vpop.permute.xlu0 %702 }
  0xe9   :  { %1115 = vmatpush1.msra.mxu0 %v759_v24  ;;  %1204 = vmatpush1.msra.mxu1 %v761_v22  ;;  %v741_v31 = vsel %vm730_vm3, %v703_v30, %v711_v25 }
  0xea   :  { %375 = vrot.lane.b32.xlu1 %v6259_v14, %s10300_s0  ;;  %367 = vrot.lane.b32.xlu0 %v6264_v15, %s10300_s0  ;;  %v755_v41 = vmul.f32 %v741_v31, %v6672_v53 }
  0xec   :  { %v727_v32 = vpop.permute.xlu1 %726  ;;  %v719_v33 = vpop.permute.xlu0 %718 }
  0xed   :  { %v745_v34 = vsel %vm730_vm3, %v727_v32, %v703_v30  ;;  %v733_v35 = vsel %vm730_vm3, %v719_v33, %v727_v32  ;;  %v737_v36 = vsel %vm730_vm3, %v711_v25, %v719_v33 }
  0xee   :  { %282 = vrot.lane.b32.xlu1 %v6180_v3, %s10298_s2  ;;  %274 = vrot.lane.b32.xlu0 %v6166_v1, %s10298_s2  ;;  %v756_v37 = vmul.f32 %v737_v36, %v6663_v50  ;;  %v758_v38 = vmul.f32 %v745_v34, %v6666_v51  ;;  %v757_v39 = vmul.f32 %v733_v35, %v6669_v52  ;;  %v1022_v35 = vld [vmem:[%s10510_s23] sm:$0xff] }
  0xf0   :  { %v709_v46 = vpop.permute.xlu1 %708  ;;  %1116 = vmatprep.subr.mxu0 %v756_v37  ;;  %1205 = vmatprep.subr.mxu1 %v758_v38  ;;  %v701_v47 = vpop.permute.xlu0 %700 }
  0xf1   :  { %1117 = vmatpush1.msra.mxu0 %v755_v41  ;;  %1206 = vmatpush1.msra.mxu1 %v757_v39  ;;  %v740_v1 = vsel %vm730_vm3, %v701_v47, %v709_v46 }
  0xf2   :  { %298 = vrot.lane.b32.xlu1 %v6175_v2, %s10298_s2  ;;  %290 = vrot.lane.b32.xlu0 %v6161_v0, %s10298_s2  ;;  %v751_v57 = vmul.f32 %v740_v1, %v6672_v53 }
  0xf4   :  { %v725_v3 = vpop.permute.xlu1 %724  ;;  %v717_v48 = vpop.permute.xlu0 %716 }
  0xf5   :  { %v744_v49 = vsel %vm730_vm3, %v725_v3, %v701_v47  ;;  %v732_v54 = vsel %vm730_vm3, %v717_v48, %v725_v3  ;;  %v736_v55 = vsel %vm730_vm3, %v709_v46, %v717_v48 }
  0xf6   :  { %280 = vrot.lane.b32.xlu1 %v6189_v4, %s10298_s2  ;;  %272 = vrot.lane.b32.xlu0 %v6194_v5, %s10298_s2  ;;  %v752_v0 = vmul.f32 %v736_v55, %v6663_v50  ;;  %v754_v2 = vmul.f32 %v744_v49, %v6666_v51  ;;  %v753_v56 = vmul.f32 %v732_v54, %v6669_v52  ;;  %v5678_v4 = vld [vmem:[%s10508_s1 + $0xc] sm:$0xf]  ;;  %v1024_v55 = vld [vmem:[%s10510_s23 + $0x10] sm:$0xff] }
  0xf7   :  { %v6771_v37 = vrot.slane %v5678_v4, %v6365_v23  ;;  %v6774_v38 = vrot.slane %v5678_v4, %v6358_v20 }
  0xf8   :  { %v707_v58 = vpop.permute.xlu1 %706  ;;  %1118 = vmatprep.subr.mxu0 %v752_v0  ;;  %1207 = vmatprep.subr.mxu1 %v754_v2  ;;  %v699_v59 = vpop.permute.xlu0 %698 }
  0xf9   :  { %1119 = vmatpush1.msra.mxu0 %v751_v57  ;;  %1208 = vmatpush1.msra.mxu1 %v753_v56  ;;  %v739_v5 = vsel %vm730_vm3, %v699_v59, %v707_v58  ;;  %10512 = vst [vmem:[#allocation10_spill] sm:$0xff] %v6771_v37  ;;  %10513 = vst [vmem:[#allocation11_spill] sm:$0xff] %v6774_v38  ;;  %v1025_v56 = vld [vmem:[%s10510_s23 + $0x18] sm:$0xff] }
  0xfa   :  { %296 = vrot.lane.b32.xlu1 %v6203_v6, %s10298_s2  ;;  %288 = vrot.lane.b32.xlu0 %v6208_v7, %s10298_s2  ;;  %v6746_v7 = vrot.slane %v5678_v4, %v6354_v18  ;;  %v747_v32 = vmul.f32 %v739_v5, %v6672_v53  ;;  %v611_v5 = vld [vmem:[%s10514_s22 + $0x8] sm:$0xff] }
  0xfc   :  { %v723_v60 = vpop.permute.xlu1 %722  ;;  %v715_v17 = vpop.permute.xlu0 %714  ;;  %10509 = vst [vmem:[#allocation8_spill] sm:$0xff] %v6746_v7 }
  0xfd   :  { %v743_v22 = vsel %vm730_vm3, %v723_v60, %v699_v59  ;;  %v731_v24 = vsel %vm730_vm3, %v715_v17, %v723_v60  ;;  %v735_v6 = vsel %vm730_vm3, %v707_v58, %v715_v17 }
  0xfe   :  { %278 = vrot.lane.b32.xlu1 %v6217_v8, %s10298_s2  ;;  %270 = vrot.lane.b32.xlu0 %v6222_v9, %s10298_s2  ;;  %v748_v25 = vmul.f32 %v735_v6, %v6663_v50  ;;  %v750_v30 = vmul.f32 %v743_v22, %v6666_v51  ;;  %v749_v31 = vmul.f32 %v731_v24, %v6669_v52 }
  0xff   :  { %v6763_v9 = vrot.slane %v5678_v4, %v6360_v21 }
 0x100   :  { %v528_v33 = vpop.permute.xlu1 %527  ;;  %1120 = vmatprep.subr.mxu0 %v748_v25  ;;  %1209 = vmatprep.subr.mxu1 %v750_v30  ;;  %v520_v34 = vpop.permute.xlu0 %519 }
 0x101   :  { %v557_v8 = vsel %vm545_vm4, %v520_v34, %v528_v33  ;;  %1121 = vmatpush1.msra.mxu0 %v747_v32  ;;  %1210 = vmatpush1.msra.mxu1 %v749_v31  ;;  %10511 = vst [vmem:[#allocation9_spill] sm:$0xff] %v6763_v9 }
 0x102   :  { %294 = vrot.lane.b32.xlu1 %v6231_v10, %s10298_s2  ;;  %286 = vrot.lane.b32.xlu0 %v6236_v11, %s10298_s2  ;;  %v575_v36 = vmul.f32 %v557_v8, %v6746_v7  ;;  %v1023_v10 = vld [vmem:[%s10510_s23 + $0x8] sm:$0xff]  ;;  %v1461_v8 = vld [vmem:[%s10515_s29 + $0x10] sm:$0xff]  ;;  %s10542_s23 = smov 1  }
 0x103   :  { %1155 = vmatmul.mubr.f32.vlgmr.msra.gmra.mxu0 %v1022_v35  ;;  %1244 = vmatmul.mubr.f32.vlgmr.msra.gmra.mxu1 %v1022_v35 }
 0x104   :  { %v544_v39 = vpop.permute.xlu1 %543  ;;  %1281 = vmatprep.subr.mxu0 %v575_v36  ;;  %v536_v41 = vpop.permute.xlu0 %535  ;;  %1160 = vmatprep.mubr.f32.mxu0 %v10312_v40  ;;  %v10310_v36 = vmov 0  }
 0x105   :  { %v561_v11 = vsel %vm545_vm4, %v544_v39, %v520_v34  ;;  %v549_v46 = vsel %vm545_vm4, %v536_v41, %v544_v39  ;;  %v553_v47 = vsel %vm545_vm4, %v528_v33, %v536_v41  ;;  %1249 = vmatprep.mubr.f32.mxu1 %v10312_v40  ;;  %5962 = vset.pattern.permute.xlu1 %v10310_v36  ;;  %v1462_v39 = vld [vmem:[%s10515_s29 + $0x18] sm:$0xff] }
 0x106   :  { %v574_v1 = vmul.f32 %v561_v11, %v6763_v9  ;;  %v576_v3 = vmul.f32 %v553_v47, %v6771_v37  ;;  %276 = vrot.lane.b32.xlu1 %v6245_v12, %s10298_s2  ;;  %268 = vrot.lane.b32.xlu0 %v6250_v13, %s10298_s2  ;;  %v577_v48 = vmul.f32 %v549_v46, %v6774_v38  ;;  %v1460_v47 = vld [vmem:[%s10515_s29 + $0x8] sm:$0xff] }
 0x107   :  { %1161 = vmatmul.mubr.f32.gmra.mxu0 %v1023_v10  ;;  %1250 = vmatmul.mubr.f32.gmra.mxu1 %v1023_v10 }
 0x108   :  { %v526_v49 = vpop.permute.xlu1 %525  ;;  %1282 = vmatpush1.msra.mxu0 %v574_v1  ;;  %1370 = vmatprep.subr.mxu1 %v577_v48  ;;  %v518_v54 = vpop.permute.xlu0 %517  ;;  %v5677_v1 = vld [vmem:[%s10508_s1 + $0x8] sm:$0xf] }
 0x109   :  { %v556_v0 = vsel %vm545_vm4, %v518_v54, %v526_v49  ;;  %1371 = vmatpush1.msra.mxu1 %v576_v3  ;;  %1166 = vmatprep.mubr.f32.mxu0 %v10312_v40 }
 0x10a   :  { %292 = vrot.lane.b32.xlu1 %v6259_v14, %s10298_s2  ;;  %284 = vrot.lane.b32.xlu0 %v6264_v15, %s10298_s2  ;;  %v571_v12 = vmul.f32 %v556_v0, %v6746_v7 }
 0x10b   :  { %1167 = vmatmul.mubr.f32.gmra.mxu0 %v1024_v55  ;;  %1255 = vmatprep.mubr.f32.mxu1 %v10312_v40 }
 0x10c   :  { %v542_v13 = vpop.permute.xlu1 %541  ;;  %1283 = vmatprep.subr.mxu0 %v571_v12  ;;  %v534_v2 = vpop.permute.xlu0 %533  ;;  %1172 = vmatprep.mubr.f32.mxu0 %v10312_v40 }
 0x10d   :  { %v560_v14 = vsel %vm545_vm4, %v542_v13, %v518_v54  ;;  %v548_v15 = vsel %vm545_vm4, %v534_v2, %v542_v13  ;;  %v552_v57 = vsel %vm545_vm4, %v526_v49, %v534_v2  ;;  %1256 = vmatmul.mubr.f32.gmra.mxu1 %v1024_v55  ;;  %5961 = vset.pattern.permute.xlu0 %v10310_v36 }
 0x10e   :  { %v570_v58 = vmul.f32 %v560_v14, %v6763_v9  ;;  %v572_v59 = vmul.f32 %v552_v57, %v6771_v37  ;;  %v573_v4 = vmul.f32 %v548_v15, %v6774_v38  ;;  %1261 = vmatprep.mubr.f32.mxu1 %v10312_v40  ;;  %1475 = vperm.xlu1 %5962, %v1461_v8  }
 0x10f   :  { %1173 = vmatmul.mubr.f32.gmra.mxu0 %v1025_v56  ;;  %1480 = vperm.xlu0 %5961, %v1462_v39   ;;  %v6865_v2 = vrot.slane %v5677_v1, %v6354_v18  ;;  %v6870_v57 = vrot.slane %v5677_v1, %v6360_v21 }
 0x110   :  { %v524_v60 = vpop.permute.xlu1 %523  ;;  %1284 = vmatpush1.msra.mxu0 %v570_v58  ;;  %1372 = vmatprep.subr.mxu1 %v573_v4  ;;  %v516_v17 = vpop.permute.xlu0 %515  ;;  %v6877_v4 = vrot.slane %v5677_v1, %v6358_v20 }
 0x111   :  { %v555_v22 = vsel %vm545_vm4, %v516_v17, %v524_v60  ;;  %1373 = vmatpush1.msra.mxu1 %v572_v59  ;;  %5683 = vmatprep.mubr.msk.f32.mxu0 %vm1268_vm5, %v611_v5  ;;  %10516 = vst [vmem:[#allocation12_spill] sm:$0xff] %v6865_v2  ;;  %10517 = vst [vmem:[#allocation13_spill] sm:$0xff] %v6870_v57  ;;  %v6874_v59 = vrot.slane %v5677_v1, %v6365_v23 }
 0x112   :  { %v567_v24 = vmul.f32 %v555_v22, %v6746_v7  ;;  %1262 = vmatmul.mubr.f32.gmra.mxu1 %v1025_v56  ;;  %1470 = vperm.xlu1 %5962, %v1460_v47   ;;  %10519 = vst [vmem:[#allocation15_spill] sm:$0xff] %v6877_v4 }
 0x113   :  { %5687 = vmatprep.mubr.msk.f32.mxu1 %vm1268_vm5, %v611_v5  ;;  %10518 = vst [vmem:[#allocation14_spill] sm:$0xff] %v6874_v59 }
 0x114   :  { %v540_v6 = vpop.permute.xlu1 %539  ;;  %1285 = vmatprep.subr.mxu0 %v567_v24  ;;  %v532_v25 = vpop.permute.xlu0 %531 }
 0x115   :  { %v559_v30 = vsel %vm545_vm4, %v540_v6, %v516_v17  ;;  %v547_v31 = vsel %vm545_vm4, %v532_v25, %v540_v6  ;;  %v551_v32 = vsel %vm545_vm4, %v524_v60, %v532_v25 }
 0x116   :  { %v566_v33 = vmul.f32 %v559_v30, %v6763_v9  ;;  %v568_v34 = vmul.f32 %v551_v32, %v6771_v37  ;;  %v569_v35 = vmul.f32 %v547_v31, %v6774_v38 }
 0x118   :  { %v522_v41 = vpop.permute.xlu1 %521  ;;  %1286 = vmatpush1.msra.mxu0 %v566_v33  ;;  %1374 = vmatprep.subr.mxu1 %v569_v35  ;;  %v514_v10 = vpop.permute.xlu0 %513 }
 0x119   :  { %v554_v11 = vsel %vm545_vm4, %v514_v10, %v522_v41  ;;  %1375 = vmatpush1.msra.mxu1 %v568_v34 }
 0x11a   :  { %v563_v46 = vmul.f32 %v554_v11, %v6746_v7 }
 0x11c   :  { %v538_v3 = vpop.permute.xlu1 %537  ;;  %1287 = vmatprep.subr.mxu0 %v563_v46  ;;  %v530_v48 = vpop.permute.xlu0 %529 }
 0x11d   :  { %v558_v49 = vsel %vm545_vm4, %v538_v3, %v514_v10  ;;  %v546_v54 = vsel %vm545_vm4, %v530_v48, %v538_v3  ;;  %v550_v55 = vsel %vm545_vm4, %v522_v41, %v530_v48 }
 0x11e   :  { %v562_v0 = vmul.f32 %v558_v49, %v6763_v9  ;;  %v564_v12 = vmul.f32 %v550_v55, %v6771_v37  ;;  %v565_v13 = vmul.f32 %v546_v54, %v6774_v38 }
 0x120   :  { %v447_v56 = vpop.permute.xlu1 %446  ;;  %1288 = vmatpush1.msra.mxu0 %v562_v0  ;;  %1376 = vmatprep.subr.mxu1 %v565_v13  ;;  %v439_v14 = vpop.permute.xlu0 %438 }
 0x121   :  { %v476_v15 = vsel %vm464_vm6, %v439_v14, %v447_v56  ;;  %1377 = vmatpush1.msra.mxu1 %v564_v12 }
 0x122   :  { %v494_v58 = vmul.f32 %v476_v15, %v6865_v2 }
 0x124   :  { %v463_v5 = vpop.permute.xlu1 %462  ;;  %1289 = vmatprep.subr.mxu0 %v494_v58  ;;  %v455_v60 = vpop.permute.xlu0 %454 }
 0x125   :  { %v480_v17 = vsel %vm464_vm6, %v463_v5, %v439_v14  ;;  %v468_v22 = vsel %vm464_vm6, %v455_v60, %v463_v5  ;;  %v472_v24 = vsel %vm464_vm6, %v447_v56, %v455_v60 }
 0x126   :  { %v493_v6 = vmul.f32 %v480_v17, %v6870_v57  ;;  %v495_v25 = vmul.f32 %v472_v24, %v6874_v59  ;;  %v496_v30 = vmul.f32 %v468_v22, %v6877_v4  ;;  %v5676_v22 = vld [vmem:[%s10508_s1 + $0x4] sm:$0xf] }
 0x128   :  { %v445_v31 = vpop.permute.xlu1 %444  ;;  %1290 = vmatpush1.msra.mxu0 %v493_v6  ;;  %1378 = vmatprep.subr.mxu1 %v496_v30  ;;  %v437_v32 = vpop.permute.xlu0 %436 }
 0x129   :  { %v475_v33 = vsel %vm464_vm6, %v437_v32, %v445_v31  ;;  %1379 = vmatpush1.msra.mxu1 %v495_v25 }
 0x12a   :  { %v490_v34 = vmul.f32 %v475_v33, %v6865_v2 }
 0x12c   :  { %v461_v35 = vpop.permute.xlu1 %460  ;;  %1291 = vmatprep.subr.mxu0 %v490_v34  ;;  %v453_v8 = vpop.permute.xlu0 %452 }
 0x12d   :  { %v479_v39 = vsel %vm464_vm6, %v461_v35, %v437_v32  ;;  %v467_v41 = vsel %vm464_vm6, %v453_v8, %v461_v35  ;;  %v471_v10 = vsel %vm464_vm6, %v445_v31, %v453_v8  ;;  %v6929_v35 = vrot.slane %v5676_v22, %v6354_v18 }
 0x12e   :  { %v489_v11 = vmul.f32 %v479_v39, %v6870_v57  ;;  %v491_v46 = vmul.f32 %v471_v10, %v6874_v59  ;;  %v492_v47 = vmul.f32 %v467_v41, %v6877_v4  ;;  %v6934_v10 = vrot.slane %v5676_v22, %v6360_v21 }
 0x12f   :  { %10520 = vst [vmem:[#allocation16_spill] sm:$0xff] %v6929_v35 }
 0x130   :  { %v443_v1 = vpop.permute.xlu1 %442  ;;  %1292 = vmatpush1.msra.mxu0 %v489_v11  ;;  %1380 = vmatprep.subr.mxu1 %v492_v47  ;;  %v435_v3 = vpop.permute.xlu0 %434  ;;  %10521 = vst [vmem:[#allocation17_spill] sm:$0xff] %v6934_v10  ;;  %v6941_v47 = vrot.slane %v5676_v22, %v6358_v20 }
 0x131   :  { %v474_v48 = vsel %vm464_vm6, %v435_v3, %v443_v1  ;;  %1381 = vmatpush1.msra.mxu1 %v491_v46  ;;  %v6938_v46 = vrot.slane %v5676_v22, %v6365_v23 }
 0x132   :  { %v486_v49 = vmul.f32 %v474_v48, %v6865_v2  ;;  %10523 = vst [vmem:[#allocation19_spill] sm:$0xff] %v6941_v47 }
 0x133   :  { %10522 = vst [vmem:[#allocation18_spill] sm:$0xff] %v6938_v46 }
 0x134   :  { %v459_v54 = vpop.permute.xlu1 %458  ;;  %1293 = vmatprep.subr.mxu0 %v486_v49  ;;  %v451_v55 = vpop.permute.xlu0 %450 }
 0x135   :  { %v478_v0 = vsel %vm464_vm6, %v459_v54, %v435_v3  ;;  %v466_v12 = vsel %vm464_vm6, %v451_v55, %v459_v54  ;;  %v470_v13 = vsel %vm464_vm6, %v443_v1, %v451_v55 }
 0x136   :  { %v485_v56 = vmul.f32 %v478_v0, %v6870_v57  ;;  %v487_v14 = vmul.f32 %v470_v13, %v6874_v59  ;;  %v488_v15 = vmul.f32 %v466_v12, %v6877_v4 }
 0x138   :  { %v441_v58 = vpop.permute.xlu1 %440  ;;  %1294 = vmatpush1.msra.mxu0 %v485_v56  ;;  %1382 = vmatprep.subr.mxu1 %v488_v15  ;;  %v433_v5 = vpop.permute.xlu0 %432 }
 0x139   :  { %v473_v60 = vsel %vm464_vm6, %v433_v5, %v441_v58  ;;  %1383 = vmatpush1.msra.mxu1 %v487_v14 }
 0x13a   :  { %v482_v17 = vmul.f32 %v473_v60, %v6865_v2 }
 0x13c   :  { %v457_v24 = vpop.permute.xlu1 %456  ;;  %1295 = vmatprep.subr.mxu0 %v482_v17  ;;  %v449_v6 = vpop.permute.xlu0 %448 }
 0x13d   :  { %v477_v25 = vsel %vm464_vm6, %v457_v24, %v433_v5  ;;  %v465_v30 = vsel %vm464_vm6, %v449_v6, %v457_v24  ;;  %v469_v31 = vsel %vm464_vm6, %v441_v58, %v449_v6 }
 0x13e   :  { %v481_v32 = vmul.f32 %v477_v25, %v6870_v57  ;;  %v483_v33 = vmul.f32 %v469_v31, %v6874_v59  ;;  %v484_v34 = vmul.f32 %v465_v30, %v6877_v4 }
 0x140   :  { %v366_v8 = vpop.permute.xlu1 %365  ;;  %1296 = vmatpush1.msra.mxu0 %v481_v32  ;;  %1384 = vmatprep.subr.mxu1 %v484_v34  ;;  %v358_v39 = vpop.permute.xlu0 %357 }
 0x141   :  { %v395_v41 = vsel %vm383_vm7, %v358_v39, %v366_v8  ;;  %1385 = vmatpush1.msra.mxu1 %v483_v33 }
 0x142   :  { %v413_v11 = vmul.f32 %v395_v41, %v6929_v35 }
 0x144   :  { %v382_v1 = vpop.permute.xlu1 %381  ;;  %1297 = vmatprep.subr.mxu0 %v413_v11  ;;  %v374_v3 = vpop.permute.xlu0 %373 }
 0x145   :  { %v399_v48 = vsel %vm383_vm7, %v382_v1, %v358_v39  ;;  %v387_v49 = vsel %vm383_vm7, %v374_v3, %v382_v1  ;;  %v391_v54 = vsel %vm383_vm7, %v366_v8, %v374_v3 }
 0x146   :  { %v412_v55 = vmul.f32 %v399_v48, %v6934_v10  ;;  %v414_v0 = vmul.f32 %v391_v54, %v6938_v46  ;;  %v415_v12 = vmul.f32 %v387_v49, %v6941_v47 }
 0x148   :  { %v364_v13 = vpop.permute.xlu1 %363  ;;  %1298 = vmatpush1.msra.mxu0 %v412_v55  ;;  %1386 = vmatprep.subr.mxu1 %v415_v12  ;;  %v356_v56 = vpop.permute.xlu0 %355  ;;  %v85_v12 = vld [vmem:[%s10508_s1] sm:$0xf]  ;;  %s10553_s1 = smov 16  }
 0x149   :  { %v394_v14 = vsel %vm383_vm7, %v356_v56, %v364_v13  ;;  %1387 = vmatpush1.msra.mxu1 %v414_v0 }
 0x14a   :  { %v409_v15 = vmul.f32 %v394_v14, %v6929_v35 }
 0x14c   :  { %v380_v58 = vpop.permute.xlu1 %379  ;;  %1299 = vmatprep.subr.mxu0 %v409_v15  ;;  %v372_v5 = vpop.permute.xlu0 %371 }
 0x14d   :  { %v398_v60 = vsel %vm383_vm7, %v380_v58, %v356_v56  ;;  %v386_v17 = vsel %vm383_vm7, %v372_v5, %v380_v58  ;;  %v390_v22 = vsel %vm383_vm7, %v364_v13, %v372_v5 }
 0x14e   :  { %v408_v24 = vmul.f32 %v398_v60, %v6934_v10  ;;  %v410_v6 = vmul.f32 %v390_v22, %v6938_v46  ;;  %v411_v25 = vmul.f32 %v386_v17, %v6941_v47  ;;  %v6993_v22 = vrot.slane %v85_v12, %v6354_v18 }
 0x150   :  { %v362_v30 = vpop.permute.xlu1 %361  ;;  %1300 = vmatpush1.msra.mxu0 %v408_v24  ;;  %1388 = vmatprep.subr.mxu1 %v411_v25  ;;  %v354_v31 = vpop.permute.xlu0 %353  ;;  %10524 = vst [vmem:[#allocation20_spill] sm:$0xff] %v6993_v22 }
 0x151   :  { %v393_v32 = vsel %vm383_vm7, %v354_v31, %v362_v30  ;;  %1389 = vmatpush1.msra.mxu1 %v410_v6 }
 0x152   :  { %v405_v33 = vmul.f32 %v393_v32, %v6929_v35  ;;  %v7002_v32 = vrot.slane %v85_v12, %v6365_v23 }
 0x154   :  { %v378_v34 = vpop.permute.xlu1 %377  ;;  %1301 = vmatprep.subr.mxu0 %v405_v33  ;;  %v370_v8 = vpop.permute.xlu0 %369  ;;  %10526 = vst [vmem:[#allocation22_spill] sm:$0xff] %v7002_v32  ;;  %v7005_v33 = vrot.slane %v85_v12, %v6358_v20 }
 0x155   :  { %v397_v39 = vsel %vm383_vm7, %v378_v34, %v354_v31  ;;  %v385_v41 = vsel %vm383_vm7, %v370_v8, %v378_v34  ;;  %v389_v11 = vsel %vm383_vm7, %v362_v30, %v370_v8  ;;  %v6998_v30 = vrot.slane %v85_v12, %v6360_v21 }
 0x156   :  { %v404_v1 = vmul.f32 %v397_v39, %v6934_v10  ;;  %v406_v3 = vmul.f32 %v389_v11, %v6938_v46  ;;  %v407_v48 = vmul.f32 %v385_v41, %v6941_v47  ;;  %10527 = vst [vmem:[#allocation23_spill] sm:$0xff] %v7005_v33 }
 0x157   :  { %10525 = vst [vmem:[#allocation21_spill] sm:$0xff] %v6998_v30 }
 0x158   :  { %v360_v49 = vpop.permute.xlu1 %359  ;;  %1302 = vmatpush1.msra.mxu0 %v404_v1  ;;  %1390 = vmatprep.subr.mxu1 %v407_v48  ;;  %v352_v54 = vpop.permute.xlu0 %351 }
 0x159   :  { %v392_v55 = vsel %vm383_vm7, %v352_v54, %v360_v49  ;;  %1391 = vmatpush1.msra.mxu1 %v406_v3 }
 0x15a   :  { %v401_v0 = vmul.f32 %v392_v55, %v6929_v35 }
 0x15c   :  { %v376_v13 = vpop.permute.xlu1 %375  ;;  %1303 = vmatprep.subr.mxu0 %v401_v0  ;;  %v368_v56 = vpop.permute.xlu0 %367 }
 0x15d   :  { %v396_v14 = vsel %vm383_vm7, %v376_v13, %v352_v54  ;;  %v384_v15 = vsel %vm383_vm7, %v368_v56, %v376_v13  ;;  %v388_v58 = vsel %vm383_vm7, %v360_v49, %v368_v56 }
 0x15e   :  { %v400_v5 = vmul.f32 %v396_v14, %v6934_v10  ;;  %v402_v60 = vmul.f32 %v388_v58, %v6938_v46  ;;  %v403_v17 = vmul.f32 %v384_v15, %v6941_v47 }
 0x160   :  { %v283_v24 = vpop.permute.xlu1 %282  ;;  %1304 = vmatpush1.msra.mxu0 %v400_v5  ;;  %1392 = vmatprep.subr.mxu1 %v403_v17  ;;  %v275_v6 = vpop.permute.xlu0 %274 }
 0x161   :  { %v314_v25 = vsel %vm302_vm8, %v275_v6, %v283_v24  ;;  %1393 = vmatpush1.msra.mxu1 %v402_v60 }
 0x162   :  { %v332_v31 = vmul.f32 %v314_v25, %v6993_v22 }
 0x164   :  { %v299_v18 = vpop.permute.xlu1 %298  ;;  %1305 = vmatprep.subr.mxu0 %v332_v31  ;;  %v291_v34 = vpop.permute.xlu0 %290 }
 0x165   :  { %v318_v8 = vsel %vm302_vm8, %v299_v18, %v275_v6  ;;  %v306_v39 = vsel %vm302_vm8, %v291_v34, %v299_v18  ;;  %v310_v21 = vsel %vm302_vm8, %v283_v24, %v291_v34 }
 0x166   :  { %v331_v41 = vmul.f32 %v318_v8, %v6998_v30  ;;  %v333_v23 = vmul.f32 %v310_v21, %v7002_v32  ;;  %v334_v11 = vmul.f32 %v306_v39, %v7005_v33 }
 0x168   :  { %v281_v20 = vpop.permute.xlu1 %280  ;;  %1306 = vmatpush1.msra.mxu0 %v331_v41  ;;  %1394 = vmatprep.subr.mxu1 %v334_v11  ;;  %v273_v1 = vpop.permute.xlu0 %272 }
 0x169   :  { %v313_v3 = vsel %vm302_vm8, %v273_v1, %v281_v20  ;;  %1395 = vmatpush1.msra.mxu1 %v333_v23 }
 0x16a   :  { %v328_v48 = vmul.f32 %v313_v3, %v6993_v22 }
 0x16c   :  { %v297_v49 = vpop.permute.xlu1 %296  ;;  %1307 = vmatprep.subr.mxu0 %v328_v48  ;;  %v289_v54 = vpop.permute.xlu0 %288 }
 0x16d   :  { %v317_v55 = vsel %vm302_vm8, %v297_v49, %v273_v1  ;;  %v305_v0 = vsel %vm302_vm8, %v289_v54, %v297_v49  ;;  %v309_v12 = vsel %vm302_vm8, %v281_v20, %v289_v54 }
 0x16e   :  { %v327_v13 = vmul.f32 %v317_v55, %v6998_v30  ;;  %v329_v56 = vmul.f32 %v309_v12, %v7002_v32  ;;  %v330_v14 = vmul.f32 %v305_v0, %v7005_v33  ;;  %v5995_v0 = vld [vmem:[%s10507_s26 + $0x68] sm:$0xff]  ;;  %v5996_v12 = vld [vmem:[%s10507_s26 + $0x60] sm:$0xff] }
 0x170   :  { %v279_v15 = vpop.permute.xlu1 %278  ;;  %1308 = vmatpush1.msra.mxu0 %v327_v13  ;;  %1396 = vmatprep.subr.mxu1 %v330_v14  ;;  %v271_v58 = vpop.permute.xlu0 %270  ;;  %v5997_v13 = vld [vmem:[%s10507_s26 + $0x78] sm:$0xff]  ;;  %v5999_v14 = vld [vmem:[%s10507_s26 + $0x70] sm:$0xff] }
 0x171   :  { %v312_v5 = vsel %vm302_vm8, %v271_v58, %v279_v15  ;;  %1397 = vmatpush1.msra.mxu1 %v329_v56  ;;  %v5998_v56 = vld [vmem:[%s10507_s26 + $0x48] sm:$0xff] }
 0x172   :  { %v324_v60 = vmul.f32 %v312_v5, %v6993_v22  ;;  %v6002_v5 = vld [vmem:[%s10507_s26 + $0x28] sm:$0xff] }
 0x174   :  { %v295_v17 = vpop.permute.xlu1 %294  ;;  %1309 = vmatprep.subr.mxu0 %v324_v60  ;;  %v287_v24 = vpop.permute.xlu0 %286  ;;  %v6003_v60 = vld [vmem:[%s10507_s26 + $0x50] sm:$0xff] }
 0x175   :  { %v316_v6 = vsel %vm302_vm8, %v295_v17, %v271_v58  ;;  %v304_v25 = vsel %vm302_vm8, %v287_v24, %v295_v17  ;;  %v308_v31 = vsel %vm302_vm8, %v279_v15, %v287_v24  ;;  %v6000_v15 = vld [vmem:[%s10507_s26 + $0x40] sm:$0xff]  ;;  %v6001_v58 = vld [vmem:[%s10507_s26 + $0x58] sm:$0xff] }
 0x176   :  { %v323_v18 = vmul.f32 %v316_v6, %v6998_v30  ;;  %v325_v34 = vmul.f32 %v308_v31, %v7002_v32  ;;  %v326_v8 = vmul.f32 %v304_v25, %v7005_v33  ;;  %v6004_v17 = vld [vmem:[%s10507_s26 + $0x20] sm:$0xff]  ;;  %v6005_v24 = vld [vmem:[%s10507_s26 + $0x38] sm:$0xff]  ;;  %v6006_v25 = vld [vmem:[%s10507_s26 + $0x8] sm:$0xff] }
 0x177   :  { %v610_v6 = vld [vmem:[%s10514_s22] sm:$0xff]  ;;  %v6007_v31 = vld [vmem:[%s10507_s26 + $0x30] sm:$0xff] }
 0x178   :  { %v277_v39 = vpop.permute.xlu1 %276  ;;  %1310 = vmatpush1.msra.mxu0 %v323_v18  ;;  %1398 = vmatprep.subr.mxu1 %v326_v8  ;;  %v269_v21 = vpop.permute.xlu0 %268  ;;  %v613_v18 = vld [vmem:[%s10514_s22 + $0x18] sm:$0xff] }
 0x179   :  { %v311_v41 = vsel %vm302_vm8, %v269_v21, %v277_v39  ;;  %1399 = vmatpush1.msra.mxu1 %v325_v34  ;;  %v6008_v34 = vld [vmem:[%s10507_s26] sm:$0xff]  ;;  %v6009_v8 = vld [vmem:[%s10507_s26 + $0x18] sm:$0xff] }
 0x17a   :  { %v320_v23 = vmul.f32 %v311_v41, %v6993_v22  ;;  %v615_v41 = vld [vmem:[%s10514_s22 + $0x28] sm:$0xff] }
 0x17c   :  { %v293_v11 = vpop.permute.xlu1 %292  ;;  %1311 = vmatprep.subr.mxu0 %v320_v23  ;;  %v285_v20 = vpop.permute.xlu0 %284  ;;  %v614_v23 = vld [vmem:[%s10514_s22 + $0x20] sm:$0xff] }
 0x17d   :  { %v315_v1 = vsel %vm302_vm8, %v293_v11, %v269_v21  ;;  %v303_v3 = vsel %vm302_vm8, %v285_v20, %v293_v11  ;;  %v307_v48 = vsel %vm302_vm8, %v277_v39, %v285_v20  ;;  %v6010_v39 = vld [vmem:[%s10507_s26 + $0x10] sm:$0xff]  ;;  %v617_v11 = vld [vmem:[%s10514_s22 + $0x38] sm:$0xff] }
 0x17e   :  { %v319_v49 = vmul.f32 %v315_v1, %v6998_v30  ;;  %v321_v54 = vmul.f32 %v307_v48, %v7002_v32  ;;  %v322_v55 = vmul.f32 %v303_v3, %v7005_v33  ;;  %v612_v21 = vld [vmem:[%s10514_s22 + $0x10] sm:$0xff] }
 0x17f   :  { %v616_v20 = vld [vmem:[%s10514_s22 + $0x30] sm:$0xff]  ;;  %s10540_s22 = smov 113  }
 0x180   :  { %1312 = vmatpush1.msra.mxu0 %v319_v49  ;;  %1400 = vmatprep.subr.mxu1 %v322_v55 }
 0x181   :  { %1337 = vmatprep.subr.mxu0 %v5995_v0  ;;  %1401 = vmatpush1.msra.mxu1 %v321_v54 }
 0x182   :  { %1338 = vmatpush2.msra.mxu0 %v5996_v12  ;;  %1426 = vmatprep.subr.mxu1 %v5997_v13 }
 0x183   :  { %1339 = vmatprep.subr.mxu0 %v5998_v56  ;;  %1427 = vmatpush2.msra.mxu1 %v5999_v14 }
 0x184   :  { %1340 = vmatpush2.msra.mxu0 %v6000_v15  ;;  %1428 = vmatprep.subr.mxu1 %v6001_v58 }
 0x185   :  { %1341 = vmatprep.subr.mxu0 %v6002_v5  ;;  %1429 = vmatpush2.msra.mxu1 %v6003_v60 }
 0x186   :  { %1342 = vmatpush2.msra.mxu0 %v6004_v17  ;;  %1430 = vmatprep.subr.mxu1 %v6005_v24 }
 0x187   :  { %1343 = vmatprep.subr.mxu0 %v6006_v25  ;;  %1431 = vmatpush2.msra.mxu1 %v6007_v31 }
 0x188   :  { %1344 = vmatpush2.msra.mxu0 %v6008_v34  ;;  %1432 = vmatprep.subr.mxu1 %v6009_v8 }
 0x189   :  { %1346 = vmatmul.mubr.f32.vlgmr.msra.gmra.mxu0 %v610_v6  ;;  %1433 = vmatpush2.msra.mxu1 %v6010_v39  ;;  %v1476_v24 = vpop.permute.xlu1 %1475 }
 0x18a   :  { %1435 = vmatmul.mubr.f32.vlgmr.msra.gmra.mxu1 %v610_v6  ;;  %5684 = vmatprep.mubr.msk.f32.mxu0 %vm1268_vm5, %v613_v18 }
 0x18b   :  { %5688 = vmatprep.mubr.msk.f32.mxu1 %vm1268_vm5, %v613_v18 }
 0x18d   :  { %1352 = vmatmul.mubr.f32.gmra.mxu0 %v612_v21 }
 0x18e   :  { %1441 = vmatmul.mubr.f32.gmra.mxu1 %v612_v21  ;;  %5685 = vmatprep.mubr.msk.f32.mxu0 %vm1268_vm5, %v615_v41  ;;  %v1471_v21 = vpop.permute.xlu1 %1470 }
 0x18f   :  { %5689 = vmatprep.mubr.msk.f32.mxu1 %vm1268_vm5, %v615_v41 }
 0x191   :  { %1358 = vmatmul.mubr.f32.gmra.mxu0 %v614_v23 }
 0x192   :  { %1447 = vmatmul.mubr.f32.gmra.mxu1 %v614_v23  ;;  %5686 = vmatprep.mubr.msk.f32.mxu0 %vm1268_vm5, %v617_v11 }
 0x193   :  { %5690 = vmatprep.mubr.msk.f32.mxu1 %vm1268_vm5, %v617_v11 }
 0x195   :  { %1364 = vmatmul.mubr.f32.gmra.mxu0 %v616_v20 }
 0x196   :  { %1453 = vmatmul.mubr.f32.gmra.mxu1 %v616_v20  ;;  %2220 = vmatprep.mubr.f32.mxu0 %v10312_v40 }
 0x197   :  { %2309 = vmatprep.mubr.f32.mxu1 %v10312_v40 }
 0x1c3   :  { %v7129_v1 = vpop.f32.mrf.mxu1  ;;  %v7131_v3 = vpop.f32.mrf.mxu0 }
 0x1c4   :  { %10528 = vst [vmem:[#allocation24_spill] sm:$0xff] %v7129_v1  ;;  %10529 = vst [vmem:[#allocation25_spill] sm:$0xff] %v7131_v3 }
 0x1c5   :  { %v7133_v48 = vpop.f32.mrf.mxu1  ;;  %v7135_v49 = vpop.f32.mrf.mxu0 }
 0x1c6   :  { %10530 = vst [vmem:[#allocation26_spill] sm:$0xff] %v7133_v48  ;;  %10531 = vst [vmem:[#allocation27_spill] sm:$0xff] %v7135_v49 }
 0x1c7   :  { %v1251_v54 = vpop.f32.mrf.mxu1  ;;  %v1162_v55 = vpop.f32.mrf.mxu0 }
 0x1c9   :  { %v1253_v0 = vpop.f32.mrf.mxu1  ;;  %v1164_v12 = vpop.f32.mrf.mxu0 }
 0x1cb   :  { %v1168_v56 = vpop.f32.mrf.mxu0 }
 0x1cd   :  { %v1257_v13 = vpop.f32.mrf.mxu1  ;;  %v1170_v15 = vpop.f32.mrf.mxu0 }
 0x1cf   :  { %v1259_v14 = vpop.f32.mrf.mxu1  ;;  %v7139_v5 = vpop.f32.mrf.mxu0 }
 0x1d1   :  { %v7143_v17 = vpop.f32.mrf.mxu0 }
 0x1d2   :  { %v7137_v58 = vpop.f32.mrf.mxu1 }
 0x1d4   :  { %v7141_v60 = vpop.f32.mrf.mxu1 }
 0x249   :  { %v7145_v6 = vpop.f32.mrf.mxu0 }
 0x24a   :  { %10532 = vst [vmem:[#allocation28_spill] sm:$0xff] %v7145_v6  ;;  %v7147_v25 = vpop.f32.mrf.mxu1 }
 0x24b   :  { %10533 = vst [vmem:[#allocation29_spill] sm:$0xff] %v7147_v25  ;;  %v7149_v31 = vpop.f32.mrf.mxu0 }
 0x24c   :  { %10534 = vst [vmem:[#allocation30_spill] sm:$0xff] %v7149_v31  ;;  %v7151_v18 = vpop.f32.mrf.mxu1 }
 0x24d   :  { %10535 = vst [vmem:[#allocation31_spill] sm:$0xff] %v7151_v18  ;;  %v1353_v34 = vpop.f32.mrf.mxu0 }
 0x24e   :  { %v1354_v8 = vadd.f32 %v1353_v34, %v1162_v55  ;;  %v1442_v39 = vpop.f32.mrf.mxu1 }
 0x24f   :  { %v1443_v41 = vadd.f32 %v1442_v39, %v1251_v54  ;;  %v1355_v23 = vpop.f32.mrf.mxu0 }
 0x250   :  { %v1487_v11 = vadd.f32 %v1471_v21, %v1354_v8  ;;  %v1356_v20 = vadd.f32 %v1355_v23, %v1164_v12  ;;  %v1444_v36 = vpop.f32.mrf.mxu1 }
 0x251   :  { %v1489_v40 = vadd.f32 %v1471_v21, %v1443_v41  ;;  %v1445_v1 = vadd.f32 %v1444_v36, %v1253_v0 }
 0x252   :  { %v1503_v3 = vmul.f32 0.05, %v1487_v11  ;;  %v1488_v48 = vadd.f32 %v1471_v21, %v1356_v20  ;;  %v1448_v36 = vpop.f32.mrf.mxu1 }
 0x253   :  { %v1490_v6 = vadd.f32 %v1471_v21, %v1445_v1  ;;  %v1505_v25 = vmul.f32 0.05, %v1489_v40 }
 0x254   :  { %v7153_v49 = vmax.f32 %v1487_v11, %v1503_v3  ;;  %v1504_v31 = vmul.f32 0.05, %v1488_v48  ;;  %v1450_v0 = vpop.f32.mrf.mxu1 }
 0x255   :  { %v1506_v18 = vmul.f32 0.05, %v1490_v6  ;;  %v7159_v54 = vmax.f32 %v1489_v40, %v1505_v25  ;;  %v1359_v40 = vpop.f32.mrf.mxu0 }
 0x256   :  { %10536 = vst [vmem:[#allocation32_spill] sm:$0xff] %v7153_v49  ;;  %v7155_v32 = vmax.f32 %v1488_v48, %v1504_v31  ;;  %2031 = vrot.lane.b32.xlu0 %v7153_v49, %s6033_s28  ;;  %v1360_v3 = vadd.f32 %v1359_v40, %v1168_v56  ;;  %v1451_v31 = vadd.f32 %v1450_v0, %v1259_v14  ;;  %v1454_v23 = vpop.f32.mrf.mxu1  ;;  %v1481_v40 = vpop.permute.xlu0 %1480 }
 0x257   :  { %10538 = vst [vmem:[#allocation34_spill] sm:$0xff] %v7159_v54  ;;  %v7163_v55 = vmax.f32 %v1490_v6, %v1506_v18  ;;  %v1361_v1 = vpop.f32.mrf.mxu0  ;;  %v1449_v6 = vadd.f32 %v1448_v36, %v1257_v13 }
 0x258   :  { %10537 = vst [vmem:[#allocation33_spill] sm:$0xff] %v7155_v32  ;;  %2037 = vrot.lane.b32.xlu1 %v7155_v32, %s6033_s28  ;;  %v1362_v48 = vadd.f32 %v1361_v1, %v1170_v15  ;;  %v1491_v12 = vadd.f32 %v1476_v24, %v1360_v3  ;;  %v1494_v34 = vadd.f32 %v1476_v24, %v1451_v31  ;;  %v1456_v1 = vpop.f32.mrf.mxu1 }
 0x259   :  { %10539 = vst [vmem:[#allocation35_spill] sm:$0xff] %v7163_v55  ;;  %v1493_v56 = vadd.f32 %v1476_v24, %v1449_v6  ;;  %v1365_v41 = vpop.f32.mrf.mxu0  ;;  %v1455_v3 = vadd.f32 %v1454_v23, %v7137_v58 }
 0x25a   :  { %2043 = vrot.lane.b32.xlu0 %v7159_v54, %s6033_s28  ;;  %v1492_v25 = vadd.f32 %v1476_v24, %v1362_v48  ;;  %v1507_v18 = vmul.f32 0.05, %v1491_v12  ;;  %v1510_v39 = vmul.f32 0.05, %v1494_v34  ;;  %v1366_v20 = vadd.f32 %v1365_v41, %v7139_v5 }
 0x25b   :  { %v1509_v13 = vmul.f32 0.05, %v1493_v56  ;;  %v1367_v11 = vpop.f32.mrf.mxu0  ;;  %v1497_v5 = vadd.f32 %v1481_v40, %v1455_v3 }
 0x25c   :  { %2049 = vrot.lane.b32.xlu1 %v7163_v55, %s6033_s28  ;;  %v1508_v15 = vmul.f32 0.05, %v1492_v25  ;;  %v7207_v8 = vmax.f32 %v1491_v12, %v1507_v18  ;;  %v7219_v24 = vmax.f32 %v1494_v34, %v1510_v39  ;;  %v1368_v36 = vadd.f32 %v1367_v11, %v7143_v17 }
 0x25d   :  { %v7215_v21 = vmax.f32 %v1493_v56, %v1509_v13  ;;  %v1495_v48 = vadd.f32 %v1481_v40, %v1366_v20  ;;  %v1457_v12 = vadd.f32 %v1456_v1, %v7141_v60  ;;  %v1513_v58 = vmul.f32 0.05, %v1497_v5 }
 0x25e   :  { %1971 = vrot.lane.b32.xlu0 %v7153_v49, %s10350_s4  ;;  %10544 = vst [vmem:[#allocation36_spill] sm:$0xff] %v7207_v8  ;;  %v7211_v14 = vmax.f32 %v1492_v25, %v1508_v15  ;;  %10547 = vst [vmem:[#allocation39_spill] sm:$0xff] %v7219_v24  ;;  %v1496_v0 = vadd.f32 %v1481_v40, %v1368_v36 }
 0x25f   :  { %10546 = vst [vmem:[#allocation38_spill] sm:$0xff] %v7215_v21  ;;  %v1511_v6 = vmul.f32 0.05, %v1495_v48  ;;  %v1498_v25 = vadd.f32 %v1481_v40, %v1457_v12  ;;  %v7275_v56 = vmax.f32 %v1497_v5, %v1513_v58 }
 0x260   :  { %1977 = vrot.lane.b32.xlu1 %v7155_v32, %s10350_s4  ;;  %10545 = vst [vmem:[#allocation37_spill] sm:$0xff] %v7211_v14  ;;  %v1512_v17 = vmul.f32 0.05, %v1496_v0 }
 0x261   :  { %v7267_v31 = vmax.f32 %v1495_v48, %v1511_v6  ;;  %v1514_v18 = vmul.f32 0.05, %v1498_v25  ;;  %10550 = vst [vmem:[#allocation42_spill] sm:$0xff] %v7275_v56 }
 0x262   :  { %1983 = vrot.lane.b32.xlu0 %v7159_v54, %s10350_s4  ;;  %v7271_v60 = vmax.f32 %v1496_v0, %v1512_v17 }
 0x263   :  { %10548 = vst [vmem:[#allocation40_spill] sm:$0xff] %v7267_v31  ;;  %v7279_v15 = vmax.f32 %v1498_v25, %v1514_v18 }
 0x264   :  { %1989 = vrot.lane.b32.xlu1 %v7163_v55, %s10350_s4  ;;  %10549 = vst [vmem:[#allocation41_spill] sm:$0xff] %v7271_v60 }
 0x265   :  { %10551 = vst [vmem:[#allocation43_spill] sm:$0xff] %v7279_v15 }
 0x266   :  { %1911 = vrot.lane.b32.xlu0 %v7153_v49, %s10540_s22 }
 0x268   :  { %1917 = vrot.lane.b32.xlu1 %v7155_v32, %s10540_s22 }
 0x26a   :  { %1923 = vrot.lane.b32.xlu0 %v7159_v54, %s10540_s22 }
 0x26c   :  { %1929 = vrot.lane.b32.xlu1 %v7163_v55, %s10540_s22 }
 0x26e   :  { %1851 = vrot.lane.b32.xlu0 %v7153_v49, %s10541_s24 }
 0x270   :  { %1857 = vrot.lane.b32.xlu1 %v7155_v32, %s10541_s24 }
 0x272   :  { %1863 = vrot.lane.b32.xlu0 %v7159_v54, %s10541_s24 }
 0x274   :  { %1869 = vrot.lane.b32.xlu1 %v7163_v55, %s10541_s24 }
 0x276   :  { %1715 = vrot.lane.b32.xlu0 %v7153_v49, %s10542_s23 }
 0x278   :  { %1721 = vrot.lane.b32.xlu1 %v7155_v32, %s10542_s23 }
 0x27a   :  { %1727 = vrot.lane.b32.xlu0 %v7159_v54, %s10542_s23 }
 0x27c   :  { %1733 = vrot.lane.b32.xlu1 %v7163_v55, %s10542_s23 }
 0x27e   :  { %1655 = vrot.lane.b32.xlu0 %v7153_v49, %s10543_s5 }
 0x280   :  { %1661 = vrot.lane.b32.xlu1 %v7155_v32, %s10543_s5 }
 0x282   :  { %1667 = vrot.lane.b32.xlu0 %v7159_v54, %s10543_s5 }
 0x284   :  { %1673 = vrot.lane.b32.xlu1 %v7163_v55, %s10543_s5 }
 0x286   :  { %2033 = vrot.lane.b32.xlu0 %v7207_v8, %s6033_s28 }
 0x288   :  { %2039 = vrot.lane.b32.xlu1 %v7211_v14, %s6033_s28 }
 0x28a   :  { %2045 = vrot.lane.b32.xlu0 %v7215_v21, %s6033_s28 }
 0x28c   :  { %2051 = vrot.lane.b32.xlu1 %v7219_v24, %s6033_s28 }
 0x28e   :  { %1973 = vrot.lane.b32.xlu0 %v7207_v8, %s10350_s4 }
 0x290   :  { %1979 = vrot.lane.b32.xlu1 %v7211_v14, %s10350_s4 }
 0x292   :  { %1985 = vrot.lane.b32.xlu0 %v7215_v21, %s10350_s4 }
 0x294   :  { %1991 = vrot.lane.b32.xlu1 %v7219_v24, %s10350_s4 }
 0x296   :  { %1913 = vrot.lane.b32.xlu0 %v7207_v8, %s10540_s22 }
 0x298   :  { %1919 = vrot.lane.b32.xlu1 %v7211_v14, %s10540_s22 }
 0x29a   :  { %1925 = vrot.lane.b32.xlu0 %v7215_v21, %s10540_s22 }
 0x29c   :  { %1931 = vrot.lane.b32.xlu1 %v7219_v24, %s10540_s22 }
 0x29e   :  { %1853 = vrot.lane.b32.xlu0 %v7207_v8, %s10541_s24 }
 0x2a0   :  { %1859 = vrot.lane.b32.xlu1 %v7211_v14, %s10541_s24 }
 0x2a2   :  { %1865 = vrot.lane.b32.xlu0 %v7215_v21, %s10541_s24 }
 0x2a4   :  { %1871 = vrot.lane.b32.xlu1 %v7219_v24, %s10541_s24 }
 0x2a6   :  { %1717 = vrot.lane.b32.xlu0 %v7207_v8, %s10542_s23 }
 0x2a8   :  { %1723 = vrot.lane.b32.xlu1 %v7211_v14, %s10542_s23 }
 0x2aa   :  { %1729 = vrot.lane.b32.xlu0 %v7215_v21, %s10542_s23 }
 0x2ac   :  { %1735 = vrot.lane.b32.xlu1 %v7219_v24, %s10542_s23 }
 0x2ae   :  { %1657 = vrot.lane.b32.xlu0 %v7207_v8, %s10543_s5 }
 0x2b0   :  { %1663 = vrot.lane.b32.xlu1 %v7211_v14, %s10543_s5 }
 0x2b2   :  { %1669 = vrot.lane.b32.xlu0 %v7215_v21, %s10543_s5 }
 0x2b4   :  { %1675 = vrot.lane.b32.xlu1 %v7219_v24, %s10543_s5 }
 0x2b6   :  { %2035 = vrot.lane.b32.xlu0 %v7267_v31, %s6033_s28 }
 0x2b8   :  { %2041 = vrot.lane.b32.xlu1 %v7271_v60, %s6033_s28 }
 0x2ba   :  { %2047 = vrot.lane.b32.xlu0 %v7275_v56, %s6033_s28 }
 0x2bc   :  { %2053 = vrot.lane.b32.xlu1 %v7279_v15, %s6033_s28 }
 0x2be   :  { %1975 = vrot.lane.b32.xlu0 %v7267_v31, %s10350_s4 }
 0x2c0   :  { %1981 = vrot.lane.b32.xlu1 %v7271_v60, %s10350_s4 }
 0x2c2   :  { %1987 = vrot.lane.b32.xlu0 %v7275_v56, %s10350_s4 }
 0x2c4   :  { %1993 = vrot.lane.b32.xlu1 %v7279_v15, %s10350_s4 }
 0x2c6   :  { %1915 = vrot.lane.b32.xlu0 %v7267_v31, %s10540_s22 }
 0x2c8   :  { %1921 = vrot.lane.b32.xlu1 %v7271_v60, %s10540_s22  ;;  %v7297_v34 = vpop.permute.xlu0 %2031 }
 0x2ca   :  { %v7299_v13 = vpop.permute.xlu1 %2037  ;;  %1927 = vrot.lane.b32.xlu0 %v7275_v56, %s10540_s22 }
 0x2cc   :  { %1933 = vrot.lane.b32.xlu1 %v7279_v15, %s10540_s22  ;;  %v7305_v39 = vpop.permute.xlu0 %2043 }
 0x2ce   :  { %v7307_v41 = vpop.permute.xlu1 %2049  ;;  %1855 = vrot.lane.b32.xlu0 %v7267_v31, %s10541_s24 }
 0x2d0   :  { %1861 = vrot.lane.b32.xlu1 %v7271_v60, %s10541_s24  ;;  %v7313_v23 = vpop.permute.xlu0 %1971 }
 0x2d2   :  { %v7315_v11 = vpop.permute.xlu1 %1977  ;;  %1867 = vrot.lane.b32.xlu0 %v7275_v56, %s10541_s24 }
 0x2d4   :  { %1873 = vrot.lane.b32.xlu1 %v7279_v15, %s10541_s24  ;;  %v7321_v20 = vpop.permute.xlu0 %1983 }
 0x2d6   :  { %v7323_v40 = vpop.permute.xlu1 %1989  ;;  %1719 = vrot.lane.b32.xlu0 %v7267_v31, %s10542_s23 }
 0x2d8   :  { %1725 = vrot.lane.b32.xlu1 %v7271_v60, %s10542_s23  ;;  %v7329_v36 = vpop.permute.xlu0 %1911 }
 0x2da   :  { %v7331_v1 = vpop.permute.xlu1 %1917  ;;  %1731 = vrot.lane.b32.xlu0 %v7275_v56, %s10542_s23 }
 0x2dc   :  { %1737 = vrot.lane.b32.xlu1 %v7279_v15, %s10542_s23  ;;  %v7337_v3 = vpop.permute.xlu0 %1923 }
 0x2de   :  { %v7339_v48 = vpop.permute.xlu1 %1929  ;;  %1659 = vrot.lane.b32.xlu0 %v7267_v31, %s10543_s5 }
 0x2e0   :  { %1665 = vrot.lane.b32.xlu1 %v7271_v60, %s10543_s5  ;;  %v7345_v0 = vpop.permute.xlu0 %1851 }
 0x2e2   :  { %v7347_v12 = vpop.permute.xlu1 %1857  ;;  %1671 = vrot.lane.b32.xlu0 %v7275_v56, %s10543_s5 }
 0x2e4   :  { %1677 = vrot.lane.b32.xlu1 %v7279_v15, %s10543_s5  ;;  %v7353_v5 = vpop.permute.xlu0 %1863 }
 0x2e6   :  { %v7355_v6 = vpop.permute.xlu1 %1869  ;;  %1599 = vrot.lane.b32.xlu0 %v7267_v31, %s10553_s1 }
 0x2e7   :  { %10552 = vst [vmem:[#allocation44_spill] sm:$0xff] %v7355_v6 }
 0x2e8   :  { %1605 = vrot.lane.b32.xlu1 %v7271_v60, %s10553_s1  ;;  %v7361_v17 = vpop.permute.xlu0 %1715 }
 0x2e9   :  { %10554 = vst [vmem:[#allocation45_spill] sm:$0xff] %v7361_v17 }
 0x2ea   :  { %v7363_v25 = vpop.permute.xlu1 %1721  ;;  %1611 = vrot.lane.b32.xlu0 %v7275_v56, %s10553_s1 }
 0x2eb   :  { %10555 = vst [vmem:[#allocation46_spill] sm:$0xff] %v7363_v25 }
 0x2ec   :  { %1617 = vrot.lane.b32.xlu1 %v7279_v15, %s10553_s1  ;;  %v7369_v58 = vpop.permute.xlu0 %1727 }
 0x2ed   :  { %10556 = vst [vmem:[#allocation47_spill] sm:$0xff] %v7369_v58 }
 0x2ee   :  { %v7371_v18 = vpop.permute.xlu1 %1733  ;;  %1597 = vrot.lane.b32.xlu0 %v7207_v8, %s10553_s1 }
 0x2ef   :  { %10557 = vst [vmem:[#allocation48_spill] sm:$0xff] %v7371_v18 }
 0x2f0   :  { %1603 = vrot.lane.b32.xlu1 %v7211_v14, %s10553_s1  ;;  %v7377_v33 = vpop.permute.xlu0 %1655 }
 0x2f1   :  { %10558 = vst [vmem:[#allocation49_spill] sm:$0xff] %v7377_v33 }
 0x2f2   :  { %v7379_v30 = vpop.permute.xlu1 %1661  ;;  %1609 = vrot.lane.b32.xlu0 %v7215_v21, %s10553_s1 }
 0x2f3   :  { %10559 = vst [vmem:[#allocation50_spill] sm:$0xff] %v7379_v30 }
 0x2f4   :  { %1615 = vrot.lane.b32.xlu1 %v7219_v24, %s10553_s1  ;;  %v7385_v22 = vpop.permute.xlu0 %1667 }
 0x2f5   :  { %10560 = vst [vmem:[#allocation51_spill] sm:$0xff] %v7385_v22 }
 0x2f6   :  { %v7387_v46 = vpop.permute.xlu1 %1673  ;;  %1595 = vrot.lane.b32.xlu0 %v7153_v49, %s10553_s1 }
 0x2f7   :  { %10561 = vst [vmem:[#allocation52_spill] sm:$0xff] %v7387_v46 }
 0x2f8   :  { %1601 = vrot.lane.b32.xlu1 %v7155_v32, %s10553_s1  ;;  %v2034_v47 = vpop.permute.xlu0 %2033 }
 0x2fa   :  { %v2040_v10 = vpop.permute.xlu1 %2039  ;;  %1607 = vrot.lane.b32.xlu0 %v7159_v54, %s10553_s1 }
 0x2fc   :  { %1613 = vrot.lane.b32.xlu1 %v7163_v55, %s10553_s1  ;;  %v2046_v35 = vpop.permute.xlu0 %2045 }
 0x2fe   :  { %v2052_v59 = vpop.permute.xlu1 %2051  ;;  %1539 = vrot.lane.b32.xlu0 %v7267_v31, %s10562_s30 }
 0x300   :  { %1545 = vrot.lane.b32.xlu1 %v7271_v60, %s10562_s30  ;;  %v7401_v4 = vpop.permute.xlu0 %1973 }
 0x302   :  { %v7403_v2 = vpop.permute.xlu1 %1979  ;;  %1551 = vrot.lane.b32.xlu0 %v7275_v56, %s10562_s30 }
 0x304   :  { %1557 = vrot.lane.b32.xlu1 %v7279_v15, %s10562_s30  ;;  %v7409_v57 = vpop.permute.xlu0 %1985 }
 0x306   :  { %v7411_v22 = vpop.permute.xlu1 %1991  ;;  %1537 = vrot.lane.b32.xlu0 %v7207_v8, %s10562_s30 }
 0x308   :  { %1543 = vrot.lane.b32.xlu1 %v7211_v14, %s10562_s30  ;;  %v7417_v46 = vpop.permute.xlu0 %1913 }
 0x30a   :  { %v7419_v33 = vpop.permute.xlu1 %1919  ;;  %1549 = vrot.lane.b32.xlu0 %v7215_v21, %s10562_s30  ;;  %v2528_v21 = vld [vmem:[%s10278_s8 + $0x18] sm:$0xff] }
 0x30c   :  { %1555 = vrot.lane.b32.xlu1 %v7219_v24, %s10562_s30  ;;  %v7425_v56 = vpop.permute.xlu0 %1925 }
 0x30e   :  { %v7427_v30 = vpop.permute.xlu1 %1931  ;;  %1535 = vrot.lane.b32.xlu0 %v7153_v49, %s10562_s30  ;;  %v2527_v49 = vld [vmem:[%s10278_s8 + $0x10] sm:$0xff] }
 0x310   :  { %1541 = vrot.lane.b32.xlu1 %v7155_v32, %s10562_s30  ;;  %v7433_v8 = vpop.permute.xlu0 %1853 }
 0x312   :  { %v7435_v38 = vpop.permute.xlu1 %1859  ;;  %1547 = vrot.lane.b32.xlu0 %v7159_v54, %s10562_s30  ;;  %v2526_v54 = vld [vmem:[%s10278_s8 + $0x8] sm:$0xff] }
 0x314   :  { %1553 = vrot.lane.b32.xlu1 %v7163_v55, %s10562_s30  ;;  %v7444_v24 = vpop.permute.xlu0 %1865 }
 0x316   :  { %v7449_v32 = vpop.permute.xlu1 %1871  ;;  %2546 = vperm.xlu0 %5961, %v2528_v21  }
 0x318   :  { %2541 = vperm.xlu1 %5962, %v2527_v49   ;;  %v7454_v14 = vpop.permute.xlu0 %1717 }
 0x319   :  { %10563 = vst [vmem:[#allocation53_spill] sm:$0xff] %v7454_v14 }
 0x31a   :  { %v7456_v9 = vpop.permute.xlu1 %1723  ;;  %2536 = vperm.xlu0 %5961, %v2526_v54   ;;  %v2059_v54 = vsel %vm973_vm0, %v2040_v10, %v2046_v35 }
 0x31b   :  { %10564 = vst [vmem:[#allocation54_spill] sm:$0xff] %v7456_v9  ;;  %v2065_v9 = vsel %vm973_vm0, %v2052_v59, %v2034_v47 }
 0x31c   :  { %v7458_v55 = vpop.permute.xlu0 %1729 }
 0x31d   :  { %10565 = vst [vmem:[#allocation55_spill] sm:$0xff] %v7458_v55 }
 0x31e   :  { %v7460_v7 = vpop.permute.xlu1 %1735 }
 0x31f   :  { %10566 = vst [vmem:[#allocation56_spill] sm:$0xff] %v7460_v7 }
 0x320   :  { %v7462_v15 = vpop.permute.xlu0 %1657 }
 0x321   :  { %10567 = vst [vmem:[#allocation57_spill] sm:$0xff] %v7462_v15  ;;  %v2061_v15 = vsel %vm973_vm0, %v7297_v34, %v7299_v13 }
 0x322   :  { %v7464_v31 = vpop.permute.xlu1 %1663 }
 0x323   :  { %10568 = vst [vmem:[#allocation58_spill] sm:$0xff] %v7464_v31 }
 0x324   :  { %v7466_v37 = vpop.permute.xlu0 %1669 }
 0x325   :  { %10569 = vst [vmem:[#allocation59_spill] sm:$0xff] %v7466_v37  ;;  %v2058_v37 = vsel %vm973_vm0, %v7299_v13, %v7305_v39  ;;  %v2056_v13 = vsel %vm973_vm0, %v2046_v35, %v2052_v59  ;;  %v2055_v59 = vsel %vm973_vm0, %v7305_v39, %v7307_v41 }
 0x326   :  { %v7468_v21 = vpop.permute.xlu1 %1675 }
 0x327   :  { %10570 = vst [vmem:[#allocation60_spill] sm:$0xff] %v7468_v21  ;;  %v2062_v21 = vsel %vm973_vm0, %v2034_v47, %v2040_v10  ;;  %v2064_v47 = vsel %vm973_vm0, %v7307_v41, %v7297_v34  ;;  %v2069_v41 = vmul.f32 %v2055_v59, %v6382_v29  ;;  %v2004_v59 = vsel %vm892_vm1, %v7323_v40, %v7313_v23 }
 0x328   :  { %v2036_v60 = vpop.permute.xlu0 %2035  ;;  %v2070_v39 = vmul.f32 %v2064_v47, %v6376_v27 }
 0x32a   :  { %v2042_v18 = vpop.permute.xlu1 %2041 }
 0x32b   :  { %v2063_v49 = vsel %vm973_vm0, %v2036_v60, %v2042_v18 }
 0x32c   :  { %v2048_v14 = vpop.permute.xlu0 %2047 }
 0x32d   :  { %v2060_v55 = vsel %vm973_vm0, %v2042_v18, %v2048_v14  ;;  %v2075_v18 = vmul.f32 %v2063_v49, %v6379_v28 }
 0x32e   :  { %v2054_v31 = vpop.permute.xlu1 %2053  ;;  %v2076_v7 = vmul.f32 %v2060_v55, %v6372_v26  ;;  %v2072_v55 = vmul.f32 %v2059_v54, %v6372_v26  ;;  %v2005_v54 = vsel %vm892_vm1, %v7411_v22, %v7401_v4 }
 0x32f   :  { %v2057_v58 = vsel %vm973_vm0, %v2048_v14, %v2054_v31  ;;  %v2066_v17 = vsel %vm973_vm0, %v2054_v31, %v2036_v60  ;;  %v2071_v14 = vmul.f32 %v2062_v21, %v6379_v28  ;;  %v2074_v31 = vmul.f32 %v2065_v9, %v6376_v27 }
 0x330   :  { %v2077_v25 = vmul.f32 %v2057_v58, %v6382_v29  ;;  %2164 = vmatprep.subr.mxu0 %v2076_v7  ;;  %v1976_v10 = vpop.permute.xlu0 %1975  ;;  %v2078_v6 = vmul.f32 %v2066_v17, %v6376_v27  ;;  %v2068_v7 = vmul.f32 %v2058_v37, %v6372_v26  ;;  %v2067_v60 = vmul.f32 %v2061_v15, %v6379_v28 }
 0x331   :  { %2165 = vmatpush1.msra.mxu0 %v2075_v18  ;;  %v2073_v17 = vmul.f32 %v2056_v13, %v6382_v29  ;;  %v1999_v9 = vsel %vm892_vm1, %v7403_v2, %v7409_v57  ;;  %v2001_v15 = vsel %vm892_vm1, %v7313_v23, %v7315_v11 }
 0x332   :  { %v1982_v35 = vpop.permute.xlu1 %1981  ;;  %2166 = vmatprep.subr.mxu0 %v2072_v55  ;;  %2253 = vmatprep.subr.mxu1 %v2078_v6  ;;  %v1998_v6 = vsel %vm892_vm1, %v7315_v11, %v7321_v20 }
 0x333   :  { %2167 = vmatpush1.msra.mxu0 %v2071_v14  ;;  %2254 = vmatpush1.msra.mxu1 %v2077_v25  ;;  %v2003_v34 = vsel %vm892_vm1, %v1976_v10, %v1982_v35  ;;  %v2002_v25 = vsel %vm892_vm1, %v7401_v4, %v7403_v2  ;;  %v1996_v2 = vsel %vm892_vm1, %v7409_v57, %v7411_v22 }
 0x334   :  { %2168 = vmatprep.subr.mxu0 %v2068_v7  ;;  %2255 = vmatprep.subr.mxu1 %v2074_v31  ;;  %v1988_v58 = vpop.permute.xlu0 %1987  ;;  %v2015_v18 = vmul.f32 %v2003_v34, %v6480_v45  ;;  %v2012_v4 = vmul.f32 %v1999_v9, %v6471_v42  ;;  %v1995_v57 = vsel %vm892_vm1, %v7321_v20, %v7323_v40 }
 0x335   :  { %v2000_v37 = vsel %vm892_vm1, %v1982_v35, %v1988_v58  ;;  %2169 = vmatpush1.msra.mxu0 %v2067_v60  ;;  %2256 = vmatpush1.msra.mxu1 %v2073_v17  ;;  %v2008_v35 = vmul.f32 %v1998_v6, %v6471_v42  ;;  %v2014_v7 = vmul.f32 %v2005_v54, %v6474_v43 }
 0x336   :  { %v1994_v21 = vpop.permute.xlu1 %1993  ;;  %2257 = vmatprep.subr.mxu1 %v2070_v39  ;;  %v2016_v49 = vmul.f32 %v2000_v37, %v6471_v42  ;;  %v2007_v31 = vmul.f32 %v2001_v15, %v6480_v45  ;;  %v2013_v60 = vmul.f32 %v1996_v2, %v6477_v44  ;;  %v2010_v20 = vmul.f32 %v2004_v59, %v6474_v43 }
 0x337   :  { %v1997_v13 = vsel %vm892_vm1, %v1988_v58, %v1994_v21  ;;  %v2006_v11 = vsel %vm892_vm1, %v1994_v21, %v1976_v10  ;;  %2258 = vmatpush1.msra.mxu1 %v2069_v41  ;;  %v2011_v10 = vmul.f32 %v2002_v25, %v6480_v45  ;;  %v2009_v40 = vmul.f32 %v1995_v57, %v6477_v44 }
 0x338   :  { %v2017_v55 = vmul.f32 %v1997_v13, %v6477_v44  ;;  %2170 = vmatprep.subr.mxu0 %v2016_v49  ;;  %v1916_v47 = vpop.permute.xlu0 %1915  ;;  %v2018_v14 = vmul.f32 %v2006_v11, %v6474_v43  ;;  %v1939_v34 = vsel %vm811_vm2, %v7419_v33, %v7425_v56  ;;  %v1941_v39 = vsel %vm811_vm2, %v7329_v36, %v7331_v1 }
 0x339   :  { %2171 = vmatpush1.msra.mxu0 %v2015_v18  ;;  %v1938_v41 = vsel %vm811_vm2, %v7331_v1, %v7337_v3  ;;  %v1942_v9 = vsel %vm811_vm2, %v7417_v46, %v7419_v33  ;;  %v1945_v6 = vsel %vm811_vm2, %v7427_v30, %v7417_v46  ;;  %v1936_v33 = vsel %vm811_vm2, %v7425_v56, %v7427_v30 }
 0x33a   :  { %v1922_v22 = vpop.permute.xlu1 %1921  ;;  %2172 = vmatprep.subr.mxu0 %v2012_v4  ;;  %2259 = vmatprep.subr.mxu1 %v2018_v14  ;;  %v1952_v46 = vmul.f32 %v1939_v34, %v6567_v61  ;;  %v1944_v13 = vsel %vm811_vm2, %v7339_v48, %v7329_v36  ;;  %v1951_v11 = vmul.f32 %v1942_v9, %v6576_v16 }
 0x33b   :  { %2173 = vmatpush1.msra.mxu0 %v2011_v10  ;;  %2260 = vmatpush1.msra.mxu1 %v2017_v55  ;;  %v1943_v23 = vsel %vm811_vm2, %v1916_v47, %v1922_v22  ;;  %v1935_v30 = vsel %vm811_vm2, %v7337_v3, %v7339_v48  ;;  %v1948_v2 = vmul.f32 %v1938_v41, %v6567_v61 }
 0x33c   :  { %2174 = vmatprep.subr.mxu0 %v2008_v35  ;;  %2261 = vmatprep.subr.mxu1 %v2014_v7  ;;  %v1928_v17 = vpop.permute.xlu0 %1927  ;;  %v1955_v25 = vmul.f32 %v1943_v23, %v6576_v16  ;;  %v1954_v55 = vmul.f32 %v1945_v6, %v6570_v62  ;;  %v1953_v4 = vmul.f32 %v1936_v33, %v6573_v63  ;;  %v10573_v33 = vld [vmem:[#allocation45_spill] sm:$0xff] }
 0x33d   :  { %v1940_v58 = vsel %vm811_vm2, %v1922_v22, %v1928_v17  ;;  %2175 = vmatpush1.msra.mxu0 %v2007_v31  ;;  %2262 = vmatpush1.msra.mxu1 %v2013_v60  ;;  %v1950_v3 = vmul.f32 %v1944_v13, %v6570_v62  ;;  %v1949_v48 = vmul.f32 %v1935_v30, %v6573_v63 }
 0x33e   :  { %v1934_v37 = vpop.permute.xlu1 %1933  ;;  %2263 = vmatprep.subr.mxu1 %v2010_v20  ;;  %v1956_v15 = vmul.f32 %v1940_v58, %v6567_v61  ;;  %v1879_v59 = vsel %vm730_vm3, %v7435_v38, %v7444_v24  ;;  %v1881_v57 = vsel %vm730_vm3, %v7345_v0, %v7347_v12  ;;  %v1878_v22 = vsel %vm730_vm3, %v7347_v12, %v7353_v5  ;;  %v10571_v58 = vld [vmem:[#allocation44_spill] sm:$0xff] }
 0x33f   :  { %v1937_v21 = vsel %vm811_vm2, %v1928_v17, %v1934_v37  ;;  %v1946_v1 = vsel %vm811_vm2, %v1934_v37, %v1916_v47  ;;  %2264 = vmatpush1.msra.mxu1 %v2009_v40  ;;  %v1947_v47 = vmul.f32 %v1941_v39, %v6576_v16  ;;  %v1882_v35 = vsel %vm730_vm3, %v7433_v8, %v7435_v38 }
 0x340   :  { %v1957_v49 = vmul.f32 %v1937_v21, %v6573_v63  ;;  %2176 = vmatprep.subr.mxu0 %v1956_v15  ;;  %v1856_v54 = vpop.permute.xlu0 %1855  ;;  %v1958_v18 = vmul.f32 %v1946_v1, %v6570_v62  ;;  %v1885_v60 = vsel %vm730_vm3, %v7449_v32, %v7433_v8  ;;  %v1876_v38 = vsel %vm730_vm3, %v7444_v24, %v7449_v32  ;;  %v10572_v1 = vld [vmem:[#allocation46_spill] sm:$0xff] }
 0x341   :  { %2177 = vmatpush1.msra.mxu0 %v1955_v25  ;;  %v1892_v8 = vmul.f32 %v1879_v59, %v6663_v50  ;;  %v1884_v39 = vsel %vm730_vm3, %v10571_v58, %v7345_v0  ;;  %v1891_v41 = vmul.f32 %v1882_v35, %v6672_v53  ;;  %v1875_v32 = vsel %vm730_vm3, %v7353_v5, %v10571_v58  ;;  %v2091_v5 = vld [vmem:[%s10277_s7] sm:$0xff]  ;;  %v10581_v59 = vld [vmem:[#allocation9_spill] sm:$0xff]  ;;  %v10583_v35 = vld [vmem:[#allocation11_spill] sm:$0xff] }
 0x342   :  { %v1862_v56 = vpop.permute.xlu1 %1861  ;;  %2178 = vmatprep.subr.mxu0 %v1952_v46  ;;  %2265 = vmatprep.subr.mxu1 %v1958_v18  ;;  %v1888_v9 = vmul.f32 %v1878_v22, %v6663_v50  ;;  %v1894_v37 = vmul.f32 %v1885_v60, %v6666_v51  ;;  %v1887_v15 = vmul.f32 %v1881_v57, %v6672_v53  ;;  %v10575_v18 = vld [vmem:[#allocation48_spill] sm:$0xff]  ;;  %v10582_v22 = vld [vmem:[#allocation37_spill] sm:$0xff] }
 0x343   :  { %2179 = vmatpush1.msra.mxu0 %v1951_v11  ;;  %2266 = vmatpush1.msra.mxu1 %v1957_v49  ;;  %v1883_v36 = vsel %vm730_vm3, %v1856_v54, %v1862_v56  ;;  %v1893_v6 = vmul.f32 %v1876_v38, %v6669_v52  ;;  %v1890_v25 = vmul.f32 %v1884_v39, %v6666_v51  ;;  %v10585_v60 = vld [vmem:[#allocation49_spill] sm:$0xff]  ;;  %v10590_v58 = vld [vmem:[#allocation56_spill] sm:$0xff] }
 0x344   :  { %2180 = vmatprep.subr.mxu0 %v1948_v2  ;;  %2267 = vmatprep.subr.mxu1 %v1954_v55  ;;  %v1868_v14 = vpop.permute.xlu0 %1867  ;;  %v1895_v23 = vmul.f32 %v1883_v36, %v6672_v53  ;;  %v1889_v21 = vmul.f32 %v1875_v32, %v6669_v52  ;;  %v1745_v49 = vsel %vm545_vm4, %v10573_v33, %v10572_v1  ;;  %v10577_v2 = vld [vmem:[#allocation10_spill] sm:$0xff]  ;;  %v10579_v36 = vld [vmem:[#allocation43_spill] sm:$0xff]  ;;  %v10591_v32 = vld [vmem:[#allocation33_spill] sm:$0xff] }
 0x345   :  { %v1880_v10 = vsel %vm730_vm3, %v1862_v56, %v1868_v14  ;;  %2181 = vmatpush1.msra.mxu0 %v1947_v47  ;;  %2268 = vmatpush1.msra.mxu1 %v1953_v4  ;;  %v1748_v11 = vsel %vm545_vm4, %v10575_v18, %v10573_v33  ;;  %v10576_v56 = vld [vmem:[#allocation41_spill] sm:$0xff]  ;;  %v10578_v4 = vld [vmem:[#allocation40_spill] sm:$0xff] }
 0x346   :  { %v1874_v7 = vpop.permute.xlu1 %1873  ;;  %2269 = vmatprep.subr.mxu1 %v1950_v3  ;;  %v1896_v31 = vmul.f32 %v1880_v10, %v6663_v50  ;;  %v10580_v3 = vld [vmem:[#allocation8_spill] sm:$0xff]  ;;  %v1751_v10 = vmul.f32 %v1748_v11, %v10581_v59 }
 0x347   :  { %v1877_v17 = vsel %vm730_vm3, %v1868_v14, %v1874_v7  ;;  %v1886_v12 = vsel %vm730_vm3, %v1874_v7, %v1856_v54  ;;  %2270 = vmatpush1.msra.mxu1 %v1949_v48  ;;  %v10574_v54 = vld [vmem:[#allocation47_spill] sm:$0xff]  ;;  %v1752_v48 = vmul.f32 %v1745_v49, %v10580_v3  ;;  %v10596_v33 = vld [vmem:[#allocation32_spill] sm:$0xff] }
 0x348   :  { %v1897_v20 = vmul.f32 %v1877_v17, %v6669_v52  ;;  %2182 = vmatprep.subr.mxu0 %v1896_v31  ;;  %v1720_v40 = vpop.permute.xlu0 %1719  ;;  %v1898_v34 = vmul.f32 %v1886_v12, %v6666_v51  ;;  %v1742_v46 = vsel %vm545_vm4, %v10572_v1, %v10574_v54  ;;  %v1739_v13 = vsel %vm545_vm4, %v10574_v54, %v10575_v18  ;;  %v10584_v31 = vld [vmem:[#allocation50_spill] sm:$0xff]  ;;  %v10587_v12 = vld [vmem:[#allocation53_spill] sm:$0xff]  ;;  %v10598_v54 = vld [vmem:[#allocation35_spill] sm:$0xff] }
 0x349   :  { %2183 = vmatpush1.msra.mxu0 %v1895_v23  ;;  %v7692_v55 = vmul.f32 %v1742_v46, %v10577_v2  ;;  %v1754_v7 = vmul.f32 %v1739_v13, %v10583_v35  ;;  %v1685_v23 = vsel %vm464_vm6, %v10585_v60, %v10584_v31  ;;  %v10586_v17 = vld [vmem:[#allocation54_spill] sm:$0xff]  ;;  %v1749_v39 = vsel %vm545_vm4, %v10590_v58, %v10587_v12 }
 0x34a   :  { %v1726_v24 = vpop.permute.xlu1 %1725  ;;  %2184 = vmatprep.subr.mxu0 %v1892_v8  ;;  %2271 = vmatprep.subr.mxu1 %v1898_v34  ;;  %v1746_v38 = vsel %vm545_vm4, %v10587_v12, %v10586_v17  ;;  %v10589_v8 = vld [vmem:[#allocation42_spill] sm:$0xff]  ;;  %v1755_v13 = vmul.f32 %v1749_v39, %v10581_v59 }
 0x34b   :  { %2185 = vmatpush1.msra.mxu0 %v1891_v41  ;;  %2272 = vmatpush1.msra.mxu1 %v1897_v20  ;;  %v1747_v47 = vsel %vm545_vm4, %v1720_v40, %v1726_v24  ;;  %v1756_v46 = vmul.f32 %v1746_v38, %v10580_v3 }
 0x34c   :  { %2186 = vmatprep.subr.mxu0 %v1888_v9  ;;  %2273 = vmatprep.subr.mxu1 %v1894_v37  ;;  %v1732_v0 = vpop.permute.xlu0 %1731  ;;  %v10592_v9 = vld [vmem:[#allocation39_spill] sm:$0xff]  ;;  %v1760_v37 = vmul.f32 %v1747_v47, %v10580_v3 }
 0x34d   :  { %2187 = vmatpush1.msra.mxu0 %v1887_v15  ;;  %2274 = vmatpush1.msra.mxu1 %v1893_v6  ;;  %v1744_v41 = vsel %vm545_vm4, %v1726_v24, %v1732_v0  ;;  %v10593_v15 = vld [vmem:[#allocation52_spill] sm:$0xff]  ;;  %v10594_v6 = vld [vmem:[#allocation51_spill] sm:$0xff]  ;;  %v10597_v24 = vld [vmem:[#allocation38_spill] sm:$0xff] }
 0x34e   :  { %v1738_v30 = vpop.permute.xlu1 %1737  ;;  %2275 = vmatprep.subr.mxu1 %v1890_v25  ;;  %2349 = vmatprep.subr.mxu0 %v10576_v56  ;;  %v1679_v25 = vsel %vm464_vm6, %v10594_v6, %v10593_v15  ;;  %v1761_v11 = vmul.f32 %v1744_v41, %v10577_v2  ;;  %v10599_v56 = vld [vmem:[#allocation34_spill] sm:$0xff]  ;;  %v10604_v41 = vld [vmem:[#allocation12_spill] sm:$0xff] }
 0x34f   :  { %5691 = vmatmul.mubr.msk.f32.vlgmr.msra.gmra.mxu0 %vm2143_vm9, %v2091_v5  ;;  %2276 = vmatpush1.msra.mxu1 %v1889_v21  ;;  %v1750_v57 = vsel %vm545_vm4, %v1738_v30, %v1720_v40  ;;  %v1741_v20 = vsel %vm545_vm4, %v1732_v0, %v1738_v30  ;;  %v10588_v40 = vld [vmem:[#allocation36_spill] sm:$0xff] }
 0x350   :  { %2350 = vmatpush1.msra.mxu0 %v10578_v4  ;;  %2438 = vmatprep.subr.mxu1 %v10579_v36  ;;  %v1660_v14 = vpop.permute.xlu0 %1659  ;;  %v1759_v1 = vmul.f32 %v1750_v57, %v10581_v59  ;;  %v1762_v18 = vmul.f32 %v1741_v20, %v10583_v35  ;;  %v10600_v4 = vld [vmem:[#allocation58_spill] sm:$0xff]  ;;  %v10601_v36 = vld [vmem:[#allocation57_spill] sm:$0xff] }
 0x351   :  { %2351 = vmatprep.subr.mxu0 %v10582_v22  ;;  %5695 = vmatmul.mubr.msk.f32.vlgmr.msra.gmra.mxu1 %vm2143_vm9, %v2091_v5  ;;  %v10595_v5 = vld [vmem:[#allocation55_spill] sm:$0xff]  ;;  %v1686_v57 = vsel %vm464_vm6, %v10601_v36, %v10600_v4  ;;  %v10602_v20 = vld [vmem:[#allocation13_spill] sm:$0xff] }
 0x352   :  { %2352 = vmatpush1.msra.mxu0 %v10588_v40  ;;  %2439 = vmatpush1.msra.mxu1 %v10589_v8  ;;  %v1666_v34 = vpop.permute.xlu1 %1665  ;;  %v1740_v21 = vsel %vm545_vm4, %v10595_v5, %v10590_v58  ;;  %v1743_v49 = vsel %vm545_vm4, %v10586_v17, %v10595_v5  ;;  %v10603_v58 = vld [vmem:[#allocation60_spill] sm:$0xff] }
 0x353   :  { %2353 = vmatprep.subr.mxu0 %v10591_v32  ;;  %2440 = vmatprep.subr.mxu1 %v10592_v9  ;;  %v1687_v30 = vsel %vm464_vm6, %v1660_v14, %v1666_v34  ;;  %v1758_v17 = vmul.f32 %v1740_v21, %v10583_v35  ;;  %v1757_v12 = vmul.f32 %v1743_v49, %v10577_v2 }
 0x354   :  { %2354 = vmatpush1.msra.mxu0 %v10596_v33  ;;  %2441 = vmatpush1.msra.mxu1 %v10597_v24  ;;  %v1672_v0 = vpop.permute.xlu0 %1671  ;;  %v1689_v39 = vsel %vm464_vm6, %v10603_v58, %v10601_v36  ;;  %v1700_v32 = vmul.f32 %v1687_v30, %v10604_v41  ;;  %v1688_v9 = vsel %vm464_vm6, %v10593_v15, %v10585_v60  ;;  %v10606_v60 = vld [vmem:[#allocation15_spill] sm:$0xff]  ;;  %v10607_v24 = vld [vmem:[#allocation14_spill] sm:$0xff] }
 0x355   :  { %2355 = vmatprep.subr.mxu0 %v1760_v37  ;;  %2442 = vmatprep.subr.mxu1 %v10598_v54  ;;  %v10605_v37 = vld [vmem:[#allocation59_spill] sm:$0xff]  ;;  %v1695_v33 = vmul.f32 %v1689_v39, %v10602_v20  ;;  %v1692_v49 = vmul.f32 %v1685_v23, %v10604_v41  ;;  %v1682_v54 = vsel %vm464_vm6, %v10584_v31, %v10594_v6 }
 0x356   :  { %2356 = vmatpush1.msra.mxu0 %v1759_v1  ;;  %2443 = vmatpush1.msra.mxu1 %v10599_v56  ;;  %v1678_v47 = vpop.permute.xlu1 %1677  ;;  %v1680_v5 = vsel %vm464_vm6, %v10605_v37, %v10603_v58  ;;  %v1696_v1 = vmul.f32 %v1686_v57, %v10604_v41  ;;  %v1694_v23 = vmul.f32 %v1679_v25, %v10606_v60  ;;  %v10610_v57 = vld [vmem:[#allocation19_spill] sm:$0xff] }
 0x357   :  { %v1690_v22 = vsel %vm464_vm6, %v1678_v47, %v1660_v14  ;;  %2357 = vmatprep.subr.mxu0 %v1756_v46  ;;  %2444 = vmatprep.subr.mxu1 %v1762_v18  ;;  %v1681_v38 = vsel %vm464_vm6, %v1672_v0, %v1678_v47  ;;  %v1684_v14 = vsel %vm464_vm6, %v1666_v34, %v1672_v0  ;;  %v10609_v47 = vld [vmem:[#allocation17_spill] sm:$0xff]  ;;  %v3592_v41 = vld [vmem:[%s10281_s11 + $0x18] sm:$0xff] }
 0x358   :  { %v1699_v40 = vmul.f32 %v1690_v22, %v10602_v20  ;;  %2358 = vmatpush1.msra.mxu0 %v1755_v13  ;;  %2445 = vmatpush1.msra.mxu1 %v1761_v11  ;;  %v1600_v8 = vpop.permute.xlu0 %1599  ;;  %v1702_v15 = vmul.f32 %v1681_v38, %v10606_v60  ;;  %v1691_v46 = vmul.f32 %v1688_v9, %v10602_v20  ;;  %v2092_v22 = vld [vmem:[%s10277_s7 + $0x8] sm:$0xff] }
 0x359   :  { %2359 = vmatprep.subr.mxu0 %v1752_v48  ;;  %2446 = vmatprep.subr.mxu1 %v1758_v17  ;;  %v1683_v48 = vsel %vm464_vm6, %v10600_v4, %v10605_v37  ;;  %v1693_v56 = vmul.f32 %v1682_v54, %v10607_v24  ;;  %v10611_v17 = vld [vmem:[#allocation18_spill] sm:$0xff] }
 0x35a   :  { %2360 = vmatpush1.msra.mxu0 %v1751_v10  ;;  %2447 = vmatpush1.msra.mxu1 %v1757_v12  ;;  %v1606_v21 = vpop.permute.xlu1 %1605  ;;  %v1701_v10 = vmul.f32 %v1684_v14, %v10607_v24  ;;  %v1697_v18 = vmul.f32 %v1683_v48, %v10607_v24  ;;  %v2093_v14 = vld [vmem:[%s10277_s7 + $0x10] sm:$0xff] }
 0x35b   :  { %v1627_v34 = vsel %vm383_vm7, %v1600_v8, %v1606_v21  ;;  %2361 = vmatprep.subr.mxu0 %v1700_v32  ;;  %2448 = vmatprep.subr.mxu1 %v1754_v7  ;;  %v1698_v7 = vmul.f32 %v1680_v5, %v10606_v60 }
 0x35c   :  { %2362 = vmatpush1.msra.mxu0 %v1699_v40  ;;  %2449 = vmatpush1.msra.mxu1 %v7692_v55  ;;  %v1612_v0 = vpop.permute.xlu0 %1611  ;;  %v10608_v55 = vld [vmem:[#allocation16_spill] sm:$0xff] }
 0x35d   :  { %2363 = vmatprep.subr.mxu0 %v1696_v1  ;;  %2450 = vmatprep.subr.mxu1 %v1702_v15  ;;  %v1640_v11 = vmul.f32 %v1627_v34, %v10608_v55  ;;  %v1624_v30 = vsel %vm383_vm7, %v1606_v21, %v1612_v0  ;;  %v2094_v15 = vld [vmem:[%s10277_s7 + $0x18] sm:$0xff] }
 0x35e   :  { %2364 = vmatpush1.msra.mxu0 %v1695_v33  ;;  %2451 = vmatpush1.msra.mxu1 %v1701_v10  ;;  %v1618_v13 = vpop.permute.xlu1 %1617  ;;  %v1641_v12 = vmul.f32 %v1624_v30, %v10611_v17 }
 0x35f   :  { %v1621_v31 = vsel %vm383_vm7, %v1612_v0, %v1618_v13  ;;  %v1630_v6 = vsel %vm383_vm7, %v1618_v13, %v1600_v8  ;;  %2365 = vmatprep.subr.mxu0 %v1692_v49  ;;  %2452 = vmatprep.subr.mxu1 %v1698_v7  ;;  %v10612_v8 = vmov 0.0  }
 0x360   :  { %v1639_v4 = vmul.f32 %v1630_v6, %v10609_v47  ;;  %2366 = vmatpush1.msra.mxu0 %v1691_v46  ;;  %2453 = vmatpush1.msra.mxu1 %v1697_v18  ;;  %v1598_v36 = vpop.permute.xlu0 %1597  ;;  %v1642_v25 = vmul.f32 %v1621_v31, %v10610_v57 }
 0x361   :  { %2367 = vmatprep.subr.mxu0 %v1640_v11  ;;  %2454 = vmatprep.subr.mxu1 %v1694_v23 }
 0x362   :  { %2455 = vmatpush1.msra.mxu1 %v1693_v56  ;;  %v1604_v38 = vpop.permute.xlu1 %1603  ;;  %2368 = vmatpush1.msra.mxu0 %v1639_v4  ;;  %v10613_v4 = vld [vmem:[#allocation20_spill] sm:$0xff] }
 0x363   :  { %v1626_v40 = vsel %vm383_vm7, %v1598_v36, %v1604_v38  ;;  %2456 = vmatprep.subr.mxu1 %v1642_v25  ;;  %2226 = vmatprep.mubr.f32.mxu0 %v10612_v8 }
 0x364   :  { %2457 = vmatpush1.msra.mxu1 %v1641_v12  ;;  %v1610_v58 = vpop.permute.xlu0 %1609  ;;  %v1636_v39 = vmul.f32 %v1626_v40, %v10608_v55  ;;  %5692 = vmatmul.mubr.msk.f32.gmra.mxu0 %vm2143_vm9, %v2092_v22  ;;  %v10614_v40 = vld [vmem:[#allocation21_spill] sm:$0xff] }
 0x365   :  { %2315 = vmatprep.mubr.f32.mxu1 %v10612_v8  ;;  %2232 = vmatprep.mubr.f32.mxu0 %v10612_v8  ;;  %v1623_v32 = vsel %vm383_vm7, %v1604_v38, %v1610_v58 }
 0x366   :  { %v1616_v9 = vpop.permute.xlu1 %1615  ;;  %2369 = vmatprep.subr.mxu0 %v1636_v39  ;;  %5696 = vmatmul.mubr.msk.f32.gmra.mxu1 %vm2143_vm9, %v2092_v22  ;;  %v1637_v34 = vmul.f32 %v1623_v32, %v10611_v17 }
 0x367   :  { %v1620_v37 = vsel %vm383_vm7, %v1610_v58, %v1616_v9  ;;  %v1629_v5 = vsel %vm383_vm7, %v1616_v9, %v1598_v36  ;;  %2321 = vmatprep.mubr.f32.mxu1 %v10612_v8  ;;  %v10616_v9 = vld [vmem:[#allocation22_spill] sm:$0xff] }
 0x368   :  { %v1635_v21 = vmul.f32 %v1629_v5, %v10609_v47  ;;  %v1596_v1 = vpop.permute.xlu0 %1595  ;;  %v1638_v48 = vmul.f32 %v1620_v37, %v10610_v57  ;;  %5693 = vmatmul.mubr.msk.f32.gmra.mxu0 %vm2143_vm9, %v2093_v14 }
 0x369   :  { %2238 = vmatprep.mubr.f32.mxu0 %v10612_v8 }
 0x36a   :  { %v1602_v33 = vpop.permute.xlu1 %1601  ;;  %2370 = vmatpush1.msra.mxu0 %v1635_v21  ;;  %2458 = vmatprep.subr.mxu1 %v1638_v48 }
 0x36b   :  { %v1625_v10 = vsel %vm383_vm7, %v1596_v1, %v1602_v33  ;;  %2459 = vmatpush1.msra.mxu1 %v1637_v34 }
 0x36c   :  { %v1608_v0 = vpop.permute.xlu0 %1607  ;;  %v1632_v49 = vmul.f32 %v1625_v10, %v10608_v55  ;;  %5697 = vmatmul.mubr.msk.f32.gmra.mxu1 %vm2143_vm9, %v2093_v14  ;;  %5694 = vmatmul.mubr.msk.f32.gmra.mxu0 %vm2143_vm9, %v2094_v15  ;;  %v10615_v14 = vld [vmem:[#allocation23_spill] sm:$0xff] }
 0x36d   :  { %2327 = vmatprep.mubr.f32.mxu1 %v10612_v8  ;;  %2411 = vmatprep.mubr.f32.mxu0 %v10612_v8  ;;  %v1622_v54 = vsel %vm383_vm7, %v1602_v33, %v1608_v0 }
 0x36e   :  { %v1614_v46 = vpop.permute.xlu1 %1613  ;;  %2371 = vmatprep.subr.mxu0 %v1632_v49  ;;  %v1633_v30 = vmul.f32 %v1622_v54, %v10611_v17 }
 0x36f   :  { %v1619_v7 = vsel %vm383_vm7, %v1608_v0, %v1614_v46  ;;  %v1628_v18 = vsel %vm383_vm7, %v1614_v46, %v1596_v1 }
 0x370   :  { %v1631_v13 = vmul.f32 %v1628_v18, %v10609_v47  ;;  %v1540_v11 = vpop.permute.xlu0 %1539  ;;  %v1634_v23 = vmul.f32 %v1619_v7, %v10610_v57  ;;  %5698 = vmatmul.mubr.msk.f32.gmra.mxu1 %vm2143_vm9, %v2094_v15 }
 0x371   :  { %2500 = vmatprep.mubr.f32.mxu1 %v10612_v8 }
 0x372   :  { %v1546_v31 = vpop.permute.xlu1 %1545  ;;  %2372 = vmatpush1.msra.mxu0 %v1631_v13  ;;  %2460 = vmatprep.subr.mxu1 %v1634_v23 }
 0x373   :  { %v1567_v6 = vsel %vm302_vm8, %v1540_v11, %v1546_v31  ;;  %2461 = vmatpush1.msra.mxu1 %v1633_v30 }
 0x374   :  { %v1552_v56 = vpop.permute.xlu0 %1551  ;;  %v1580_v36 = vmul.f32 %v1567_v6, %v10613_v4 }
 0x375   :  { %v1564_v25 = vsel %vm302_vm8, %v1546_v31, %v1552_v56 }
 0x376   :  { %v1558_v22 = vpop.permute.xlu1 %1557  ;;  %2373 = vmatprep.subr.mxu0 %v1580_v36  ;;  %v1581_v37 = vmul.f32 %v1564_v25, %v10616_v9  ;;  %v1787_v25 = vld [vmem:[%s10276_s6] sm:$0xff] }
 0x377   :  { %v1561_v12 = vsel %vm302_vm8, %v1552_v56, %v1558_v22  ;;  %v1570_v38 = vsel %vm302_vm8, %v1558_v22, %v1540_v11 }
 0x378   :  { %v1579_v58 = vmul.f32 %v1570_v38, %v10614_v40  ;;  %v1538_v39 = vpop.permute.xlu0 %1537  ;;  %v1582_v32 = vmul.f32 %v1561_v12, %v10615_v14  ;;  %v1788_v12 = vld [vmem:[%s10276_s6 + $0x8] sm:$0xff]  ;;  %v1789_v38 = vld [vmem:[%s10276_s6 + $0x10] sm:$0xff] }
 0x37a   :  { %v1544_v5 = vpop.permute.xlu1 %1543  ;;  %2374 = vmatpush1.msra.mxu0 %v1579_v58  ;;  %2462 = vmatprep.subr.mxu1 %v1582_v32  ;;  %v1790_v58 = vld [vmem:[%s10276_s6 + $0x18] sm:$0xff]  ;;  %s10625_s6 = smov 112  }
 0x37b   :  { %v1566_v21 = vsel %vm302_vm8, %v1538_v39, %v1544_v5  ;;  %2463 = vmatpush1.msra.mxu1 %v1581_v37 }
 0x37c   :  { %v1550_v1 = vpop.permute.xlu0 %1549  ;;  %v1576_v48 = vmul.f32 %v1566_v21, %v10613_v4 }
 0x37d   :  { %v1563_v34 = vsel %vm302_vm8, %v1544_v5, %v1550_v1 }
 0x37e   :  { %v1556_v15 = vpop.permute.xlu1 %1555  ;;  %2375 = vmatprep.subr.mxu0 %v1576_v48  ;;  %v1577_v46 = vmul.f32 %v1563_v34, %v10616_v9 }
 0x37f   :  { %v1560_v33 = vsel %vm302_vm8, %v1550_v1, %v1556_v15  ;;  %v1569_v10 = vsel %vm302_vm8, %v1556_v15, %v1538_v39 }
 0x380   :  { %v1575_v0 = vmul.f32 %v1569_v10, %v10614_v40  ;;  %v1536_v49 = vpop.permute.xlu0 %1535  ;;  %v1578_v54 = vmul.f32 %v1560_v33, %v10615_v14 }
 0x382   :  { %v1542_v7 = vpop.permute.xlu1 %1541  ;;  %2376 = vmatpush1.msra.mxu0 %v1575_v0  ;;  %2464 = vmatprep.subr.mxu1 %v1578_v54 }
 0x383   :  { %v1565_v18 = vsel %vm302_vm8, %v1536_v49, %v1542_v7  ;;  %2465 = vmatpush1.msra.mxu1 %v1577_v46 }
 0x384   :  { %v1548_v13 = vpop.permute.xlu0 %1547  ;;  %v1572_v11 = vmul.f32 %v1565_v18, %v10613_v4 }
 0x385   :  { %v1562_v23 = vsel %vm302_vm8, %v1542_v7, %v1548_v13 }
 0x386   :  { %v1554_v30 = vpop.permute.xlu1 %1553  ;;  %2377 = vmatprep.subr.mxu0 %v1572_v11  ;;  %v1573_v22 = vmul.f32 %v1562_v23, %v10616_v9 }
 0x387   :  { %v1559_v31 = vsel %vm302_vm8, %v1548_v13, %v1554_v30  ;;  %v1568_v6 = vsel %vm302_vm8, %v1554_v30, %v1536_v49 }
 0x388   :  { %v1571_v56 = vmul.f32 %v1568_v6, %v10614_v40  ;;  %v1574_v36 = vmul.f32 %v1559_v31, %v10615_v14 }
 0x38a   :  { %2378 = vmatpush1.msra.mxu0 %v1571_v56  ;;  %2466 = vmatprep.subr.mxu1 %v1574_v36 }
 0x38b   :  { %5699 = vmatmul.mubr.msk.f32.vlgmr.msra.gmra.mxu0 %vm2334_vm10, %v1787_v25  ;;  %2467 = vmatpush1.msra.mxu1 %v1573_v22 }
 0x38c   :  { %5703 = vmatmul.mubr.msk.f32.vlgmr.msra.gmra.mxu1 %vm2334_vm10, %v1787_v25  ;;  %2417 = vmatprep.mubr.f32.mxu0 %v10612_v8 }
 0x38d   :  { %2506 = vmatprep.mubr.f32.mxu1 %v10612_v8 }
 0x38f   :  { %5700 = vmatmul.mubr.msk.f32.gmra.mxu0 %vm2334_vm10, %v1788_v12 }
 0x390   :  { %5704 = vmatmul.mubr.msk.f32.gmra.mxu1 %vm2334_vm10, %v1788_v12  ;;  %2423 = vmatprep.mubr.f32.mxu0 %v10612_v8 }
 0x391   :  { %2512 = vmatprep.mubr.f32.mxu1 %v10612_v8  ;;  %v7933_v18 = vpop.permute.xlu0 %2546 }
 0x393   :  { %5701 = vmatmul.mubr.msk.f32.gmra.mxu0 %vm2334_vm10, %v1789_v38 }
 0x394   :  { %5705 = vmatmul.mubr.msk.f32.gmra.mxu1 %vm2334_vm10, %v1789_v38  ;;  %2429 = vmatprep.mubr.f32.mxu0 %v10612_v8 }
 0x395   :  { %2518 = vmatprep.mubr.f32.mxu1 %v10612_v8  ;;  %v2537_v38 = vpop.permute.xlu0 %2536 }
 0x397   :  { %5702 = vmatmul.mubr.msk.f32.gmra.mxu0 %vm2334_vm10, %v1790_v58 }
 0x398   :  { %5706 = vmatmul.mubr.msk.f32.gmra.mxu1 %vm2334_vm10, %v1790_v58  ;;  %3285 = vmatprep.mubr.f32.mxu0 %v10612_v8 }
 0x399   :  { %3374 = vmatprep.mubr.f32.mxu1 %v10612_v8 }
 0x40f   :  { %v2222_v32 = vpop.f32.mrf.mxu0 }
 0x411   :  { %v2311_v39 = vpop.f32.mrf.mxu1  ;;  %v2224_v5 = vpop.f32.mrf.mxu0 }
 0x413   :  { %v2313_v37 = vpop.f32.mrf.mxu1 }
 0x424   :  { %v2228_v1 = vpop.f32.mrf.mxu0 }
 0x426   :  { %v2317_v21 = vpop.f32.mrf.mxu1  ;;  %v2230_v34 = vpop.f32.mrf.mxu0 }
 0x428   :  { %v2319_v48 = vpop.f32.mrf.mxu1  ;;  %v7919_v33 = vpop.f32.mrf.mxu0 }
 0x42a   :  { %v7923_v0 = vpop.f32.mrf.mxu0 }
 0x42c   :  { %v7917_v15 = vpop.f32.mrf.mxu1  ;;  %v7927_v54 = vpop.f32.mrf.mxu0 }
 0x42e   :  { %v7921_v10 = vpop.f32.mrf.mxu1  ;;  %v7931_v7 = vpop.f32.mrf.mxu0 }
 0x430   :  { %v7925_v49 = vpop.f32.mrf.mxu1 }
 0x432   :  { %v7929_v46 = vpop.f32.mrf.mxu1 }
 0x44b   :  { %v2413_v13 = vpop.f32.mrf.mxu0 }
 0x44c   :  { %v7935_v11 = vadd.f32 %v2413_v13, %v2222_v32  ;;  %v2502_v23 = vpop.f32.mrf.mxu1 }
 0x44d   :  { %v7937_v30 = vadd.f32 %v2502_v23, %v2311_v39  ;;  %v2415_v31 = vpop.f32.mrf.mxu0 }
 0x44e   :  { %10617 = vst [vmem:[#allocation44_spill] sm:$0xff] %v7935_v11  ;;  %v7939_v6 = vadd.f32 %v2415_v31, %v2224_v5  ;;  %v2504_v56 = vpop.f32.mrf.mxu1 }
 0x44f   :  { %10618 = vst [vmem:[#allocation46_spill] sm:$0xff] %v7937_v30  ;;  %v7941_v36 = vadd.f32 %v2504_v56, %v2313_v37  ;;  %v2419_v25 = vpop.f32.mrf.mxu0 }
 0x450   :  { %10619 = vst [vmem:[#allocation45_spill] sm:$0xff] %v7939_v6  ;;  %v2420_v22 = vadd.f32 %v2419_v25, %v2228_v1  ;;  %v2508_v12 = vpop.f32.mrf.mxu1 }
 0x451   :  { %10620 = vst [vmem:[#allocation47_spill] sm:$0xff] %v7941_v36  ;;  %v2509_v58 = vadd.f32 %v2508_v12, %v2317_v21  ;;  %v2421_v9 = vpop.f32.mrf.mxu0 }
 0x452   :  { %v2553_v40 = vadd.f32 %v2537_v38, %v2420_v22  ;;  %v2422_v14 = vadd.f32 %v2421_v9, %v2230_v34  ;;  %v2510_v4 = vpop.f32.mrf.mxu1  ;;  %v2542_v34 = vpop.permute.xlu1 %2541 }
 0x453   :  { %v2555_v32 = vadd.f32 %v2537_v38, %v2509_v58  ;;  %v2511_v13 = vadd.f32 %v2510_v4, %v2319_v48  ;;  %v2425_v4 = vpop.f32.mrf.mxu0 }
 0x454   :  { %v2569_v11 = vmul.f32 0.05, %v2553_v40  ;;  %v2554_v39 = vadd.f32 %v2537_v38, %v2422_v14  ;;  %v2426_v1 = vadd.f32 %v2425_v4, %v7919_v33 }
 0x455   :  { %v2556_v23 = vadd.f32 %v2537_v38, %v2511_v13  ;;  %v2571_v5 = vmul.f32 0.05, %v2555_v32  ;;  %v2427_v14 = vpop.f32.mrf.mxu0 }
 0x456   :  { %v7943_v30 = vmax.f32 %v2553_v40, %v2569_v11  ;;  %v2570_v31 = vmul.f32 0.05, %v2554_v39  ;;  %v2514_v40 = vpop.f32.mrf.mxu1  ;;  %v2428_v48 = vadd.f32 %v2427_v14, %v7923_v0  ;;  %v2557_v25 = vadd.f32 %v2542_v34, %v2426_v1 }
 0x457   :  { %v2572_v56 = vmul.f32 0.05, %v2556_v23  ;;  %v7949_v21 = vmax.f32 %v2555_v32, %v2571_v5  ;;  %v2515_v22 = vadd.f32 %v2514_v40, %v7917_v15 }
 0x458   :  { %10621 = vst [vmem:[#allocation48_spill] sm:$0xff] %v7943_v30  ;;  %v7945_v37 = vmax.f32 %v2554_v39, %v2570_v31  ;;  %3097 = vrot.lane.b32.xlu1 %v7943_v30, %s6033_s28  ;;  %v2516_v11 = vpop.f32.mrf.mxu1  ;;  %v2558_v12 = vadd.f32 %v2542_v34, %v2428_v48  ;;  %v2573_v33 = vmul.f32 0.05, %v2557_v25  ;;  %v2431_v31 = vpop.f32.mrf.mxu0 }
 0x459   :  { %10623 = vst [vmem:[#allocation40_spill] sm:$0xff] %v7949_v21  ;;  %v7953_v9 = vmax.f32 %v2556_v23, %v2572_v56  ;;  %v2517_v38 = vadd.f32 %v2516_v11, %v7921_v10  ;;  %v2559_v58 = vadd.f32 %v2542_v34, %v2515_v22  ;;  %v2432_v40 = vadd.f32 %v2431_v31, %v7927_v54 }
 0x45a   :  { %10622 = vst [vmem:[#allocation41_spill] sm:$0xff] %v7945_v37  ;;  %3103 = vrot.lane.b32.xlu0 %v7945_v37, %s6033_s28  ;;  %v2574_v0 = vmul.f32 0.05, %v2558_v12  ;;  %v8013_v15 = vmax.f32 %v2557_v25, %v2573_v33  ;;  %v2520_v56 = vpop.f32.mrf.mxu1  ;;  %v2433_v4 = vpop.f32.mrf.mxu0 }
 0x45b   :  { %10624 = vst [vmem:[#allocation43_spill] sm:$0xff] %v7953_v9  ;;  %v2560_v32 = vadd.f32 %v2542_v34, %v2517_v38  ;;  %v2575_v13 = vmul.f32 0.05, %v2559_v58  ;;  %v2434_v14 = vadd.f32 %v2433_v4, %v7931_v7  ;;  %v2561_v48 = vadd.f32 %v7933_v18, %v2432_v40 }
 0x45c   :  { %3109 = vrot.lane.b32.xlu1 %v7949_v21, %s6033_s28  ;;  %10626 = vst [vmem:[#allocation37_spill] sm:$0xff] %v8013_v15  ;;  %v8017_v10 = vmax.f32 %v2558_v12, %v2574_v0  ;;  %v2522_v1 = vpop.f32.mrf.mxu1  ;;  %v2521_v34 = vadd.f32 %v2520_v56, %v7925_v49 }
 0x45d   :  { %v2576_v39 = vmul.f32 0.05, %v2560_v32  ;;  %v8021_v23 = vmax.f32 %v2559_v58, %v2575_v13  ;;  %v2562_v54 = vadd.f32 %v7933_v18, %v2434_v14  ;;  %v2523_v25 = vadd.f32 %v2522_v1, %v7929_v46 }
 0x45e   :  { %3115 = vrot.lane.b32.xlu0 %v7953_v9, %s6033_s28  ;;  %10627 = vst [vmem:[#allocation50_spill] sm:$0xff] %v8017_v10  ;;  %v2577_v7 = vmul.f32 0.05, %v2561_v48  ;;  %v2563_v12 = vadd.f32 %v7933_v18, %v2521_v34 }
 0x45f   :  { %10628 = vst [vmem:[#allocation49_spill] sm:$0xff] %v8021_v23  ;;  %v8025_v5 = vmax.f32 %v2560_v32, %v2576_v39  ;;  %v2578_v38 = vmul.f32 0.05, %v2562_v54  ;;  %v2564_v33 = vadd.f32 %v7933_v18, %v2523_v25 }
 0x460   :  { %3037 = vrot.lane.b32.xlu1 %v7943_v30, %s10625_s6  ;;  %v8101_v46 = vmax.f32 %v2561_v48, %v2577_v7  ;;  %v2579_v0 = vmul.f32 0.05, %v2563_v12 }
 0x461   :  { %10629 = vst [vmem:[#allocation54_spill] sm:$0xff] %v8025_v5  ;;  %v8107_v13 = vmax.f32 %v2562_v54, %v2578_v38  ;;  %v2580_v39 = vmul.f32 0.05, %v2564_v33 }
 0x462   :  { %3043 = vrot.lane.b32.xlu0 %v7945_v37, %s10625_s6  ;;  %10630 = vst [vmem:[#allocation53_spill] sm:$0xff] %v8101_v46  ;;  %v8113_v18 = vmax.f32 %v2563_v12, %v2579_v0 }
 0x463   :  { %10631 = vst [vmem:[#allocation36_spill] sm:$0xff] %v8107_v13  ;;  %v8119_v4 = vmax.f32 %v2564_v33, %v2580_v39 }
 0x464   :  { %3049 = vrot.lane.b32.xlu1 %v7949_v21, %s10625_s6  ;;  %10632 = vst [vmem:[#allocation42_spill] sm:$0xff] %v8113_v18 }
 0x465   :  { %10633 = vst [vmem:[#allocation56_spill] sm:$0xff] %v8119_v4 }
 0x466   :  { %3055 = vrot.lane.b32.xlu0 %v7953_v9, %s10625_s6 }
 0x468   :  { %2977 = vrot.lane.b32.xlu1 %v7943_v30, %s10540_s22 }
 0x46a   :  { %2983 = vrot.lane.b32.xlu0 %v7945_v37, %s10540_s22 }
 0x46c   :  { %2989 = vrot.lane.b32.xlu1 %v7949_v21, %s10540_s22 }
 0x46e   :  { %2995 = vrot.lane.b32.xlu0 %v7953_v9, %s10540_s22 }
 0x470   :  { %2917 = vrot.lane.b32.xlu1 %v7943_v30, %s10541_s24 }
 0x472   :  { %2923 = vrot.lane.b32.xlu0 %v7945_v37, %s10541_s24 }
 0x474   :  { %2929 = vrot.lane.b32.xlu1 %v7949_v21, %s10541_s24 }
 0x476   :  { %2935 = vrot.lane.b32.xlu0 %v7953_v9, %s10541_s24 }
 0x478   :  { %2781 = vrot.lane.b32.xlu1 %v7943_v30, %s10542_s23 }
 0x47a   :  { %2787 = vrot.lane.b32.xlu0 %v7945_v37, %s10542_s23 }
 0x47c   :  { %2793 = vrot.lane.b32.xlu1 %v7949_v21, %s10542_s23 }
 0x47e   :  { %2799 = vrot.lane.b32.xlu0 %v7953_v9, %s10542_s23 }
 0x480   :  { %2721 = vrot.lane.b32.xlu1 %v7943_v30, %s10543_s5 }
 0x482   :  { %2727 = vrot.lane.b32.xlu0 %v7945_v37, %s10543_s5 }
 0x484   :  { %2733 = vrot.lane.b32.xlu1 %v7949_v21, %s10543_s5 }
 0x486   :  { %2739 = vrot.lane.b32.xlu0 %v7953_v9, %s10543_s5 }
 0x488   :  { %2661 = vrot.lane.b32.xlu1 %v7943_v30, %s10553_s1 }
 0x48a   :  { %2667 = vrot.lane.b32.xlu0 %v7945_v37, %s10553_s1 }
 0x48c   :  { %2673 = vrot.lane.b32.xlu1 %v7949_v21, %s10553_s1 }
 0x48e   :  { %2679 = vrot.lane.b32.xlu0 %v7953_v9, %s10553_s1 }
 0x490   :  { %2601 = vrot.lane.b32.xlu1 %v7943_v30, %s10562_s30  ;;  %v3591_v30 = vld [vmem:[%s10281_s11 + $0x10] sm:$0xff] }
 0x492   :  { %2607 = vrot.lane.b32.xlu0 %v7945_v37, %s10562_s30 }
 0x494   :  { %3099 = vrot.lane.b32.xlu1 %v8013_v15, %s6033_s28 }
 0x496   :  { %3105 = vrot.lane.b32.xlu0 %v8017_v10, %s6033_s28 }
 0x498   :  { %3111 = vrot.lane.b32.xlu1 %v8021_v23, %s6033_s28 }
 0x49a   :  { %3117 = vrot.lane.b32.xlu0 %v8025_v5, %s6033_s28 }
 0x49c   :  { %3039 = vrot.lane.b32.xlu1 %v8013_v15, %s10625_s6 }
 0x49e   :  { %3045 = vrot.lane.b32.xlu0 %v8017_v10, %s10625_s6 }
 0x4a0   :  { %3051 = vrot.lane.b32.xlu1 %v8021_v23, %s10625_s6 }
 0x4a2   :  { %3057 = vrot.lane.b32.xlu0 %v8025_v5, %s10625_s6 }
 0x4a4   :  { %2979 = vrot.lane.b32.xlu1 %v8013_v15, %s10540_s22 }
 0x4a6   :  { %2985 = vrot.lane.b32.xlu0 %v8017_v10, %s10540_s22 }
 0x4a8   :  { %2991 = vrot.lane.b32.xlu1 %v8021_v23, %s10540_s22 }
 0x4aa   :  { %2997 = vrot.lane.b32.xlu0 %v8025_v5, %s10540_s22 }
 0x4ac   :  { %2919 = vrot.lane.b32.xlu1 %v8013_v15, %s10541_s24 }
 0x4ae   :  { %2925 = vrot.lane.b32.xlu0 %v8017_v10, %s10541_s24 }
 0x4b0   :  { %2931 = vrot.lane.b32.xlu1 %v8021_v23, %s10541_s24 }
 0x4b2   :  { %2937 = vrot.lane.b32.xlu0 %v8025_v5, %s10541_s24 }
 0x4b4   :  { %2783 = vrot.lane.b32.xlu1 %v8013_v15, %s10542_s23 }
 0x4b6   :  { %2789 = vrot.lane.b32.xlu0 %v8017_v10, %s10542_s23 }
 0x4b8   :  { %2795 = vrot.lane.b32.xlu1 %v8021_v23, %s10542_s23 }
 0x4ba   :  { %2801 = vrot.lane.b32.xlu0 %v8025_v5, %s10542_s23 }
 0x4bc   :  { %2723 = vrot.lane.b32.xlu1 %v8013_v15, %s10543_s5 }
 0x4be   :  { %2729 = vrot.lane.b32.xlu0 %v8017_v10, %s10543_s5 }
 0x4c0   :  { %2735 = vrot.lane.b32.xlu1 %v8021_v23, %s10543_s5 }
 0x4c2   :  { %2741 = vrot.lane.b32.xlu0 %v8025_v5, %s10543_s5 }
 0x4c4   :  { %2663 = vrot.lane.b32.xlu1 %v8013_v15, %s10553_s1 }
 0x4c6   :  { %2669 = vrot.lane.b32.xlu0 %v8017_v10, %s10553_s1 }
 0x4c8   :  { %2675 = vrot.lane.b32.xlu1 %v8021_v23, %s10553_s1 }
 0x4ca   :  { %2681 = vrot.lane.b32.xlu0 %v8025_v5, %s10553_s1  ;;  %v8083_v11 = vpop.permute.xlu1 %3097 }
 0x4cc   :  { %v8087_v22 = vpop.permute.xlu0 %3103  ;;  %2603 = vrot.lane.b32.xlu1 %v8013_v15, %s10562_s30 }
 0x4ce   :  { %2609 = vrot.lane.b32.xlu0 %v8017_v10, %s10562_s30  ;;  %v8094_v49 = vpop.permute.xlu1 %3109 }
 0x4d0   :  { %v8097_v58 = vpop.permute.xlu0 %3115  ;;  %2615 = vrot.lane.b32.xlu1 %v8021_v23, %s10562_s30 }
 0x4d2   :  { %2621 = vrot.lane.b32.xlu0 %v8025_v5, %s10562_s30  ;;  %v8105_v32 = vpop.permute.xlu1 %3037 }
 0x4d4   :  { %v8109_v31 = vpop.permute.xlu0 %3043  ;;  %3101 = vrot.lane.b32.xlu1 %v8101_v46, %s6033_s28 }
 0x4d6   :  { %3107 = vrot.lane.b32.xlu0 %v8107_v13, %s6033_s28  ;;  %v8117_v56 = vpop.permute.xlu1 %3049 }
 0x4d8   :  { %v8121_v40 = vpop.permute.xlu0 %3055  ;;  %3113 = vrot.lane.b32.xlu1 %v8113_v18, %s6033_s28 }
 0x4da   :  { %3119 = vrot.lane.b32.xlu0 %v8119_v4, %s6033_s28  ;;  %v8127_v14 = vpop.permute.xlu1 %2977 }
 0x4dc   :  { %v8129_v1 = vpop.permute.xlu0 %2983  ;;  %3041 = vrot.lane.b32.xlu1 %v8101_v46, %s10625_s6 }
 0x4de   :  { %3047 = vrot.lane.b32.xlu0 %v8107_v13, %s10625_s6  ;;  %v8135_v48 = vpop.permute.xlu1 %2989 }
 0x4e0   :  { %v8137_v34 = vpop.permute.xlu0 %2995  ;;  %3053 = vrot.lane.b32.xlu1 %v8113_v18, %s10625_s6 }
 0x4e2   :  { %3059 = vrot.lane.b32.xlu0 %v8119_v4, %s10625_s6  ;;  %v8143_v54 = vpop.permute.xlu1 %2917 }
 0x4e4   :  { %v8145_v25 = vpop.permute.xlu0 %2923  ;;  %2981 = vrot.lane.b32.xlu1 %v8101_v46, %s10540_s22 }
 0x4e6   :  { %2987 = vrot.lane.b32.xlu0 %v8107_v13, %s10540_s22  ;;  %v8151_v7 = vpop.permute.xlu1 %2929 }
 0x4e8   :  { %v8153_v12 = vpop.permute.xlu0 %2935  ;;  %2993 = vrot.lane.b32.xlu1 %v8113_v18, %s10540_s22 }
 0x4e9   :  { %10634 = vst [vmem:[#allocation33_spill] sm:$0xff] %v8153_v12 }
 0x4ea   :  { %2999 = vrot.lane.b32.xlu0 %v8119_v4, %s10540_s22  ;;  %v8159_v38 = vpop.permute.xlu1 %2781 }
 0x4eb   :  { %10635 = vst [vmem:[#allocation39_spill] sm:$0xff] %v8159_v38 }
 0x4ec   :  { %v8161_v33 = vpop.permute.xlu0 %2787  ;;  %2921 = vrot.lane.b32.xlu1 %v8101_v46, %s10541_s24 }
 0x4ed   :  { %10636 = vst [vmem:[#allocation52_spill] sm:$0xff] %v8161_v33 }
 0x4ee   :  { %2927 = vrot.lane.b32.xlu0 %v8107_v13, %s10541_s24  ;;  %v8167_v0 = vpop.permute.xlu1 %2793 }
 0x4ef   :  { %10637 = vst [vmem:[#allocation51_spill] sm:$0xff] %v8167_v0 }
 0x4f0   :  { %v8169_v39 = vpop.permute.xlu0 %2799  ;;  %2933 = vrot.lane.b32.xlu1 %v8113_v18, %s10541_s24 }
 0x4f1   :  { %10638 = vst [vmem:[#allocation55_spill] sm:$0xff] %v8169_v39 }
 0x4f2   :  { %2939 = vrot.lane.b32.xlu0 %v8119_v4, %s10541_s24  ;;  %v8175_v36 = vpop.permute.xlu1 %2721 }
 0x4f3   :  { %10639 = vst [vmem:[#allocation32_spill] sm:$0xff] %v8175_v36 }
 0x4f4   :  { %v8177_v6 = vpop.permute.xlu0 %2727  ;;  %2785 = vrot.lane.b32.xlu1 %v8101_v46, %s10542_s23 }
 0x4f5   :  { %10640 = vst [vmem:[#allocation38_spill] sm:$0xff] %v8177_v6 }
 0x4f6   :  { %2791 = vrot.lane.b32.xlu0 %v8107_v13, %s10542_s23  ;;  %v8183_v17 = vpop.permute.xlu1 %2733 }
 0x4f7   :  { %10641 = vst [vmem:[#allocation35_spill] sm:$0xff] %v8183_v17 }
 0x4f8   :  { %v8185_v8 = vpop.permute.xlu0 %2739  ;;  %2797 = vrot.lane.b32.xlu1 %v8113_v18, %s10542_s23 }
 0x4f9   :  { %10642 = vst [vmem:[#allocation34_spill] sm:$0xff] %v8185_v8 }
 0x4fa   :  { %2803 = vrot.lane.b32.xlu0 %v8119_v4, %s10542_s23  ;;  %v8191_v57 = vpop.permute.xlu1 %2661 }
 0x4fb   :  { %10643 = vst [vmem:[#allocation58_spill] sm:$0xff] %v8191_v57 }
 0x4fc   :  { %v8193_v47 = vpop.permute.xlu0 %2667  ;;  %2725 = vrot.lane.b32.xlu1 %v8101_v46, %s10543_s5 }
 0x4fd   :  { %10644 = vst [vmem:[#allocation57_spill] sm:$0xff] %v8193_v47 }
 0x4fe   :  { %2731 = vrot.lane.b32.xlu0 %v8107_v13, %s10543_s5  ;;  %v8199_v55 = vpop.permute.xlu1 %2673 }
 0x4ff   :  { %10645 = vst [vmem:[#allocation60_spill] sm:$0xff] %v8199_v55 }
 0x500   :  { %v8201_v24 = vpop.permute.xlu0 %2679  ;;  %2737 = vrot.lane.b32.xlu1 %v8113_v18, %s10543_s5 }
 0x501   :  { %10646 = vst [vmem:[#allocation59_spill] sm:$0xff] %v8201_v24 }
 0x502   :  { %2743 = vrot.lane.b32.xlu0 %v8119_v4, %s10543_s5  ;;  %v8207_v60 = vpop.permute.xlu1 %2601 }
 0x503   :  { %10647 = vst [vmem:[#allocation61_spill] sm:$0xff] %v8207_v60 }
 0x504   :  { %v8209_v57 = vpop.permute.xlu0 %2607  ;;  %2665 = vrot.lane.b32.xlu1 %v8101_v46, %s10553_s1 }
 0x505   :  { %10648 = vst [vmem:[#allocation62_spill] sm:$0xff] %v8209_v57 }
 0x506   :  { %2671 = vrot.lane.b32.xlu0 %v8107_v13, %s10553_s1  ;;  %v3100_v47 = vpop.permute.xlu1 %3099 }
 0x508   :  { %v3106_v55 = vpop.permute.xlu0 %3105  ;;  %2677 = vrot.lane.b32.xlu1 %v8113_v18, %s10553_s1 }
 0x50a   :  { %2683 = vrot.lane.b32.xlu0 %v8119_v4, %s10553_s1  ;;  %v3112_v24 = vpop.permute.xlu1 %3111 }
 0x50c   :  { %v3118_v17 = vpop.permute.xlu0 %3117  ;;  %2605 = vrot.lane.b32.xlu1 %v8101_v46, %s10562_s30 }
 0x50d   :  { %v3131_v39 = vsel %vm973_vm0, %v3118_v17, %v3100_v47 }
 0x50e   :  { %2611 = vrot.lane.b32.xlu0 %v8107_v13, %s10562_s30  ;;  %v8223_v60 = vpop.permute.xlu1 %3039 }
 0x510   :  { %v8225_v57 = vpop.permute.xlu0 %3045  ;;  %2617 = vrot.lane.b32.xlu1 %v8113_v18, %s10562_s30 }
 0x512   :  { %2623 = vrot.lane.b32.xlu0 %v8119_v4, %s10562_s30  ;;  %v8231_v8 = vpop.permute.xlu1 %3051 }
 0x514   :  { %v8233_v20 = vpop.permute.xlu0 %3057  ;;  %2613 = vrot.lane.b32.xlu1 %v7949_v21, %s10562_s30  ;;  %v3590_v21 = vld [vmem:[%s10281_s11 + $0x8] sm:$0xff] }
 0x516   :  { %2619 = vrot.lane.b32.xlu0 %v7953_v9, %s10562_s30  ;;  %v8242_v23 = vpop.permute.xlu1 %2979 }
 0x518   :  { %v8247_v5 = vpop.permute.xlu0 %2985  ;;  %3610 = vperm.xlu1 %5962, %v3592_v41  }
 0x51a   :  { %3605 = vperm.xlu0 %5961, %v3591_v30   ;;  %v8252_v37 = vpop.permute.xlu1 %2991 }
 0x51c   :  { %v8254_v18 = vpop.permute.xlu0 %2997  ;;  %3600 = vperm.xlu1 %5962, %v3590_v21  }
 0x51e   :  { %v8256_v9 = vpop.permute.xlu1 %2919 }
 0x520   :  { %v8258_v15 = vpop.permute.xlu0 %2925 }
 0x522   :  { %v8260_v36 = vpop.permute.xlu1 %2931 }
 0x524   :  { %v8262_v6 = vpop.permute.xlu0 %2937 }
 0x526   :  { %v8264_v35 = vpop.permute.xlu1 %2783 }
 0x527   :  { %10649 = vst [vmem:[#allocation63_spill] sm:$0xff] %v8264_v35 }
 0x528   :  { %v8266_v41 = vpop.permute.xlu0 %2789 }
 0x529   :  { %10650 = vst [vmem:[#allocation64_spill] sm:$0xff] %v8266_v41 }
 0x52a   :  { %v8268_v10 = vpop.permute.xlu1 %2795 }
 0x52b   :  { %10651 = vst [vmem:[#allocation65_spill] sm:$0xff] %v8268_v10 }
 0x52c   :  { %v8270_v30 = vpop.permute.xlu0 %2801 }
 0x52d   :  { %10652 = vst [vmem:[#allocation66_spill] sm:$0xff] %v8270_v30 }
 0x52e   :  { %v8272_v59 = vpop.permute.xlu1 %2723 }
 0x52f   :  { %10653 = vst [vmem:[#allocation67_spill] sm:$0xff] %v8272_v59 }
 0x530   :  { %v8274_v3 = vpop.permute.xlu0 %2729 }
 0x531   :  { %10654 = vst [vmem:[#allocation68_spill] sm:$0xff] %v8274_v3 }
 0x532   :  { %v8276_v21 = vpop.permute.xlu1 %2735 }
 0x533   :  { %10655 = vst [vmem:[#allocation69_spill] sm:$0xff] %v8276_v21 }
 0x534   :  { %v8278_v4 = vpop.permute.xlu0 %2741 }
 0x535   :  { %10656 = vst [vmem:[#allocation70_spill] sm:$0xff] %v8278_v4 }
 0x536   :  { %v8280_v46 = vpop.permute.xlu1 %2663 }
 0x537   :  { %10657 = vst [vmem:[#allocation71_spill] sm:$0xff] %v8280_v46 }
 0x538   :  { %v8282_v2 = vpop.permute.xlu0 %2669 }
 0x539   :  { %10658 = vst [vmem:[#allocation72_spill] sm:$0xff] %v8282_v2  ;;  %v3125_v2 = vsel %vm973_vm0, %v3106_v55, %v3112_v24 }
 0x53a   :  { %v8284_v13 = vpop.permute.xlu1 %2675 }
 0x53b   :  { %10659 = vst [vmem:[#allocation73_spill] sm:$0xff] %v8284_v13 }
 0x53c   :  { %v8286_v35 = vpop.permute.xlu0 %2681 }
 0x53d   :  { %10660 = vst [vmem:[#allocation74_spill] sm:$0xff] %v8286_v35 }
 0x53e   :  { %v8288_v41 = vpop.permute.xlu1 %2603 }
 0x53f   :  { %10661 = vst [vmem:[#allocation75_spill] sm:$0xff] %v8288_v41  ;;  %v3127_v41 = vsel %vm973_vm0, %v8083_v11, %v8087_v22 }
 0x540   :  { %v8290_v10 = vpop.permute.xlu0 %2609 }
 0x541   :  { %10662 = vst [vmem:[#allocation76_spill] sm:$0xff] %v8290_v10 }
 0x542   :  { %v8292_v30 = vpop.permute.xlu1 %2615 }
 0x543   :  { %10663 = vst [vmem:[#allocation77_spill] sm:$0xff] %v8292_v30  ;;  %v3124_v30 = vsel %vm973_vm0, %v8087_v22, %v8094_v49  ;;  %v3122_v22 = vsel %vm973_vm0, %v3112_v24, %v3118_v17  ;;  %v3133_v17 = vmul.f32 %v3127_v41, %v6379_v28 }
 0x544   :  { %v8294_v59 = vpop.permute.xlu0 %2621 }
 0x545   :  { %10664 = vst [vmem:[#allocation78_spill] sm:$0xff] %v8294_v59  ;;  %v3128_v59 = vsel %vm973_vm0, %v3100_v47, %v3106_v55  ;;  %v3130_v47 = vsel %vm973_vm0, %v8097_v58, %v8083_v11 }
 0x546   :  { %v3102_v3 = vpop.permute.xlu1 %3101 }
 0x548   :  { %v3108_v21 = vpop.permute.xlu0 %3107 }
 0x549   :  { %v3129_v4 = vsel %vm973_vm0, %v3102_v3, %v3108_v21 }
 0x54a   :  { %v3114_v46 = vpop.permute.xlu1 %3113 }
 0x54b   :  { %v3126_v13 = vsel %vm973_vm0, %v3108_v21, %v3114_v46  ;;  %v3141_v21 = vmul.f32 %v3129_v4, %v6379_v28  ;;  %v3065_v4 = vsel %vm892_vm1, %v8225_v57, %v8231_v8 }
 0x54c   :  { %v3120_v10 = vpop.permute.xlu0 %3119  ;;  %v3142_v35 = vmul.f32 %v3126_v13, %v6372_v26  ;;  %v3138_v13 = vmul.f32 %v3125_v2, %v6372_v26  ;;  %v3134_v2 = vmul.f32 %v3124_v30, %v6372_v26  ;;  %v3071_v30 = vsel %vm892_vm1, %v8233_v20, %v8223_v60 }
 0x54d   :  { %v3123_v0 = vsel %vm973_vm0, %v3114_v46, %v3120_v10  ;;  %v3132_v38 = vsel %vm973_vm0, %v3120_v10, %v3102_v3  ;;  %v3137_v46 = vmul.f32 %v3128_v59, %v6379_v28  ;;  %v3121_v3 = vsel %vm973_vm0, %v8094_v49, %v8097_v58 }
 0x54e   :  { %v3143_v33 = vmul.f32 %v3123_v0, %v6382_v29  ;;  %3229 = vmatprep.subr.mxu0 %v3142_v35  ;;  %v3042_v55 = vpop.permute.xlu1 %3041  ;;  %v3144_v12 = vmul.f32 %v3132_v38, %v6376_v27  ;;  %v3140_v35 = vmul.f32 %v3131_v39, %v6376_v27  ;;  %v3139_v10 = vmul.f32 %v3122_v22, %v6382_v29 }
 0x54f   :  { %3230 = vmatpush1.msra.mxu0 %v3141_v21  ;;  %v3136_v49 = vmul.f32 %v3130_v47, %v6376_v27  ;;  %v3135_v58 = vmul.f32 %v3121_v3, %v6382_v29  ;;  %v3067_v38 = vsel %vm892_vm1, %v8105_v32, %v8109_v31  ;;  %v3068_v0 = vsel %vm892_vm1, %v8223_v60, %v8225_v57 }
 0x550   :  { %v3048_v24 = vpop.permute.xlu0 %3047  ;;  %3231 = vmatprep.subr.mxu0 %v3138_v13  ;;  %3318 = vmatprep.subr.mxu1 %v3144_v12  ;;  %v3062_v57 = vsel %vm892_vm1, %v8231_v8, %v8233_v20  ;;  %v3078_v60 = vmul.f32 %v3065_v4, %v6471_v42  ;;  %v3070_v3 = vsel %vm892_vm1, %v8121_v40, %v8105_v32 }
 0x551   :  { %3232 = vmatpush1.msra.mxu0 %v3137_v46  ;;  %3319 = vmatpush1.msra.mxu1 %v3143_v33  ;;  %v3069_v59 = vsel %vm892_vm1, %v3042_v55, %v3048_v24  ;;  %v3064_v33 = vsel %vm892_vm1, %v8109_v31, %v8117_v56  ;;  %v3061_v20 = vsel %vm892_vm1, %v8117_v56, %v8121_v40 }
 0x552   :  { %3233 = vmatprep.subr.mxu0 %v3134_v2  ;;  %3320 = vmatprep.subr.mxu1 %v3140_v35  ;;  %v3054_v11 = vpop.permute.xlu1 %3053  ;;  %v3081_v21 = vmul.f32 %v3069_v59, %v6480_v45  ;;  %v3080_v2 = vmul.f32 %v3071_v30, %v6474_v43  ;;  %v3073_v35 = vmul.f32 %v3067_v38, %v6480_v45 }
 0x553   :  { %v3066_v12 = vsel %vm892_vm1, %v3048_v24, %v3054_v11  ;;  %3234 = vmatpush1.msra.mxu0 %v3133_v17  ;;  %3321 = vmatpush1.msra.mxu1 %v3139_v10  ;;  %v3074_v24 = vmul.f32 %v3064_v33, %v6471_v42  ;;  %v3079_v17 = vmul.f32 %v3062_v57, %v6477_v44 }
 0x554   :  { %v3060_v39 = vpop.permute.xlu0 %3059  ;;  %3322 = vmatprep.subr.mxu1 %v3136_v49  ;;  %v3082_v41 = vmul.f32 %v3066_v12, %v6471_v42  ;;  %v3076_v56 = vmul.f32 %v3070_v3, %v6474_v43  ;;  %v3075_v40 = vmul.f32 %v3061_v20, %v6477_v44  ;;  %v3005_v59 = vsel %vm811_vm2, %v8247_v5, %v8252_v37 }
 0x555   :  { %v3063_v22 = vsel %vm892_vm1, %v3054_v11, %v3060_v39  ;;  %v3072_v31 = vsel %vm892_vm1, %v3060_v39, %v3042_v55  ;;  %3323 = vmatpush1.msra.mxu1 %v3135_v58  ;;  %v3077_v55 = vmul.f32 %v3068_v0, %v6480_v45  ;;  %v3007_v49 = vsel %vm811_vm2, %v8127_v14, %v8129_v1 }
 0x556   :  { %v3083_v13 = vmul.f32 %v3063_v22, %v6477_v44  ;;  %3235 = vmatprep.subr.mxu0 %v3082_v41  ;;  %v2982_v47 = vpop.permute.xlu1 %2981  ;;  %v3084_v46 = vmul.f32 %v3072_v31, %v6474_v43  ;;  %v3004_v58 = vsel %vm811_vm2, %v8129_v1, %v8135_v48  ;;  %v3008_v4 = vsel %vm811_vm2, %v8242_v23, %v8247_v5 }
 0x557   :  { %3236 = vmatpush1.msra.mxu0 %v3081_v21  ;;  %v3011_v33 = vsel %vm811_vm2, %v8254_v18, %v8242_v23  ;;  %v3002_v5 = vsel %vm811_vm2, %v8252_v37, %v8254_v18  ;;  %v3018_v23 = vmul.f32 %v3005_v59, %v6567_v61  ;;  %v3010_v22 = vsel %vm811_vm2, %v8137_v34, %v8127_v14 }
 0x558   :  { %v2988_v8 = vpop.permute.xlu0 %2987  ;;  %3237 = vmatprep.subr.mxu0 %v3078_v60  ;;  %3324 = vmatprep.subr.mxu1 %v3084_v46  ;;  %v3017_v31 = vmul.f32 %v3008_v4, %v6576_v16  ;;  %v3001_v37 = vsel %vm811_vm2, %v8135_v48, %v8137_v34  ;;  %v3014_v57 = vmul.f32 %v3004_v58, %v6567_v61 }
 0x559   :  { %3238 = vmatpush1.msra.mxu0 %v3077_v55  ;;  %3325 = vmatpush1.msra.mxu1 %v3083_v13  ;;  %v3009_v32 = vsel %vm811_vm2, %v2982_v47, %v2988_v8  ;;  %v3020_v13 = vmul.f32 %v3011_v33, %v6570_v62  ;;  %v3019_v60 = vmul.f32 %v3002_v5, %v6573_v63  ;;  %v10667_v5 = vld [vmem:[#allocation39_spill] sm:$0xff] }
 0x55a   :  { %3239 = vmatprep.subr.mxu0 %v3074_v24  ;;  %3326 = vmatprep.subr.mxu1 %v3080_v2  ;;  %v2994_v10 = vpop.permute.xlu1 %2993  ;;  %v3021_v0 = vmul.f32 %v3009_v32, %v6576_v16  ;;  %v3016_v48 = vmul.f32 %v3010_v22, %v6570_v62  ;;  %v3015_v34 = vmul.f32 %v3001_v37, %v6573_v63 }
 0x55b   :  { %v3006_v11 = vsel %vm811_vm2, %v2988_v8, %v2994_v10  ;;  %3240 = vmatpush1.msra.mxu0 %v3073_v35  ;;  %3327 = vmatpush1.msra.mxu1 %v3079_v17  ;;  %v2945_v3 = vsel %vm730_vm3, %v8258_v15, %v8260_v36  ;;  %v2947_v20 = vsel %vm730_vm3, %v8143_v54, %v8145_v25 }
 0x55c   :  { %v3000_v12 = vpop.permute.xlu0 %2999  ;;  %3328 = vmatprep.subr.mxu1 %v3076_v56  ;;  %v3022_v38 = vmul.f32 %v3006_v11, %v6567_v61  ;;  %v2944_v8 = vsel %vm730_vm3, %v8145_v25, %v8151_v7  ;;  %v2948_v24 = vsel %vm730_vm3, %v8256_v9, %v8258_v15  ;;  %v2951_v17 = vsel %vm730_vm3, %v8262_v6, %v8256_v9  ;;  %v10665_v11 = vld [vmem:[#allocation33_spill] sm:$0xff] }
 0x55d   :  { %v3003_v39 = vsel %vm811_vm2, %v2994_v10, %v3000_v12  ;;  %v3012_v1 = vsel %vm811_vm2, %v3000_v12, %v2982_v47  ;;  %3329 = vmatpush1.msra.mxu1 %v3075_v40  ;;  %v3013_v47 = vmul.f32 %v3007_v49, %v6576_v16  ;;  %v2942_v15 = vsel %vm730_vm3, %v8260_v36, %v8262_v6 }
 0x55e   :  { %v3023_v41 = vmul.f32 %v3003_v39, %v6573_v63  ;;  %3241 = vmatprep.subr.mxu0 %v3022_v38  ;;  %v2922_v30 = vpop.permute.xlu1 %2921  ;;  %v3024_v21 = vmul.f32 %v3012_v1, %v6570_v62  ;;  %v2958_v9 = vmul.f32 %v2945_v3, %v6663_v50  ;;  %v2950_v49 = vsel %vm730_vm3, %v10665_v11, %v8143_v54  ;;  %v10666_v1 = vld [vmem:[#allocation52_spill] sm:$0xff]  ;;  %v10675_v3 = vld [vmem:[#allocation9_spill] sm:$0xff] }
 0x55f   :  { %3242 = vmatpush1.msra.mxu0 %v3021_v0  ;;  %v2957_v58 = vmul.f32 %v2948_v24, %v6672_v53  ;;  %v2941_v6 = vsel %vm730_vm3, %v8151_v7, %v10665_v11  ;;  %v2954_v4 = vmul.f32 %v2944_v8, %v6663_v50  ;;  %v2960_v12 = vmul.f32 %v2951_v17, %v6666_v51  ;;  %v3157_v7 = vld [vmem:[%s10280_s10] sm:$0xff]  ;;  %v10676_v8 = vld [vmem:[#allocation50_spill] sm:$0xff]  ;;  %v10677_v24 = vld [vmem:[#allocation11_spill] sm:$0xff] }
 0x560   :  { %v2928_v18 = vpop.permute.xlu0 %2927  ;;  %3243 = vmatprep.subr.mxu0 %v3018_v23  ;;  %3330 = vmatprep.subr.mxu1 %v3024_v21  ;;  %v2953_v38 = vmul.f32 %v2947_v20, %v6672_v53  ;;  %v2959_v33 = vmul.f32 %v2942_v15, %v6669_v52  ;;  %v2956_v0 = vmul.f32 %v2950_v49, %v6666_v51  ;;  %v10669_v21 = vld [vmem:[#allocation55_spill] sm:$0xff]  ;;  %v10679_v17 = vld [vmem:[#allocation32_spill] sm:$0xff]  ;;  %v10684_v11 = vld [vmem:[#allocation66_spill] sm:$0xff] }
 0x561   :  { %3244 = vmatpush1.msra.mxu0 %v3017_v31  ;;  %3331 = vmatpush1.msra.mxu1 %v3023_v41  ;;  %v2949_v14 = vsel %vm730_vm3, %v2922_v30, %v2928_v18  ;;  %v2955_v39 = vmul.f32 %v2941_v6, %v6669_v52  ;;  %v2811_v41 = vsel %vm545_vm4, %v10667_v5, %v10666_v1  ;;  %v10685_v6 = vld [vmem:[#allocation41_spill] sm:$0xff] }
 0x562   :  { %3245 = vmatprep.subr.mxu0 %v3014_v57  ;;  %3332 = vmatprep.subr.mxu1 %v3020_v13  ;;  %v2934_v46 = vpop.permute.xlu1 %2933  ;;  %v2961_v32 = vmul.f32 %v2949_v14, %v6672_v53  ;;  %v2814_v31 = vsel %vm545_vm4, %v10669_v21, %v10667_v5  ;;  %v10671_v57 = vld [vmem:[#allocation10_spill] sm:$0xff]  ;;  %v10673_v14 = vld [vmem:[#allocation56_spill] sm:$0xff] }
 0x563   :  { %v2946_v55 = vsel %vm730_vm3, %v2928_v18, %v2934_v46  ;;  %3246 = vmatpush1.msra.mxu0 %v3013_v47  ;;  %3333 = vmatpush1.msra.mxu1 %v3019_v60  ;;  %v10670_v18 = vld [vmem:[#allocation36_spill] sm:$0xff]  ;;  %v10672_v60 = vld [vmem:[#allocation53_spill] sm:$0xff] }
 0x564   :  { %v2940_v2 = vpop.permute.xlu0 %2939  ;;  %3334 = vmatprep.subr.mxu1 %v3016_v48  ;;  %v2962_v35 = vmul.f32 %v2946_v55, %v6663_v50  ;;  %v10674_v48 = vld [vmem:[#allocation8_spill] sm:$0xff]  ;;  %v2817_v55 = vmul.f32 %v2814_v31, %v10675_v3 }
 0x565   :  { %v2943_v10 = vsel %vm730_vm3, %v2934_v46, %v2940_v2  ;;  %v2952_v25 = vsel %vm730_vm3, %v2940_v2, %v2922_v30  ;;  %3335 = vmatpush1.msra.mxu1 %v3015_v34  ;;  %v10668_v30 = vld [vmem:[#allocation51_spill] sm:$0xff]  ;;  %v2818_v34 = vmul.f32 %v2811_v41, %v10674_v48 }
 0x566   :  { %v2963_v56 = vmul.f32 %v2943_v10, %v6669_v52  ;;  %3247 = vmatprep.subr.mxu0 %v2962_v35  ;;  %v2786_v40 = vpop.permute.xlu1 %2785  ;;  %v2964_v59 = vmul.f32 %v2952_v25, %v6666_v51  ;;  %v2808_v23 = vsel %vm545_vm4, %v10666_v1, %v10668_v30  ;;  %v2805_v22 = vsel %vm545_vm4, %v10668_v30, %v10669_v21  ;;  %v10678_v35 = vld [vmem:[#allocation38_spill] sm:$0xff]  ;;  %v10680_v10 = vld [vmem:[#allocation64_spill] sm:$0xff]  ;;  %v10681_v25 = vld [vmem:[#allocation63_spill] sm:$0xff] }
 0x567   :  { %3248 = vmatpush1.msra.mxu0 %v2961_v32  ;;  %v8518_v13 = vmul.f32 %v2808_v23, %v10671_v57  ;;  %v2820_v2 = vmul.f32 %v2805_v22, %v10677_v24  ;;  %v2751_v32 = vsel %vm464_vm6, %v10679_v17, %v10678_v35  ;;  %v2812_v15 = vsel %vm545_vm4, %v10681_v25, %v10680_v10  ;;  %v10690_v1 = vld [vmem:[#allocation43_spill] sm:$0xff]  ;;  %v10691_v30 = vld [vmem:[#allocation12_spill] sm:$0xff] }
 0x568   :  { %v2792_v36 = vpop.permute.xlu0 %2791  ;;  %3249 = vmatprep.subr.mxu0 %v2958_v9  ;;  %3336 = vmatprep.subr.mxu1 %v2964_v59  ;;  %v10683_v9 = vld [vmem:[#allocation42_spill] sm:$0xff]  ;;  %v2815_v49 = vsel %vm545_vm4, %v10684_v11, %v10681_v25  ;;  %v2822_v5 = vmul.f32 %v2812_v15, %v10674_v48  ;;  %v2758_v23 = vmul.f32 %v2751_v32, %v10691_v30  ;;  %v10695_v25 = vld [vmem:[#allocation13_spill] sm:$0xff] }
 0x569   :  { %3250 = vmatpush1.msra.mxu0 %v2957_v58  ;;  %3337 = vmatpush1.msra.mxu1 %v2963_v56  ;;  %v2813_v47 = vsel %vm545_vm4, %v2786_v40, %v2792_v36  ;;  %v2821_v21 = vmul.f32 %v2815_v49, %v10675_v3  ;;  %v10697_v49 = vld [vmem:[#allocation34_spill] sm:$0xff] }
 0x56a   :  { %3251 = vmatprep.subr.mxu0 %v2954_v4  ;;  %3338 = vmatprep.subr.mxu1 %v2960_v12  ;;  %v2798_v54 = vpop.permute.xlu1 %2797  ;;  %v10686_v4 = vld [vmem:[#allocation54_spill] sm:$0xff]  ;;  %v2826_v12 = vmul.f32 %v2813_v47, %v10674_v48 }
 0x56b   :  { %3252 = vmatpush1.msra.mxu0 %v2953_v38  ;;  %3339 = vmatpush1.msra.mxu1 %v2959_v33  ;;  %v2810_v58 = vsel %vm545_vm4, %v2792_v36, %v2798_v54  ;;  %v10687_v38 = vld [vmem:[#allocation65_spill] sm:$0xff] }
 0x56c   :  { %v2804_v37 = vpop.permute.xlu0 %2803  ;;  %3340 = vmatprep.subr.mxu1 %v2956_v0  ;;  %3413 = vmatprep.subr.mxu0 %v10670_v18  ;;  %v2809_v33 = vsel %vm545_vm4, %v10680_v10, %v10687_v38  ;;  %v2806_v0 = vsel %vm545_vm4, %v10687_v38, %v10684_v11  ;;  %v10689_v36 = vld [vmem:[#allocation49_spill] sm:$0xff]  ;;  %v2827_v22 = vmul.f32 %v2810_v58, %v10671_v57  ;;  %v10698_v58 = vld [vmem:[#allocation35_spill] sm:$0xff] }
 0x56d   :  { %5707 = vmatmul.mubr.msk.f32.vlgmr.msra.gmra.mxu0 %vm2143_vm9, %v3157_v7  ;;  %3341 = vmatpush1.msra.mxu1 %v2955_v39  ;;  %v2816_v20 = vsel %vm545_vm4, %v2804_v37, %v2786_v40  ;;  %v2807_v56 = vsel %vm545_vm4, %v2798_v54, %v2804_v37  ;;  %v10682_v40 = vld [vmem:[#allocation37_spill] sm:$0xff]  ;;  %v10688_v39 = vld [vmem:[#allocation48_spill] sm:$0xff]  ;;  %v2823_v47 = vmul.f32 %v2809_v33, %v10671_v57 }
 0x56e   :  { %3414 = vmatpush1.msra.mxu0 %v10672_v60  ;;  %3502 = vmatprep.subr.mxu1 %v10673_v14  ;;  %v2726_v46 = vpop.permute.xlu1 %2725  ;;  %v2828_v41 = vmul.f32 %v2807_v56, %v10677_v24  ;;  %v10692_v37 = vld [vmem:[#allocation40_spill] sm:$0xff]  ;;  %v2824_v14 = vmul.f32 %v2806_v0, %v10677_v24  ;;  %v10700_v0 = vld [vmem:[#allocation15_spill] sm:$0xff] }
 0x56f   :  { %3415 = vmatprep.subr.mxu0 %v10676_v8  ;;  %5711 = vmatmul.mubr.msk.f32.vlgmr.msra.gmra.mxu1 %vm2143_vm9, %v3157_v7  ;;  %v2825_v7 = vmul.f32 %v2816_v20, %v10675_v3  ;;  %v10693_v20 = vld [vmem:[#allocation68_spill] sm:$0xff]  ;;  %v10694_v8 = vld [vmem:[#allocation67_spill] sm:$0xff] }
 0x570   :  { %3416 = vmatpush1.msra.mxu0 %v10682_v40  ;;  %3503 = vmatpush1.msra.mxu1 %v10683_v9  ;;  %v2732_v59 = vpop.permute.xlu0 %2731  ;;  %v2752_v32 = vsel %vm464_vm6, %v10694_v8, %v10693_v20  ;;  %v10696_v40 = vld [vmem:[#allocation70_spill] sm:$0xff]  ;;  %v1459_v24 = vld [vmem:[%s10515_s29] sm:$0xff]  ;;  %s6045_s29 = smov [#allocation5]  }
 0x571   :  { %3417 = vmatprep.subr.mxu0 %v10685_v6  ;;  %3504 = vmatprep.subr.mxu1 %v10686_v4  ;;  %v2753_v31 = vsel %vm464_vm6, %v2726_v46, %v2732_v59  ;;  %v2745_v6 = vsel %vm464_vm6, %v10698_v58, %v10697_v49  ;;  %v2754_v4 = vsel %vm464_vm6, %v10697_v49, %v10679_v17  ;;  %v10710_v49 = vld [vmem:[#allocation59_spill] sm:$0xff] }
 0x572   :  { %3418 = vmatpush1.msra.mxu0 %v10688_v39  ;;  %3505 = vmatpush1.msra.mxu1 %v10689_v36  ;;  %v2738_v54 = vpop.permute.xlu1 %2737  ;;  %v2766_v11 = vmul.f32 %v2753_v31, %v10691_v30  ;;  %v2762_v33 = vmul.f32 %v2752_v32, %v10691_v30  ;;  %v10701_v39 = vld [vmem:[#allocation14_spill] sm:$0xff] }
 0x573   :  { %3419 = vmatprep.subr.mxu0 %v2826_v12  ;;  %3506 = vmatprep.subr.mxu1 %v10690_v1  ;;  %v2750_v9 = vsel %vm464_vm6, %v2732_v59, %v2738_v54  ;;  %v10699_v12 = vld [vmem:[#allocation69_spill] sm:$0xff]  ;;  %v2757_v1 = vmul.f32 %v2754_v4, %v10695_v25 }
 0x574   :  { %3420 = vmatpush1.msra.mxu0 %v2825_v7  ;;  %3507 = vmatpush1.msra.mxu1 %v10692_v37  ;;  %v2744_v18 = vpop.permute.xlu0 %2743  ;;  %v2746_v38 = vsel %vm464_vm6, %v10699_v12, %v10696_v40  ;;  %v2749_v59 = vsel %vm464_vm6, %v10693_v20, %v10699_v12  ;;  %v2767_v36 = vmul.f32 %v2750_v9, %v10701_v39  ;;  %v10712_v4 = vld [vmem:[#allocation73_spill] sm:$0xff] }
 0x575   :  { %v2756_v60 = vsel %vm464_vm6, %v2744_v18, %v2726_v46  ;;  %3421 = vmatprep.subr.mxu0 %v2822_v5  ;;  %3508 = vmatprep.subr.mxu1 %v2828_v41  ;;  %v2747_v10 = vsel %vm464_vm6, %v2738_v54, %v2744_v18  ;;  %v2755_v46 = vsel %vm464_vm6, %v10696_v40, %v10694_v8  ;;  %v10705_v8 = vld [vmem:[#allocation17_spill] sm:$0xff] }
 0x576   :  { %v2765_v15 = vmul.f32 %v2756_v60, %v10695_v25  ;;  %3422 = vmatpush1.msra.mxu0 %v2821_v21  ;;  %3509 = vmatpush1.msra.mxu1 %v2827_v22  ;;  %v2666_v56 = vpop.permute.xlu1 %2665  ;;  %v2768_v7 = vmul.f32 %v2747_v10, %v10700_v0  ;;  %v2761_v17 = vmul.f32 %v2755_v46, %v10695_v25  ;;  %v10702_v21 = vld [vmem:[#allocation72_spill] sm:$0xff]  ;;  %v10703_v22 = vld [vmem:[#allocation71_spill] sm:$0xff]  ;;  %v10708_v46 = vld [vmem:[#allocation58_spill] sm:$0xff] }
 0x577   :  { %3423 = vmatprep.subr.mxu0 %v2818_v34  ;;  %3510 = vmatprep.subr.mxu1 %v2824_v14  ;;  %v2764_v5 = vmul.f32 %v2746_v38, %v10700_v0  ;;  %v2763_v41 = vmul.f32 %v2749_v59, %v10701_v39  ;;  %v2692_v31 = vsel %vm383_vm7, %v10703_v22, %v10702_v21  ;;  %v3158_v14 = vld [vmem:[%s10280_s10 + $0x8] sm:$0xff] }
 0x578   :  { %3424 = vmatpush1.msra.mxu0 %v2817_v55  ;;  %3511 = vmatpush1.msra.mxu1 %v2823_v47  ;;  %v2672_v34 = vpop.permute.xlu0 %2671  ;;  %v2760_v37 = vmul.f32 %v2745_v6, %v10700_v0  ;;  %v10704_v47 = vld [vmem:[#allocation16_spill] sm:$0xff]  ;;  %v10711_v6 = vld [vmem:[#allocation74_spill] sm:$0xff]  ;;  %v2689_v59 = vsel %vm383_vm7, %v10702_v21, %v10712_v4 }
 0x579   :  { %3425 = vmatprep.subr.mxu0 %v2766_v11  ;;  %3512 = vmatprep.subr.mxu1 %v2820_v2  ;;  %v2693_v55 = vsel %vm383_vm7, %v2666_v56, %v2672_v34  ;;  %v2748_v2 = vsel %vm464_vm6, %v10678_v35, %v10698_v58  ;;  %v10709_v11 = vmov 0.0   ;;  %v2694_v58 = vsel %vm383_vm7, %v10710_v49, %v10708_v46  ;;  %v3159_v21 = vld [vmem:[%s10280_s10 + $0x10] sm:$0xff] }
 0x57a   :  { %3426 = vmatpush1.msra.mxu0 %v2765_v15  ;;  %3513 = vmatpush1.msra.mxu1 %v8518_v13  ;;  %v2678_v54 = vpop.permute.xlu1 %2677  ;;  %v2706_v60 = vmul.f32 %v2693_v55, %v10704_v47  ;;  %v10706_v15 = vld [vmem:[#allocation19_spill] sm:$0xff]  ;;  %v2686_v12 = vsel %vm383_vm7, %v10712_v4, %v10711_v6  ;;  %v2695_v38 = vsel %vm383_vm7, %v10711_v6, %v10703_v22 }
 0x57b   :  { %3427 = vmatprep.subr.mxu0 %v2762_v33  ;;  %3514 = vmatprep.subr.mxu1 %v2768_v7  ;;  %v2690_v20 = vsel %vm383_vm7, %v2672_v34, %v2678_v54  ;;  %v10713_v33 = vld [vmem:[#allocation18_spill] sm:$0xff]  ;;  %v3160_v6 = vld [vmem:[%s10280_s10 + $0x18] sm:$0xff] }
 0x57c   :  { %3428 = vmatpush1.msra.mxu0 %v2761_v17  ;;  %3515 = vmatpush1.msra.mxu1 %v2767_v36  ;;  %v2684_v13 = vpop.permute.xlu0 %2683  ;;  %v2707_v7 = vmul.f32 %v2690_v20, %v10713_v33  ;;  %v2702_v17 = vmul.f32 %v2692_v31, %v10704_v47  ;;  %v2697_v31 = vmul.f32 %v2694_v58, %v10705_v8 }
 0x57d   :  { %v2687_v35 = vsel %vm383_vm7, %v2678_v54, %v2684_v13  ;;  %v2696_v18 = vsel %vm383_vm7, %v2684_v13, %v2666_v56  ;;  %3429 = vmatprep.subr.mxu0 %v2758_v23  ;;  %3516 = vmatprep.subr.mxu1 %v2764_v5  ;;  %v2759_v56 = vmul.f32 %v2748_v2, %v10701_v39  ;;  %v10707_v23 = vld [vmem:[#allocation57_spill] sm:$0xff]  ;;  %v10714_v54 = vld [vmem:[#allocation60_spill] sm:$0xff] }
 0x57e   :  { %v2705_v32 = vmul.f32 %v2696_v18, %v10705_v8  ;;  %3430 = vmatpush1.msra.mxu0 %v2757_v1  ;;  %3517 = vmatpush1.msra.mxu1 %v2763_v41  ;;  %v2606_v10 = vpop.permute.xlu1 %2605  ;;  %v2708_v40 = vmul.f32 %v2687_v35, %v10706_v15  ;;  %v2691_v9 = vsel %vm383_vm7, %v10708_v46, %v10707_v23  ;;  %v10718_v46 = vld [vmem:[#allocation75_spill] sm:$0xff] }
 0x57f   :  { %3291 = vmatprep.mubr.f32.mxu0 %v10709_v11  ;;  %3431 = vmatprep.subr.mxu0 %v2706_v60  ;;  %v2698_v55 = vmul.f32 %v2691_v9, %v10704_v47  ;;  %v2685_v2 = vsel %vm383_vm7, %v10714_v54, %v10710_v49  ;;  %v2701_v1 = vmul.f32 %v2695_v38, %v10705_v8  ;;  %v10715_v60 = vld [vmem:[#allocation20_spill] sm:$0xff]  ;;  %v10719_v49 = vld [vmem:[#allocation21_spill] sm:$0xff] }
 0x580   :  { %3518 = vmatprep.subr.mxu1 %v2760_v37  ;;  %5708 = vmatmul.mubr.msk.f32.gmra.mxu0 %vm2143_vm9, %v3158_v14  ;;  %v2612_v34 = vpop.permute.xlu0 %2611  ;;  %v2704_v5 = vmul.f32 %v2686_v12, %v10706_v15  ;;  %v2688_v22 = vsel %vm383_vm7, %v10707_v23, %v10714_v54  ;;  %v2703_v13 = vmul.f32 %v2689_v59, %v10713_v33  ;;  %v10717_v23 = vld [vmem:[#allocation76_spill] sm:$0xff]  ;;  %v10720_v12 = vld [vmem:[#allocation62_spill] sm:$0xff]  ;;  %v10721_v38 = vld [vmem:[#allocation61_spill] sm:$0xff] }
 0x581   :  { %3519 = vmatpush1.msra.mxu1 %v2759_v56  ;;  %3432 = vmatpush1.msra.mxu0 %v2705_v32  ;;  %v2633_v36 = vsel %vm302_vm8, %v2606_v10, %v2612_v34  ;;  %v2700_v32 = vmul.f32 %v2685_v2, %v10706_v15  ;;  %v2632_v9 = vsel %vm302_vm8, %v10718_v46, %v10717_v23 }
 0x582   :  { %3520 = vmatprep.subr.mxu1 %v2708_v40  ;;  %3380 = vmatprep.mubr.f32.mxu1 %v10709_v11  ;;  %v2618_v41 = vpop.permute.xlu1 %2617  ;;  %v2646_v20 = vmul.f32 %v2633_v36, %v10715_v60  ;;  %v2699_v40 = vmul.f32 %v2688_v22, %v10713_v33  ;;  %v2631_v59 = vsel %vm302_vm8, %v10721_v38, %v10720_v12 }
 0x583   :  { %3433 = vmatprep.subr.mxu0 %v2702_v17  ;;  %3521 = vmatpush1.msra.mxu1 %v2707_v7  ;;  %v10722_v7 = vld [vmem:[#allocation78_spill] sm:$0xff]  ;;  %v2642_v22 = vmul.f32 %v2632_v9, %v10715_v60 }
 0x584   :  { %3297 = vmatprep.mubr.f32.mxu0 %v10709_v11  ;;  %5712 = vmatmul.mubr.msk.f32.gmra.mxu1 %vm2143_vm9, %v3158_v14  ;;  %v2624_v37 = vpop.permute.xlu0 %2623  ;;  %v10716_v14 = vld [vmem:[#allocation23_spill] sm:$0xff] }
 0x585   :  { %3434 = vmatpush1.msra.mxu0 %v2701_v1  ;;  %3522 = vmatprep.subr.mxu1 %v2704_v5  ;;  %v2627_v35 = vsel %vm302_vm8, %v2618_v41, %v2624_v37  ;;  %v2636_v18 = vsel %vm302_vm8, %v2624_v37, %v2606_v10  ;;  %v2630_v10 = vsel %vm302_vm8, %v2612_v34, %v2618_v41  ;;  %v10724_v5 = vld [vmem:[#allocation22_spill] sm:$0xff] }
 0x586   :  { %5709 = vmatmul.mubr.msk.f32.gmra.mxu0 %vm2143_vm9, %v3159_v21  ;;  %3435 = vmatprep.subr.mxu0 %v2698_v55  ;;  %v2648_v56 = vmul.f32 %v2627_v35, %v10716_v14  ;;  %v2645_v58 = vmul.f32 %v2636_v18, %v10719_v49  ;;  %v2635_v34 = vsel %vm302_vm8, %v10722_v7, %v10718_v46  ;;  %v2614_v17 = vpop.permute.xlu1 %2613  ;;  %v10723_v55 = vld [vmem:[#allocation77_spill] sm:$0xff]  ;;  %v2856_v46 = vld [vmem:[%s10279_s9 + $0x18] sm:$0xff] }
 0x587   :  { %3523 = vmatpush1.msra.mxu1 %v2703_v13  ;;  %3436 = vmatpush1.msra.mxu0 %v2697_v31  ;;  %v2626_v54 = vsel %vm302_vm8, %v10723_v55, %v10722_v7  ;;  %v2629_v1 = vsel %vm302_vm8, %v10717_v23, %v10723_v55  ;;  %v2647_v41 = vmul.f32 %v2630_v10, %v10724_v5  ;;  %v2855_v23 = vld [vmem:[%s10279_s9 + $0x10] sm:$0xff] }
 0x588   :  { %3524 = vmatprep.subr.mxu1 %v2700_v32  ;;  %3386 = vmatprep.mubr.f32.mxu1 %v10709_v11  ;;  %v2620_v4 = vpop.permute.xlu0 %2619  ;;  %v2641_v31 = vmul.f32 %v2635_v34, %v10719_v49  ;;  %v2628_v37 = vsel %vm302_vm8, %v10720_v12, %v2614_v17  ;;  %v2644_v35 = vmul.f32 %v2626_v54, %v10716_v14  ;;  %v2853_v32 = vld [vmem:[%s10279_s9] sm:$0xff] }
 0x589   :  { %3437 = vmatprep.subr.mxu0 %v2646_v20  ;;  %3525 = vmatpush1.msra.mxu1 %v2699_v40  ;;  %v2634_v36 = vsel %vm302_vm8, %v2620_v4, %v10721_v38  ;;  %v2625_v2 = vsel %vm302_vm8, %v2614_v17, %v2620_v4  ;;  %v2643_v20 = vmul.f32 %v2629_v1, %v10724_v5 }
 0x58a   :  { %3303 = vmatprep.mubr.f32.mxu0 %v10709_v11  ;;  %5713 = vmatmul.mubr.msk.f32.gmra.mxu1 %vm2143_vm9, %v3159_v21  ;;  %v2637_v13 = vmul.f32 %v2634_v36, %v10719_v49  ;;  %v2638_v21 = vmul.f32 %v2631_v59, %v10715_v60  ;;  %v2640_v18 = vmul.f32 %v2625_v2, %v10716_v14 }
 0x58b   :  { %5710 = vmatmul.mubr.msk.f32.gmra.mxu0 %vm2143_vm9, %v3160_v6  ;;  %3526 = vmatprep.subr.mxu1 %v2648_v56  ;;  %v2639_v40 = vmul.f32 %v2628_v37, %v10724_v5  ;;  %v2854_v56 = vld [vmem:[%s10279_s9 + $0x8] sm:$0xff]  ;;  %s10828_s9 = sld [smem:[#allocation83_spill]] }
 0x58c   :  { %3438 = vmatpush1.msra.mxu0 %v2645_v58  ;;  %3392 = vmatprep.mubr.f32.mxu1 %v10709_v11 }
 0x58d   :  { %3439 = vmatprep.subr.mxu0 %v2642_v22  ;;  %3527 = vmatpush1.msra.mxu1 %v2647_v41 }
 0x58e   :  { %5714 = vmatmul.mubr.msk.f32.gmra.mxu1 %vm2143_vm9, %v3160_v6  ;;  %3440 = vmatpush1.msra.mxu0 %v2641_v31 }
 0x58f   :  { %3528 = vmatprep.subr.mxu1 %v2644_v35  ;;  %3441 = vmatprep.subr.mxu0 %v2638_v21 }
 0x590   :  { %3529 = vmatpush1.msra.mxu1 %v2643_v20  ;;  %3442 = vmatpush1.msra.mxu0 %v2637_v13 }
 0x591   :  { %3475 = vmatprep.mubr.f32.mxu0 %v10709_v11  ;;  %3530 = vmatprep.subr.mxu1 %v2640_v18  ;;  %v9579_v19 = vld [vmem:[%s10828_s9 + $0xf8] sm:$0xff] }
 0x592   :  { %5715 = vmatmul.mubr.msk.f32.vlgmr.msra.gmra.mxu0 %vm2334_vm10, %v2853_v32  ;;  %3531 = vmatpush1.msra.mxu1 %v2639_v40 }
 0x593   :  { %3564 = vmatprep.mubr.f32.mxu1 %v10709_v11  ;;  %3481 = vmatprep.mubr.f32.mxu0 %v10709_v11  ;;  %v8787_v41 = vpop.permute.xlu1 %3610 }
 0x594   :  { %5719 = vmatmul.mubr.msk.f32.vlgmr.msra.gmra.mxu1 %vm2334_vm10, %v2853_v32 }
 0x595   :  { %3570 = vmatprep.mubr.f32.mxu1 %v10709_v11 }
 0x596   :  { %5716 = vmatmul.mubr.msk.f32.gmra.mxu0 %vm2334_vm10, %v2854_v56 }
 0x597   :  { %3487 = vmatprep.mubr.f32.mxu0 %v10709_v11  ;;  %v3601_v32 = vpop.permute.xlu1 %3600 }
 0x598   :  { %5720 = vmatmul.mubr.msk.f32.gmra.mxu1 %vm2334_vm10, %v2854_v56 }
 0x599   :  { %3576 = vmatprep.mubr.f32.mxu1 %v10709_v11 }
 0x59a   :  { %5717 = vmatmul.mubr.msk.f32.gmra.mxu0 %vm2334_vm10, %v2855_v23 }
 0x59b   :  { %3493 = vmatprep.mubr.f32.mxu0 %v10709_v11 }
 0x59c   :  { %5721 = vmatmul.mubr.msk.f32.gmra.mxu1 %vm2334_vm10, %v2855_v23 }
 0x59d   :  { %3582 = vmatprep.mubr.f32.mxu1 %v10709_v11 }
 0x59e   :  { %5718 = vmatmul.mubr.msk.f32.gmra.mxu0 %vm2334_vm10, %v2856_v46 }
 0x59f   :  { %4334 = vmatprep.mubr.f32.mxu0 %v10709_v11 }
 0x5a0   :  { %5722 = vmatmul.mubr.msk.f32.gmra.mxu1 %vm2334_vm10, %v2856_v46 }
 0x5a1   :  { %4405 = vmatprep.mubr.f32.mxu1 %v10709_v11 }
 0x62d   :  { %v3287_v9 = vpop.f32.mrf.mxu0 }
 0x62f   :  { %v3289_v10 = vpop.f32.mrf.mxu0  ;;  %v3376_v58 = vpop.f32.mrf.mxu1 }
 0x631   :  { %v3378_v4 = vpop.f32.mrf.mxu1 }
 0x640   :  { %v3293_v6 = vpop.f32.mrf.mxu0 }
 0x642   :  { %v3295_v12 = vpop.f32.mrf.mxu0 }
 0x644   :  { %v3382_v38 = vpop.f32.mrf.mxu1 }
 0x646   :  { %v8771_v59 = vpop.f32.mrf.mxu0  ;;  %v3384_v7 = vpop.f32.mrf.mxu1 }
 0x648   :  { %v8773_v34 = vpop.f32.mrf.mxu0 }
 0x64a   :  { %v8775_v17 = vpop.f32.mrf.mxu1 }
 0x64b   :  { %v8777_v36 = vpop.f32.mrf.mxu0 }
 0x64c   :  { %v8779_v55 = vpop.f32.mrf.mxu1 }
 0x64d   :  { %v8783_v2 = vpop.f32.mrf.mxu0 }
 0x64e   :  { %v8781_v54 = vpop.f32.mrf.mxu1 }
 0x650   :  { %v8785_v1 = vpop.f32.mrf.mxu1 }
 0x652   :  { %v3477_v22 = vpop.f32.mrf.mxu0 }
 0x653   :  { %v8789_v31 = vadd.f32 %v3477_v22, %v3287_v9 }
 0x654   :  { %v3566_v13 = vpop.f32.mrf.mxu1  ;;  %v3479_v21 = vpop.f32.mrf.mxu0 }
 0x655   :  { %10725 = vst [vmem:[#allocation33_spill] sm:$0xff] %v8789_v31  ;;  %v8791_v37 = vadd.f32 %v3566_v13, %v3376_v58  ;;  %v8793_v35 = vadd.f32 %v3479_v21, %v3289_v10 }
 0x656   :  { %v3568_v18 = vpop.f32.mrf.mxu1  ;;  %v3483_v20 = vpop.f32.mrf.mxu0 }
 0x657   :  { %10726 = vst [vmem:[#allocation52_spill] sm:$0xff] %v8791_v37  ;;  %10727 = vst [vmem:[#allocation39_spill] sm:$0xff] %v8793_v35  ;;  %v8795_v40 = vadd.f32 %v3568_v18, %v3378_v4  ;;  %v3484_v56 = vadd.f32 %v3483_v20, %v3293_v6 }
 0x658   :  { %v3572_v23 = vpop.f32.mrf.mxu1  ;;  %v3485_v46 = vpop.f32.mrf.mxu0 }
 0x659   :  { %10728 = vst [vmem:[#allocation51_spill] sm:$0xff] %v8795_v40  ;;  %v3617_v5 = vadd.f32 %v3601_v32, %v3484_v56  ;;  %v3573_v11 = vadd.f32 %v3572_v23, %v3382_v38  ;;  %v3486_v14 = vadd.f32 %v3485_v46, %v3295_v12  ;;  %v3606_v38 = vpop.permute.xlu0 %3605 }
 0x65a   :  { %v3574_v49 = vpop.f32.mrf.mxu1 }
 0x65b   :  { %v3633_v9 = vmul.f32 0.05, %v3617_v5  ;;  %v3619_v22 = vadd.f32 %v3601_v32, %v3573_v11  ;;  %v3618_v31 = vadd.f32 %v3601_v32, %v3486_v14  ;;  %v3575_v60 = vadd.f32 %v3574_v49, %v3384_v7  ;;  %v3489_v11 = vpop.f32.mrf.mxu0 }
 0x65c   :  { %v3490_v49 = vadd.f32 %v3489_v11, %v8771_v59 }
 0x65d   :  { %v8797_v58 = vmax.f32 %v3617_v5, %v3633_v9  ;;  %v3635_v10 = vmul.f32 0.05, %v3619_v22  ;;  %v3634_v13 = vmul.f32 0.05, %v3618_v31  ;;  %v3620_v21 = vadd.f32 %v3601_v32, %v3575_v60  ;;  %v3578_v60 = vpop.f32.mrf.mxu1  ;;  %v3491_v14 = vpop.f32.mrf.mxu0 }
 0x65e   :  { %v3492_v5 = vadd.f32 %v3491_v14, %v8773_v34  ;;  %v3579_v18 = vadd.f32 %v3578_v60, %v8775_v17 }
 0x65f   :  { %10729 = vst [vmem:[#allocation55_spill] sm:$0xff] %v8797_v58  ;;  %v8799_v37 = vmax.f32 %v3618_v31, %v3634_v13  ;;  %v3636_v4 = vmul.f32 0.05, %v3620_v21  ;;  %4158 = vrot.lane.b32.xlu0 %v8797_v58, %s6033_s28  ;;  %v8803_v6 = vmax.f32 %v3619_v22, %v3635_v10  ;;  %v3580_v7 = vpop.f32.mrf.mxu1  ;;  %v3621_v31 = vadd.f32 %v3606_v38, %v3490_v49  ;;  %v3495_v13 = vpop.f32.mrf.mxu0 }
 0x660   :  { %v3622_v20 = vadd.f32 %v3606_v38, %v3492_v5  ;;  %v3581_v32 = vadd.f32 %v3580_v7, %v8779_v55  ;;  %v3623_v56 = vadd.f32 %v3606_v38, %v3579_v18  ;;  %v3496_v11 = vadd.f32 %v3495_v13, %v8777_v36 }
 0x661   :  { %10730 = vst [vmem:[#allocation36_spill] sm:$0xff] %v8799_v37  ;;  %10731 = vst [vmem:[#allocation53_spill] sm:$0xff] %v8803_v6  ;;  %4164 = vrot.lane.b32.xlu1 %v8799_v37, %s6033_s28  ;;  %v8807_v12 = vmax.f32 %v3620_v21, %v3636_v4  ;;  %v3637_v59 = vmul.f32 0.05, %v3621_v31  ;;  %v3584_v21 = vpop.f32.mrf.mxu1  ;;  %v3497_v4 = vpop.f32.mrf.mxu0 }
 0x662   :  { %v3638_v34 = vmul.f32 0.05, %v3622_v20  ;;  %v3624_v23 = vadd.f32 %v3606_v38, %v3581_v32  ;;  %v3639_v46 = vmul.f32 0.05, %v3623_v56  ;;  %v3498_v60 = vadd.f32 %v3497_v4, %v8783_v2 }
 0x663   :  { %10732 = vst [vmem:[#allocation56_spill] sm:$0xff] %v8807_v12  ;;  %4170 = vrot.lane.b32.xlu0 %v8803_v6, %s6033_s28  ;;  %v8867_v17 = vmax.f32 %v3621_v31, %v3637_v59  ;;  %v3586_v14 = vpop.f32.mrf.mxu1  ;;  %v3625_v49 = vadd.f32 %v8787_v41, %v3496_v11  ;;  %v3585_v5 = vadd.f32 %v3584_v21, %v8781_v54 }
 0x664   :  { %v8871_v55 = vmax.f32 %v3622_v20, %v3638_v34  ;;  %v3640_v9 = vmul.f32 0.05, %v3624_v23  ;;  %v8875_v22 = vmax.f32 %v3623_v56, %v3639_v46  ;;  %v3626_v36 = vadd.f32 %v8787_v41, %v3498_v60 }
 0x665   :  { %4176 = vrot.lane.b32.xlu1 %v8807_v12, %s6033_s28  ;;  %10733 = vst [vmem:[#allocation50_spill] sm:$0xff] %v8867_v17  ;;  %v3587_v7 = vadd.f32 %v3586_v14, %v8785_v1  ;;  %v3641_v2 = vmul.f32 0.05, %v3625_v49  ;;  %v3627_v18 = vadd.f32 %v8787_v41, %v3585_v5 }
 0x666   :  { %10734 = vst [vmem:[#allocation38_spill] sm:$0xff] %v8871_v55  ;;  %10735 = vst [vmem:[#allocation32_spill] sm:$0xff] %v8875_v22  ;;  %v8879_v10 = vmax.f32 %v3624_v23, %v3640_v9  ;;  %v3642_v20 = vmul.f32 0.05, %v3626_v36 }
 0x667   :  { %4098 = vrot.lane.b32.xlu0 %v8797_v58, %s10625_s6  ;;  %v3628_v32 = vadd.f32 %v8787_v41, %v3587_v7  ;;  %v8955_v1 = vmax.f32 %v3625_v49, %v3641_v2  ;;  %v3643_v56 = vmul.f32 0.05, %v3627_v18 }
 0x668   :  { %10736 = vst [vmem:[#allocation64_spill] sm:$0xff] %v8879_v10  ;;  %v8961_v23 = vmax.f32 %v3626_v36, %v3642_v20 }
 0x669   :  { %4104 = vrot.lane.b32.xlu1 %v8799_v37, %s10625_s6  ;;  %10737 = vst [vmem:[#allocation63_spill] sm:$0xff] %v8955_v1  ;;  %v3644_v46 = vmul.f32 0.05, %v3628_v32  ;;  %v8967_v41 = vmax.f32 %v3627_v18, %v3643_v56 }
 0x66b   :  { %4110 = vrot.lane.b32.xlu0 %v8803_v6, %s10625_s6  ;;  %10738 = vst [vmem:[#allocation37_spill] sm:$0xff] %v8967_v41  ;;  %v8973_v21 = vmax.f32 %v3628_v32, %v3644_v46 }
 0x66d   :  { %4116 = vrot.lane.b32.xlu1 %v8807_v12, %s10625_s6  ;;  %10739 = vst [vmem:[#allocation42_spill] sm:$0xff] %v8973_v21 }
 0x66f   :  { %4038 = vrot.lane.b32.xlu0 %v8797_v58, %s10540_s22 }
 0x671   :  { %4044 = vrot.lane.b32.xlu1 %v8799_v37, %s10540_s22 }
 0x673   :  { %4050 = vrot.lane.b32.xlu0 %v8803_v6, %s10540_s22 }
 0x675   :  { %4056 = vrot.lane.b32.xlu1 %v8807_v12, %s10540_s22 }
 0x677   :  { %3978 = vrot.lane.b32.xlu0 %v8797_v58, %s10541_s24 }
 0x679   :  { %3984 = vrot.lane.b32.xlu1 %v8799_v37, %s10541_s24 }
 0x67b   :  { %3990 = vrot.lane.b32.xlu0 %v8803_v6, %s10541_s24 }
 0x67d   :  { %3996 = vrot.lane.b32.xlu1 %v8807_v12, %s10541_s24 }
 0x67f   :  { %3845 = vrot.lane.b32.xlu0 %v8797_v58, %s10542_s23 }
 0x681   :  { %3851 = vrot.lane.b32.xlu1 %v8799_v37, %s10542_s23 }
 0x683   :  { %3857 = vrot.lane.b32.xlu0 %v8803_v6, %s10542_s23 }
 0x685   :  { %3863 = vrot.lane.b32.xlu1 %v8807_v12, %s10542_s23 }
 0x687   :  { %3785 = vrot.lane.b32.xlu0 %v8797_v58, %s10543_s5 }
 0x689   :  { %3791 = vrot.lane.b32.xlu1 %v8799_v37, %s10543_s5 }
 0x68b   :  { %3797 = vrot.lane.b32.xlu0 %v8803_v6, %s10543_s5 }
 0x68d   :  { %3803 = vrot.lane.b32.xlu1 %v8807_v12, %s10543_s5 }
 0x68f   :  { %3725 = vrot.lane.b32.xlu0 %v8797_v58, %s10553_s1 }
 0x691   :  { %3731 = vrot.lane.b32.xlu1 %v8799_v37, %s10553_s1 }
 0x693   :  { %3737 = vrot.lane.b32.xlu0 %v8803_v6, %s10553_s1 }
 0x695   :  { %3743 = vrot.lane.b32.xlu1 %v8807_v12, %s10553_s1 }
 0x697   :  { %3665 = vrot.lane.b32.xlu0 %v8797_v58, %s10562_s30  ;;  %v4557_v58 = vld [vmem:[%s10284_s14] sm:$0xff] }
 0x699   :  { %3671 = vrot.lane.b32.xlu1 %v8799_v37, %s10562_s30 }
 0x69b   :  { %4160 = vrot.lane.b32.xlu0 %v8867_v17, %s6033_s28 }
 0x69d   :  { %4166 = vrot.lane.b32.xlu1 %v8871_v55, %s6033_s28 }
 0x69f   :  { %4172 = vrot.lane.b32.xlu0 %v8875_v22, %s6033_s28 }
 0x6a1   :  { %4178 = vrot.lane.b32.xlu1 %v8879_v10, %s6033_s28 }
 0x6a3   :  { %4100 = vrot.lane.b32.xlu0 %v8867_v17, %s10625_s6 }
 0x6a5   :  { %4106 = vrot.lane.b32.xlu1 %v8871_v55, %s10625_s6 }
 0x6a7   :  { %4112 = vrot.lane.b32.xlu0 %v8875_v22, %s10625_s6 }
 0x6a9   :  { %4118 = vrot.lane.b32.xlu1 %v8879_v10, %s10625_s6 }
 0x6ab   :  { %4040 = vrot.lane.b32.xlu0 %v8867_v17, %s10540_s22 }
 0x6ad   :  { %4046 = vrot.lane.b32.xlu1 %v8871_v55, %s10540_s22 }
 0x6af   :  { %4052 = vrot.lane.b32.xlu0 %v8875_v22, %s10540_s22 }
 0x6b1   :  { %4058 = vrot.lane.b32.xlu1 %v8879_v10, %s10540_s22 }
 0x6b3   :  { %3980 = vrot.lane.b32.xlu0 %v8867_v17, %s10541_s24 }
 0x6b5   :  { %3986 = vrot.lane.b32.xlu1 %v8871_v55, %s10541_s24 }
 0x6b7   :  { %3992 = vrot.lane.b32.xlu0 %v8875_v22, %s10541_s24 }
 0x6b9   :  { %3998 = vrot.lane.b32.xlu1 %v8879_v10, %s10541_s24 }
 0x6bb   :  { %3847 = vrot.lane.b32.xlu0 %v8867_v17, %s10542_s23 }
 0x6bd   :  { %3853 = vrot.lane.b32.xlu1 %v8871_v55, %s10542_s23 }
 0x6bf   :  { %3859 = vrot.lane.b32.xlu0 %v8875_v22, %s10542_s23 }
 0x6c1   :  { %3865 = vrot.lane.b32.xlu1 %v8879_v10, %s10542_s23 }
 0x6c3   :  { %3787 = vrot.lane.b32.xlu0 %v8867_v17, %s10543_s5 }
 0x6c5   :  { %3793 = vrot.lane.b32.xlu1 %v8871_v55, %s10543_s5 }
 0x6c7   :  { %3799 = vrot.lane.b32.xlu0 %v8875_v22, %s10543_s5 }
 0x6c9   :  { %3805 = vrot.lane.b32.xlu1 %v8879_v10, %s10543_s5 }
 0x6cb   :  { %3727 = vrot.lane.b32.xlu0 %v8867_v17, %s10553_s1 }
 0x6cd   :  { %3733 = vrot.lane.b32.xlu1 %v8871_v55, %s10553_s1 }
 0x6cf   :  { %3739 = vrot.lane.b32.xlu0 %v8875_v22, %s10553_s1 }
 0x6d1   :  { %3745 = vrot.lane.b32.xlu1 %v8879_v10, %s10553_s1  ;;  %v8937_v38 = vpop.permute.xlu0 %4158 }
 0x6d3   :  { %v8941_v31 = vpop.permute.xlu1 %4164  ;;  %3667 = vrot.lane.b32.xlu0 %v8867_v17, %s10562_s30 }
 0x6d5   :  { %3673 = vrot.lane.b32.xlu1 %v8871_v55, %s10562_s30  ;;  %v8948_v54 = vpop.permute.xlu0 %4170 }
 0x6d7   :  { %v8951_v59 = vpop.permute.xlu1 %4176  ;;  %3679 = vrot.lane.b32.xlu0 %v8875_v22, %s10562_s30 }
 0x6d9   :  { %3685 = vrot.lane.b32.xlu1 %v8879_v10, %s10562_s30  ;;  %v8959_v34 = vpop.permute.xlu0 %4098  ;;  %v5147_v10 = vld [vmem:[%s10288_s18 + $0x18] sm:$0xff] }
 0x6db   :  { %v8963_v9 = vpop.permute.xlu1 %4104  ;;  %4162 = vrot.lane.b32.xlu0 %v8955_v1, %s6033_s28 }
 0x6dd   :  { %4168 = vrot.lane.b32.xlu1 %v8961_v23, %s6033_s28  ;;  %v8971_v13 = vpop.permute.xlu0 %4110 }
 0x6df   :  { %v8975_v4 = vpop.permute.xlu1 %4116  ;;  %4174 = vrot.lane.b32.xlu0 %v8967_v41, %s6033_s28 }
 0x6e1   :  { %4180 = vrot.lane.b32.xlu1 %v8973_v21, %s6033_s28  ;;  %v8981_v11 = vpop.permute.xlu0 %4038 }
 0x6e3   :  { %v8983_v60 = vpop.permute.xlu1 %4044  ;;  %4102 = vrot.lane.b32.xlu0 %v8955_v1, %s10625_s6 }
 0x6e5   :  { %4108 = vrot.lane.b32.xlu1 %v8961_v23, %s10625_s6  ;;  %v8989_v14 = vpop.permute.xlu0 %4050 }
 0x6e7   :  { %v8991_v49 = vpop.permute.xlu1 %4056  ;;  %4114 = vrot.lane.b32.xlu0 %v8967_v41, %s10625_s6 }
 0x6e9   :  { %4120 = vrot.lane.b32.xlu1 %v8973_v21, %s10625_s6  ;;  %v8997_v5 = vpop.permute.xlu0 %3978 }
 0x6eb   :  { %v8999_v36 = vpop.permute.xlu1 %3984  ;;  %4042 = vrot.lane.b32.xlu0 %v8955_v1, %s10540_s22 }
 0x6ed   :  { %4048 = vrot.lane.b32.xlu1 %v8961_v23, %s10540_s22  ;;  %v9005_v7 = vpop.permute.xlu0 %3990 }
 0x6ef   :  { %v9007_v2 = vpop.permute.xlu1 %3996  ;;  %4054 = vrot.lane.b32.xlu0 %v8967_v41, %s10540_s22 }
 0x6f1   :  { %4060 = vrot.lane.b32.xlu1 %v8973_v21, %s10540_s22  ;;  %v9013_v18 = vpop.permute.xlu0 %3845 }
 0x6f2   :  { %10740 = vst [vmem:[#allocation66_spill] sm:$0xff] %v9013_v18 }
 0x6f3   :  { %v9015_v20 = vpop.permute.xlu1 %3851  ;;  %3982 = vrot.lane.b32.xlu0 %v8955_v1, %s10541_s24 }
 0x6f5   :  { %3988 = vrot.lane.b32.xlu1 %v8961_v23, %s10541_s24  ;;  %v9021_v32 = vpop.permute.xlu0 %3857 }
 0x6f6   :  { %10741 = vst [vmem:[#allocation41_spill] sm:$0xff] %v9021_v32 }
 0x6f7   :  { %v9023_v56 = vpop.permute.xlu1 %3863  ;;  %3994 = vrot.lane.b32.xlu0 %v8967_v41, %s10541_s24 }
 0x6f8   :  { %10742 = vst [vmem:[#allocation54_spill] sm:$0xff] %v9023_v56 }
 0x6f9   :  { %4000 = vrot.lane.b32.xlu1 %v8973_v21, %s10541_s24  ;;  %v9029_v46 = vpop.permute.xlu0 %3785 }
 0x6fa   :  { %10743 = vst [vmem:[#allocation65_spill] sm:$0xff] %v9029_v46 }
 0x6fb   :  { %v9031_v40 = vpop.permute.xlu1 %3791  ;;  %3849 = vrot.lane.b32.xlu0 %v8955_v1, %s10542_s23 }
 0x6fc   :  { %10744 = vst [vmem:[#allocation48_spill] sm:$0xff] %v9031_v40 }
 0x6fd   :  { %3855 = vrot.lane.b32.xlu1 %v8961_v23, %s10542_s23  ;;  %v9037_v35 = vpop.permute.xlu0 %3797 }
 0x6fe   :  { %10745 = vst [vmem:[#allocation49_spill] sm:$0xff] %v9037_v35 }
 0x6ff   :  { %v3804_v33 = vpop.permute.xlu1 %3803  ;;  %3861 = vrot.lane.b32.xlu0 %v8967_v41, %s10542_s23 }
 0x700   :  { %v9044_v15 = vsel %vm464_vm6, %v9037_v35, %v3804_v33  ;;  %v9049_v8 = vsel %vm464_vm6, %v3804_v33, %v9029_v46 }
 0x701   :  { %10746 = vst [vmem:[#allocation43_spill] sm:$0xff] %v9044_v15  ;;  %10747 = vst [vmem:[#allocation40_spill] sm:$0xff] %v9049_v8  ;;  %3867 = vrot.lane.b32.xlu1 %v8973_v21, %s10542_s23  ;;  %v3726_v47 = vpop.permute.xlu0 %3725 }
 0x703   :  { %v3732_v39 = vpop.permute.xlu1 %3731  ;;  %3789 = vrot.lane.b32.xlu0 %v8955_v1, %s10543_s5 }
 0x704   :  { %v9057_v0 = vsel %vm383_vm7, %v3726_v47, %v3732_v39 }
 0x705   :  { %10748 = vst [vmem:[#allocation68_spill] sm:$0xff] %v9057_v0  ;;  %3795 = vrot.lane.b32.xlu1 %v8961_v23, %s10543_s5  ;;  %v3738_v15 = vpop.permute.xlu0 %3737 }
 0x706   :  { %v9063_v33 = vsel %vm383_vm7, %v3732_v39, %v3738_v15 }
 0x707   :  { %10749 = vst [vmem:[#allocation67_spill] sm:$0xff] %v9063_v33  ;;  %v3744_v8 = vpop.permute.xlu1 %3743  ;;  %3801 = vrot.lane.b32.xlu0 %v8967_v41, %s10543_s5 }
 0x708   :  { %v9069_v35 = vsel %vm383_vm7, %v3738_v15, %v3744_v8  ;;  %v9073_v30 = vsel %vm383_vm7, %v3744_v8, %v3726_v47 }
 0x709   :  { %10750 = vst [vmem:[#allocation70_spill] sm:$0xff] %v9069_v35  ;;  %10751 = vst [vmem:[#allocation34_spill] sm:$0xff] %v9073_v30  ;;  %3807 = vrot.lane.b32.xlu1 %v8973_v21, %s10543_s5  ;;  %v9077_v0 = vpop.permute.xlu0 %3665 }
 0x70a   :  { %10752 = vst [vmem:[#allocation35_spill] sm:$0xff] %v9077_v0 }
 0x70b   :  { %v9079_v46 = vpop.permute.xlu1 %3671  ;;  %3729 = vrot.lane.b32.xlu0 %v8955_v1, %s10553_s1 }
 0x70c   :  { %10753 = vst [vmem:[#allocation69_spill] sm:$0xff] %v9079_v46 }
 0x70d   :  { %3735 = vrot.lane.b32.xlu1 %v8961_v23, %s10553_s1  ;;  %v4161_v39 = vpop.permute.xlu0 %4160 }
 0x70f   :  { %v4167_v15 = vpop.permute.xlu1 %4166  ;;  %3741 = vrot.lane.b32.xlu0 %v8967_v41, %s10553_s1 }
 0x710   :  { %v9089_v47 = vsel %vm973_vm0, %v4161_v39, %v4167_v15 }
 0x711   :  { %3747 = vrot.lane.b32.xlu1 %v8973_v21, %s10553_s1  ;;  %v4173_v8 = vpop.permute.xlu0 %4172 }
 0x712   :  { %v9095_v0 = vsel %vm973_vm0, %v4167_v15, %v4173_v8 }
 0x713   :  { %v4179_v46 = vpop.permute.xlu1 %4178  ;;  %3669 = vrot.lane.b32.xlu0 %v8955_v1, %s10562_s30 }
 0x714   :  { %v9101_v33 = vsel %vm973_vm0, %v4173_v8, %v4179_v46  ;;  %v9105_v35 = vsel %vm973_vm0, %v4179_v46, %v4161_v39 }
 0x715   :  { %3675 = vrot.lane.b32.xlu1 %v8961_v23, %s10562_s30  ;;  %v4101_v30 = vpop.permute.xlu0 %4100 }
 0x717   :  { %v4107_v40 = vpop.permute.xlu1 %4106  ;;  %3681 = vrot.lane.b32.xlu0 %v8967_v41, %s10562_s30 }
 0x718   :  { %v9113_v15 = vsel %vm892_vm1, %v4101_v30, %v4107_v40 }
 0x719   :  { %3687 = vrot.lane.b32.xlu1 %v8973_v21, %s10562_s30  ;;  %v4113_v8 = vpop.permute.xlu0 %4112 }
 0x71a   :  { %v9119_v46 = vsel %vm892_vm1, %v4107_v40, %v4113_v8 }
 0x71b   :  { %v4119_v39 = vpop.permute.xlu1 %4118  ;;  %3677 = vrot.lane.b32.xlu0 %v8803_v6, %s10562_s30  ;;  %v2525_v6 = vld [vmem:[%s10278_s8] sm:$0xff] }
 0x71c   :  { %v9125_v25 = vsel %vm892_vm1, %v4113_v8, %v4119_v39  ;;  %v9129_v57 = vsel %vm892_vm1, %v4119_v39, %v4101_v30  ;;  %v3589_v30 = vld [vmem:[%s10281_s11] sm:$0xff] }
 0x71d   :  { %3683 = vrot.lane.b32.xlu1 %v8807_v12, %s10562_s30  ;;  %v4041_v40 = vpop.permute.xlu0 %4040 }
 0x71f   :  { %v4047_v22 = vpop.permute.xlu1 %4046  ;;  %1465 = vperm.xlu0 %5961, %v1459_v24  }
 0x720   :  { %v9141_v8 = vsel %vm811_vm2, %v4041_v40, %v4047_v22 }
 0x721   :  { %2531 = vperm.xlu1 %5962, %v2525_v6   ;;  %v4053_v39 = vpop.permute.xlu0 %4052  ;;  %v5060_v6 = vld [vmem:[%s10286_s16] sm:$0x3] }
 0x722   :  { %v9148_v12 = vsel %vm811_vm2, %v4047_v22, %v4053_v39 }
 0x723   :  { %v4059_v3 = vpop.permute.xlu1 %4058  ;;  %3595 = vperm.xlu0 %5961, %v3589_v30  }
 0x724   :  { %v9155_v24 = vsel %vm811_vm2, %v4053_v39, %v4059_v3  ;;  %v9159_v32 = vsel %vm811_vm2, %v4059_v3, %v4041_v40  ;;  %v5146_v3 = vld [vmem:[%s10288_s18 + $0x10] sm:$0xff]  ;;  %v5145_v39 = vld [vmem:[%s10288_s18 + $0x8] sm:$0xff] }
 0x725   :  { %4560 = vperm.xlu1 %5962, %v4557_v58   ;;  %v3981_v22 = vpop.permute.xlu0 %3980 }
 0x727   :  { %v3987_v37 = vpop.permute.xlu1 %3986  ;;  %5063 = vperm.xlu0 %5961, %v5060_v6  }
 0x728   :  { %v9169_v30 = vsel %vm730_vm3, %v3981_v22, %v3987_v37 }
 0x729   :  { %5165 = vperm.xlu1 %5962, %v5147_v10   ;;  %v3993_v40 = vpop.permute.xlu0 %3992  ;;  %v5144_v10 = vld [vmem:[%s10288_s18] sm:$0xff] }
 0x72a   :  { %v9176_v58 = vsel %vm730_vm3, %v3987_v37, %v3993_v40 }
 0x72b   :  { %v3999_v48 = vpop.permute.xlu1 %3998  ;;  %5160 = vperm.xlu0 %5961, %v5146_v3  }
 0x72c   :  { %v9183_v6 = vsel %vm730_vm3, %v3993_v40, %v3999_v48  ;;  %v9187_v41 = vsel %vm730_vm3, %v3999_v48, %v3981_v22 }
 0x72d   :  { %5155 = vperm.xlu1 %5962, %v5145_v39   ;;  %v3848_v37 = vpop.permute.xlu0 %3847 }
 0x72f   :  { %v3854_v17 = vpop.permute.xlu1 %3853  ;;  %5150 = vperm.xlu0 %5961, %v5144_v10  }
 0x730   :  { %v9194_v56 = vsel %vm545_vm4, %v3848_v37, %v3854_v17 }
 0x731   :  { %10754 = vst [vmem:[#allocation72_spill] sm:$0xff] %v9194_v56  ;;  %v3860_v3 = vpop.permute.xlu0 %3859 }
 0x732   :  { %v9198_v40 = vsel %vm545_vm4, %v3854_v17, %v3860_v3 }
 0x733   :  { %10755 = vst [vmem:[#allocation71_spill] sm:$0xff] %v9198_v40  ;;  %v3866_v55 = vpop.permute.xlu1 %3865 }
 0x734   :  { %v9202_v48 = vsel %vm545_vm4, %v3860_v3, %v3866_v55  ;;  %v9206_v22 = vsel %vm545_vm4, %v3866_v55, %v3848_v37 }
 0x735   :  { %10756 = vst [vmem:[#allocation57_spill] sm:$0xff] %v9202_v48  ;;  %10757 = vst [vmem:[#allocation58_spill] sm:$0xff] %v9206_v22  ;;  %v3788_v39 = vpop.permute.xlu0 %3787 }
 0x737   :  { %v3794_v10 = vpop.permute.xlu1 %3793 }
 0x738   :  { %v9210_v21 = vsel %vm464_vm6, %v3788_v39, %v3794_v10 }
 0x739   :  { %10758 = vst [vmem:[#allocation59_spill] sm:$0xff] %v9210_v21  ;;  %v3800_v56 = vpop.permute.xlu0 %3799 }
 0x73a   :  { %v9214_v17 = vsel %vm464_vm6, %v3794_v10, %v3800_v56 }
 0x73b   :  { %10759 = vst [vmem:[#allocation74_spill] sm:$0xff] %v9214_v17  ;;  %v3806_v40 = vpop.permute.xlu1 %3805 }
 0x73c   :  { %v9218_v3 = vsel %vm464_vm6, %v3800_v56, %v3806_v40  ;;  %v9222_v55 = vsel %vm464_vm6, %v3806_v40, %v3788_v39 }
 0x73d   :  { %10760 = vst [vmem:[#allocation73_spill] sm:$0xff] %v9218_v3  ;;  %10761 = vst [vmem:[#allocation60_spill] sm:$0xff] %v9222_v55  ;;  %v3728_v37 = vpop.permute.xlu0 %3727 }
 0x73f   :  { %v3734_v48 = vpop.permute.xlu1 %3733 }
 0x740   :  { %v9226_v22 = vsel %vm383_vm7, %v3728_v37, %v3734_v48 }
 0x741   :  { %10762 = vst [vmem:[#allocation76_spill] sm:$0xff] %v9226_v22  ;;  %v3740_v21 = vpop.permute.xlu0 %3739 }
 0x742   :  { %v9230_v10 = vsel %vm383_vm7, %v3734_v48, %v3740_v21 }
 0x743   :  { %10763 = vst [vmem:[#allocation75_spill] sm:$0xff] %v9230_v10  ;;  %v3746_v17 = vpop.permute.xlu1 %3745 }
 0x744   :  { %v9234_v56 = vsel %vm383_vm7, %v3740_v21, %v3746_v17  ;;  %v9238_v40 = vsel %vm383_vm7, %v3746_v17, %v3728_v37 }
 0x745   :  { %10764 = vst [vmem:[#allocation62_spill] sm:$0xff] %v9234_v56  ;;  %10765 = vst [vmem:[#allocation61_spill] sm:$0xff] %v9238_v40  ;;  %v3668_v39 = vpop.permute.xlu0 %3667 }
 0x747   :  { %v3674_v3 = vpop.permute.xlu1 %3673 }
 0x748   :  { %v9242_v55 = vsel %vm302_vm8, %v3668_v39, %v3674_v3 }
 0x749   :  { %10766 = vst [vmem:[#allocation78_spill] sm:$0xff] %v9242_v55  ;;  %v3680_v22 = vpop.permute.xlu0 %3679 }
 0x74a   :  { %v9246_v48 = vsel %vm302_vm8, %v3674_v3, %v3680_v22 }
 0x74b   :  { %10767 = vst [vmem:[#allocation77_spill] sm:$0xff] %v9246_v48  ;;  %v3686_v10 = vpop.permute.xlu1 %3685 }
 0x74c   :  { %v9250_v21 = vsel %vm302_vm8, %v3680_v22, %v3686_v10  ;;  %v9254_v17 = vsel %vm302_vm8, %v3686_v10, %v3668_v39  ;;  %v4185_v22 = vsel %vm973_vm0, %v8941_v31, %v8948_v54 }
 0x74d   :  { %10768 = vst [vmem:[#allocation79_spill] sm:$0xff] %v9250_v21  ;;  %10769 = vst [vmem:[#allocation80_spill] sm:$0xff] %v9254_v17  ;;  %v4163_v37 = vpop.permute.xlu0 %4162 }
 0x74f   :  { %v4169_v56 = vpop.permute.xlu1 %4168 }
 0x750   :  { %v4190_v40 = vsel %vm973_vm0, %v4163_v37, %v4169_v56 }
 0x751   :  { %v4175_v55 = vpop.permute.xlu0 %4174  ;;  %v4202_v10 = vmul.f32 %v4190_v40, %v6379_v28 }
 0x752   :  { %v4187_v1 = vsel %vm973_vm0, %v4169_v56, %v4175_v55  ;;  %v4188_v56 = vsel %vm973_vm0, %v8937_v38, %v8941_v31  ;;  %v4201_v31 = vmul.f32 %v9105_v35, %v6376_v27 }
 0x753   :  { %v4203_v3 = vmul.f32 %v4187_v1, %v6372_v26  ;;  %v4181_v48 = vpop.permute.xlu1 %4180  ;;  %v4199_v1 = vmul.f32 %v9095_v0, %v6372_v26  ;;  %v4182_v0 = vsel %vm973_vm0, %v8948_v54, %v8951_v59 }
 0x754   :  { %v4184_v39 = vsel %vm973_vm0, %v4175_v55, %v4181_v48  ;;  %v4193_v21 = vsel %vm973_vm0, %v4181_v48, %v4163_v37  ;;  %v4191_v55 = vsel %vm973_vm0, %v8951_v59, %v8937_v38  ;;  %v4198_v48 = vmul.f32 %v9089_v47, %v6379_v28 }
 0x755   :  { %v4204_v17 = vmul.f32 %v4184_v39, %v6382_v29  ;;  %v4205_v18 = vmul.f32 %v4193_v21, %v6376_v27  ;;  %4278 = vmatprep.subr.mxu0 %v4203_v3  ;;  %v4103_v40 = vpop.permute.xlu0 %4102  ;;  %v4195_v37 = vmul.f32 %v4185_v22, %v6372_v26  ;;  %v4194_v3 = vmul.f32 %v4188_v56, %v6379_v28 }
 0x756   :  { %4279 = vmatpush1.msra.mxu0 %v4202_v10  ;;  %v4200_v38 = vmul.f32 %v9101_v33, %v6382_v29  ;;  %v4197_v35 = vmul.f32 %v4191_v55, %v6376_v27  ;;  %v4196_v59 = vmul.f32 %v4182_v0, %v6382_v29  ;;  %v4125_v33 = vsel %vm892_vm1, %v8963_v9, %v8971_v13 }
 0x757   :  { %v4109_v21 = vpop.permute.xlu1 %4108  ;;  %4280 = vmatprep.subr.mxu0 %v4199_v1  ;;  %4349 = vmatprep.subr.mxu1 %v4205_v18  ;;  %v4128_v22 = vsel %vm892_vm1, %v8959_v34, %v8963_v9  ;;  %v4139_v10 = vmul.f32 %v9119_v46, %v6471_v42  ;;  %v4138_v55 = vmul.f32 %v9113_v15, %v6480_v45 }
 0x758   :  { %4281 = vmatpush1.msra.mxu0 %v4198_v48  ;;  %4350 = vmatpush1.msra.mxu1 %v4204_v17  ;;  %v4130_v47 = vsel %vm892_vm1, %v4103_v40, %v4109_v21  ;;  %v4122_v9 = vsel %vm892_vm1, %v8971_v13, %v8975_v4  ;;  %v4141_v46 = vmul.f32 %v9129_v57, %v6474_v43 }
 0x759   :  { %4282 = vmatprep.subr.mxu0 %v4195_v37  ;;  %4351 = vmatprep.subr.mxu1 %v4201_v31  ;;  %v4115_v54 = vpop.permute.xlu0 %4114  ;;  %v4142_v17 = vmul.f32 %v4130_v47, %v6480_v45  ;;  %v4135_v0 = vmul.f32 %v4125_v33, %v6471_v42  ;;  %v4134_v31 = vmul.f32 %v4128_v22, %v6480_v45 }
 0x75a   :  { %v4127_v26 = vsel %vm892_vm1, %v4109_v21, %v4115_v54  ;;  %4283 = vmatpush1.msra.mxu0 %v4194_v3  ;;  %4352 = vmatpush1.msra.mxu1 %v4200_v38  ;;  %v4065_v21 = vsel %vm811_vm2, %v8983_v60, %v8989_v14  ;;  %v4068_v3 = vsel %vm811_vm2, %v8981_v11, %v8983_v60 }
 0x75b   :  { %v4143_v28 = vmul.f32 %v4127_v26, %v6471_v42  ;;  %v4121_v18 = vpop.permute.xlu1 %4120  ;;  %4353 = vmatprep.subr.mxu1 %v4197_v35  ;;  %v4079_v38 = vmul.f32 %v9148_v12, %v6567_v61  ;;  %v4078_v26 = vmul.f32 %v9141_v8, %v6576_v16  ;;  %v4062_v12 = vsel %vm811_vm2, %v8989_v14, %v8991_v49 }
 0x75c   :  { %v4124_v27 = vsel %vm892_vm1, %v4115_v54, %v4121_v18  ;;  %v4133_v29 = vsel %vm892_vm1, %v4121_v18, %v4103_v40  ;;  %4354 = vmatpush1.msra.mxu1 %v4196_v59  ;;  %v4131_v40 = vsel %vm892_vm1, %v8975_v4, %v8959_v34  ;;  %v4140_v34 = vmul.f32 %v9125_v25, %v6477_v44 }
 0x75d   :  { %v4144_v39 = vmul.f32 %v4124_v27, %v6477_v44  ;;  %v4145_v56 = vmul.f32 %v4133_v29, %v6474_v43  ;;  %4284 = vmatprep.subr.mxu0 %v4143_v28  ;;  %v4043_v1 = vpop.permute.xlu0 %4042  ;;  %v4137_v57 = vmul.f32 %v4131_v40, %v6474_v43  ;;  %v4136_v4 = vmul.f32 %v4122_v9, %v6477_v44 }
 0x75e   :  { %4285 = vmatpush1.msra.mxu0 %v4142_v17  ;;  %v4071_v59 = vsel %vm811_vm2, %v8991_v49, %v8981_v11  ;;  %v4081_v60 = vmul.f32 %v9159_v32, %v6570_v62  ;;  %v4075_v18 = vmul.f32 %v4065_v21, %v6567_v61  ;;  %v4074_v33 = vmul.f32 %v4068_v3, %v6576_v16  ;;  %v10780_v3 = vld [vmem:[#allocation41_spill] sm:$0xff] }
 0x75f   :  { %v4049_v48 = vpop.permute.xlu1 %4048  ;;  %4286 = vmatprep.subr.mxu0 %v4139_v10  ;;  %4355 = vmatprep.subr.mxu1 %v4145_v56  ;;  %v4080_v11 = vmul.f32 %v9155_v24, %v6573_v63  ;;  %v4077_v49 = vmul.f32 %v4071_v59, %v6570_v62  ;;  %v4076_v32 = vmul.f32 %v4062_v12, %v6573_v63  ;;  %v10782_v59 = vld [vmem:[#allocation55_spill] sm:$0xff] }
 0x760   :  { %4287 = vmatpush1.msra.mxu0 %v4138_v55  ;;  %4356 = vmatpush1.msra.mxu1 %v4144_v39  ;;  %v4070_v15 = vsel %vm811_vm2, %v4043_v1, %v4049_v48  ;;  %v4005_v17 = vsel %vm730_vm3, %v8999_v36, %v9005_v7  ;;  %v4008_v29 = vsel %vm730_vm3, %v8997_v5, %v8999_v36 }
 0x761   :  { %4288 = vmatprep.subr.mxu0 %v4135_v0  ;;  %4357 = vmatprep.subr.mxu1 %v4141_v46  ;;  %v4055_v13 = vpop.permute.xlu0 %4054  ;;  %v4082_v37 = vmul.f32 %v4070_v15, %v6576_v16  ;;  %v4019_v22 = vmul.f32 %v9176_v58, %v6663_v50  ;;  %v4018_v40 = vmul.f32 %v9169_v30, %v6672_v53 }
 0x762   :  { %v4067_v42 = vsel %vm811_vm2, %v4049_v48, %v4055_v13  ;;  %4289 = vmatpush1.msra.mxu0 %v4134_v31  ;;  %4358 = vmatpush1.msra.mxu1 %v4140_v34  ;;  %v4002_v36 = vsel %vm730_vm3, %v9005_v7, %v9007_v2  ;;  %v4021_v58 = vmul.f32 %v9187_v41, %v6666_v51  ;;  %v4218_v41 = vld [vmem:[%s10283_s13] sm:$0xff]  ;;  %v10771_v48 = vld [vmem:[#allocation63_spill] sm:$0xff]  ;;  %v10774_v34 = vld [vmem:[#allocation54_spill] sm:$0xff] }
 0x763   :  { %v4083_v45 = vmul.f32 %v4067_v42, %v6567_v61  ;;  %v4061_v25 = vpop.permute.xlu1 %4060  ;;  %4359 = vmatprep.subr.mxu1 %v4137_v57  ;;  %v4015_v9 = vmul.f32 %v4005_v17, %v6663_v50  ;;  %v4014_v46 = vmul.f32 %v4008_v29, %v6672_v53  ;;  %v10775_v57 = vld [vmem:[#allocation50_spill] sm:$0xff]  ;;  %v10790_v17 = vld [vmem:[#allocation57_spill] sm:$0xff]  ;;  %v10791_v29 = vld [vmem:[#allocation71_spill] sm:$0xff] }
 0x764   :  { %v4064_v43 = vsel %vm811_vm2, %v4055_v13, %v4061_v25  ;;  %v4073_v44 = vsel %vm811_vm2, %v4061_v25, %v4043_v1  ;;  %4360 = vmatpush1.msra.mxu1 %v4136_v4  ;;  %v4011_v1 = vsel %vm730_vm3, %v9007_v2, %v8997_v5  ;;  %v4020_v5 = vmul.f32 %v9183_v6, %v6669_v52  ;;  %v10776_v4 = vld [vmem:[#allocation37_spill] sm:$0xff] }
 0x765   :  { %v4084_v47 = vmul.f32 %v4064_v43, %v6573_v63  ;;  %v4085_v54 = vmul.f32 %v4073_v44, %v6570_v62  ;;  %4290 = vmatprep.subr.mxu0 %v4083_v45  ;;  %v3983_v35 = vpop.permute.xlu0 %3982  ;;  %v4017_v7 = vmul.f32 %v4011_v1, %v6666_v51  ;;  %v4016_v2 = vmul.f32 %v4002_v36, %v6669_v52  ;;  %v10777_v45 = vld [vmem:[#allocation8_spill] sm:$0xff]  ;;  %v10794_v36 = vld [vmem:[#allocation65_spill] sm:$0xff] }
 0x766   :  { %4291 = vmatpush1.msra.mxu0 %v4082_v37  ;;  %v10778_v37 = vld [vmem:[#allocation36_spill] sm:$0xff] }
 0x767   :  { %v3989_v28 = vpop.permute.xlu1 %3988  ;;  %4292 = vmatprep.subr.mxu0 %v4079_v38  ;;  %4361 = vmatprep.subr.mxu1 %v4085_v54  ;;  %v10779_v43 = vld [vmem:[#allocation64_spill] sm:$0xff]  ;;  %v3872_v38 = vsel %vm545_vm4, %v9015_v20, %v10780_v3  ;;  %v10781_v54 = vld [vmem:[#allocation9_spill] sm:$0xff] }
 0x768   :  { %4293 = vmatpush1.msra.mxu0 %v4078_v26  ;;  %4362 = vmatpush1.msra.mxu1 %v4084_v47  ;;  %v4010_v8 = vsel %vm730_vm3, %v3983_v35, %v3989_v28  ;;  %v3869_v47 = vsel %vm545_vm4, %v10780_v3, %v10774_v34  ;;  %v10783_v26 = vld [vmem:[#allocation32_spill] sm:$0xff] }
 0x769   :  { %4294 = vmatprep.subr.mxu0 %v4075_v18  ;;  %4363 = vmatprep.subr.mxu1 %v4081_v60  ;;  %v3995_v14 = vpop.permute.xlu0 %3994  ;;  %v4022_v27 = vmul.f32 %v4010_v8, %v6672_v53  ;;  %v10770_v53 = vld [vmem:[#allocation66_spill] sm:$0xff] }
 0x76a   :  { %v4007_v61 = vsel %vm730_vm3, %v3989_v28, %v3995_v14  ;;  %4295 = vmatpush1.msra.mxu0 %v4074_v33  ;;  %4364 = vmatpush1.msra.mxu1 %v4080_v11  ;;  %v3878_v15 = vsel %vm545_vm4, %v10774_v34, %v10770_v53  ;;  %v10784_v28 = vld [vmem:[#allocation72_spill] sm:$0xff]  ;;  %v10785_v33 = vld [vmem:[#allocation11_spill] sm:$0xff]  ;;  %v10787_v8 = vld [vmem:[#allocation58_spill] sm:$0xff] }
 0x76b   :  { %v4023_v16 = vmul.f32 %v4007_v61, %v6663_v50  ;;  %v4001_v24 = vpop.permute.xlu1 %4000  ;;  %4365 = vmatprep.subr.mxu1 %v4077_v49  ;;  %v3881_v60 = vmul.f32 %v3878_v15, %v10781_v54  ;;  %v3886_v18 = vmul.f32 %v10784_v28, %v10777_v45  ;;  %v10788_v49 = vld [vmem:[#allocation10_spill] sm:$0xff]  ;;  %v10801_v15 = vld [vmem:[#allocation40_spill] sm:$0xff] }
 0x76c   :  { %v4004_v62 = vsel %vm730_vm3, %v3995_v14, %v4001_v24  ;;  %v4013_v63 = vsel %vm730_vm3, %v4001_v24, %v3983_v35  ;;  %4366 = vmatpush1.msra.mxu1 %v4076_v32  ;;  %v3885_v14 = vmul.f32 %v10787_v8, %v10781_v54  ;;  %v10808_v28 = vld [vmem:[#allocation76_spill] sm:$0xff] }
 0x76d   :  { %v4024_v10 = vmul.f32 %v4004_v62, %v6669_v52  ;;  %v4025_v39 = vmul.f32 %v4013_v63, %v6666_v51  ;;  %4296 = vmatprep.subr.mxu0 %v4023_v16  ;;  %v3850_v56 = vpop.permute.xlu0 %3849  ;;  %v3875_v51 = vsel %vm545_vm4, %v10770_v53, %v9015_v20  ;;  %v10772_v52 = vld [vmem:[#allocation42_spill] sm:$0xff]  ;;  %v10786_v20 = vld [vmem:[#allocation56_spill] sm:$0xff]  ;;  %v10789_v16 = vld [vmem:[#allocation53_spill] sm:$0xff]  ;;  %v3884_v63 = vmul.f32 %v3869_v47, %v10785_v33 }
 0x76e   :  { %4297 = vmatpush1.msra.mxu0 %v4022_v27  ;;  %v3882_v44 = vmul.f32 %v3875_v51, %v10777_v45  ;;  %v3888_v27 = vmul.f32 %v10790_v17, %v10785_v33  ;;  %v10798_v51 = vld [vmem:[#allocation60_spill] sm:$0xff]  ;;  %v10813_v17 = vld [vmem:[#allocation34_spill] sm:$0xff] }
 0x76f   :  { %v3856_v55 = vpop.permute.xlu1 %3855  ;;  %4298 = vmatprep.subr.mxu0 %v4019_v22  ;;  %4367 = vmatprep.subr.mxu1 %v4025_v39  ;;  %v3887_v22 = vmul.f32 %v10791_v29, %v10788_v49  ;;  %v10792_v39 = vld [vmem:[#allocation13_spill] sm:$0xff]  ;;  %v10815_v29 = vld [vmem:[#allocation20_spill] sm:$0xff] }
 0x770   :  { %4299 = vmatpush1.msra.mxu0 %v4018_v40  ;;  %4368 = vmatpush1.msra.mxu1 %v4024_v10  ;;  %v3877_v6 = vsel %vm545_vm4, %v3850_v56, %v3856_v55  ;;  %v10793_v40 = vld [vmem:[#allocation48_spill] sm:$0xff] }
 0x771   :  { %4300 = vmatprep.subr.mxu0 %v4015_v9  ;;  %4369 = vmatprep.subr.mxu1 %v4021_v58  ;;  %v3862_v30 = vpop.permute.xlu0 %3861  ;;  %v3890_v25 = vmul.f32 %v3877_v6, %v10777_v45  ;;  %v3815_v58 = vsel %vm464_vm6, %v10794_v36, %v10793_v40  ;;  %v3825_v6 = vmul.f32 %v10798_v51, %v10792_v39  ;;  %v10818_v36 = vld [vmem:[#allocation69_spill] sm:$0xff]  ;;  %v10822_v51 = vmov 0.0  }
 0x772   :  { %4301 = vmatpush1.msra.mxu0 %v4014_v46  ;;  %4370 = vmatpush1.msra.mxu1 %v4020_v5  ;;  %v3874_v21 = vsel %vm545_vm4, %v3856_v55, %v3862_v30  ;;  %v10795_v55 = vld [vmem:[#allocation12_spill] sm:$0xff]  ;;  %v3883_v5 = vmul.f32 %v3872_v38, %v10788_v49 }
 0x773   :  { %v3868_v50 = vpop.permute.xlu1 %3867  ;;  %4371 = vmatprep.subr.mxu1 %v4017_v7  ;;  %4417 = vmatprep.subr.mxu0 %v8961_v23  ;;  %v10773_v23 = vld [vmem:[#allocation38_spill] sm:$0xff]  ;;  %v3891_v32 = vmul.f32 %v3874_v21, %v10788_v49  ;;  %v10796_v7 = vld [vmem:[#allocation59_spill] sm:$0xff]  ;;  %v10811_v49 = vld [vmem:[#allocation68_spill] sm:$0xff] }
 0x774   :  { %5723 = vmatmul.mubr.msk.f32.vlgmr.msra.gmra.mxu0 %vm2143_vm9, %v4218_v41  ;;  %4372 = vmatpush1.msra.mxu1 %v4016_v2  ;;  %v3880_v31 = vsel %vm545_vm4, %v3868_v50, %v3850_v56  ;;  %v3871_v13 = vsel %vm545_vm4, %v3862_v30, %v3868_v50  ;;  %v10797_v2 = vld [vmem:[#allocation15_spill] sm:$0xff]  ;;  %vm5168_vm4 = vcmask 15360  }
 0x775   :  { %4418 = vmatpush1.msra.mxu0 %v10771_v48  ;;  %4488 = vmatprep.subr.mxu1 %v10772_v52  ;;  %v3790_v0 = vpop.permute.xlu0 %3789  ;;  %v3889_v35 = vmul.f32 %v3880_v31, %v10781_v54  ;;  %v3892_v11 = vmul.f32 %v3871_v13, %v10785_v33  ;;  %v10799_v48 = vld [vmem:[#allocation14_spill] sm:$0xff]  ;;  %v3822_v31 = vmul.f32 %v3815_v58, %v10795_v55  ;;  %v10809_v33 = vld [vmem:[#allocation61_spill] sm:$0xff]  ;;  %v10819_v58 = vld [vmem:[#allocation35_spill] sm:$0xff] }
 0x776   :  { %4419 = vmatprep.subr.mxu0 %v10773_v23  ;;  %5724 = vmatmul.mubr.msk.f32.vlgmr.msra.gmra.mxu1 %vm2143_vm9, %v4218_v41  ;;  %v3826_v41 = vmul.f32 %v10796_v7, %v10795_v55  ;;  %v10800_v23 = vld [vmem:[#allocation49_spill] sm:$0xff]  ;;  %v3821_v13 = vmul.f32 %v10801_v15, %v10792_v39  ;;  %v10826_v15 = vld [vmem:[#allocation79_spill] sm:$0xff] }
 0x777   :  { %4420 = vmatpush1.msra.mxu0 %v10775_v57  ;;  %4489 = vmatpush1.msra.mxu1 %v10776_v4  ;;  %v3796_v42 = vpop.permute.xlu1 %3795  ;;  %v3812_v34 = vsel %vm464_vm6, %v10793_v40, %v10800_v23  ;;  %v10802_v57 = vld [vmem:[#allocation73_spill] sm:$0xff]  ;;  %v10825_v23 = vld [vmem:[#allocation80_spill] sm:$0xff] }
 0x778   :  { %4421 = vmatprep.subr.mxu0 %v10778_v37  ;;  %4490 = vmatprep.subr.mxu1 %v10779_v43  ;;  %v3817_v61 = vsel %vm464_vm6, %v3790_v0, %v3796_v42  ;;  %v3828_v4 = vmul.f32 %v10802_v57, %v10797_v2  ;;  %v10805_v37 = vld [vmem:[#allocation16_spill] sm:$0xff]  ;;  %v3823_v54 = vmul.f32 %v3812_v34, %v10799_v48  ;;  %v10820_v7 = vld [vmem:[#allocation21_spill] sm:$0xff] }
 0x779   :  { %4422 = vmatpush1.msra.mxu0 %v10782_v59  ;;  %4491 = vmatpush1.msra.mxu1 %v10783_v26  ;;  %v3802_v12 = vpop.permute.xlu0 %3801  ;;  %v3830_v9 = vmul.f32 %v3817_v61, %v10795_v55  ;;  %v10807_v26 = vld [vmem:[#allocation19_spill] sm:$0xff]  ;;  %v10812_v61 = vld [vmem:[#allocation62_spill] sm:$0xff]  ;;  %v3695_v55 = vsel %vm302_vm8, %v10819_v58, %v10818_v36  ;;  %v3705_v34 = vmul.f32 %v10825_v23, %v10820_v7 }
 0x77a   :  { %4423 = vmatprep.subr.mxu0 %v3890_v25  ;;  %4492 = vmatprep.subr.mxu1 %v10786_v20  ;;  %v3814_v46 = vsel %vm464_vm6, %v3796_v42, %v3802_v12  ;;  %v10803_v42 = vld [vmem:[#allocation43_spill] sm:$0xff]  ;;  %v10804_v25 = vld [vmem:[#allocation74_spill] sm:$0xff] }
 0x77b   :  { %4424 = vmatpush1.msra.mxu0 %v3889_v35  ;;  %4493 = vmatpush1.msra.mxu1 %v10789_v16  ;;  %v3808_v24 = vpop.permute.xlu1 %3807  ;;  %v3831_v52 = vmul.f32 %v3814_v46, %v10799_v48  ;;  %v3824_v45 = vmul.f32 %v10803_v42, %v10797_v2  ;;  %v3827_v21 = vmul.f32 %v10804_v25, %v10799_v48  ;;  %v10806_v35 = vld [vmem:[#allocation17_spill] sm:$0xff]  ;;  %v10810_v20 = vld [vmem:[#allocation18_spill] sm:$0xff]  ;;  %v9806_v23 = vld [vmem:[%s10828_s9 + $0x138] sm:$0xff] }
 0x77c   :  { %v3820_v62 = vsel %vm464_vm6, %v3808_v24, %v3790_v0  ;;  %4425 = vmatprep.subr.mxu0 %v3886_v18  ;;  %4494 = vmatprep.subr.mxu1 %v3892_v11  ;;  %v3811_v10 = vsel %vm464_vm6, %v3802_v12, %v3808_v24  ;;  %v3766_v18 = vmul.f32 %v10808_v28, %v10805_v37  ;;  %v10823_v48 = vld [vmem:[#allocation78_spill] sm:$0xff]  ;;  %v10827_v42 = vld [vmem:[#allocation77_spill] sm:$0xff]  ;;  %vm5181_vm6 = vcmask 1041408  }
 0x77d   :  { %v3829_v56 = vmul.f32 %v3820_v62, %v10792_v39  ;;  %4426 = vmatpush1.msra.mxu0 %v3885_v14  ;;  %4495 = vmatpush1.msra.mxu1 %v3891_v32  ;;  %v3730_v1 = vpop.permute.xlu0 %3729  ;;  %v3832_v50 = vmul.f32 %v3811_v10, %v10797_v2  ;;  %v3765_v11 = vmul.f32 %v10809_v33, %v10806_v35  ;;  %v10814_v62 = vld [vmem:[#allocation75_spill] sm:$0xff]  ;;  %v10816_v39 = vld [vmem:[#allocation70_spill] sm:$0xff]  ;;  %v9631_v28 = vld [vmem:[%s10828_s9 + $0x68] sm:$0xff] }
 0x77e   :  { %4427 = vmatprep.subr.mxu0 %v3882_v44  ;;  %4496 = vmatprep.subr.mxu1 %v3888_v27  ;;  %v3762_v32 = vmul.f32 %v10811_v49, %v10805_v37  ;;  %v3768_v16 = vmul.f32 %v10812_v61, %v10807_v26  ;;  %v3761_v27 = vmul.f32 %v10813_v17, %v10806_v35  ;;  %v10821_v2 = vld [vmem:[#allocation23_spill] sm:$0xff]  ;;  %v9643_v33 = vld [vmem:[%s10828_s9 + $0xe0] sm:$0xff]  ;;  %v10831_v61 = vld [vmem:[#allocation26_spill] sm:$0xff] }
 0x77f   :  { %4428 = vmatpush1.msra.mxu0 %v3881_v60  ;;  %4497 = vmatpush1.msra.mxu1 %v3887_v22  ;;  %v3736_v30 = vpop.permute.xlu1 %3735  ;;  %v9657_v49 = vld [vmem:[%s10828_s9 + $0x60] sm:$0xff]  ;;  %10835 = vst [vmem:[#allocation42_spill] sm:$0xff] %v9806_v23 }
 0x780   :  { %v3757_v53 = vsel %vm383_vm7, %v3730_v1, %v3736_v30  ;;  %4429 = vmatprep.subr.mxu0 %v3830_v9  ;;  %4498 = vmatprep.subr.mxu1 %v3884_v63  ;;  %v3767_v63 = vmul.f32 %v10814_v62, %v10810_v20  ;;  %v9678_v62 = vld [vmem:[%s10828_s9 + $0x160] sm:$0xff] }
 0x781   :  { %4430 = vmatpush1.msra.mxu0 %v3829_v56  ;;  %4499 = vmatpush1.msra.mxu1 %v3883_v5  ;;  %v3742_v0 = vpop.permute.xlu0 %3741  ;;  %v3770_v43 = vmul.f32 %v3757_v53, %v10805_v37  ;;  %v3764_v56 = vmul.f32 %v10816_v39, %v10807_v26  ;;  %v9699_v39 = vld [vmem:[%s10828_s9 + $0xd0] sm:$0xff] }
 0x782   :  { %4431 = vmatprep.subr.mxu0 %v3826_v41  ;;  %4500 = vmatprep.subr.mxu1 %v3832_v50  ;;  %v3754_v3 = vsel %vm383_vm7, %v3736_v30, %v3742_v0 }
 0x783   :  { %4432 = vmatpush1.msra.mxu0 %v3825_v6  ;;  %4501 = vmatpush1.msra.mxu1 %v3831_v52  ;;  %v3748_v44 = vpop.permute.xlu1 %3747  ;;  %v3771_v8 = vmul.f32 %v3754_v3, %v10810_v20  ;;  %v3702_v6 = vmul.f32 %v3695_v55, %v10815_v29  ;;  %v3706_v52 = vmul.f32 %v10823_v48, %v10815_v29  ;;  %v9782_v48 = vld [vmem:[%s10828_s9 + $0x140] sm:$0xff] }
 0x784   :  { %v3751_v38 = vsel %vm383_vm7, %v3742_v0, %v3748_v44  ;;  %v3760_v47 = vsel %vm383_vm7, %v3748_v44, %v3730_v1  ;;  %4433 = vmatprep.subr.mxu0 %v3822_v31  ;;  %4502 = vmatprep.subr.mxu1 %v3828_v4  ;;  %v10817_v1 = vld [vmem:[#allocation67_spill] sm:$0xff]  ;;  %v10824_v0 = vld [vmem:[#allocation22_spill] sm:$0xff]  ;;  %v3917_v44 = vld [vmem:[%s10282_s12] sm:$0xff] }
 0x785   :  { %v3769_v59 = vmul.f32 %v3760_v47, %v10806_v35  ;;  %v3772_v12 = vmul.f32 %v3751_v38, %v10807_v26  ;;  %4434 = vmatpush1.msra.mxu0 %v3821_v13  ;;  %4503 = vmatpush1.msra.mxu1 %v3827_v21  ;;  %v3670_v60 = vpop.permute.xlu0 %3669  ;;  %v3763_v40 = vmul.f32 %v10817_v1, %v10810_v20  ;;  %v9584_v38 = vld [vmem:[%s10828_s9 + $0x78] sm:$0xff]  ;;  %v9612_v26 = vld [vmem:[%s10828_s9 + $0x1f0] sm:$0xff] }
 0x786   :  { %4435 = vmatprep.subr.mxu0 %v3770_v43  ;;  %4504 = vmatprep.subr.mxu1 %v3824_v45  ;;  %v3708_v13 = vmul.f32 %v10826_v15, %v10821_v2  ;;  %v3707_v45 = vmul.f32 %v10827_v42, %v10824_v0  ;;  %v9589_v47 = vld [vmem:[%s10828_s9 + $0x1f8] sm:$0xff]  ;;  %v9711_v1 = vld [vmem:[%s10828_s9 + $0x50] sm:$0xff]  ;;  %v9842_v42 = vld [vmem:[%s10828_s9 + $0x1a8] sm:$0xff] }
 0x787   :  { %4505 = vmatpush1.msra.mxu1 %v3823_v54  ;;  %v3676_v14 = vpop.permute.xlu1 %3675  ;;  %4436 = vmatpush1.msra.mxu0 %v3769_v59  ;;  %v9595_v54 = vld [vmem:[%s10828_s9 + $0xf0] sm:$0xff]  ;;  %v9600_v35 = vld [vmem:[%s10828_s9 + $0x178] sm:$0xff]  ;;  %10841 = vst [vmem:[#allocation36_spill] sm:$0xff] %v9842_v42 }
 0x788   :  { %v3697_v24 = vsel %vm302_vm8, %v3670_v60, %v3676_v14  ;;  %4506 = vmatprep.subr.mxu1 %v3772_v12  ;;  %4437 = vmatprep.subr.mxu0 %v3766_v18  ;;  %v9607_v59 = vld [vmem:[%s10828_s9 + $0x70] sm:$0xff]  ;;  %v9619_v12 = vld [vmem:[%s10828_s9 + $0xe8] sm:$0xff]  ;;  %v10829_v20 = vld [vmem:[#allocation27_spill] sm:$0xff] }
 0x789   :  { %v3710_v22 = vmul.f32 %v3697_v24, %v10815_v29  ;;  %4507 = vmatpush1.msra.mxu1 %v3771_v8  ;;  %4438 = vmatpush1.msra.mxu0 %v3765_v11  ;;  %v3682_v10 = vpop.permute.xlu0 %3681  ;;  %v9636_v18 = vld [vmem:[%s10828_s9 + $0x1e8] sm:$0xff]  ;;  %v10830_v8 = vld [vmem:[#allocation30_spill] sm:$0xff]  ;;  %v9686_v29 = vld [vmem:[%s10828_s9 + $0x58] sm:$0xff] }
 0x78a   :  { %4508 = vmatprep.subr.mxu1 %v3768_v16  ;;  %4439 = vmatprep.subr.mxu0 %v3762_v32  ;;  %v3694_v9 = vsel %vm302_vm8, %v3676_v14, %v3682_v10  ;;  %v9648_v11 = vld [vmem:[%s10828_s9 + $0x168] sm:$0xff]  ;;  %v1350_v14 = vadd.f32 %v10830_v8, %v10829_v20  ;;  %v9662_v32 = vld [vmem:[%s10828_s9 + $0x1e0] sm:$0xff]  ;;  %v10832_v16 = vld [vmem:[#allocation31_spill] sm:$0xff] }
 0x78b   :  { %4509 = vmatpush1.msra.mxu1 %v3767_v63  ;;  %v3688_v46 = vpop.permute.xlu1 %3687  ;;  %4440 = vmatpush1.msra.mxu0 %v3761_v27  ;;  %v3711_v31 = vmul.f32 %v3694_v9, %v10824_v0  ;;  %v1439_v24 = vadd.f32 %v10832_v16, %v10831_v61  ;;  %v9673_v27 = vld [vmem:[%s10828_s9 + $0xd8] sm:$0xff]  ;;  %v9818_v15 = vld [vmem:[%s10828_s9 + $0x1b0] sm:$0xff]  ;;  %v9868_v20 = vld [vmem:[%s10828_s9 + $0x1a0] sm:$0xff] }
 0x78c   :  { %v3691_v5 = vsel %vm302_vm8, %v3682_v10, %v3688_v46  ;;  %v3700_v30 = vsel %vm302_vm8, %v3688_v46, %v3670_v60  ;;  %4510 = vmatprep.subr.mxu1 %v3764_v56  ;;  %4441 = vmatprep.subr.mxu0 %v3710_v22  ;;  %v9624_v60 = vld [vmem:[%s10828_s9 + $0x170] sm:$0xff]  ;;  %v9691_v22 = vld [vmem:[%s10828_s9 + $0x1d8] sm:$0xff]  ;;  %v9735_v46 = vld [vmem:[%s10828_s9 + $0x48] sm:$0xff]  ;;  %10837 = vst [vmem:[#allocation54_spill] sm:$0xff] %v9818_v15 }
 0x78d   :  { %v3709_v41 = vmul.f32 %v3700_v30, %v10820_v7  ;;  %v3712_v50 = vmul.f32 %v3691_v5, %v10821_v2  ;;  %4511 = vmatpush1.msra.mxu1 %v3763_v40  ;;  %v3678_v53 = vpop.permute.xlu0 %3677  ;;  %4479 = vmatprep.mubr.f32.mxu0 %v10822_v51  ;;  %v9704_v56 = vld [vmem:[%s10828_s9 + $0x158] sm:$0xff]  ;;  %v9716_v40 = vld [vmem:[%s10828_s9 + $0x1d0] sm:$0xff]  ;;  %v9744_v30 = vld [vmem:[%s10828_s9 + $0x1c8] sm:$0xff]  ;;  %10847 = vst [vmem:[#allocation55_spill] sm:$0xff] %v9868_v20 }
 0x78e   :  { %4550 = vmatprep.mubr.f32.mxu1 %v10822_v51  ;;  %v3692_v57 = vsel %vm302_vm8, %v10818_v36, %v3678_v53  ;;  %v9723_v36 = vld [vmem:[%s10828_s9 + $0xc8] sm:$0xff]  ;;  %v10848_v8 = vld [vmem:[#allocation24_spill] sm:$0xff]  ;;  %v9877_v16 = vld [vmem:[%s10828_s9 + $0x98] sm:$0xff] }
 0x78f   :  { %v3684_v4 = vpop.permute.xlu1 %3683  ;;  %4442 = vmatpush1.msra.mxu0 %v3709_v41  ;;  %4512 = vmatprep.subr.mxu1 %v3712_v50  ;;  %v3703_v3 = vmul.f32 %v3692_v57, %v10824_v0  ;;  %v9753_v41 = vld [vmem:[%s10828_s9 + $0xc0] sm:$0xff]  ;;  %v9794_v0 = vld [vmem:[%s10828_s9 + $0x1b8] sm:$0xff]  ;;  %v9830_v57 = vld [vmem:[%s10828_s9 + $0x130] sm:$0xff]  ;;  %10850 = vst [vmem:[#allocation32_spill] sm:$0xff] %v9877_v16 }
 0x790   :  { %v3689_v25 = vsel %vm302_vm8, %v3678_v53, %v3684_v4  ;;  %v3698_v21 = vsel %vm302_vm8, %v3684_v4, %v10819_v58  ;;  %4443 = vmatprep.subr.mxu0 %v3706_v52  ;;  %4513 = vmatpush1.msra.mxu1 %v3711_v31  ;;  %v9728_v58 = vld [vmem:[%s10828_s9 + $0x150] sm:$0xff]  ;;  %v9765_v50 = vld [vmem:[%s10828_s9 + $0x40] sm:$0xff]  ;;  %v9789_v52 = vld [vmem:[%s10828_s9 + $0x38] sm:$0xff]  ;;  %10839 = vst [vmem:[#allocation37_spill] sm:$0xff] %v9830_v57 }
 0x791   :  { %v3701_v37 = vmul.f32 %v3698_v21, %v10820_v7  ;;  %v3704_v43 = vmul.f32 %v3689_v25, %v10821_v2  ;;  %4444 = vmatpush1.msra.mxu0 %v3705_v34  ;;  %4514 = vmatprep.subr.mxu1 %v3708_v13  ;;  %v9758_v2 = vld [vmem:[%s10828_s9 + $0x148] sm:$0xff]  ;;  %v9770_v53 = vld [vmem:[%s10828_s9 + $0x1c0] sm:$0xff]  ;;  %v9801_v31 = vld [vmem:[%s10828_s9 + $0xb0] sm:$0xff] }
 0x792   :  { %4445 = vmatprep.subr.mxu0 %v3702_v6  ;;  %4515 = vmatpush1.msra.mxu1 %v3707_v45  ;;  %v9777_v6 = vld [vmem:[%s10828_s9 + $0xb8] sm:$0xff]  ;;  %v9813_v34 = vld [vmem:[%s10828_s9 + $0x30] sm:$0xff]  ;;  %v9825_v13 = vld [vmem:[%s10828_s9 + $0xa8] sm:$0xff] }
 0x793   :  { %4446 = vmatpush1.msra.mxu0 %v3701_v37  ;;  %4516 = vmatprep.subr.mxu1 %v3704_v43  ;;  %10836 = vst [vmem:[#allocation38_spill] sm:$0xff] %v9813_v34  ;;  %10838 = vst [vmem:[#allocation50_spill] sm:$0xff] %v9825_v13  ;;  %v9837_v4 = vld [vmem:[%s10828_s9 + $0x28] sm:$0xff]  ;;  %v9849_v45 = vld [vmem:[%s10828_s9 + $0xa0] sm:$0xff] }
 0x794   :  { %5725 = vmatmul.mubr.msk.f32.vlgmr.msra.gmra.mxu0 %vm2334_vm10, %v3917_v44  ;;  %4517 = vmatpush1.msra.mxu1 %v3703_v3  ;;  %10840 = vst [vmem:[#allocation8_spill] sm:$0xff] %v9837_v4  ;;  %10842 = vst [vmem:[#allocation64_spill] sm:$0xff] %v9849_v45  ;;  %v9854_v25 = vld [vmem:[%s10828_s9 + $0x128] sm:$0xff]  ;;  %v10845_v37 = vld [vmem:[#allocation28_spill] sm:$0xff] }
 0x795   :  { %5741 = vmatprep.subr.mxu0 %v9579_v19  ;;  %5726 = vmatmul.mubr.msk.f32.vlgmr.msra.gmra.mxu1 %vm2334_vm10, %v3917_v44  ;;  %10843 = vst [vmem:[#allocation41_spill] sm:$0xff] %v9854_v25  ;;  %v10844_v21 = vld [vmem:[#allocation25_spill] sm:$0xff]  ;;  %v9863_v3 = vld [vmem:[%s10828_s9 + $0x20] sm:$0xff] }
 0x796   :  { %5742 = vmatpush3.msra.mxu0 %v9584_v38  ;;  %5785 = vmatprep.subr.mxu1 %v9589_v47  ;;  %v1348_v43 = vadd.f32 %v10845_v37, %v10844_v21  ;;  %10846 = vst [vmem:[#allocation9_spill] sm:$0xff] %v9863_v3  ;;  %v10854_v21 = vld [vmem:[#allocation45_spill] sm:$0xff] }
 0x797   :  { %5743 = vmatprep.subr.mxu0 %v9595_v54  ;;  %5786 = vmatpush3.msra.mxu1 %v9600_v35 }
 0x798   :  { %5744 = vmatpush3.msra.mxu0 %v9607_v59  ;;  %5787 = vmatprep.subr.mxu1 %v9612_v26 }
 0x799   :  { %5745 = vmatprep.subr.mxu0 %v9619_v12  ;;  %5788 = vmatpush3.msra.mxu1 %v9624_v60 }
 0x79a   :  { %5746 = vmatpush3.msra.mxu0 %v9631_v28  ;;  %5789 = vmatprep.subr.mxu1 %v9636_v18  ;;  %v9668_v17 = vpop.permute.xlu0 %1465 }
 0x79b   :  { %5747 = vmatprep.subr.mxu0 %v9643_v33  ;;  %5790 = vmatpush3.msra.mxu1 %v9648_v11  ;;  %v1484_v63 = vadd.f32 %v9668_v17, %v1350_v14  ;;  %v1486_v10 = vadd.f32 %v9668_v17, %v1439_v24  ;;  %v10849_v14 = vld [vmem:[#allocation29_spill] sm:$0xff]  ;;  %v9882_v24 = vld [vmem:[%s10828_s9 + $0x120] sm:$0xff] }
 0x79c   :  { %5748 = vmatpush3.msra.mxu0 %v9657_v49  ;;  %5791 = vmatprep.subr.mxu1 %v9662_v32  ;;  %v2532_v44 = vpop.permute.xlu1 %2531  ;;  %v1437_v61 = vadd.f32 %v10849_v14, %v10848_v8  ;;  %10851 = vst [vmem:[#allocation72_spill] sm:$0xff] %v9882_v24  ;;  %v9909_v8 = vld [vmem:[%s10828_s9 + $0x118] sm:$0xff] }
 0x79d   :  { %5749 = vmatprep.subr.mxu0 %v9673_v27  ;;  %5792 = vmatpush3.msra.mxu1 %v9678_v62  ;;  %v1500_v55 = vmul.f32 0.05, %v1484_v63  ;;  %v1502_v9 = vmul.f32 0.05, %v1486_v10  ;;  %v2550_v37 = vadd.f32 %v2532_v44, %v10854_v21  ;;  %10856 = vst [vmem:[#allocation10_spill] sm:$0xff] %v9909_v8  ;;  %v10857_v14 = vld [vmem:[#allocation47_spill] sm:$0xff] }
 0x79e   :  { %5750 = vmatpush3.msra.mxu0 %v9686_v29  ;;  %5793 = vmatprep.subr.mxu1 %v9691_v22  ;;  %v9929_v21 = vld [vmem:[%s10828_s9 + $0x88] sm:$0xff] }
 0x79f   :  { %5751 = vmatprep.subr.mxu0 %v9699_v39  ;;  %5794 = vmatpush3.msra.mxu1 %v9704_v56  ;;  %v9739_v5 = vmax.f32 %v1484_v63, %v1500_v55  ;;  %v9746_v7 = vmax.f32 %v1486_v10, %v1502_v9  ;;  %v1483_v63 = vadd.f32 %v9668_v17, %v1348_v43  ;;  %v9890_v10 = vld [vmem:[%s10828_s9 + $0x18] sm:$0xff]  ;;  %v9904_v43 = vld [vmem:[%s10828_s9 + $0x90] sm:$0xff] }
 0x7a0   :  { %5752 = vmatpush3.msra.mxu0 %v9711_v1  ;;  %5795 = vmatprep.subr.mxu1 %v9716_v40  ;;  %10852 = vst [vmem:[#allocation11_spill] sm:$0xff] %v9890_v10  ;;  %v9895_v55 = vld [vmem:[%s10828_s9 + $0x198] sm:$0xff]  ;;  %v1485_v9 = vadd.f32 %v9668_v17, %v1437_v61  ;;  %10855 = vst [vmem:[#allocation58_spill] sm:$0xff] %v9904_v43  ;;  %v9917_v17 = vld [vmem:[%s10828_s9 + $0x10] sm:$0xff] }
 0x7a1   :  { %10833 = vst [vmem:[#allocation66_spill] sm:$0xff] %v9739_v5  ;;  %10834 = vst [vmem:[#allocation63_spill] sm:$0xff] %v9746_v7  ;;  %5753 = vmatprep.subr.mxu0 %v9723_v36  ;;  %5796 = vmatpush3.msra.mxu1 %v9728_v58  ;;  %v9922_v61 = vld [vmem:[%s10828_s9 + $0x190] sm:$0xff]  ;;  %v1499_v51 = vmul.f32 0.05, %v1483_v63 }
 0x7a2   :  { %5754 = vmatpush3.msra.mxu0 %v9735_v46  ;;  %4715 = vmatprep.mubr.f32.mxu0 %v9739_v5  ;;  %10853 = vst [vmem:[#allocation56_spill] sm:$0xff] %v9895_v55  ;;  %v3596_v5 = vpop.permute.xlu0 %3595  ;;  %10858 = vst [vmem:[#allocation53_spill] sm:$0xff] %v9917_v17 }
 0x7a3   :  { %5797 = vmatprep.subr.mxu1 %v9744_v30  ;;  %4800 = vmatprep.mubr.f32.mxu1 %v9746_v7  ;;  %v2552_v7 = vadd.f32 %v2532_v44, %v10857_v14  ;;  %10859 = vst [vmem:[#allocation57_spill] sm:$0xff] %v9922_v61  ;;  %10860 = vst [vmem:[#allocation71_spill] sm:$0xff] %v9929_v21  ;;  %v9934_v14 = vld [vmem:[%s10828_s9 + $0x110] sm:$0xff] }
 0x7a4   :  { %5755 = vmatprep.subr.mxu0 %v9753_v41  ;;  %5798 = vmatpush3.msra.mxu1 %v9758_v2  ;;  %10861 = vst [vmem:[#allocation13_spill] sm:$0xff] %v9934_v14 }
 0x7a5   :  { %5756 = vmatpush3.msra.mxu0 %v9765_v50  ;;  %5799 = vmatprep.subr.mxu1 %v9770_v53 }
 0x7a6   :  { %5757 = vmatprep.subr.mxu0 %v9777_v6  ;;  %5800 = vmatpush3.msra.mxu1 %v9782_v48 }
 0x7a7   :  { %5758 = vmatpush3.msra.mxu0 %v9789_v52  ;;  %5801 = vmatprep.subr.mxu1 %v9794_v0 }
 0x7a8   :  { %5759 = vmatprep.subr.mxu0 %v9801_v31  ;;  %5802 = vmatpush3.msra.mxu1 %v9806_v23 }
 0x7a9   :  { %5760 = vmatpush3.msra.mxu0 %v9813_v34  ;;  %5803 = vmatprep.subr.mxu1 %v9818_v15  ;;  %v9987_v15 = vmax.f32 %v1483_v63, %v1499_v51 }
 0x7aa   :  { %5761 = vmatprep.subr.mxu0 %v9825_v13  ;;  %5804 = vmatpush3.msra.mxu1 %v9830_v57  ;;  %v10867_v57 = vld [vmem:[#allocation51_spill] sm:$0xff] }
 0x7ab   :  { %5762 = vmatpush3.msra.mxu0 %v9837_v4  ;;  %5805 = vmatprep.subr.mxu1 %v9842_v42  ;;  %v10866_v42 = vld [vmem:[#allocation39_spill] sm:$0xff]  ;;  %v3616_v4 = vadd.f32 %v3596_v5, %v10867_v57  ;;  %v9981_v57 = vld [vmem:[%s10828_s9 + $0x100] sm:$0xff] }
 0x7ac   :  { %5763 = vmatprep.subr.mxu0 %v9849_v45  ;;  %5806 = vmatpush3.msra.mxu1 %v9854_v25  ;;  %v10865_v25 = vld [vmem:[#allocation46_spill] sm:$0xff]  ;;  %v3614_v45 = vadd.f32 %v3596_v5, %v10866_v42  ;;  %v9969_v42 = vld [vmem:[%s10828_s9] sm:$0xff] }
 0x7ad   :  { %5764 = vmatpush3.msra.mxu0 %v9863_v3  ;;  %5807 = vmatprep.subr.mxu1 %v9868_v20  ;;  %v2551_v3 = vadd.f32 %v2532_v44, %v10865_v25  ;;  %v9974_v25 = vld [vmem:[%s10828_s9 + $0x180] sm:$0xff] }
 0x7ae   :  { %5765 = vmatprep.subr.mxu0 %v9877_v16  ;;  %5808 = vmatpush3.msra.mxu1 %v9882_v24  ;;  %v10862_v24 = vld [vmem:[#allocation44_spill] sm:$0xff]  ;;  %v1501_v16 = vmul.f32 0.05, %v1485_v9  ;;  %v3630_v23 = vmul.f32 0.05, %v3614_v45 }
 0x7af   :  { %5766 = vmatpush3.msra.mxu0 %v9890_v10  ;;  %5809 = vmatprep.subr.mxu1 %v9895_v55  ;;  %v2549_v20 = vadd.f32 %v2532_v44, %v10862_v24  ;;  %v9942_v55 = vld [vmem:[%s10828_s9 + $0x8] sm:$0xff]  ;;  %v9956_v24 = vld [vmem:[%s10828_s9 + $0x80] sm:$0xff]  ;;  %v2568_v44 = vmul.f32 0.05, %v2552_v7  ;;  %v2567_v34 = vmul.f32 0.05, %v2551_v3 }
 0x7b0   :  { %5767 = vmatprep.subr.mxu0 %v9904_v43  ;;  %5810 = vmatpush3.msra.mxu1 %v9909_v8  ;;  %10863 = vst [vmem:[#allocation48_spill] sm:$0xff] %v9942_v55  ;;  %v9947_v10 = vld [vmem:[%s10828_s9 + $0x188] sm:$0xff]  ;;  %v2566_v43 = vmul.f32 0.05, %v2550_v37 }
 0x7b1   :  { %10864 = vst [vmem:[#allocation65_spill] sm:$0xff] %v9947_v10  ;;  %5768 = vmatpush3.msra.mxu0 %v9917_v17  ;;  %5811 = vmatprep.subr.mxu1 %v9922_v61  ;;  %v9961_v8 = vld [vmem:[%s10828_s9 + $0x108] sm:$0xff]  ;;  %v2565_v13 = vmul.f32 0.05, %v2549_v20 }
 0x7b2   :  { %5769 = vmatprep.subr.mxu0 %v9929_v21  ;;  %5812 = vmatpush3.msra.mxu1 %v9934_v14  ;;  %v10868_v14 = vld [vmem:[#allocation33_spill] sm:$0xff]  ;;  %v10869_v21 = vld [vmem:[#allocation52_spill] sm:$0xff] }
 0x7b3   :  { %5770 = vmatpush3.msra.mxu0 %v9942_v55  ;;  %5813 = vmatprep.subr.mxu1 %v9947_v10  ;;  %v3613_v61 = vadd.f32 %v3596_v5, %v10868_v14  ;;  %v3615_v17 = vadd.f32 %v3596_v5, %v10869_v21  ;;  %v9991_v10 = vmax.f32 %v2550_v37, %v2566_v43  ;;  %v3632_v21 = vmul.f32 0.05, %v3616_v4  ;;  %v10894_v43 = vld [vmem:[#allocation66_spill] sm:$0xff] }
 0x7b4   :  { %5771 = vmatprep.subr.mxu0 %v9956_v24  ;;  %5814 = vmatpush3.msra.mxu1 %v9961_v8  ;;  %v9993_v55 = vmax.f32 %v1485_v9, %v1501_v16  ;;  %v9997_v5 = vmax.f32 %v2552_v7, %v2568_v44  ;;  %v10002_v51 = vmax.f32 %v2549_v20, %v2565_v13 }
 0x7b5   :  { %5772 = vmatpush3.msra.mxu0 %v9969_v42  ;;  %5815 = vmatprep.subr.mxu1 %v9974_v25  ;;  %v3629_v63 = vmul.f32 0.05, %v3613_v61  ;;  %v10005_v16 = vmax.f32 %v3614_v45, %v3630_v23  ;;  %v10007_v9 = vmax.f32 %v2551_v3, %v2567_v34  ;;  %v3631_v37 = vmul.f32 0.05, %v3615_v17  ;;  %v4561_v34 = vpop.permute.xlu1 %4560 }
 0x7b6   :  { %4716 = vmatmul.mubr.f32.vlgmr.msra.gmra.mxu0 %v9987_v15  ;;  %5816 = vmatpush3.msra.mxu1 %v9981_v57  ;;  %v10012_v7 = vmax.f32 %v3616_v4, %v3632_v21  ;;  %v4821_v14 = vmul.f32 %v9987_v15, %v9987_v15  ;;  %v4825_v44 = vmul.f32 %v10002_v51, %v10002_v51 }
 0x7b7   :  { %4720 = vmatprep.mubr.f32.mxu0 %v9991_v10  ;;  %4801 = vmatmul.mubr.f32.vlgmr.msra.gmra.mxu1 %v9993_v55  ;;  %v10021_v23 = vmax.f32 %v3615_v17, %v3631_v37  ;;  %v10895_v17 = vld [vmem:[#allocation63_spill] sm:$0xff]  ;;  %v4827_v21 = vmul.f32 %v10007_v9, %v10007_v9 }
 0x7b8   :  { %4805 = vmatprep.mubr.f32.mxu1 %v9997_v5  ;;  %5829 = vmatprep.subr.mxu0 %v9579_v19  ;;  %v10018_v19 = vmax.f32 %v3613_v61, %v3629_v63  ;;  %v4824_v61 = vmul.f32 %v10895_v17, %v10895_v17  ;;  %v4832_v63 = vmul.f32 %v10012_v7, %v10012_v7 }
 0x7b9   :  { %5830 = vmatpush3.msra.mxu0 %v9584_v38  ;;  %5873 = vmatprep.subr.mxu1 %v9589_v47  ;;  %v10870_v38 = vld [vmem:[#allocation38_spill] sm:$0xff] }
 0x7ba   :  { %4721 = vmatmul.mubr.f32.gmra.mxu0 %v10002_v51  ;;  %5831 = vmatprep.subr.mxu0 %v9595_v54  ;;  %v10871_v47 = vld [vmem:[#allocation42_spill] sm:$0xff]  ;;  %v4829_v37 = vmul.f32 %v10018_v19, %v10018_v19 }
 0x7bb   :  { %4725 = vmatprep.mubr.f32.mxu0 %v10005_v16  ;;  %4806 = vmatmul.mubr.f32.gmra.mxu1 %v10007_v9  ;;  %v10872_v54 = vld [vmem:[#allocation50_spill] sm:$0xff] }
 0x7bc   :  { %4810 = vmatprep.mubr.f32.mxu1 %v10012_v7  ;;  %5874 = vmatpush3.msra.mxu1 %v9600_v35  ;;  %v10873_v35 = vld [vmem:[#allocation54_spill] sm:$0xff] }
 0x7bd   :  { %5832 = vmatpush3.msra.mxu0 %v9607_v59  ;;  %5875 = vmatprep.subr.mxu1 %v9612_v26  ;;  %v10874_v59 = vld [vmem:[#allocation8_spill] sm:$0xff]  ;;  %v10875_v26 = vld [vmem:[#allocation37_spill] sm:$0xff] }
 0x7be   :  { %4726 = vmatmul.mubr.f32.gmra.mxu0 %v10018_v19  ;;  %5833 = vmatprep.subr.mxu0 %v9619_v12  ;;  %v10876_v12 = vld [vmem:[#allocation64_spill] sm:$0xff] }
 0x7bf   :  { %4811 = vmatmul.mubr.f32.gmra.mxu1 %v10021_v23  ;;  %5834 = vmatpush3.msra.mxu0 %v9631_v28  ;;  %v10878_v28 = vld [vmem:[#allocation9_spill] sm:$0xff] }
 0x7c0   :  { %5876 = vmatpush3.msra.mxu1 %v9624_v60  ;;  %5835 = vmatprep.subr.mxu0 %v9643_v33  ;;  %v10877_v60 = vld [vmem:[#allocation36_spill] sm:$0xff] }
 0x7c1   :  { %5877 = vmatprep.subr.mxu1 %v9636_v18  ;;  %5836 = vmatpush3.msra.mxu0 %v9657_v49  ;;  %v10879_v18 = vld [vmem:[#allocation41_spill] sm:$0xff]  ;;  %v10880_v33 = vld [vmem:[#allocation32_spill] sm:$0xff]  ;;  %v10882_v49 = vld [vmem:[#allocation11_spill] sm:$0xff] }
 0x7c2   :  { %5878 = vmatpush3.msra.mxu1 %v9648_v11  ;;  %5837 = vmatprep.subr.mxu0 %v9673_v27  ;;  %v10881_v11 = vld [vmem:[#allocation55_spill] sm:$0xff]  ;;  %v10884_v27 = vld [vmem:[#allocation58_spill] sm:$0xff] }
 0x7c3   :  { %5879 = vmatprep.subr.mxu1 %v9662_v32  ;;  %5838 = vmatpush3.msra.mxu0 %v9686_v29  ;;  %v10883_v32 = vld [vmem:[#allocation72_spill] sm:$0xff]  ;;  %v10886_v29 = vld [vmem:[#allocation53_spill] sm:$0xff] }
 0x7c4   :  { %5880 = vmatpush3.msra.mxu1 %v9678_v62  ;;  %5839 = vmatprep.subr.mxu0 %v9699_v39  ;;  %v10885_v62 = vld [vmem:[#allocation56_spill] sm:$0xff]  ;;  %v10888_v39 = vld [vmem:[#allocation71_spill] sm:$0xff] }
 0x7c5   :  { %5881 = vmatprep.subr.mxu1 %v9691_v22  ;;  %5840 = vmatpush3.msra.mxu0 %v9711_v1  ;;  %v10887_v22 = vld [vmem:[#allocation10_spill] sm:$0xff]  ;;  %v10890_v1 = vld [vmem:[#allocation48_spill] sm:$0xff] }
 0x7c6   :  { %5882 = vmatpush3.msra.mxu1 %v9704_v56  ;;  %5841 = vmatprep.subr.mxu0 %v9723_v36  ;;  %v10889_v56 = vld [vmem:[#allocation57_spill] sm:$0xff] }
 0x7c7   :  { %5883 = vmatprep.subr.mxu1 %v9716_v40  ;;  %5842 = vmatpush3.msra.mxu0 %v9735_v46  ;;  %v10891_v40 = vld [vmem:[#allocation13_spill] sm:$0xff] }
 0x7c8   :  { %5884 = vmatpush3.msra.mxu1 %v9728_v58  ;;  %5843 = vmatprep.subr.mxu0 %v9753_v41  ;;  %v10892_v36 = vld [vmem:[#allocation65_spill] sm:$0xff]  ;;  %v10893_v58 = vmov 0.0  }
 0x7c9   :  { %5885 = vmatprep.subr.mxu1 %v9744_v30  ;;  %5844 = vmatpush3.msra.mxu0 %v9765_v50 }
 0x7ca   :  { %5886 = vmatpush3.msra.mxu1 %v9758_v2  ;;  %5845 = vmatprep.subr.mxu0 %v9777_v6 }
 0x7cb   :  { %5887 = vmatprep.subr.mxu1 %v9770_v53  ;;  %5846 = vmatpush3.msra.mxu0 %v9789_v52 }
 0x7cc   :  { %5888 = vmatpush3.msra.mxu1 %v9782_v48  ;;  %5847 = vmatprep.subr.mxu0 %v9801_v31 }
 0x7cd   :  { %5889 = vmatprep.subr.mxu1 %v9794_v0  ;;  %5848 = vmatpush3.msra.mxu0 %v10870_v38 }
 0x7ce   :  { %5890 = vmatpush3.msra.mxu1 %v10871_v47  ;;  %5849 = vmatprep.subr.mxu0 %v10872_v54  ;;  %v4831_v47 = vmul.f32 %v10021_v23, %v10021_v23 }
 0x7cf   :  { %5891 = vmatprep.subr.mxu1 %v10873_v35  ;;  %5850 = vmatpush3.msra.mxu0 %v10874_v59 }
 0x7d0   :  { %5892 = vmatpush3.msra.mxu1 %v10875_v26  ;;  %5851 = vmatprep.subr.mxu0 %v10876_v12 }
 0x7d1   :  { %5893 = vmatprep.subr.mxu1 %v10877_v60  ;;  %5852 = vmatpush3.msra.mxu0 %v10878_v28 }
 0x7d2   :  { %5894 = vmatpush3.msra.mxu1 %v10879_v18  ;;  %5853 = vmatprep.subr.mxu0 %v10880_v33 }
 0x7d3   :  { %5895 = vmatprep.subr.mxu1 %v10881_v11  ;;  %5854 = vmatpush3.msra.mxu0 %v10882_v49 }
 0x7d4   :  { %5896 = vmatpush3.msra.mxu1 %v10883_v32  ;;  %5855 = vmatprep.subr.mxu0 %v10884_v27 }
 0x7d5   :  { %5897 = vmatprep.subr.mxu1 %v10885_v62  ;;  %5856 = vmatpush3.msra.mxu0 %v10886_v29 }
 0x7d6   :  { %5898 = vmatpush3.msra.mxu1 %v10887_v22  ;;  %5857 = vmatprep.subr.mxu0 %v10888_v39 }
 0x7d7   :  { %5899 = vmatprep.subr.mxu1 %v10889_v56  ;;  %5858 = vmatpush3.msra.mxu0 %v10890_v1 }
 0x7d8   :  { %5900 = vmatpush3.msra.mxu1 %v10891_v40  ;;  %5859 = vmatprep.subr.mxu0 %v9956_v24  ;;  %v4826_v24 = vmul.f32 %v9991_v10, %v9991_v10 }
 0x7d9   :  { %5901 = vmatprep.subr.mxu1 %v10892_v36  ;;  %5860 = vmatpush3.msra.mxu0 %v9969_v42  ;;  %v4823_v42 = vmul.f32 %v9993_v55, %v9993_v55 }
 0x7da   :  { %5902 = vmatpush3.msra.mxu1 %v9961_v8  ;;  %5927 = vmatprep.subr.mxu0 %v10893_v58  ;;  %v4822_v8 = vmul.f32 %v10894_v43, %v10894_v43 }
 0x7db   :  { %5903 = vmatprep.subr.mxu1 %v9974_v25  ;;  %v4828_v25 = vmul.f32 %v9997_v5, %v9997_v5 }
 0x7dc   :  { %5904 = vmatpush3.msra.mxu1 %v9981_v57  ;;  %v4830_v57 = vmul.f32 %v10005_v16, %v10005_v16 }
 0x834   :  { %v4336_v46 = vpop.f32.mrf.mxu0 }
 0x836   :  { %v4407_v30 = vpop.f32.mrf.mxu1  ;;  %v4338_v41 = vpop.f32.mrf.mxu0 }
 0x838   :  { %v4409_v2 = vpop.f32.mrf.mxu1 }
 0x854   :  { %v4481_v50 = vpop.f32.mrf.mxu0 }
 0x855   :  { %v4552_v53 = vpop.f32.mrf.mxu1  ;;  %v4482_v6 = vadd.f32 %v4481_v50, %v4336_v46 }
 0x856   :  { %v4483_v48 = vpop.f32.mrf.mxu0  ;;  %v4553_v52 = vadd.f32 %v4552_v53, %v4407_v30 }
 0x857   :  { %v4484_v0 = vadd.f32 %v4483_v48, %v4338_v41  ;;  %v4554_v31 = vpop.f32.mrf.mxu1  ;;  %v10087_v45 = vadd.f32 %v4561_v34, %v4482_v6 }
 0x858   :  { %v4555_v13 = vadd.f32 %v4554_v31, %v4409_v2  ;;  %v10091_v20 = vadd.f32 %v4561_v34, %v4553_v52 }
 0x859   :  { %v10085_v4 = vadd.f32 %v4561_v34, %v4484_v0  ;;  %v4833_v35 = vmul.f32 %v10087_v45, %v10087_v45 }
 0x85a   :  { %v10089_v3 = vadd.f32 %v4561_v34, %v4555_v13  ;;  %v4835_v59 = vmul.f32 %v10091_v20, %v10091_v20 }
 0x85b   :  { %4730 = vmatprep.mubr.f32.mxu0 %v10085_v4  ;;  %v4834_v38 = vmul.f32 %v10085_v4, %v10085_v4 }
 0x85c   :  { %4731 = vmatmul.mubr.f32.gmra.mxu0 %v10087_v45  ;;  %4815 = vmatprep.mubr.f32.mxu1 %v10089_v3  ;;  %v4836_v54 = vmul.f32 %v10089_v3, %v10089_v3 }
 0x85d   :  { %4816 = vmatmul.mubr.f32.gmra.mxu1 %v10091_v20  ;;  %4901 = vmatprep.mubr.f32.mxu0 %v4822_v8 }
 0x85e   :  { %4986 = vmatprep.mubr.f32.mxu1 %v4824_v61 }
 0x860   :  { %4902 = vmatmul.mubr.f32.vlgmr.msra.gmra.mxu0 %v4821_v14 }
 0x861   :  { %4906 = vmatprep.mubr.f32.mxu0 %v4826_v24  ;;  %4987 = vmatmul.mubr.f32.vlgmr.msra.gmra.mxu1 %v4823_v42 }
 0x862   :  { %4991 = vmatprep.mubr.f32.mxu1 %v4828_v25 }
 0x864   :  { %4907 = vmatmul.mubr.f32.gmra.mxu0 %v4825_v44 }
 0x865   :  { %4911 = vmatprep.mubr.f32.mxu0 %v4830_v57  ;;  %4992 = vmatmul.mubr.f32.gmra.mxu1 %v4827_v21 }
 0x866   :  { %4996 = vmatprep.mubr.f32.mxu1 %v4832_v63 }
 0x868   :  { %4912 = vmatmul.mubr.f32.gmra.mxu0 %v4829_v37 }
 0x869   :  { %4916 = vmatprep.mubr.f32.mxu0 %v4834_v38  ;;  %4997 = vmatmul.mubr.f32.gmra.mxu1 %v4831_v47 }
 0x86a   :  { %5001 = vmatprep.mubr.f32.mxu1 %v4836_v54 }
 0x86c   :  { %4917 = vmatmul.mubr.f32.gmra.mxu0 %v4833_v35 }
 0x86d   :  { %5002 = vmatmul.mubr.f32.gmra.mxu1 %v4835_v59  ;;  %5935 = vmatprep.mubr.msk.f32.mxu0 %vm6043_vm11, %v10893_v58 }
 0x876   :  { %v5773_v26 = vpop.f32.mrf.mxu0 }
 0x877   :  { %v5817_v12 = vpop.f32.mrf.mxu1 }
 0x878   :  { %v5774_v60 = vpop.f32.mrf.mxu0 }
 0x879   :  { %v5818_v28 = vpop.f32.mrf.mxu1  ;;  %v5775_v41 = vadd.f32 %v5774_v60, %v5773_v26 }
 0x87a   :  { %v5776_v18 = vpop.f32.mrf.mxu0  ;;  %v5819_v2 = vadd.f32 %v5818_v28, %v5817_v12 }
 0x87b   :  { %v5820_v33 = vpop.f32.mrf.mxu1 }
 0x87c   :  { %v5777_v11 = vpop.f32.mrf.mxu0  ;;  %v4803_v8 = vadd.f32 %v5819_v2, %v5775_v41 }
 0x87d   :  { %v5821_v49 = vpop.f32.mrf.mxu1  ;;  %v5778_v1 = vadd.f32 %v5777_v11, %v5776_v18 }
 0x87e   :  { %v5779_v32 = vpop.f32.mrf.mxu0  ;;  %v5822_v40 = vadd.f32 %v5821_v49, %v5820_v33  ;;  %v10132_v47 = vmul.f32 0.00390625, %v4803_v8 }
 0x87f   :  { %v5823_v27 = vpop.f32.mrf.mxu1 }
 0x880   :  { %v5780_v62 = vpop.f32.mrf.mxu0  ;;  %v4808_v53 = vadd.f32 %v5822_v40, %v5778_v1 }
 0x881   :  { %v5824_v29 = vpop.f32.mrf.mxu1  ;;  %v5781_v6 = vadd.f32 %v5780_v62, %v5779_v32 }
 0x882   :  { %v5825_v48 = vadd.f32 %v5824_v29, %v5823_v27  ;;  %v10130_v14 = vmul.f32 0.00390625, %v4808_v53  ;;  %v5015_v27 = vmul.f32 %v10132_v47, %v10132_v47 }
 0x884   :  { %v4813_v24 = vadd.f32 %v5825_v48, %v5781_v6  ;;  %v5016_v59 = vmul.f32 %v10130_v14, %v10130_v14 }
 0x886   :  { %v5009_v26 = vmul.f32 0.00390625, %v4813_v24 }
 0x91c   :  { %v5782_v22 = vpop.f32.mrf.mxu0 }
 0x91d   :  { %v5826_v39 = vpop.f32.mrf.mxu1 }
 0x91e   :  { %v5783_v56 = vpop.f32.mrf.mxu0 }
 0x91f   :  { %v5827_v36 = vpop.f32.mrf.mxu1  ;;  %v5784_v44 = vadd.f32 %v5783_v56, %v5782_v22 }
 0x920   :  { %v5861_v46 = vpop.f32.mrf.mxu0  ;;  %v5828_v57 = vadd.f32 %v5827_v36, %v5826_v39  ;;  %v5017_v39 = vmul.f32 %v5009_v26, %v5009_v26 }
 0x921   :  { %v5905_v30 = vpop.f32.mrf.mxu1 }
 0x922   :  { %v5862_v50 = vpop.f32.mrf.mxu0  ;;  %v4818_v28 = vadd.f32 %v5828_v57, %v5784_v44 }
 0x923   :  { %v5906_v52 = vpop.f32.mrf.mxu1  ;;  %v5863_v0 = vadd.f32 %v5862_v50, %v5861_v46 }
 0x924   :  { %v5907_v31 = vadd.f32 %v5906_v52, %v5905_v30  ;;  %v5864_v34 = vpop.f32.mrf.mxu0  ;;  %v5010_v40 = vmul.f32 0.00390625, %v4818_v28 }
 0x925   :  { %v5908_v13 = vpop.f32.mrf.mxu1 }
 0x926   :  { %v5865_v61 = vpop.f32.mrf.mxu0  ;;  %v4989_v21 = vadd.f32 %v5907_v31, %v5863_v0  ;;  %v5018_v53 = vmul.f32 %v5010_v40, %v5010_v40 }
 0x927   :  { %v5866_v42 = vadd.f32 %v5865_v61, %v5864_v34  ;;  %v5909_v25 = vpop.f32.mrf.mxu1 }
 0x928   :  { %v5910_v63 = vadd.f32 %v5909_v25, %v5908_v13  ;;  %v5867_v37 = vpop.f32.mrf.mxu0  ;;  %v5011_v18 = vmul.f32 0.00390625, %v4989_v21 }
 0x929   :  { %v5911_v38 = vpop.f32.mrf.mxu1 }
 0x92a   :  { %v4994_v54 = vadd.f32 %v5910_v63, %v5866_v42  ;;  %v5868_v35 = vpop.f32.mrf.mxu0  ;;  %v5019_v36 = vsub.f32 %v5011_v18, %v5015_v27  ;;  %v5059_v27 = vld [vmem:[%s10285_s15] sm:$0x3] }
 0x92b   :  { %v5869_v12 = vadd.f32 %v5868_v35, %v5867_v37  ;;  %v5912_v60 = vpop.f32.mrf.mxu1 }
 0x92c   :  { %v5012_v33 = vmul.f32 0.00390625, %v4994_v54  ;;  %v5913_v11 = vadd.f32 %v5912_v60, %v5911_v38  ;;  %v5870_v49 = vpop.f32.mrf.mxu0  ;;  %v5023_v6 = vmax.f32 %v5019_v36, 0.0  ;;  %v5166_v36 = vpop.permute.xlu1 %5165 }
 0x92d   :  { %v5914_v32 = vpop.f32.mrf.mxu1 }
 0x92e   :  { %v5020_v62 = vsub.f32 %v5012_v33, %v5016_v59  ;;  %v4999_v29 = vadd.f32 %v5913_v11, %v5869_v12  ;;  %v5871_v22 = vpop.f32.mrf.mxu0  ;;  %vm5029_vm1 = vcmp.eq.f32.partialorder %v5023_v6, inf  ;;  %v5032_v18 = vand.u32 2147483648, %v5023_v6 }
 0x92f   :  { %v5872_v56 = vadd.f32 %v5871_v22, %v5870_v49  ;;  %v5915_v1 = vpop.f32.mrf.mxu1  ;;  %vm5031_vm3 = vcmp.eq.f32.partialorder %v5023_v6, 0.0 }
 0x930   :  { %v5013_v46 = vmul.f32 0.00390625, %v4999_v29  ;;  %v5916_v30 = vadd.f32 %v5915_v1, %v5914_v32  ;;  %v5024_v41 = vmax.f32 %v5020_v62, 0.0  ;;  %v5143_v1 = vld [vmem:[%s10287_s17 + $0x18] sm:$0xff] }
 0x932   :  { %v5021_v2 = vsub.f32 %v5013_v46, %v5017_v39  ;;  %v5004_v50 = vadd.f32 %v5916_v30, %v5872_v56  ;;  %5971 = vrsqrt.f32 %v5024_v41  ;;  %vm5036_vm14 = vcmp.eq.f32.partialorder %v5024_v41, inf  ;;  %v5141_v39 = vld [vmem:[%s10287_s17 + $0x8] sm:$0xff]  ;;  %v5142_v56 = vld [vmem:[%s10287_s17 + $0x10] sm:$0xff]  ;;  %v5156_v30 = vpop.permute.xlu1 %5155 }
 0x933   :  { %v5039_v59 = vand.u32 2147483648, %v5024_v41  ;;  %vm5038_vm2 = vcmp.eq.f32.partialorder %v5024_v41, 0.0 }
 0x934   :  { %v5025_v48 = vmax.f32 %v5021_v2, 0.0  ;;  %v5014_v52 = vmul.f32 0.00390625, %v5004_v50 }
 0x936   :  { %5973 = vrsqrt.f32 %v5025_v48  ;;  %v5022_v0 = vsub.f32 %v5014_v52, %v5018_v53  ;;  %vm5043_vm12 = vcmp.eq.f32.partialorder %v5025_v48, inf  ;;  %v5046_v63 = vand.u32 2147483648, %v5025_v48 }
 0x937   :  { %5975 = vrsqrt.f32 %v5023_v6  ;;  %vm5045_vm0 = vcmp.eq.f32.partialorder %v5025_v48, 0.0 }
 0x938   :  { %v5026_v31 = vmax.f32 %v5022_v0, 0.0 }
 0x93a   :  { %5977 = vrsqrt.f32 %v5026_v31  ;;  %vm5050_vm13 = vcmp.eq.f32.partialorder %v5026_v31, inf  ;;  %v5053_v21 = vand.u32 2147483648, %v5026_v31  ;;  %vm5052_vm15 = vcmp.eq.f32.partialorder %v5026_v31, 0.0 }
 0x93f   :  { %v5972_v34 = vpop.eup %5971 }
 0x940   :  { %v5035_v24 = vmul.f32 %v5972_v34, %v5024_v41 }
 0x942   :  { %v5037_v38 = vsel %vm5036_vm14, %v5024_v41, %v5035_v24 }
 0x943   :  { %v5974_v13 = vpop.eup %5973  ;;  %v5040_v28 = vsel %vm5038_vm2, %v5039_v59, %v5037_v38 }
 0x944   :  { %v5042_v8 = vmul.f32 %v5974_v13, %v5025_v48  ;;  %v5976_v61 = vpop.eup %5975  ;;  %v5056_v49 = vadd.f32 %v5040_v28, %v10130_v14  ;;  %v5140_v14 = vld [vmem:[%s10287_s17] sm:$0xff]  ;;  %v10896_v28 = vmov 0  }
 0x945   :  { %v5028_v57 = vmul.f32 %v5976_v61, %v5023_v6  ;;  %5940 = vmatprep.mubr.msk.f32.mxu1 %vm5168_vm4, %v5140_v14 }
 0x946   :  { %v5044_v44 = vsel %vm5043_vm12, %v5025_v48, %v5042_v8 }
 0x947   :  { %v5978_v42 = vpop.eup %5977  ;;  %v5047_v35 = vsel %vm5045_vm0, %v5046_v63, %v5044_v44  ;;  %v5030_v60 = vsel %vm5029_vm1, %v5023_v6, %v5028_v57 }
 0x948   :  { %v5049_v25 = vmul.f32 %v5978_v42, %v5026_v31  ;;  %v5057_v33 = vadd.f32 %v5047_v35, %v5009_v26  ;;  %v5033_v11 = vsel %vm5031_vm3, %v5032_v18, %v5030_v60  ;;  %v5064_v26 = vpop.permute.xlu0 %5063 }
 0x949   :  { %v5055_v32 = vadd.f32 %v5033_v11, %v10132_v47  ;;  %v5398_v11 = vld [vmem:[%s10290_s20] sm:$0xff] }
 0x94a   :  { %v5051_v37 = vsel %vm5050_vm13, %v5026_v31, %v5049_v25 }
 0x94b   :  { %v5054_v54 = vsel %vm5052_vm15, %v5053_v21, %v5051_v37 }
 0x94c   :  { %v5058_v12 = vadd.f32 %v5054_v54, %v5010_v40  ;;  %v6044_v40 = vmov 1   ;;  %v5161_v46 = vpop.permute.xlu0 %5160 }
 0x94d   :  { %5963 = vset.pattern.permute.xlu0 %v6044_v40 }
 0x94e   :  { %5928 = vmatpush3.msra.mxu0 %v5058_v12 }
 0x94f   :  { %5929 = vmatprep.subr.mxu0 %v10893_v58 }
 0x950   :  { %5930 = vmatpush3.msra.mxu0 %v5057_v33  ;;  %v5151_v53 = vpop.permute.xlu0 %5150 }
 0x951   :  { %5931 = vmatprep.subr.mxu0 %v10893_v58 }
 0x952   :  { %5932 = vmatpush3.msra.mxu0 %v5056_v49  ;;  %v5399_v49 = vld [vmem:[%s10290_s20 + $0x8] sm:$0xff] }
 0x953   :  { %5933 = vmatprep.subr.mxu0 %v10893_v58 }
 0x954   :  { %5934 = vmatpush3.msra.mxu0 %v5055_v32  ;;  %v5401_v32 = vld [vmem:[%s10290_s20 + $0x18] sm:$0xff] }
 0x955   :  { %5936 = vmatmul.mubr.msk.f32.vlgmr.msra.gmra.mxu0 %vm1268_vm5, %v5059_v27  ;;  %v5400_v27 = vld [vmem:[%s10290_s20 + $0x10] sm:$0xff] }
 0x956   :  { %5498 = vmatprep.mubr.f32.mxu0 %v10893_v58 }
 0xa15   :  { %v5135_v62 = vpop.f32.mrf.mxu0 }
 0xa16   :  { %v5136_v47 = vadd.f32 %v5135_v62, %v5064_v26 }
 0xa17   :  { %v5937_v29 = vpop.f32.mrf.mxu0 }
 0xa18   :  { %v5139_v22 = vmax.f32 %v5136_v47, 0.0 }
 0xa1a   :  { %5938 = vmatprep.subr.msk.mxu1 %vm5181_vm6, %v5139_v22 }
 0xa1b   :  { %5939 = vmatpush3.msk.msra.mxu1 %vm5181_vm6, %v5139_v22 }
 0xa1c   :  { %5941 = vmatmul.mubr.msk.f32.vlgmr.msra.gmra.mxu1 %vm5168_vm4, %v5141_v39 }
 0xa1d   :  { %5943 = vmatprep.mubr.msk.f32.mxu1 %vm5168_vm4, %v5142_v56 }
 0xa20   :  { %5944 = vmatmul.mubr.msk.f32.gmra.mxu1 %vm5168_vm4, %v5143_v1 }
 0xa21   :  { %5587 = vmatprep.mubr.f32.mxu1 %v10893_v58 }
 0xadc   :  { %v5942_v41 = vpop.f32.mrf.mxu1 }
 0xadd   :  { %v5257_v2 = vadd.f32 %v5942_v41, %v5156_v30 }
 0xade   :  { %v5251_v50 = vpop.f32.mrf.mxu1 }
 0xadf   :  { %v5271_v6 = vsub.f32 0.0, %v5257_v2  ;;  %v5252_v48 = vadd.f32 %v5251_v50, %v5151_v53 }
 0xae0   :  { %v5945_v52 = vpop.f32.mrf.mxu1 }
 0xae1   :  { %v5267_v0 = vadd.f32 %v5945_v52, %v5166_v36  ;;  %v5276_v8 = vmul.f32 1.442695, %v5271_v6  ;;  %v5270_v61 = vsub.f32 0.0, %v5252_v48  ;;  %v5612_v6 = vld [vmem:[%s10507_s26] sm:$0xff] }
 0xae2   :  { %v5261_v31 = vpop.f32.mrf.mxu1 }
 0xae3   :  { %v5273_v34 = vsub.f32 0.0, %v5267_v0  ;;  %v5262_v13 = vadd.f32 %v5261_v31, %v5161_v46  ;;  %v5274_v25 = vmul.f32 1.442695, %v5270_v61 }
 0xae5   :  { %v5280_v24 = vmul.f32 1.442695, %v5273_v34  ;;  %v5272_v42 = vsub.f32 0.0, %v5262_v13  ;;  %v5613_v13 = vld [vmem:[%s10507_s26 + $0x8] sm:$0xff] }
 0xae7   :  { %5979 = vpow2.f32 %v5280_v24  ;;  %v5278_v44 = vmul.f32 1.442695, %v5272_v42 }
 0xae8   :  { %5981 = vpow2.f32 %v5276_v8 }
 0xae9   :  { %5983 = vpow2.f32 %v5274_v25  ;;  %v5618_v25 = vld [vmem:[%s10507_s26 + $0x30] sm:$0xff] }
 0xaea   :  { %5985 = vpow2.f32 %v5278_v44 }
 0xaf4   :  { %v5980_v57 = vpop.eup %5979 }
 0xaf5   :  { %v5982_v21 = vpop.eup %5981  ;;  %v5285_v63 = vadd.f32 1.0, %v5980_v57 }
 0xaf6   :  { %v5283_v37 = vadd.f32 1.0, %v5982_v21  ;;  %v5984_v38 = vpop.eup %5983 }
 0xaf7   :  { %5987 = vrcp.f32 %v5285_v63  ;;  %v5986_v54 = vpop.eup %5985  ;;  %v5282_v35 = vadd.f32 1.0, %v5984_v38  ;;  %v5616_v63 = vld [vmem:[%s10507_s26 + $0x20] sm:$0xff] }
 0xaf8   :  { %5989 = vrcp.f32 %v5283_v37  ;;  %v5284_v59 = vadd.f32 1.0, %v5986_v54 }
 0xaf9   :  { %5991 = vrcp.f32 %v5282_v35  ;;  %v5619_v35 = vld [vmem:[%s10507_s26 + $0x38] sm:$0xff] }
 0xafa   :  { %5993 = vrcp.f32 %v5284_v59 }
 0xb04   :  { %v5988_v12 = vpop.eup %5987 }
 0xb05   :  { %5359 = vperm.xlu0 %5963, %v5988_v12   ;;  %5319 = vperm.xlu1 %5962, %v5988_v12   ;;  %v5990_v60 = vpop.eup %5989 }
 0xb06   :  { %v5992_v18 = vpop.eup %5991 }
 0xb07   :  { %v5994_v33 = vpop.eup %5993 }
 0xb09   :  { %5964 = vset.pattern.permute.xlu0 %v10896_v28  ;;  %5965 = vset.pattern.permute.xlu1 %v6044_v40 }
 0xb0a   :  { %5309 = vperm.xlu0 %5964, %v5990_v60   ;;  %5351 = vperm.xlu1 %5965, %v5990_v60  }
 0xb0e   :  { %5969 = vset.pattern.permute.xlu0 %v6044_v40  ;;  %5966 = vset.pattern.permute.xlu1 %v10896_v28 }
 0xb0f   :  { %5314 = vperm.xlu1 %5966, %v5994_v33   ;;  %5347 = vperm.xlu0 %5969, %v5992_v18  }
 0xb13   :  { %5967 = vset.pattern.permute.xlu1 %v6044_v40  ;;  %5970 = vset.pattern.permute.xlu0 %v10896_v28 }
 0xb14   :  { %5355 = vperm.xlu1 %5967, %v5994_v33   ;;  %5414 = vperm.xlu0 %5970, %v5400_v27  }
 0xb18   :  { %5968 = vset.pattern.permute.xlu1 %v10896_v28 }
 0xb19   :  { %5304 = vperm.xlu1 %5968, %v5992_v18   ;;  %v5617_v18 = vld [vmem:[%s10507_s26 + $0x28] sm:$0xff] }
 0xb1d   :  { %5404 = vperm.xlu1 %5968, %v5398_v11  }
 0xb21   :  { %5409 = vperm.xlu1 %5968, %v5399_v49  }
 0xb25   :  { %5419 = vperm.xlu1 %5968, %v5401_v32   ;;  %v5622_v32 = vld [vmem:[%s10507_s26 + $0x50] sm:$0xff] }
 0xb80   :  { %v5320_v14 = vpop.permute.xlu1 %5319  ;;  %v5360_v26 = vpop.permute.xlu0 %5359 }
 0xb81   :  { %v5328_v62 = vmul.f32 %v5320_v14, %v10087_v45  ;;  %v5329_v47 = vmul.f32 %v5320_v14, %v10085_v4  ;;  %v5368_v29 = vmul.f32 %v5360_v26, %v10091_v20  ;;  %v5369_v22 = vmul.f32 %v5360_v26, %v10089_v3  ;;  %v5620_v26 = vld [vmem:[%s10507_s26 + $0x40] sm:$0xff] }
 0xb83   :  { %5458 = vmatprep.subr.mxu0 %v5329_v47  ;;  %5547 = vmatprep.subr.mxu1 %v5369_v22  ;;  %v5623_v22 = vld [vmem:[%s10507_s26 + $0x58] sm:$0xff] }
 0xb84   :  { %5459 = vmatpush1.msra.mxu0 %v5328_v62  ;;  %5548 = vmatpush1.msra.mxu1 %v5368_v29 }
 0xb85   :  { %v5352_v39 = vpop.permute.xlu1 %5351  ;;  %v5310_v56 = vpop.permute.xlu0 %5309 }
 0xb86   :  { %v5325_v46 = vmul.f32 %v5310_v56, %v9991_v10  ;;  %v5324_v4 = vmul.f32 %v5310_v56, %v10002_v51  ;;  %v5365_v41 = vmul.f32 %v5352_v39, %v9997_v5  ;;  %v5381_v5 = vld [vmem:[%s10289_s19 + $0x18] sm:$0xff] }
 0xb8a   :  { %v5315_v1 = vpop.permute.xlu1 %5314  ;;  %v5348_v30 = vpop.permute.xlu0 %5347 }
 0xb8b   :  { %v5326_v40 = vmul.f32 %v5315_v1, %v10018_v19  ;;  %v5327_v36 = vmul.f32 %v5315_v1, %v10005_v16  ;;  %v5364_v19 = vmul.f32 %v5352_v39, %v10007_v9  ;;  %v5363_v10 = vmul.f32 %v5348_v30, %v10895_v17  ;;  %v5614_v17 = vld [vmem:[%s10507_s26 + $0x10] sm:$0xff]  ;;  %v5621_v1 = vld [vmem:[%s10507_s26 + $0x48] sm:$0xff] }
 0xb8c   :  { %v5362_v51 = vmul.f32 %v5348_v30, %v9993_v55  ;;  %v5380_v55 = vld [vmem:[%s10289_s19 + $0x10] sm:$0xff] }
 0xb8d   :  { %5460 = vmatprep.subr.mxu0 %v5327_v36 }
 0xb8e   :  { %5461 = vmatpush1.msra.mxu0 %v5326_v40 }
 0xb8f   :  { %v5356_v45 = vpop.permute.xlu1 %5355  ;;  %5462 = vmatprep.subr.mxu0 %v5325_v46  ;;  %v5415_v59 = vpop.permute.xlu0 %5414 }
 0xb90   :  { %v5366_v3 = vmul.f32 %v5356_v45, %v10021_v23  ;;  %v5367_v20 = vmul.f32 %v5356_v45, %v10012_v7  ;;  %5463 = vmatpush1.msra.mxu0 %v5324_v4  ;;  %v5378_v7 = vld [vmem:[%s10289_s19] sm:$0xff]  ;;  %v5626_v45 = vld [vmem:[%s10507_s26 + $0x70] sm:$0xff] }
 0xb92   :  { %5549 = vmatprep.subr.mxu1 %v5367_v20 }
 0xb93   :  { %5550 = vmatpush1.msra.mxu1 %v5366_v3 }
 0xb94   :  { %v5305_v16 = vpop.permute.xlu1 %5304  ;;  %5551 = vmatprep.subr.mxu1 %v5365_v41 }
 0xb95   :  { %v5322_v2 = vmul.f32 %v5305_v16, %v9987_v15  ;;  %v5323_v23 = vmul.f32 %v5305_v16, %v10894_v43  ;;  %5552 = vmatpush1.msra.mxu1 %v5364_v19  ;;  %v5379_v15 = vld [vmem:[%s10289_s19 + $0x8] sm:$0xff]  ;;  %v5624_v19 = vld [vmem:[%s10507_s26 + $0x60] sm:$0xff]  ;;  %s5665_s19 = sshll.u32 %s6045_s29, 4  ;;  %s5666_s19 = int_to_ptr.vmem [resolvable:$true] %s5665_s19 }
 0xb96   :  { %5553 = vmatprep.subr.mxu1 %v5363_v10  ;;  %s6011_s1 = scalar_lea.vmem %s5666_s19, 2048  ;;  %p6016_p1 = scmp.lt.s32.totalorder %s5666_s19, %s5666_s19 }
 0xb97   :  { %5464 = vmatprep.subr.mxu0 %v5323_v23  ;;  %5554 = vmatpush1.msra.mxu1 %v5362_v51  ;;  %p6012_p0 = scmp.ne.s32.totalorder %s5666_s19, %s6011_s1  ;;  %p6017_p2 = scmp.lt.s32.totalorder %s6011_s1, %s6011_s1 }
 0xb98   :  { %5465 = vmatpush1.msra.mxu0 %v5322_v2  ;;  %5737 = vmatmul.mubr.msk.f32.vlgmr.msra.gmra.mxu1 %vm1268_vm5, %v5378_v7  ;;  %v5405_v9 = vpop.permute.xlu1 %5404  ;;  %v5627_v2 = vld [vmem:[%s10507_s26 + $0x78] sm:$0xff] }
 0xb99   :  { %5733 = vmatmul.mubr.msk.f32.vlgmr.msra.gmra.mxu0 %vm1268_vm5, %v5378_v7  ;;  %5593 = vmatprep.mubr.f32.mxu1 %v10893_v58  ;;  %p6018_p3 = por %p6017_p2, %p6016_p1 }
 0xb9a   :  { %5504 = vmatprep.mubr.f32.mxu0 %v10893_v58 }
 0xb9b   :  { %p6019_p4 = pnand %p6018_p3, %p6012_p0 }
 0xb9c   :  { %5738 = vmatmul.mubr.msk.f32.gmra.mxu1 %vm1268_vm5, %v5379_v15  ;;  %v5410_v8 = vpop.permute.xlu1 %5409 }
 0xb9d   :  { %5734 = vmatmul.mubr.msk.f32.gmra.mxu0 %vm1268_vm5, %v5379_v15  ;;  %5599 = vmatprep.mubr.f32.mxu1 %v10893_v58 }
 0xb9e   :  { %5510 = vmatprep.mubr.f32.mxu0 %v10893_v58 }
 0xba0   :  { %5739 = vmatmul.mubr.msk.f32.gmra.mxu1 %vm1268_vm5, %v5380_v55  ;;  %v5420_v46 = vpop.permute.xlu1 %5419 }
 0xba1   :  { %5735 = vmatmul.mubr.msk.f32.gmra.mxu0 %vm1268_vm5, %v5380_v55  ;;  %5605 = vmatprep.mubr.f32.mxu1 %v10893_v58 }
 0xba2   :  { %5516 = vmatprep.mubr.f32.mxu0 %v10893_v58  ;;  %v5615_v58 = vld [vmem:[%s10507_s26 + $0x18] sm:$0xff] }
 0xba4   :  { %5740 = vmatmul.mubr.msk.f32.gmra.mxu1 %vm1268_vm5, %v5381_v5 }
 0xba5   :  { %5736 = vmatmul.mubr.msk.f32.gmra.mxu0 %vm1268_vm5, %v5381_v5  ;;  %v5625_v5 = vld [vmem:[%s10507_s26 + $0x68] sm:$0xff] }
 0xc58   :  { %v5589_v43 = vpop.f32.mrf.mxu1 }
 0xc59   :  { %v5590_v50 = vadd.f32 %v5589_v43, %v5405_v9  ;;  %v5500_v53 = vpop.f32.mrf.mxu0 }
 0xc5a   :  { %v5501_v48 = vadd.f32 %v5500_v53, %v5405_v9  ;;  %v5591_v52 = vpop.f32.mrf.mxu1 }
 0xc5b   :  { %v5630_v0 = vadd.f32 %v5614_v17, %v5590_v50  ;;  %v5592_v31 = vadd.f32 %v5591_v52, %v5405_v9  ;;  %v5502_v34 = vpop.f32.mrf.mxu0 }
 0xc5c   :  { %v5628_v61 = vadd.f32 %v5612_v6, %v5501_v48  ;;  %v5503_v24 = vadd.f32 %v5502_v34, %v5405_v9  ;;  %v5595_v42 = vpop.f32.mrf.mxu1 }
 0xc5d   :  { %5646 = vst [vmem:[#allocation5 + $0x10] sm:$0xff] %v5630_v0  ;;  %v5631_v44 = vadd.f32 %v5615_v58, %v5592_v31  ;;  %v5596_v57 = vadd.f32 %v5595_v42, %v5410_v8  ;;  %v5506_v21 = vpop.f32.mrf.mxu0 }
 0xc5e   :  { %5644 = vst [vmem:[#allocation5] sm:$0xff] %v5628_v61  ;;  %v5629_v37 = vadd.f32 %v5613_v13, %v5503_v24  ;;  %v5507_v38 = vadd.f32 %v5506_v21, %v5410_v8  ;;  %v5597_v54 = vpop.f32.mrf.mxu1 }
 0xc5f   :  { %5647 = vst [vmem:[#allocation5 + $0x18] sm:$0xff] %v5631_v44  ;;  %v5634_v12 = vadd.f32 %v5618_v25, %v5596_v57  ;;  %v5598_v60 = vadd.f32 %v5597_v54, %v5410_v8  ;;  %v5508_v28 = vpop.f32.mrf.mxu0 }
 0xc60   :  { %5645 = vst [vmem:[#allocation5 + $0x8] sm:$0xff] %v5629_v37  ;;  %v5632_v33 = vadd.f32 %v5616_v63, %v5507_v38  ;;  %v5509_v11 = vadd.f32 %v5508_v28, %v5410_v8  ;;  %v5601_v49 = vpop.f32.mrf.mxu1 }
 0xc61   :  { %5650 = vst [vmem:[#allocation5 + $0x30] sm:$0xff] %v5634_v12  ;;  %v5635_v27 = vadd.f32 %v5619_v35, %v5598_v60  ;;  %v5512_v14 = vpop.f32.mrf.mxu0  ;;  %v5602_v62 = vadd.f32 %v5601_v49, %v5415_v59 }
 0xc62   :  { %5648 = vst [vmem:[#allocation5 + $0x20] sm:$0xff] %v5632_v33  ;;  %v5633_v47 = vadd.f32 %v5617_v18, %v5509_v11  ;;  %v5603_v29 = vpop.f32.mrf.mxu1  ;;  %v5513_v39 = vadd.f32 %v5512_v14, %v5415_v59 }
 0xc63   :  { %5651 = vst [vmem:[#allocation5 + $0x38] sm:$0xff] %v5635_v27  ;;  %v5514_v56 = vpop.f32.mrf.mxu0  ;;  %v5604_v40 = vadd.f32 %v5603_v29, %v5415_v59  ;;  %v5638_v36 = vadd.f32 %v5622_v32, %v5602_v62 }
 0xc64   :  { %5649 = vst [vmem:[#allocation5 + $0x28] sm:$0xff] %v5633_v47  ;;  %v5607_v4 = vpop.f32.mrf.mxu1  ;;  %v5515_v3 = vadd.f32 %v5514_v56, %v5415_v59  ;;  %v5636_v20 = vadd.f32 %v5620_v26, %v5513_v39 }
 0xc65   :  { %v5608_v30 = vadd.f32 %v5607_v4, %v5420_v46  ;;  %v5518_v41 = vpop.f32.mrf.mxu0  ;;  %v5639_v10 = vadd.f32 %v5623_v22, %v5604_v40  ;;  %5654 = vst [vmem:[#allocation5 + $0x50] sm:$0xff] %v5638_v36 }
 0xc66   :  { %v5519_v16 = vadd.f32 %v5518_v41, %v5420_v46  ;;  %v5609_v51 = vpop.f32.mrf.mxu1  ;;  %v5637_v23 = vadd.f32 %v5621_v1, %v5515_v3  ;;  %5652 = vst [vmem:[#allocation5 + $0x40] sm:$0xff] %v5636_v20 }
 0xc67   :  { %v5642_v7 = vadd.f32 %v5626_v45, %v5608_v30  ;;  %v5610_v15 = vadd.f32 %v5609_v51, %v5420_v46  ;;  %v5520_v55 = vpop.f32.mrf.mxu0  ;;  %5655 = vst [vmem:[#allocation5 + $0x58] sm:$0xff] %v5639_v10 }
 0xc68   :  { %v5640_v9 = vadd.f32 %v5624_v19, %v5519_v16  ;;  %v5521_v43 = vadd.f32 %v5520_v55, %v5420_v46  ;;  %5653 = vst [vmem:[#allocation5 + $0x48] sm:$0xff] %v5637_v23 }
 0xc69   :  { %5658 = vst [vmem:[#allocation5 + $0x70] sm:$0xff] %v5642_v7  ;;  %v5643_v17 = vadd.f32 %v5627_v2, %v5610_v15 }
 0xc6a   :  { %5656 = vst [vmem:[#allocation5 + $0x60] sm:$0xff] %v5640_v9  ;;  %v5641_v50 = vadd.f32 %v5625_v5, %v5521_v43 }
 0xc6b   :  { %5659 = vst [vmem:[#allocation5 + $0x78] sm:$0xff] %v5643_v17 }
 0xc6c   :  { %5657 = vst [vmem:[#allocation5 + $0x68] sm:$0xff] %v5641_v50 }
 0xc6d   :  { %6022 = shalt.err (!%p6019_p4)
}
 0xc6e   :  { %s6046_s26 = smov 512   ;;  %s6047_s8 = smov 32  }
 0xc6f   :  { %5671 = dma.vmem_to_hbm [thread:$0]  %s5666_s19, 2048, %s10291_s21, [#allocation6], %s6046_s26, %s6046_s26, %s6047_s8  }
 0xc70   :  { %6031 = dma.done.wait [#allocation6], 2048  }
 0xc71   :  { %6032 = vsyncadd [#allocation6], 4294965248 }
 0xc72   :  { %5675 = vsyncpa [#allocation6], 1 }

</bundles_post_ra>
